<compile_context>
chip_gen: v6e
topology: v6e:2x2x1
jax: 0.10.0
libtpu: 0.0.40
codegen_flags: <defaults>
</compile_context>

<pallas_src>
import functools

import jax
import jax.numpy as jnp
from jax.experimental import pallas as pl
from jax.experimental.pallas import tpu as pltpu

TM = 256                    # row tile for the flattened (1x1-conv / stem / FC) matmul kernel
BN_EPS = 1e-5
STAGE_STRIDES = (1, 2, 2, 2)
VMEM_LIMIT = 32 * 1024 * 1024


def _cparams(*sem):
    return pltpu.CompilerParams(dimension_semantics=sem, vmem_limit_bytes=VMEM_LIMIT)


# ----------------------------------------------------------------------------- layout helper

def _pad_phase_split(x, k, stride, pad, pad_value):
    """NHWC -> tap-phase layout [B, s*s*Hq, Wq, C] so that every conv/pool tap (dy,dx) is a
    contiguous (Ho, Wo) window:
        out[b, (ry*s+rx)*Hq + a, j, c] == x_padded[b, s*a + ry, s*j + rx, c]
    For stride 1 this is just the spatially padded tensor (no extra copy)."""
    b, h, w, c = x.shape
    s = stride
    ho = (h + 2 * pad - k) // s + 1
    wo = (w + 2 * pad - k) // s + 1
    hq = ho + (k - 1) // s
    wq = wo + (k - 1) // s
    hp, wp = s * hq, s * wq
    pad_h = max(hp, h + 2 * pad) - h - pad
    pad_w = max(wp, w + 2 * pad) - w - pad
    xp = jnp.pad(x, ((0, 0), (pad, pad_h), (pad, pad_w), (0, 0)),
                 constant_values=pad_value)[:, :hp, :wp, :]
    if s == 1:
        ph = xp
    else:
        xr = xp.reshape(b, hq, s, wq, s, c)
        ph = jnp.transpose(xr, (0, 2, 4, 1, 3, 5)).reshape(b, s * s * hq, wq, c)
    return ph.astype(jnp.bfloat16), ho, wo, hq, wq


# ----------------------------------------------------------------------------- Pallas kernels

def _matmul_bias_kernel(x_ref, w_ref, b_ref, o_ref, *, relu):
    # x:(bm,K) bf16  w:(K,N) bf16  b:(1,N) f32  -> f32 accumulate, f32 epilogue, cast at store.
    acc = jnp.dot(x_ref[...], w_ref[...], preferred_element_type=jnp.float32)
    out = acc + b_ref[...]
    if relu:
        out = jnp.maximum(out, 0.0)
    o_ref[...] = out.astype(o_ref.dtype)


def _matmul_bias_res_kernel(x_ref, w_ref, b_ref, r_ref, o_ref, *, relu):
    # Same as above but with the residual branch fused into the epilogue (add + ReLU).
    acc = jnp.dot(x_ref[...], w_ref[...], preferred_element_type=jnp.float32)
    out = acc + b_ref[...] + r_ref[...].astype(jnp.float32)
    if relu:
        out = jnp.maximum(out, 0.0)
    o_ref[...] = out.astype(o_ref.dtype)


def _conv_tap_kernel(x_ref, w_ref, b_ref, o_ref, *, k, stride, hq, ho, wo, relu):
    # Direct KxK conv for one image.  dx-outer loop: the column (sublane) shift + flatten is
    # done once per dx and reused for every dy tap, which is then a contiguous row window.
    # x:(1, s*s*hq, wq, Cin) bf16   w:(k*k, Cin, Cout) bf16   b:(1, Cout) f32
    # o:(1, ho*wo, Cout)  -- epilogue stores the 2-D accumulator directly (no reshape).
    cin = x_ref.shape[-1]
    acc = None
    for dx in range(k):
        c0 = dx // stride
        col = x_ref[0, :, c0:c0 + wo, :]                       # (s*s*hq, wo, cin), 1 shift/dx
        colm = col.reshape(col.shape[0] * wo, cin)             # 1 flatten/dx (free if wo%8==0)
        for dy in range(k):
            p = (dy % stride) * stride + (dx % stride)         # phase index
            r0 = (p * hq + dy // stride) * wo                  # contiguous row-window start
            win = colm[r0:r0 + ho * wo, :]                     # (ho*wo, cin)
            d = jnp.dot(win, w_ref[dy * k + dx], preferred_element_type=jnp.float32)
            acc = d if acc is None else acc + d
    out = acc + b_ref[...]
    if relu:
        out = jnp.maximum(out, 0.0)
    o_ref[...] = out[None].astype(o_ref.dtype)


def _maxpool_tap_kernel(x_ref, o_ref, *, k, stride, hq, ho, wo):
    # Running max over k*k taps; dx-hoisted column shift, accumulator shaped like the out block.
    acc = None
    for dx in range(k):
        c0 = dx // stride
        col = x_ref[0, :, c0:c0 + wo, :]                       # (s*s*hq, wo, C)
        for dy in range(k):
            p = (dy % stride) * stride + (dx % stride)
            r0 = p * hq + dy // stride
            win = col[r0:r0 + ho]                              # (ho, wo, C) leading-dim slice
            acc = win if acc is None else jnp.maximum(acc, win)
    o_ref[...] = acc[None].astype(o_ref.dtype)


def _downsample_kernel(x_ref, w_ref, b_ref, o_ref, *, relu):
    # Stride-2 1x1 conv + BN for one image, with no strided loads anywhere:
    #   x:(1, ho, 1, wo, 2*Cin) bf16  -- even input rows only (selected by the BlockSpec) and
    #                                    W folded pairwise into channels (free HBM view).
    #   w:(2*Cin, Cout) bf16          -- odd-column half is zero, so only even W contribute.
    _, ho, _, wo, c2 = x_ref.shape
    x = x_ref[0, :, 0, :, :].reshape(ho * wo, c2)
    out = jnp.dot(x, w_ref[...], preferred_element_type=jnp.float32) + b_ref[...]
    if relu:
        out = jnp.maximum(out, 0.0)
    o_ref[...] = out[None].astype(o_ref.dtype)


def _avgpool_fc_kernel(x_ref, w_ref, b_ref, o_ref):
    # Fused AdaptiveAvgPool2d(1) + Linear: x:(B, H*W, C) -> mean -> (B, C) -> (B, Npad) f32.
    feat = jnp.mean(x_ref[...].astype(jnp.float32), axis=1)
    out = jnp.dot(feat.astype(jnp.bfloat16), w_ref[...],
                  preferred_element_type=jnp.float32) + b_ref[...]
    o_ref[...] = out.astype(o_ref.dtype)


# ----------------------------------------------------------------------------- kernel wrappers

def matmul_bias(x, w, bias, *, relu, out_dtype, residual=None):
    """(M,K)@(K,N) + bias [+ residual] [+ relu].  No row-padding copies: tile = min(TM, M)."""
    m, kdim = x.shape
    n = w.shape[1]
    bm = min(TM, m)
    grid = (pl.cdiv(m, bm),)
    in_specs = [pl.BlockSpec((bm, kdim), lambda i: (i, 0)),
                pl.BlockSpec((kdim, n), lambda i: (0, 0)),
                pl.BlockSpec((1, n), lambda i: (0, 0))]
    args = [x, w, bias]
    if residual is None:
        kernel = functools.partial(_matmul_bias_kernel, relu=relu)
    else:
        in_specs.append(pl.BlockSpec((bm, n), lambda i: (i, 0)))
        args.append(residual)
        kernel = functools.partial(_matmul_bias_res_kernel, relu=relu)
    return pl.pallas_call(
        kernel,
        out_shape=jax.ShapeDtypeStruct((m, n), out_dtype),
        grid=grid,
        in_specs=in_specs,
        out_specs=pl.BlockSpec((bm, n), lambda i: (i, 0)),
        compiler_params=_cparams("parallel"),
    )(*args)


def conv1x1_s1(x, p, *, relu, residual=None):
    """1x1 Conv2d(bias=False)+BN (+ fused residual add + ReLU), stride 1: flattened matmul."""
    b, h, w, cin = x.shape
    cout = p['w_mat'].shape[1]
    xf = x.reshape(b * h * w, cin)
    rf = residual.reshape(b * h * w, cout) if residual is not None else None
    out = matmul_bias(xf, p['w_mat'], p['bias'], relu=relu, out_dtype=jnp.bfloat16, residual=rf)
    return out.reshape(b, h, w, cout)


def conv1x1_s2_downsample(x, p):
    """1x1 Conv2d(bias=False)+BN with stride 2 (bottleneck downsample branch)."""
    b, h, w, cin = x.shape
    ho, wo = h // 2, w // 2
    cout = p['w2'].shape[1]
    xv = x.reshape(b, ho, 2, wo, 2 * cin)      # free view, row-major contiguity preserved
    kernel = functools.partial(_downsample_kernel, relu=False)
    out = pl.pallas_call(
        kernel,
        out_shape=jax.ShapeDtypeStruct((b, ho * wo, cout), jnp.bfloat16),
        grid=(b,),
        in_specs=[pl.BlockSpec((1, ho, 1, wo, 2 * cin), lambda i: (i, 0, 0, 0, 0)),
                  pl.BlockSpec((2 * cin, cout), lambda i: (0, 0)),
                  pl.BlockSpec((1, cout), lambda i: (0, 0))],
        out_specs=pl.BlockSpec((1, ho * wo, cout), lambda i: (i, 0, 0)),
        compiler_params=_cparams("parallel"),
    )(xv, p['w2'], p['bias'])
    return out.reshape(b, ho, wo, cout)


def conv3x3_bn(x, p, *, stride, relu):
    """3x3 Conv2d(bias=False)+BN(+ReLU) as a direct (tap-accumulating) Pallas conv kernel."""
    w_taps, bias = p['w_taps'], p['bias']
    kk, cin, cout = w_taps.shape
    k = 3
    ph, ho, wo, hq, wq = _pad_phase_split(x, k, stride, 1, 0.0)
    b = x.shape[0]
    kernel = functools.partial(_conv_tap_kernel, k=k, stride=stride, hq=hq,
                               ho=ho, wo=wo, relu=relu)
    out = pl.pallas_call(
        kernel,
        out_shape=jax.ShapeDtypeStruct((b, ho * wo, cout), jnp.bfloat16),
        grid=(b,),
        in_specs=[pl.BlockSpec((1, stride * stride * hq, wq, cin), lambda i: (i, 0, 0, 0)),
                  pl.BlockSpec((kk, cin, cout), lambda i: (0, 0, 0)),
                  pl.BlockSpec((1, cout), lambda i: (0, 0))],
        out_specs=pl.BlockSpec((1, ho * wo, cout), lambda i: (i, 0, 0)),
        compiler_params=_cparams("parallel"),
    )(ph, w_taps, bias)
    return out.reshape(b, ho, wo, cout)


def stem_conv7x7(x, p):
    """7x7/stride-2/pad-3 Conv2d(bias=False)+BN+ReLU: im2col (cheap, Cin=3) + one K=147 matmul."""
    b, h, w, cin = x.shape
    k, stride, pad = 7, 2, 3
    ho = (h + 2 * pad - k) // stride + 1
    wo = (w + 2 * pad - k) // stride + 1
    xp = jnp.pad(x, ((0, 0), (pad, pad), (pad, pad), (0, 0)))
    cols = []
    for dy in range(k):
        for dx in range(k):
            cols.append(xp[:, dy:dy + stride * (ho - 1) + 1:stride,
                           dx:dx + stride * (wo - 1) + 1:stride, :])
    patches = jnp.concatenate(cols, axis=-1).reshape(b * ho * wo, k * k * cin)
    cout = p['w_mat'].shape[1]
    out = matmul_bias(patches, p['w_mat'], p['bias'], relu=True, out_dtype=jnp.bfloat16)
    return out.reshape(b, ho, wo, cout)


def maxpool3x3s2(x):
    """MaxPool2d(kernel_size=3, stride=2, padding=1) on NHWC, direct (no im2col)."""
    b, h, w, c = x.shape
    ph, ho, wo, hq, wq = _pad_phase_split(x, 3, 2, 1, float('-inf'))
    kernel = functools.partial(_maxpool_tap_kernel, k=3, stride=2, hq=hq, ho=ho, wo=wo)
    return pl.pallas_call(
        kernel,
        out_shape=jax.ShapeDtypeStruct((b, ho, wo, c), jnp.bfloat16),
        grid=(b,),
        in_specs=[pl.BlockSpec((1, 4 * hq, wq, c), lambda i: (i, 0, 0, 0))],
        out_specs=pl.BlockSpec((1, ho, wo, c), lambda i: (i, 0, 0, 0)),
        compiler_params=_cparams("parallel"),
    )(ph)


def avgpool_fc(x, fc_p):
    """Fused AdaptiveAvgPool2d(1) + Dropout(identity at inference) + Linear (lane-padded N)."""
    b, h, w, c = x.shape
    xf = x.reshape(b, h * w, c)
    npad = fc_p['w_pad'].shape[1]
    return pl.pallas_call(
        _avgpool_fc_kernel,
        out_shape=jax.ShapeDtypeStruct((b, npad), jnp.float32),
        grid=(1,),
        in_specs=[pl.BlockSpec((b, h * w, c), lambda i: (0, 0, 0)),
                  pl.BlockSpec((c, npad), lambda i: (0, 0)),
                  pl.BlockSpec((1, npad), lambda i: (0, 0))],
        out_specs=pl.BlockSpec((b, npad), lambda i: (0, 0)),
        compiler_params=_cparams("arbitrary"),
    )(xf, fc_p['w_pad'], fc_p['b_pad'])


# ----------------------------------------------------------------------------- model (glue)

def bottleneck(x, blk, stride):
    out = conv1x1_s1(x, blk['conv1'], relu=True)
    out = conv3x3_bn(out, blk['conv2'], stride=stride, relu=True)
    ds = blk['downsample']
    if ds is None:
        identity = x
    elif 'w2' in ds:                      # stride-2 downsample branch
        identity = conv1x1_s2_downsample(x, ds)
    else:                                 # stride-1 (channel-change only) downsample branch
        identity = conv1x1_s1(x, ds, relu=False)
    # conv3 + BN + residual add + ReLU fused into a single matmul epilogue.
    return conv1x1_s1(out, blk['conv3'], relu=True, residual=identity)


def forward(prepped, x_nchw, *, num_classes):
    # layout: input NCHW (PyTorch convention) -> NHWC bf16 internally.
    x = jnp.transpose(x_nchw, (0, 2, 3, 1)).astype(jnp.bfloat16)
    x = stem_conv7x7(x, prepped['stem'])
    x = maxpool3x3s2(x)
    for stage_blocks, st in zip(prepped['stages'], STAGE_STRIDES):
        for bi, blk in enumerate(stage_blocks):
            x = bottleneck(x, blk, st if bi == 0 else 1)
    logits = avgpool_fc(x, prepped['fc'])                      # (B, Npad) f32
    return logits[:, :num_classes]


# ----------------------------------------------------------------------------- weight prep
# All constant transforms (BN folding, transposes, bf16 casts, FC lane padding) run ONCE here,
# not per forward call.

def _fold_bn(w, bn):
    scale = bn['gamma'] / jnp.sqrt(bn['var'] + BN_EPS)
    bias = (bn['beta'] - bn['mean'] * scale).reshape(1, -1).astype(jnp.float32)
    return w * scale[:, None, None, None], bias


def _prep_1x1(layer):
    w_f, bias = _fold_bn(layer['w'], layer['bn'])
    cout, cin = w_f.shape[:2]
    return {'w_mat': jnp.transpose(w_f.reshape(cout, cin)).astype(jnp.bfloat16), 'bias': bias}


def _prep_1x1_s2(layer):
    w_f, bias = _fold_bn(layer['w'], layer['bn'])
    cout, cin = w_f.shape[:2]
    wm = jnp.transpose(w_f.reshape(cout, cin)).astype(jnp.bfloat16)
    w2 = jnp.concatenate([wm, jnp.zeros_like(wm)], axis=0)     # odd-W half zeroed
    return {'w2': w2, 'bias': bias}


def _prep_kxk(layer):
    w_f, bias = _fold_bn(layer['w'], layer['bn'])
    cout, cin, kh, kw = w_f.shape
    w_taps = jnp.transpose(w_f, (2, 3, 1, 0)).reshape(kh * kw, cin, cout).astype(jnp.bfloat16)
    return {'w_taps': w_taps, 'bias': bias}


def _prep_stem(layer):
    w_f, bias = _fold_bn(layer['w'], layer['bn'])
    cout, cin, kh, kw = w_f.shape
    w_mat = jnp.transpose(w_f, (2, 3, 1, 0)).reshape(kh * kw * cin, cout).astype(jnp.bfloat16)
    return {'w_mat': w_mat, 'bias': bias}


def prepare_params(params):
    prepped = {'stem': _prep_stem(params['stem']), 'stages': []}
    for stage_blocks, st in zip(params['stages'], STAGE_STRIDES):
        pstage = []
        for bi, blk in enumerate(stage_blocks):
            stride_b = st if bi == 0 else 1
            pblk = {'conv1': _prep_1x1(blk['conv1']),
                    'conv2': _prep_kxk(blk['conv2']),
                    'conv3': _prep_1x1(blk['conv3']),
                    'downsample': None}
            if blk['downsample'] is not None:
                pblk['downsample'] = (_prep_1x1(blk['downsample']) if stride_b == 1
                                      else _prep_1x1_s2(blk['downsample']))
            pstage.append(pblk)
        prepped['stages'].append(pstage)
    fc_w, fc_b = params['fc']['w'], params['fc']['b']
    nc, c = fc_w.shape
    npad = max(128, ((nc + 127) // 128) * 128)       # lane-dense FC output (stores unmasked)
    w_pad = jnp.zeros((c, npad), jnp.float32).at[:, :nc].set(jnp.transpose(fc_w))
    b_pad = jnp.zeros((1, npad), jnp.float32).at[:, :nc].set(fc_b)
    prepped['fc'] = {'w_pad': w_pad.astype(jnp.bfloat16), 'b_pad': b_pad}
    return prepped


# ----------------------------------------------------------------------------- parameters

class _KeyGen:
    def __init__(self, key):
        self._key = key

    def __call__(self):
        self._key, k = jax.random.split(self._key)
        return k


def _bn_params(c):
    # PyTorch BatchNorm2d defaults (eval mode): gamma=1, beta=0, running stats (0, 1)
    return {'gamma': jnp.ones((c,), jnp.float32),
            'beta': jnp.zeros((c,), jnp.float32),
            'mean': jnp.zeros((c,), jnp.float32),
            'var': jnp.ones((c,), jnp.float32)}


def _conv_w(kg, cin, cout, k):
    fan_in = cin * k * k
    std = (2.0 / fan_in) ** 0.5
    return jax.random.normal(kg(), (cout, cin, k, k), jnp.float32) * std


def init_params(key, num_classes=4, base=8, layers=(1, 1, 1, 1)):
    kg = _KeyGen(key)
    expansion = 4
    params = {'stem': {'w': _conv_w(kg, 3, base, 7), 'bn': _bn_params(base)}}
    stages = []
    in_c = base
    widths = [base, base * 2, base * 4, base * 8]
    for width, nblk, st in zip(widths, layers, STAGE_STRIDES):
        blocks = []
        for bi in range(nblk):
            out_c = width * expansion
            stride_b = st if bi == 0 else 1
            blk = {
                'conv1': {'w': _conv_w(kg, in_c, width, 1), 'bn': _bn_params(width)},
                'conv2': {'w': _conv_w(kg, width, width, 3), 'bn': _bn_params(width)},
                'conv3': {'w': _conv_w(kg, width, out_c, 1), 'bn': _bn_params(out_c)},
                'downsample': None,
            }
            if stride_b != 1 or in_c != out_c:
                blk['downsample'] = {'w': _conv_w(kg, in_c, out_c, 1), 'bn': _bn_params(out_c)}
            blocks.append(blk)
            in_c = out_c
        stages.append(blocks)
    params['stages'] = stages
    params['fc'] = {'w': jax.random.normal(kg(), (num_classes, in_c), jnp.float32) * 0.01,
                    'b': jnp.zeros((num_classes,), jnp.float32)}
    return params


# ----------------------------------------------------------------------------- main

if __name__ == "__main__":
    key = jax.random.PRNGKey(0)
    pkey, xkey = jax.random.split(key)

    params = init_params(pkey, num_classes=4)
    prepped = prepare_params(params)                              # one-time weight prep
    x = jax.random.normal(xkey, (2, 3, 32, 32), jnp.float32)      # NCHW, like the PyTorch module

    fwd = jax.jit(functools.partial(forward, num_classes=4))
    logits = jax.block_until_ready(fwd(prepped, x))

    assert logits.shape == (2, 4), logits.shape
    assert bool(jnp.all(jnp.isfinite(logits)))
    print("KERNEL_OK")
</pallas_src>

<mosaic_0001>
module attributes {stable_mosaic.version = 11 : i64} {
  func.func @_matmul_bias_kernel(%arg0: i32, %arg1: memref<256x147xbf16, #tpu.memory_space<vmem>>, %arg2: memref<147x8xbf16, #tpu.memory_space<vmem>>, %arg3: memref<1x8xf32, #tpu.memory_space<vmem>>, %arg4: memref<256x8xbf16, #tpu.memory_space<vmem>>) attributes {dimension_semantics = [#tpu.dimension_semantics<parallel>], iteration_bounds = array<i64: 2>, scalar_prefetch = 0 : i64, scratch_operands = 0 : i64, tpu.core_type = #tpu.core_type<tc>, window_params = [{transform_indices = @transform_0, window_bounds = array<i64: 256, 147>}, {pipeline_mode = #tpu.pipeline_mode<synchronous>, transform_indices = @transform_1, window_bounds = array<i64: 147, 8>}, {pipeline_mode = #tpu.pipeline_mode<synchronous>, transform_indices = @transform_2, window_bounds = array<i64: 1, 8>}, {transform_indices = @transform_3, window_bounds = array<i64: 256, 8>}]} {
    %c0 = arith.constant 0 : index
    %c0_0 = arith.constant 0 : index
    %0 = vector.load %arg1[%c0, %c0_0] : memref<256x147xbf16, #tpu.memory_space<vmem>>, vector<256x147xbf16>
    %c0_1 = arith.constant 0 : index
    %c0_2 = arith.constant 0 : index
    %1 = vector.load %arg2[%c0_1, %c0_2] : memref<147x8xbf16, #tpu.memory_space<vmem>>, vector<147x8xbf16>
    %cst = arith.constant dense<0.000000e+00> : vector<256x8xf32>
    %2 = tpu.matmul %0, %1, %cst {dimension_numbers = #tpu.dot_dimension_numbers<[1], [0], [0], [1], [0, 0, 1, 1], [], []>} : vector<256x147xbf16>, vector<147x8xbf16>, vector<256x8xf32> -> vector<256x8xf32>
    %c0_3 = arith.constant 0 : index
    %c0_4 = arith.constant 0 : index
    %3 = vector.load %arg3[%c0_3, %c0_4] : memref<1x8xf32, #tpu.memory_space<vmem>>, vector<1x8xf32>
    %4 = vector.broadcast %3 : vector<1x8xf32> to vector<256x8xf32>
    %5 = arith.addf %2, %4 : vector<256x8xf32>
    %cst_5 = arith.constant 0.000000e+00 : f32
    %6 = vector.broadcast %cst_5 : f32 to vector<256x8xf32>
    %7 = arith.maximumf %5, %6 : vector<256x8xf32>
    %8 = arith.truncf %7 : vector<256x8xf32> to vector<256x8xbf16>
    %c0_6 = arith.constant 0 : index
    %c0_7 = arith.constant 0 : index
    %9 = vector.load %arg4[%c0_6, %c0_7] : memref<256x8xbf16, #tpu.memory_space<vmem>>, vector<256x8xbf16>
    tpu.vector_store %arg4[%c0_6, %c0_7], %8 {strides = array<i32>} : memref<256x8xbf16, #tpu.memory_space<vmem>>, vector<256x8xbf16>,
    return
  }
  func.func @transform_0(%arg0: i32) -> (i32, i32) {
    %c0_i32 = arith.constant 0 : i32
    %c0_i32_0 = arith.constant 0 : i32
    return %arg0, %c0_i32 : i32, i32
  }
  func.func @transform_1(%arg0: i32) -> (i32, i32) {
    %c0_i32 = arith.constant 0 : i32
    %c0_i32_0 = arith.constant 0 : i32
    %c0_i32_1 = arith.constant 0 : i32
    return %c0_i32, %c0_i32_0 : i32, i32
  }
  func.func @transform_2(%arg0: i32) -> (i32, i32) {
    %c0_i32 = arith.constant 0 : i32
    %c0_i32_0 = arith.constant 0 : i32
    %c0_i32_1 = arith.constant 0 : i32
    return %c0_i32, %c0_i32_0 : i32, i32
  }
  func.func @transform_3(%arg0: i32) -> (i32, i32) {
    %c0_i32 = arith.constant 0 : i32
    %c0_i32_0 = arith.constant 0 : i32
    return %arg0, %c0_i32 : i32, i32
  }
}

module attributes {stable_mosaic.version = 11 : i64} {
  func.func @_maxpool_tap_kernel(%arg0: i32, %arg1: memref<1x36x9x8xbf16, #tpu.memory_space<vmem>>, %arg2: memref<1x8x8x8xbf16, #tpu.memory_space<vmem>>) attributes {dimension_semantics = [#tpu.dimension_semantics<parallel>], iteration_bounds = array<i64: 2>, scalar_prefetch = 0 : i64, scratch_operands = 0 : i64, tpu.core_type = #tpu.core_type<tc>, window_params = [{transform_indices = @transform_0, window_bounds = array<i64: 1, 36, 9, 8>}, {transform_indices = @transform_1, window_bounds = array<i64: 1, 8, 8, 8>}]} {
    %c0 = arith.constant 0 : index
    %c0_0 = arith.constant 0 : index
    %c0_1 = arith.constant 0 : index
    %c0_2 = arith.constant 0 : index
    %0 = vector.load %arg1[%c0, %c0_0, %c0_1, %c0_2] : memref<1x36x9x8xbf16, #tpu.memory_space<vmem>>, vector<1x36x8x8xbf16>
    %1 = vector.shape_cast %0 : vector<1x36x8x8xbf16> to vector<36x8x8xbf16>
    %2 = vector.extract_strided_slice %1 {offsets = [0, 0, 0], sizes = [8, 8, 8], strides = [1, 1, 1]} : vector<36x8x8xbf16> to vector<8x8x8xbf16>
    %3 = vector.extract_strided_slice %1 {offsets = [18, 0, 0], sizes = [8, 8, 8], strides = [1, 1, 1]} : vector<36x8x8xbf16> to vector<8x8x8xbf16>
    %4 = arith.maximumf %2, %3 : vector<8x8x8xbf16>
    %5 = vector.extract_strided_slice %1 {offsets = [1, 0, 0], sizes = [8, 8, 8], strides = [1, 1, 1]} : vector<36x8x8xbf16> to vector<8x8x8xbf16>
    %6 = arith.maximumf %4, %5 : vector<8x8x8xbf16>
    %c0_3 = arith.constant 0 : index
    %c0_4 = arith.constant 0 : index
    %c0_5 = arith.constant 0 : index
    %c0_6 = arith.constant 0 : index
    %7 = vector.load %arg1[%c0_3, %c0_4, %c0_5, %c0_6] : memref<1x36x9x8xbf16, #tpu.memory_space<vmem>>, vector<1x36x8x8xbf16>
    %8 = vector.shape_cast %7 : vector<1x36x8x8xbf16> to vector<36x8x8xbf16>
    %9 = vector.extract_strided_slice %8 {offsets = [9, 0, 0], sizes = [8, 8, 8], strides = [1, 1, 1]} : vector<36x8x8xbf16> to vector<8x8x8xbf16>
    %10 = arith.maximumf %6, %9 : vector<8x8x8xbf16>
    %11 = vector.extract_strided_slice %8 {offsets = [27, 0, 0], sizes = [8, 8, 8], strides = [1, 1, 1]} : vector<36x8x8xbf16> to vector<8x8x8xbf16>
    %12 = arith.maximumf %10, %11 : vector<8x8x8xbf16>
    %13 = vector.extract_strided_slice %8 {offsets = [10, 0, 0], sizes = [8, 8, 8], strides = [1, 1, 1]} : vector<36x8x8xbf16> to vector<8x8x8xbf16>
    %14 = arith.maximumf %12, %13 : vector<8x8x8xbf16>
    %c0_7 = arith.constant 0 : index
    %c0_8 = arith.constant 0 : index
    %c1 = arith.constant 1 : index
    %c0_9 = arith.constant 0 : index
    %15 = vector.load %arg1[%c0_7, %c0_8, %c1, %c0_9] : memref<1x36x9x8xbf16, #tpu.memory_space<vmem>>, vector<1x36x8x8xbf16>
    %16 = vector.shape_cast %15 : vector<1x36x8x8xbf16> to vector<36x8x8xbf16>
    %17 = vector.extract_strided_slice %16 {offsets = [0, 0, 0], sizes = [8, 8, 8], strides = [1, 1, 1]} : vector<36x8x8xbf16> to vector<8x8x8xbf16>
    %18 = arith.maximumf %14, %17 : vector<8x8x8xbf16>
    %19 = vector.extract_strided_slice %16 {offsets = [18, 0, 0], sizes = [8, 8, 8], strides = [1, 1, 1]} : vector<36x8x8xbf16> to vector<8x8x8xbf16>
    %20 = arith.maximumf %18, %19 : vector<8x8x8xbf16>
    %21 = vector.extract_strided_slice %16 {offsets = [1, 0, 0], sizes = [8, 8, 8], strides = [1, 1, 1]} : vector<36x8x8xbf16> to vector<8x8x8xbf16>
    %22 = arith.maximumf %20, %21 : vector<8x8x8xbf16>
    %23 = vector.shape_cast %22 : vector<8x8x8xbf16> to vector<1x8x8x8xbf16>
    %c0_10 = arith.constant 0 : index
    %c0_11 = arith.constant 0 : index
    %c0_12 = arith.constant 0 : index
    %c0_13 = arith.constant 0 : index
    %24 = vector.load %arg2[%c0_10, %c0_11, %c0_12, %c0_13] : memref<1x8x8x8xbf16, #tpu.memory_space<vmem>>, vector<1x8x8x8xbf16>
    tpu.vector_store %arg2[%c0_10, %c0_11, %c0_12, %c0_13], %23 {strides = array<i32>} : memref<1x8x8x8xbf16, #tpu.memory_space<vmem>>, vector<1x8x8x8xbf16>,
    return
  }
  func.func @transform_0(%arg0: i32) -> (i32, i32, i32, i32) {
    %c0_i32 = arith.constant 0 : i32
    %c0_i32_0 = arith.constant 0 : i32
    %c0_i32_1 = arith.constant 0 : i32
    %c0_i32_2 = arith.constant 0 : i32
    return %arg0, %c0_i32, %c0_i32_0, %c0_i32_1 : i32, i32, i32, i32
  }
  func.func @transform_1(%arg0: i32) -> (i32, i32, i32, i32) {
    %c0_i32 = arith.constant 0 : i32
    %c0_i32_0 = arith.constant 0 : i32
    %c0_i32_1 = arith.constant 0 : i32
    %c0_i32_2 = arith.constant 0 : i32
    return %arg0, %c0_i32, %c0_i32_0, %c0_i32_1 : i32, i32, i32, i32
  }
}

module attributes {stable_mosaic.version = 11 : i64} {
  func.func @_matmul_bias_kernel(%arg0: i32, %arg1: memref<128x8xbf16, #tpu.memory_space<vmem>>, %arg2: memref<8x8xbf16, #tpu.memory_space<vmem>>, %arg3: memref<1x8xf32, #tpu.memory_space<vmem>>, %arg4: memref<128x8xbf16, #tpu.memory_space<vmem>>) attributes {dimension_semantics = [#tpu.dimension_semantics<parallel>], iteration_bounds = array<i64: 1>, scalar_prefetch = 0 : i64, scratch_operands = 0 : i64, tpu.core_type = #tpu.core_type<tc>, window_params = [{transform_indices = @transform_0, window_bounds = array<i64: 128, 8>}, {pipeline_mode = #tpu.pipeline_mode<synchronous>, transform_indices = @transform_1, window_bounds = array<i64: 8, 8>}, {pipeline_mode = #tpu.pipeline_mode<synchronous>, transform_indices = @transform_2, window_bounds = array<i64: 1, 8>}, {transform_indices = @transform_3, window_bounds = array<i64: 128, 8>}]} {
    %c0 = arith.constant 0 : index
    %c0_0 = arith.constant 0 : index
    %0 = vector.load %arg1[%c0, %c0_0] : memref<128x8xbf16, #tpu.memory_space<vmem>>, vector<128x8xbf16>
    %c0_1 = arith.constant 0 : index
    %c0_2 = arith.constant 0 : index
    %1 = vector.load %arg2[%c0_1, %c0_2] : memref<8x8xbf16, #tpu.memory_space<vmem>>, vector<8x8xbf16>
    %cst = arith.constant dense<0.000000e+00> : vector<128x8xf32>
    %2 = tpu.matmul %0, %1, %cst {dimension_numbers = #tpu.dot_dimension_numbers<[1], [0], [0], [1], [0, 0, 1, 1], [], []>} : vector<128x8xbf16>, vector<8x8xbf16>, vector<128x8xf32> -> vector<128x8xf32>
    %c0_3 = arith.constant 0 : index
    %c0_4 = arith.constant 0 : index
    %3 = vector.load %arg3[%c0_3, %c0_4] : memref<1x8xf32, #tpu.memory_space<vmem>>, vector<1x8xf32>
    %4 = vector.broadcast %3 : vector<1x8xf32> to vector<128x8xf32>
    %5 = arith.addf %2, %4 : vector<128x8xf32>
    %cst_5 = arith.constant 0.000000e+00 : f32
    %6 = vector.broadcast %cst_5 : f32 to vector<128x8xf32>
    %7 = arith.maximumf %5, %6 : vector<128x8xf32>
    %8 = arith.truncf %7 : vector<128x8xf32> to vector<128x8xbf16>
    %c0_6 = arith.constant 0 : index
    %c0_7 = arith.constant 0 : index
    %9 = vector.load %arg4[%c0_6, %c0_7] : memref<128x8xbf16, #tpu.memory_space<vmem>>, vector<128x8xbf16>
    tpu.vector_store %arg4[%c0_6, %c0_7], %8 {strides = array<i32>} : memref<128x8xbf16, #tpu.memory_space<vmem>>, vector<128x8xbf16>,
    return
  }
  func.func @transform_0(%arg0: i32) -> (i32, i32) {
    %c0_i32 = arith.constant 0 : i32
    %c0_i32_0 = arith.constant 0 : i32
    return %arg0, %c0_i32 : i32, i32
  }
  func.func @transform_1(%arg0: i32) -> (i32, i32) {
    %c0_i32 = arith.constant 0 : i32
    %c0_i32_0 = arith.constant 0 : i32
    %c0_i32_1 = arith.constant 0 : i32
    return %c0_i32, %c0_i32_0 : i32, i32
  }
  func.func @transform_2(%arg0: i32) -> (i32, i32) {
    %c0_i32 = arith.constant 0 : i32
    %c0_i32_0 = arith.constant 0 : i32
    %c0_i32_1 = arith.constant 0 : i32
    return %c0_i32, %c0_i32_0 : i32, i32
  }
  func.func @transform_3(%arg0: i32) -> (i32, i32) {
    %c0_i32 = arith.constant 0 : i32
    %c0_i32_0 = arith.constant 0 : i32
    return %arg0, %c0_i32 : i32, i32
  }
}

module attributes {stable_mosaic.version = 11 : i64} {
  func.func @_conv_tap_kernel(%arg0: i32, %arg1: memref<1x10x10x8xbf16, #tpu.memory_space<vmem>>, %arg2: memref<9x8x8xbf16, #tpu.memory_space<vmem>>, %arg3: memref<1x8xf32, #tpu.memory_space<vmem>>, %arg4: memref<1x64x8xbf16, #tpu.memory_space<vmem>>) attributes {dimension_semantics = [#tpu.dimension_semantics<parallel>], iteration_bounds = array<i64: 2>, scalar_prefetch = 0 : i64, scratch_operands = 0 : i64, tpu.core_type = #tpu.core_type<tc>, window_params = [{transform_indices = @transform_0, window_bounds = array<i64: 1, 10, 10, 8>}, {pipeline_mode = #tpu.pipeline_mode<synchronous>, transform_indices = @transform_1, window_bounds = array<i64: 9, 8, 8>}, {pipeline_mode = #tpu.pipeline_mode<synchronous>, transform_indices = @transform_2, window_bounds = array<i64: 1, 8>}, {transform_indices = @transform_3, window_bounds = array<i64: 1, 64, 8>}]} {
    %c0 = arith.constant 0 : index
    %c0_0 = arith.constant 0 : index
    %c0_1 = arith.constant 0 : index
    %c0_2 = arith.constant 0 : index
    %0 = vector.load %arg1[%c0, %c0_0, %c0_1, %c0_2] : memref<1x10x10x8xbf16, #tpu.memory_space<vmem>>, vector<1x10x8x8xbf16>
    %1 = vector.shape_cast %0 : vector<1x10x8x8xbf16> to vector<10x8x8xbf16>
    %2 = vector.shape_cast %1 : vector<10x8x8xbf16> to vector<80x8xbf16>
    %3 = vector.extract_strided_slice %2 {offsets = [0, 0], sizes = [64, 8], strides = [1, 1]} : vector<80x8xbf16> to vector<64x8xbf16>
    %c0_3 = arith.constant 0 : index
    %c0_4 = arith.constant 0 : index
    %c0_5 = arith.constant 0 : index
    %4 = vector.load %arg2[%c0_3, %c0_4, %c0_5] : memref<9x8x8xbf16, #tpu.memory_space<vmem>>, vector<1x8x8xbf16>
    %5 = vector.shape_cast %4 : vector<1x8x8xbf16> to vector<8x8xbf16>
    %cst = arith.constant dense<0.000000e+00> : vector<64x8xf32>
    %6 = tpu.matmul %3, %5, %cst {dimension_numbers = #tpu.dot_dimension_numbers<[1], [0], [0], [1], [0, 0, 1, 1], [], []>} : vector<64x8xbf16>, vector<8x8xbf16>, vector<64x8xf32> -> vector<64x8xf32>
    %7 = vector.extract_strided_slice %2 {offsets = [8, 0], sizes = [64, 8], strides = [1, 1]} : vector<80x8xbf16> to vector<64x8xbf16>
    %c3 = arith.constant 3 : index
    %c0_6 = arith.constant 0 : index
    %c0_7 = arith.constant 0 : index
    %8 = vector.load %arg2[%c3, %c0_6, %c0_7] : memref<9x8x8xbf16, #tpu.memory_space<vmem>>, vector<1x8x8xbf16>
    %9 = vector.shape_cast %8 : vector<1x8x8xbf16> to vector<8x8xbf16>
    %cst_8 = arith.constant dense<0.000000e+00> : vector<64x8xf32>
    %10 = tpu.matmul %7, %9, %cst_8 {dimension_numbers = #tpu.dot_dimension_numbers<[1], [0], [0], [1], [0, 0, 1, 1], [], []>} : vector<64x8xbf16>, vector<8x8xbf16>, vector<64x8xf32> -> vector<64x8xf32>
    %11 = arith.addf %6, %10 : vector<64x8xf32>
    %12 = vector.extract_strided_slice %2 {offsets = [16, 0], sizes = [64, 8], strides = [1, 1]} : vector<80x8xbf16> to vector<64x8xbf16>
    %c6 = arith.constant 6 : index
    %c0_9 = arith.constant 0 : index
    %c0_10 = arith.constant 0 : index
    %13 = vector.load %arg2[%c6, %c0_9, %c0_10] : memref<9x8x8xbf16, #tpu.memory_space<vmem>>, vector<1x8x8xbf16>
    %14 = vector.shape_cast %13 : vector<1x8x8xbf16> to vector<8x8xbf16>
    %cst_11 = arith.constant dense<0.000000e+00> : vector<64x8xf32>
    %15 = tpu.matmul %12, %14, %cst_11 {dimension_numbers = #tpu.dot_dimension_numbers<[1], [0], [0], [1], [0, 0, 1, 1], [], []>} : vector<64x8xbf16>, vector<8x8xbf16>, vector<64x8xf32> -> vector<64x8xf32>
    %16 = arith.addf %11, %15 : vector<64x8xf32>
    %c0_12 = arith.constant 0 : index
    %c0_13 = arith.constant 0 : index
    %c1 = arith.constant 1 : index
    %c0_14 = arith.constant 0 : index
    %17 = vector.load %arg1[%c0_12, %c0_13, %c1, %c0_14] : memref<1x10x10x8xbf16, #tpu.memory_space<vmem>>, vector<1x10x8x8xbf16>
    %18 = vector.shape_cast %17 : vector<1x10x8x8xbf16> to vector<10x8x8xbf16>
    %19 = vector.shape_cast %18 : vector<10x8x8xbf16> to vector<80x8xbf16>
    %20 = vector.extract_strided_slice %19 {offsets = [0, 0], sizes = [64, 8], strides = [1, 1]} : vector<80x8xbf16> to vector<64x8xbf16>
    %c1_15 = arith.constant 1 : index
    %c0_16 = arith.constant 0 : index
    %c0_17 = arith.constant 0 : index
    %21 = vector.load %arg2[%c1_15, %c0_16, %c0_17] : memref<9x8x8xbf16, #tpu.memory_space<vmem>>, vector<1x8x8xbf16>
    %22 = vector.shape_cast %21 : vector<1x8x8xbf16> to vector<8x8xbf16>
    %cst_18 = arith.constant dense<0.000000e+00> : vector<64x8xf32>
    %23 = tpu.matmul %20, %22, %cst_18 {dimension_numbers = #tpu.dot_dimension_numbers<[1], [0], [0], [1], [0, 0, 1, 1], [], []>} : vector<64x8xbf16>, vector<8x8xbf16>, vector<64x8xf32> -> vector<64x8xf32>
    %24 = arith.addf %16, %23 : vector<64x8xf32>
    %25 = vector.extract_strided_slice %19 {offsets = [8, 0], sizes = [64, 8], strides = [1, 1]} : vector<80x8xbf16> to vector<64x8xbf16>
    %c4 = arith.constant 4 : index
    %c0_19 = arith.constant 0 : index
    %c0_20 = arith.constant 0 : index
    %26 = vector.load %arg2[%c4, %c0_19, %c0_20] : memref<9x8x8xbf16, #tpu.memory_space<vmem>>, vector<1x8x8xbf16>
    %27 = vector.shape_cast %26 : vector<1x8x8xbf16> to vector<8x8xbf16>
    %cst_21 = arith.constant dense<0.000000e+00> : vector<64x8xf32>
    %28 = tpu.matmul %25, %27, %cst_21 {dimension_numbers = #tpu.dot_dimension_numbers<[1], [0], [0], [1], [0, 0, 1, 1], [], []>} : vector<64x8xbf16>, vector<8x8xbf16>, vector<64x8xf32> -> vector<64x8xf32>
    %29 = arith.addf %24, %28 : vector<64x8xf32>
    %30 = vector.extract_strided_slice %19 {offsets = [16, 0], sizes = [64, 8], strides = [1, 1]} : vector<80x8xbf16> to vector<64x8xbf16>
    %c7 = arith.constant 7 : index
    %c0_22 = arith.constant 0 : index
    %c0_23 = arith.constant 0 : index
    %31 = vector.load %arg2[%c7, %c0_22, %c0_23] : memref<9x8x8xbf16, #tpu.memory_space<vmem>>, vector<1x8x8xbf16>
    %32 = vector.shape_cast %31 : vector<1x8x8xbf16> to vector<8x8xbf16>
    %cst_24 = arith.constant dense<0.000000e+00> : vector<64x8xf32>
    %33 = tpu.matmul %30, %32, %cst_24 {dimension_numbers = #tpu.dot_dimension_numbers<[1], [0], [0], [1], [0, 0, 1, 1], [], []>} : vector<64x8xbf16>, vector<8x8xbf16>, vector<64x8xf32> -> vector<64x8xf32>
    %34 = arith.addf %29, %33 : vector<64x8xf32>
    %c0_25 = arith.constant 0 : index
    %c0_26 = arith.constant 0 : index
    %c2 = arith.constant 2 : index
    %c0_27 = arith.constant 0 : index
    %35 = vector.load %arg1[%c0_25, %c0_26, %c2, %c0_27] : memref<1x10x10x8xbf16, #tpu.memory_space<vmem>>, vector<1x10x8x8xbf16>
    %36 = vector.shape_cast %35 : vector<1x10x8x8xbf16> to vector<10x8x8xbf16>
    %37 = vector.shape_cast %36 : vector<10x8x8xbf16> to vector<80x8xbf16>
    %38 = vector.extract_strided_slice %37 {offsets = [0, 0], sizes = [64, 8], strides = [1, 1]} : vector<80x8xbf16> to vector<64x8xbf16>
    %c2_28 = arith.constant 2 : index
    %c0_29 = arith.constant 0 : index
    %c0_30 = arith.constant 0 : index
    %39 = vector.load %arg2[%c2_28, %c0_29, %c0_30] : memref<9x8x8xbf16, #tpu.memory_space<vmem>>, vector<1x8x8xbf16>
    %40 = vector.shape_cast %39 : vector<1x8x8xbf16> to vector<8x8xbf16>
    %cst_31 = arith.constant dense<0.000000e+00> : vector<64x8xf32>
    %41 = tpu.matmul %38, %40, %cst_31 {dimension_numbers = #tpu.dot_dimension_numbers<[1], [0], [0], [1], [0, 0, 1, 1], [], []>} : vector<64x8xbf16>, vector<8x8xbf16>, vector<64x8xf32> -> vector<64x8xf32>
    %42 = arith.addf %34, %41 : vector<64x8xf32>
    %43 = vector.extract_strided_slice %37 {offsets = [8, 0], sizes = [64, 8], strides = [1, 1]} : vector<80x8xbf16> to vector<64x8xbf16>
    %c5 = arith.constant 5 : index
    %c0_32 = arith.constant 0 : index
    %c0_33 = arith.constant 0 : index
    %44 = vector.load %arg2[%c5, %c0_32, %c0_33] : memref<9x8x8xbf16, #tpu.memory_space<vmem>>, vector<1x8x8xbf16>
    %45 = vector.shape_cast %44 : vector<1x8x8xbf16> to vector<8x8xbf16>
    %cst_34 = arith.constant dense<0.000000e+00> : vector<64x8xf32>
    %46 = tpu.matmul %43, %45, %cst_34 {dimension_numbers = #tpu.dot_dimension_numbers<[1], [0], [0], [1], [0, 0, 1, 1], [], []>} : vector<64x8xbf16>, vector<8x8xbf16>, vector<64x8xf32> -> vector<64x8xf32>
    %47 = arith.addf %42, %46 : vector<64x8xf32>
    %48 = vector.extract_strided_slice %37 {offsets = [16, 0], sizes = [64, 8], strides = [1, 1]} : vector<80x8xbf16> to vector<64x8xbf16>
    %c8 = arith.constant 8 : index
    %c0_35 = arith.constant 0 : index
    %c0_36 = arith.constant 0 : index
    %49 = vector.load %arg2[%c8, %c0_35, %c0_36] : memref<9x8x8xbf16, #tpu.memory_space<vmem>>, vector<1x8x8xbf16>
    %50 = vector.shape_cast %49 : vector<1x8x8xbf16> to vector<8x8xbf16>
    %cst_37 = arith.constant dense<0.000000e+00> : vector<64x8xf32>
    %51 = tpu.matmul %48, %50, %cst_37 {dimension_numbers = #tpu.dot_dimension_numbers<[1], [0], [0], [1], [0, 0, 1, 1], [], []>} : vector<64x8xbf16>, vector<8x8xbf16>, vector<64x8xf32> -> vector<64x8xf32>
    %52 = arith.addf %47, %51 : vector<64x8xf32>
    %c0_38 = arith.constant 0 : index
    %c0_39 = arith.constant 0 : index
    %53 = vector.load %arg3[%c0_38, %c0_39] : memref<1x8xf32, #tpu.memory_space<vmem>>, vector<1x8xf32>
    %54 = vector.broadcast %53 : vector<1x8xf32> to vector<64x8xf32>
    %55 = arith.addf %52, %54 : vector<64x8xf32>
    %cst_40 = arith.constant 0.000000e+00 : f32
    %56 = vector.broadcast %cst_40 : f32 to vector<64x8xf32>
    %57 = arith.maximumf %55, %56 : vector<64x8xf32>
    %58 = vector.shape_cast %57 : vector<64x8xf32> to vector<1x64x8xf32>
    %59 = arith.truncf %58 : vector<1x64x8xf32> to vector<1x64x8xbf16>
    %c0_41 = arith.constant 0 : index
    %c0_42 = arith.constant 0 : index
    %c0_43 = arith.constant 0 : index
    %60 = vector.load %arg4[%c0_41, %c0_42, %c0_43] : memref<1x64x8xbf16, #tpu.memory_space<vmem>>, vector<1x64x8xbf16>
    tpu.vector_store %arg4[%c0_41, %c0_42, %c0_43], %59 {strides = array<i32>} : memref<1x64x8xbf16, #tpu.memory_space<vmem>>, vector<1x64x8xbf16>,
    return
  }
  func.func @transform_0(%arg0: i32) -> (i32, i32, i32, i32) {
    %c0_i32 = arith.constant 0 : i32
    %c0_i32_0 = arith.constant 0 : i32
    %c0_i32_1 = arith.constant 0 : i32
    %c0_i32_2 = arith.constant 0 : i32
    return %arg0, %c0_i32, %c0_i32_0, %c0_i32_1 : i32, i32, i32, i32
  }
  func.func @transform_1(%arg0: i32) -> (i32, i32, i32) {
    %c0_i32 = arith.constant 0 : i32
    %c0_i32_0 = arith.constant 0 : i32
    %c0_i32_1 = arith.constant 0 : i32
    %c0_i32_2 = arith.constant 0 : i32
    return %c0_i32, %c0_i32_0, %c0_i32_1 : i32, i32, i32
  }
  func.func @transform_2(%arg0: i32) -> (i32, i32) {
    %c0_i32 = arith.constant 0 : i32
    %c0_i32_0 = arith.constant 0 : i32
    %c0_i32_1 = arith.constant 0 : i32
    return %c0_i32, %c0_i32_0 : i32, i32
  }
  func.func @transform_3(%arg0: i32) -> (i32, i32, i32) {
    %c0_i32 = arith.constant 0 : i32
    %c0_i32_0 = arith.constant 0 : i32
    %c0_i32_1 = arith.constant 0 : i32
    return %arg0, %c0_i32, %c0_i32_0 : i32, i32, i32
  }
}

module attributes {stable_mosaic.version = 11 : i64} {
  func.func @_matmul_bias_kernel(%arg0: i32, %arg1: memref<128x8xbf16, #tpu.memory_space<vmem>>, %arg2: memref<8x32xbf16, #tpu.memory_space<vmem>>, %arg3: memref<1x32xf32, #tpu.memory_space<vmem>>, %arg4: memref<128x32xbf16, #tpu.memory_space<vmem>>) attributes {dimension_semantics = [#tpu.dimension_semantics<parallel>], iteration_bounds = array<i64: 1>, scalar_prefetch = 0 : i64, scratch_operands = 0 : i64, tpu.core_type = #tpu.core_type<tc>, window_params = [{transform_indices = @transform_0, window_bounds = array<i64: 128, 8>}, {pipeline_mode = #tpu.pipeline_mode<synchronous>, transform_indices = @transform_1, window_bounds = array<i64: 8, 32>}, {pipeline_mode = #tpu.pipeline_mode<synchronous>, transform_indices = @transform_2, window_bounds = array<i64: 1, 32>}, {transform_indices = @transform_3, window_bounds = array<i64: 128, 32>}]} {
    %c0 = arith.constant 0 : index
    %c0_0 = arith.constant 0 : index
    %0 = vector.load %arg1[%c0, %c0_0] : memref<128x8xbf16, #tpu.memory_space<vmem>>, vector<128x8xbf16>
    %c0_1 = arith.constant 0 : index
    %c0_2 = arith.constant 0 : index
    %1 = vector.load %arg2[%c0_1, %c0_2] : memref<8x32xbf16, #tpu.memory_space<vmem>>, vector<8x32xbf16>
    %cst = arith.constant dense<0.000000e+00> : vector<128x32xf32>
    %2 = tpu.matmul %0, %1, %cst {dimension_numbers = #tpu.dot_dimension_numbers<[1], [0], [0], [1], [0, 0, 1, 1], [], []>} : vector<128x8xbf16>, vector<8x32xbf16>, vector<128x32xf32> -> vector<128x32xf32>
    %c0_3 = arith.constant 0 : index
    %c0_4 = arith.constant 0 : index
    %3 = vector.load %arg3[%c0_3, %c0_4] : memref<1x32xf32, #tpu.memory_space<vmem>>, vector<1x32xf32>
    %4 = vector.broadcast %3 : vector<1x32xf32> to vector<128x32xf32>
    %5 = arith.addf %2, %4 : vector<128x32xf32>
    %6 = arith.truncf %5 : vector<128x32xf32> to vector<128x32xbf16>
    %c0_5 = arith.constant 0 : index
    %c0_6 = arith.constant 0 : index
    %7 = vector.load %arg4[%c0_5, %c0_6] : memref<128x32xbf16, #tpu.memory_space<vmem>>, vector<128x32xbf16>
    tpu.vector_store %arg4[%c0_5, %c0_6], %6 {strides = array<i32>} : memref<128x32xbf16, #tpu.memory_space<vmem>>, vector<128x32xbf16>,
    return
  }
  func.func @transform_0(%arg0: i32) -> (i32, i32) {
    %c0_i32 = arith.constant 0 : i32
    %c0_i32_0 = arith.constant 0 : i32
    return %arg0, %c0_i32 : i32, i32
  }
  func.func @transform_1(%arg0: i32) -> (i32, i32) {
    %c0_i32 = arith.constant 0 : i32
    %c0_i32_0 = arith.constant 0 : i32
    %c0_i32_1 = arith.constant 0 : i32
    return %c0_i32, %c0_i32_0 : i32, i32
  }
  func.func @transform_2(%arg0: i32) -> (i32, i32) {
    %c0_i32 = arith.constant 0 : i32
    %c0_i32_0 = arith.constant 0 : i32
    %c0_i32_1 = arith.constant 0 : i32
    return %c0_i32, %c0_i32_0 : i32, i32
  }
  func.func @transform_3(%arg0: i32) -> (i32, i32) {
    %c0_i32 = arith.constant 0 : i32
    %c0_i32_0 = arith.constant 0 : i32
    return %arg0, %c0_i32 : i32, i32
  }
}

module attributes {stable_mosaic.version = 11 : i64} {
  func.func @_matmul_bias_res_kernel(%arg0: i32, %arg1: memref<128x8xbf16, #tpu.memory_space<vmem>>, %arg2: memref<8x32xbf16, #tpu.memory_space<vmem>>, %arg3: memref<1x32xf32, #tpu.memory_space<vmem>>, %arg4: memref<128x32xbf16, #tpu.memory_space<vmem>>, %arg5: memref<128x32xbf16, #tpu.memory_space<vmem>>) attributes {dimension_semantics = [#tpu.dimension_semantics<parallel>], iteration_bounds = array<i64: 1>, scalar_prefetch = 0 : i64, scratch_operands = 0 : i64, tpu.core_type = #tpu.core_type<tc>, window_params = [{transform_indices = @transform_0, window_bounds = array<i64: 128, 8>}, {pipeline_mode = #tpu.pipeline_mode<synchronous>, transform_indices = @transform_1, window_bounds = array<i64: 8, 32>}, {pipeline_mode = #tpu.pipeline_mode<synchronous>, transform_indices = @transform_2, window_bounds = array<i64: 1, 32>}, {transform_indices = @transform_3, window_bounds = array<i64: 128, 32>}, {transform_indices = @transform_4, window_bounds = array<i64: 128, 32>}]} {
    %c0 = arith.constant 0 : index
    %c0_0 = arith.constant 0 : index
    %0 = vector.load %arg1[%c0, %c0_0] : memref<128x8xbf16, #tpu.memory_space<vmem>>, vector<128x8xbf16>
    %c0_1 = arith.constant 0 : index
    %c0_2 = arith.constant 0 : index
    %1 = vector.load %arg2[%c0_1, %c0_2] : memref<8x32xbf16, #tpu.memory_space<vmem>>, vector<8x32xbf16>
    %cst = arith.constant dense<0.000000e+00> : vector<128x32xf32>
    %2 = tpu.matmul %0, %1, %cst {dimension_numbers = #tpu.dot_dimension_numbers<[1], [0], [0], [1], [0, 0, 1, 1], [], []>} : vector<128x8xbf16>, vector<8x32xbf16>, vector<128x32xf32> -> vector<128x32xf32>
    %c0_3 = arith.constant 0 : index
    %c0_4 = arith.constant 0 : index
    %3 = vector.load %arg3[%c0_3, %c0_4] : memref<1x32xf32, #tpu.memory_space<vmem>>, vector<1x32xf32>
    %4 = vector.broadcast %3 : vector<1x32xf32> to vector<128x32xf32>
    %5 = arith.addf %2, %4 : vector<128x32xf32>
    %c0_5 = arith.constant 0 : index
    %c0_6 = arith.constant 0 : index
    %6 = vector.load %arg4[%c0_5, %c0_6] : memref<128x32xbf16, #tpu.memory_space<vmem>>, vector<128x32xbf16>
    %7 = arith.extf %6 : vector<128x32xbf16> to vector<128x32xf32>
    %8 = arith.addf %5, %7 : vector<128x32xf32>
    %cst_7 = arith.constant 0.000000e+00 : f32
    %9 = vector.broadcast %cst_7 : f32 to vector<128x32xf32>
    %10 = arith.maximumf %8, %9 : vector<128x32xf32>
    %11 = arith.truncf %10 : vector<128x32xf32> to vector<128x32xbf16>
    %c0_8 = arith.constant 0 : index
    %c0_9 = arith.constant 0 : index
    %12 = vector.load %arg5[%c0_8, %c0_9] : memref<128x32xbf16, #tpu.memory_space<vmem>>, vector<128x32xbf16>
    tpu.vector_store %arg5[%c0_8, %c0_9], %11 {strides = array<i32>} : memref<128x32xbf16, #tpu.memory_space<vmem>>, vector<128x32xbf16>,
    return
  }
  func.func @transform_0(%arg0: i32) -> (i32, i32) {
    %c0_i32 = arith.constant 0 : i32
    %c0_i32_0 = arith.constant 0 : i32
    return %arg0, %c0_i32 : i32, i32
  }
  func.func @transform_1(%arg0: i32) -> (i32, i32) {
    %c0_i32 = arith.constant 0 : i32
    %c0_i32_0 = arith.constant 0 : i32
    %c0_i32_1 = arith.constant 0 : i32
    return %c0_i32, %c0_i32_0 : i32, i32
  }
  func.func @transform_2(%arg0: i32) -> (i32, i32) {
    %c0_i32 = arith.constant 0 : i32
    %c0_i32_0 = arith.constant 0 : i32
    %c0_i32_1 = arith.constant 0 : i32
    return %c0_i32, %c0_i32_0 : i32, i32
  }
  func.func @transform_3(%arg0: i32) -> (i32, i32) {
    %c0_i32 = arith.constant 0 : i32
    %c0_i32_0 = arith.constant 0 : i32
    return %arg0, %c0_i32 : i32, i32
  }
  func.func @transform_4(%arg0: i32) -> (i32, i32) {
    %c0_i32 = arith.constant 0 : i32
    %c0_i32_0 = arith.constant 0 : i32
    return %arg0, %c0_i32 : i32, i32
  }
}

module attributes {stable_mosaic.version = 11 : i64} {
  func.func @_matmul_bias_kernel(%arg0: i32, %arg1: memref<128x32xbf16, #tpu.memory_space<vmem>>, %arg2: memref<32x16xbf16, #tpu.memory_space<vmem>>, %arg3: memref<1x16xf32, #tpu.memory_space<vmem>>, %arg4: memref<128x16xbf16, #tpu.memory_space<vmem>>) attributes {dimension_semantics = [#tpu.dimension_semantics<parallel>], iteration_bounds = array<i64: 1>, scalar_prefetch = 0 : i64, scratch_operands = 0 : i64, tpu.core_type = #tpu.core_type<tc>, window_params = [{transform_indices = @transform_0, window_bounds = array<i64: 128, 32>}, {pipeline_mode = #tpu.pipeline_mode<synchronous>, transform_indices = @transform_1, window_bounds = array<i64: 32, 16>}, {pipeline_mode = #tpu.pipeline_mode<synchronous>, transform_indices = @transform_2, window_bounds = array<i64: 1, 16>}, {transform_indices = @transform_3, window_bounds = array<i64: 128, 16>}]} {
    %c0 = arith.constant 0 : index
    %c0_0 = arith.constant 0 : index
    %0 = vector.load %arg1[%c0, %c0_0] : memref<128x32xbf16, #tpu.memory_space<vmem>>, vector<128x32xbf16>
    %c0_1 = arith.constant 0 : index
    %c0_2 = arith.constant 0 : index
    %1 = vector.load %arg2[%c0_1, %c0_2] : memref<32x16xbf16, #tpu.memory_space<vmem>>, vector<32x16xbf16>
    %cst = arith.constant dense<0.000000e+00> : vector<128x16xf32>
    %2 = tpu.matmul %0, %1, %cst {dimension_numbers = #tpu.dot_dimension_numbers<[1], [0], [0], [1], [0, 0, 1, 1], [], []>} : vector<128x32xbf16>, vector<32x16xbf16>, vector<128x16xf32> -> vector<128x16xf32>
    %c0_3 = arith.constant 0 : index
    %c0_4 = arith.constant 0 : index
    %3 = vector.load %arg3[%c0_3, %c0_4] : memref<1x16xf32, #tpu.memory_space<vmem>>, vector<1x16xf32>
    %4 = vector.broadcast %3 : vector<1x16xf32> to vector<128x16xf32>
    %5 = arith.addf %2, %4 : vector<128x16xf32>
    %cst_5 = arith.constant 0.000000e+00 : f32
    %6 = vector.broadcast %cst_5 : f32 to vector<128x16xf32>
    %7 = arith.maximumf %5, %6 : vector<128x16xf32>
    %8 = arith.truncf %7 : vector<128x16xf32> to vector<128x16xbf16>
    %c0_6 = arith.constant 0 : index
    %c0_7 = arith.constant 0 : index
    %9 = vector.load %arg4[%c0_6, %c0_7] : memref<128x16xbf16, #tpu.memory_space<vmem>>, vector<128x16xbf16>
    tpu.vector_store %arg4[%c0_6, %c0_7], %8 {strides = array<i32>} : memref<128x16xbf16, #tpu.memory_space<vmem>>, vector<128x16xbf16>,
    return
  }
  func.func @transform_0(%arg0: i32) -> (i32, i32) {
    %c0_i32 = arith.constant 0 : i32
    %c0_i32_0 = arith.constant 0 : i32
    return %arg0, %c0_i32 : i32, i32
  }
  func.func @transform_1(%arg0: i32) -> (i32, i32) {
    %c0_i32 = arith.constant 0 : i32
    %c0_i32_0 = arith.constant 0 : i32
    %c0_i32_1 = arith.constant 0 : i32
    return %c0_i32, %c0_i32_0 : i32, i32
  }
  func.func @transform_2(%arg0: i32) -> (i32, i32) {
    %c0_i32 = arith.constant 0 : i32
    %c0_i32_0 = arith.constant 0 : i32
    %c0_i32_1 = arith.constant 0 : i32
    return %c0_i32, %c0_i32_0 : i32, i32
  }
  func.func @transform_3(%arg0: i32) -> (i32, i32) {
    %c0_i32 = arith.constant 0 : i32
    %c0_i32_0 = arith.constant 0 : i32
    return %arg0, %c0_i32 : i32, i32
  }
}

module attributes {stable_mosaic.version = 11 : i64} {
  func.func @_conv_tap_kernel(%arg0: i32, %arg1: memref<1x20x5x16xbf16, #tpu.memory_space<vmem>>, %arg2: memref<9x16x16xbf16, #tpu.memory_space<vmem>>, %arg3: memref<1x16xf32, #tpu.memory_space<vmem>>, %arg4: memref<1x16x16xbf16, #tpu.memory_space<vmem>>) attributes {dimension_semantics = [#tpu.dimension_semantics<parallel>], iteration_bounds = array<i64: 2>, scalar_prefetch = 0 : i64, scratch_operands = 0 : i64, tpu.core_type = #tpu.core_type<tc>, window_params = [{transform_indices = @transform_0, window_bounds = array<i64: 1, 20, 5, 16>}, {pipeline_mode = #tpu.pipeline_mode<synchronous>, transform_indices = @transform_1, window_bounds = array<i64: 9, 16, 16>}, {pipeline_mode = #tpu.pipeline_mode<synchronous>, transform_indices = @transform_2, window_bounds = array<i64: 1, 16>}, {transform_indices = @transform_3, window_bounds = array<i64: 1, 16, 16>}]} {
    %c0 = arith.constant 0 : index
    %c0_0 = arith.constant 0 : index
    %c0_1 = arith.constant 0 : index
    %c0_2 = arith.constant 0 : index
    %0 = vector.load %arg1[%c0, %c0_0, %c0_1, %c0_2] : memref<1x20x5x16xbf16, #tpu.memory_space<vmem>>, vector<1x20x4x16xbf16>
    %1 = vector.shape_cast %0 : vector<1x20x4x16xbf16> to vector<20x4x16xbf16>
    %2 = vector.shape_cast %1 : vector<20x4x16xbf16> to vector<80x16xbf16>
    %3 = vector.extract_strided_slice %2 {offsets = [0, 0], sizes = [16, 16], strides = [1, 1]} : vector<80x16xbf16> to vector<16x16xbf16>
    %c0_3 = arith.constant 0 : index
    %c0_4 = arith.constant 0 : index
    %c0_5 = arith.constant 0 : index
    %4 = vector.load %arg2[%c0_3, %c0_4, %c0_5] : memref<9x16x16xbf16, #tpu.memory_space<vmem>>, vector<1x16x16xbf16>
    %5 = vector.shape_cast %4 : vector<1x16x16xbf16> to vector<16x16xbf16>
    %cst = arith.constant dense<0.000000e+00> : vector<16x16xf32>
    %6 = tpu.matmul %3, %5, %cst {dimension_numbers = #tpu.dot_dimension_numbers<[1], [0], [0], [1], [0, 0, 1, 1], [], []>} : vector<16x16xbf16>, vector<16x16xbf16>, vector<16x16xf32> -> vector<16x16xf32>
    %7 = vector.extract_strided_slice %2 {offsets = [40, 0], sizes = [16, 16], strides = [1, 1]} : vector<80x16xbf16> to vector<16x16xbf16>
    %c3 = arith.constant 3 : index
    %c0_6 = arith.constant 0 : index
    %c0_7 = arith.constant 0 : index
    %8 = vector.load %arg2[%c3, %c0_6, %c0_7] : memref<9x16x16xbf16, #tpu.memory_space<vmem>>, vector<1x16x16xbf16>
    %9 = vector.shape_cast %8 : vector<1x16x16xbf16> to vector<16x16xbf16>
    %cst_8 = arith.constant dense<0.000000e+00> : vector<16x16xf32>
    %10 = tpu.matmul %7, %9, %cst_8 {dimension_numbers = #tpu.dot_dimension_numbers<[1], [0], [0], [1], [0, 0, 1, 1], [], []>} : vector<16x16xbf16>, vector<16x16xbf16>, vector<16x16xf32> -> vector<16x16xf32>
    %11 = arith.addf %6, %10 : vector<16x16xf32>
    %12 = vector.extract_strided_slice %2 {offsets = [4, 0], sizes = [16, 16], strides = [1, 1]} : vector<80x16xbf16> to vector<16x16xbf16>
    %c6 = arith.constant 6 : index
    %c0_9 = arith.constant 0 : index
    %c0_10 = arith.constant 0 : index
    %13 = vector.load %arg2[%c6, %c0_9, %c0_10] : memref<9x16x16xbf16, #tpu.memory_space<vmem>>, vector<1x16x16xbf16>
    %14 = vector.shape_cast %13 : vector<1x16x16xbf16> to vector<16x16xbf16>
    %cst_11 = arith.constant dense<0.000000e+00> : vector<16x16xf32>
    %15 = tpu.matmul %12, %14, %cst_11 {dimension_numbers = #tpu.dot_dimension_numbers<[1], [0], [0], [1], [0, 0, 1, 1], [], []>} : vector<16x16xbf16>, vector<16x16xbf16>, vector<16x16xf32> -> vector<16x16xf32>
    %16 = arith.addf %11, %15 : vector<16x16xf32>
    %c0_12 = arith.constant 0 : index
    %c0_13 = arith.constant 0 : index
    %c0_14 = arith.constant 0 : index
    %c0_15 = arith.constant 0 : index
    %17 = vector.load %arg1[%c0_12, %c0_13, %c0_14, %c0_15] : memref<1x20x5x16xbf16, #tpu.memory_space<vmem>>, vector<1x20x4x16xbf16>
    %18 = vector.shape_cast %17 : vector<1x20x4x16xbf16> to vector<20x4x16xbf16>
    %19 = vector.shape_cast %18 : vector<20x4x16xbf16> to vector<80x16xbf16>
    %20 = vector.extract_strided_slice %19 {offsets = [20, 0], sizes = [16, 16], strides = [1, 1]} : vector<80x16xbf16> to vector<16x16xbf16>
    %c1 = arith.constant 1 : index
    %c0_16 = arith.constant 0 : index
    %c0_17 = arith.constant 0 : index
    %21 = vector.load %arg2[%c1, %c0_16, %c0_17] : memref<9x16x16xbf16, #tpu.memory_space<vmem>>, vector<1x16x16xbf16>
    %22 = vector.shape_cast %21 : vector<1x16x16xbf16> to vector<16x16xbf16>
    %cst_18 = arith.constant dense<0.000000e+00> : vector<16x16xf32>
    %23 = tpu.matmul %20, %22, %cst_18 {dimension_numbers = #tpu.dot_dimension_numbers<[1], [0], [0], [1], [0, 0, 1, 1], [], []>} : vector<16x16xbf16>, vector<16x16xbf16>, vector<16x16xf32> -> vector<16x16xf32>
    %24 = arith.addf %16, %23 : vector<16x16xf32>
    %25 = vector.extract_strided_slice %19 {offsets = [60, 0], sizes = [16, 16], strides = [1, 1]} : vector<80x16xbf16> to vector<16x16xbf16>
    %c4 = arith.constant 4 : index
    %c0_19 = arith.constant 0 : index
    %c0_20 = arith.constant 0 : index
    %26 = vector.load %arg2[%c4, %c0_19, %c0_20] : memref<9x16x16xbf16, #tpu.memory_space<vmem>>, vector<1x16x16xbf16>
    %27 = vector.shape_cast %26 : vector<1x16x16xbf16> to vector<16x16xbf16>
    %cst_21 = arith.constant dense<0.000000e+00> : vector<16x16xf32>
    %28 = tpu.matmul %25, %27, %cst_21 {dimension_numbers = #tpu.dot_dimension_numbers<[1], [0], [0], [1], [0, 0, 1, 1], [], []>} : vector<16x16xbf16>, vector<16x16xbf16>, vector<16x16xf32> -> vector<16x16xf32>
    %29 = arith.addf %24, %28 : vector<16x16xf32>
    %30 = vector.extract_strided_slice %19 {offsets = [24, 0], sizes = [16, 16], strides = [1, 1]} : vector<80x16xbf16> to vector<16x16xbf16>
    %c7 = arith.constant 7 : index
    %c0_22 = arith.constant 0 : index
    %c0_23 = arith.constant 0 : index
    %31 = vector.load %arg2[%c7, %c0_22, %c0_23] : memref<9x16x16xbf16, #tpu.memory_space<vmem>>, vector<1x16x16xbf16>
    %32 = vector.shape_cast %31 : vector<1x16x16xbf16> to vector<16x16xbf16>
    %cst_24 = arith.constant dense<0.000000e+00> : vector<16x16xf32>
    %33 = tpu.matmul %30, %32, %cst_24 {dimension_numbers = #tpu.dot_dimension_numbers<[1], [0], [0], [1], [0, 0, 1, 1], [], []>} : vector<16x16xbf16>, vector<16x16xbf16>, vector<16x16xf32> -> vector<16x16xf32>
    %34 = arith.addf %29, %33 : vector<16x16xf32>
    %c0_25 = arith.constant 0 : index
    %c0_26 = arith.constant 0 : index
    %c1_27 = arith.constant 1 : index
    %c0_28 = arith.constant 0 : index
    %35 = vector.load %arg1[%c0_25, %c0_26, %c1_27, %c0_28] : memref<1x20x5x16xbf16, #tpu.memory_space<vmem>>, vector<1x20x4x16xbf16>
    %36 = vector.shape_cast %35 : vector<1x20x4x16xbf16> to vector<20x4x16xbf16>
    %37 = vector.shape_cast %36 : vector<20x4x16xbf16> to vector<80x16xbf16>
    %38 = vector.extract_strided_slice %37 {offsets = [0, 0], sizes = [16, 16], strides = [1, 1]} : vector<80x16xbf16> to vector<16x16xbf16>
    %c2 = arith.constant 2 : index
    %c0_29 = arith.constant 0 : index
    %c0_30 = arith.constant 0 : index
    %39 = vector.load %arg2[%c2, %c0_29, %c0_30] : memref<9x16x16xbf16, #tpu.memory_space<vmem>>, vector<1x16x16xbf16>
    %40 = vector.shape_cast %39 : vector<1x16x16xbf16> to vector<16x16xbf16>
    %cst_31 = arith.constant dense<0.000000e+00> : vector<16x16xf32>
    %41 = tpu.matmul %38, %40, %cst_31 {dimension_numbers = #tpu.dot_dimension_numbers<[1], [0], [0], [1], [0, 0, 1, 1], [], []>} : vector<16x16xbf16>, vector<16x16xbf16>, vector<16x16xf32> -> vector<16x16xf32>
    %42 = arith.addf %34, %41 : vector<16x16xf32>
    %43 = vector.extract_strided_slice %37 {offsets = [40, 0], sizes = [16, 16], strides = [1, 1]} : vector<80x16xbf16> to vector<16x16xbf16>
    %c5 = arith.constant 5 : index
    %c0_32 = arith.constant 0 : index
    %c0_33 = arith.constant 0 : index
    %44 = vector.load %arg2[%c5, %c0_32, %c0_33] : memref<9x16x16xbf16, #tpu.memory_space<vmem>>, vector<1x16x16xbf16>
    %45 = vector.shape_cast %44 : vector<1x16x16xbf16> to vector<16x16xbf16>
    %cst_34 = arith.constant dense<0.000000e+00> : vector<16x16xf32>
    %46 = tpu.matmul %43, %45, %cst_34 {dimension_numbers = #tpu.dot_dimension_numbers<[1], [0], [0], [1], [0, 0, 1, 1], [], []>} : vector<16x16xbf16>, vector<16x16xbf16>, vector<16x16xf32> -> vector<16x16xf32>
    %47 = arith.addf %42, %46 : vector<16x16xf32>
    %48 = vector.extract_strided_slice %37 {offsets = [4, 0], sizes = [16, 16], strides = [1, 1]} : vector<80x16xbf16> to vector<16x16xbf16>
    %c8 = arith.constant 8 : index
    %c0_35 = arith.constant 0 : index
    %c0_36 = arith.constant 0 : index
    %49 = vector.load %arg2[%c8, %c0_35, %c0_36] : memref<9x16x16xbf16, #tpu.memory_space<vmem>>, vector<1x16x16xbf16>
    %50 = vector.shape_cast %49 : vector<1x16x16xbf16> to vector<16x16xbf16>
    %cst_37 = arith.constant dense<0.000000e+00> : vector<16x16xf32>
    %51 = tpu.matmul %48, %50, %cst_37 {dimension_numbers = #tpu.dot_dimension_numbers<[1], [0], [0], [1], [0, 0, 1, 1], [], []>} : vector<16x16xbf16>, vector<16x16xbf16>, vector<16x16xf32> -> vector<16x16xf32>
    %52 = arith.addf %47, %51 : vector<16x16xf32>
    %c0_38 = arith.constant 0 : index
    %c0_39 = arith.constant 0 : index
    %53 = vector.load %arg3[%c0_38, %c0_39] : memref<1x16xf32, #tpu.memory_space<vmem>>, vector<1x16xf32>
    %54 = vector.broadcast %53 : vector<1x16xf32> to vector<16x16xf32>
    %55 = arith.addf %52, %54 : vector<16x16xf32>
    %cst_40 = arith.constant 0.000000e+00 : f32
    %56 = vector.broadcast %cst_40 : f32 to vector<16x16xf32>
    %57 = arith.maximumf %55, %56 : vector<16x16xf32>
    %58 = vector.shape_cast %57 : vector<16x16xf32> to vector<1x16x16xf32>
    %59 = arith.truncf %58 : vector<1x16x16xf32> to vector<1x16x16xbf16>
    %c0_41 = arith.constant 0 : index
    %c0_42 = arith.constant 0 : index
    %c0_43 = arith.constant 0 : index
    %60 = vector.load %arg4[%c0_41, %c0_42, %c0_43] : memref<1x16x16xbf16, #tpu.memory_space<vmem>>, vector<1x16x16xbf16>
    tpu.vector_store %arg4[%c0_41, %c0_42, %c0_43], %59 {strides = array<i32>} : memref<1x16x16xbf16, #tpu.memory_space<vmem>>, vector<1x16x16xbf16>,
    return
  }
  func.func @transform_0(%arg0: i32) -> (i32, i32, i32, i32) {
    %c0_i32 = arith.constant 0 : i32
    %c0_i32_0 = arith.constant 0 : i32
    %c0_i32_1 = arith.constant 0 : i32
    %c0_i32_2 = arith.constant 0 : i32
    return %arg0, %c0_i32, %c0_i32_0, %c0_i32_1 : i32, i32, i32, i32
  }
  func.func @transform_1(%arg0: i32) -> (i32, i32, i32) {
    %c0_i32 = arith.constant 0 : i32
    %c0_i32_0 = arith.constant 0 : i32
    %c0_i32_1 = arith.constant 0 : i32
    %c0_i32_2 = arith.constant 0 : i32
    return %c0_i32, %c0_i32_0, %c0_i32_1 : i32, i32, i32
  }
  func.func @transform_2(%arg0: i32) -> (i32, i32) {
    %c0_i32 = arith.constant 0 : i32
    %c0_i32_0 = arith.constant 0 : i32
    %c0_i32_1 = arith.constant 0 : i32
    return %c0_i32, %c0_i32_0 : i32, i32
  }
  func.func @transform_3(%arg0: i32) -> (i32, i32, i32) {
    %c0_i32 = arith.constant 0 : i32
    %c0_i32_0 = arith.constant 0 : i32
    %c0_i32_1 = arith.constant 0 : i32
    return %arg0, %c0_i32, %c0_i32_0 : i32, i32, i32
  }
}

module attributes {stable_mosaic.version = 11 : i64} {
  func.func @_downsample_kernel(%arg0: i32, %arg1: memref<1x4x1x4x64xbf16, #tpu.memory_space<vmem>>, %arg2: memref<64x64xbf16, #tpu.memory_space<vmem>>, %arg3: memref<1x64xf32, #tpu.memory_space<vmem>>, %arg4: memref<1x16x64xbf16, #tpu.memory_space<vmem>>) attributes {dimension_semantics = [#tpu.dimension_semantics<parallel>], iteration_bounds = array<i64: 2>, scalar_prefetch = 0 : i64, scratch_operands = 0 : i64, tpu.core_type = #tpu.core_type<tc>, window_params = [{transform_indices = @transform_0, window_bounds = array<i64: 1, 4, 1, 4, 64>}, {pipeline_mode = #tpu.pipeline_mode<synchronous>, transform_indices = @transform_1, window_bounds = array<i64: 64, 64>}, {pipeline_mode = #tpu.pipeline_mode<synchronous>, transform_indices = @transform_2, window_bounds = array<i64: 1, 64>}, {transform_indices = @transform_3, window_bounds = array<i64: 1, 16, 64>}]} {
    %c0 = arith.constant 0 : index
    %c0_0 = arith.constant 0 : index
    %c0_1 = arith.constant 0 : index
    %c0_2 = arith.constant 0 : index
    %c0_3 = arith.constant 0 : index
    %0 = vector.load %arg1[%c0, %c0_0, %c0_1, %c0_2, %c0_3] : memref<1x4x1x4x64xbf16, #tpu.memory_space<vmem>>, vector<1x4x1x4x64xbf16>
    %1 = vector.shape_cast %0 : vector<1x4x1x4x64xbf16> to vector<4x4x64xbf16>
    %2 = vector.shape_cast %1 : vector<4x4x64xbf16> to vector<16x64xbf16>
    %c0_4 = arith.constant 0 : index
    %c0_5 = arith.constant 0 : index
    %3 = vector.load %arg2[%c0_4, %c0_5] : memref<64x64xbf16, #tpu.memory_space<vmem>>, vector<64x64xbf16>
    %cst = arith.constant dense<0.000000e+00> : vector<16x64xf32>
    %4 = tpu.matmul %2, %3, %cst {dimension_numbers = #tpu.dot_dimension_numbers<[1], [0], [0], [1], [0, 0, 1, 1], [], []>} : vector<16x64xbf16>, vector<64x64xbf16>, vector<16x64xf32> -> vector<16x64xf32>
    %c0_6 = arith.constant 0 : index
    %c0_7 = arith.constant 0 : index
    %5 = vector.load %arg3[%c0_6, %c0_7] : memref<1x64xf32, #tpu.memory_space<vmem>>, vector<1x64xf32>
    %6 = vector.broadcast %5 : vector<1x64xf32> to vector<16x64xf32>
    %7 = arith.addf %4, %6 : vector<16x64xf32>
    %8 = vector.shape_cast %7 : vector<16x64xf32> to vector<1x16x64xf32>
    %9 = arith.truncf %8 : vector<1x16x64xf32> to vector<1x16x64xbf16>
    %c0_8 = arith.constant 0 : index
    %c0_9 = arith.constant 0 : index
    %c0_10 = arith.constant 0 : index
    %10 = vector.load %arg4[%c0_8, %c0_9, %c0_10] : memref<1x16x64xbf16, #tpu.memory_space<vmem>>, vector<1x16x64xbf16>
    tpu.vector_store %arg4[%c0_8, %c0_9, %c0_10], %9 {strides = array<i32>} : memref<1x16x64xbf16, #tpu.memory_space<vmem>>, vector<1x16x64xbf16>,
    return
  }
  func.func @transform_0(%arg0: i32) -> (i32, i32, i32, i32, i32) {
    %c0_i32 = arith.constant 0 : i32
    %c0_i32_0 = arith.constant 0 : i32
    %c0_i32_1 = arith.constant 0 : i32
    %c0_i32_2 = arith.constant 0 : i32
    %c0_i32_3 = arith.constant 0 : i32
    return %arg0, %c0_i32, %c0_i32_0, %c0_i32_1, %c0_i32_2 : i32, i32, i32, i32, i32
  }
  func.func @transform_1(%arg0: i32) -> (i32, i32) {
    %c0_i32 = arith.constant 0 : i32
    %c0_i32_0 = arith.constant 0 : i32
    %c0_i32_1 = arith.constant 0 : i32
    return %c0_i32, %c0_i32_0 : i32, i32
  }
  func.func @transform_2(%arg0: i32) -> (i32, i32) {
    %c0_i32 = arith.constant 0 : i32
    %c0_i32_0 = arith.constant 0 : i32
    %c0_i32_1 = arith.constant 0 : i32
    return %c0_i32, %c0_i32_0 : i32, i32
  }
  func.func @transform_3(%arg0: i32) -> (i32, i32, i32) {
    %c0_i32 = arith.constant 0 : i32
    %c0_i32_0 = arith.constant 0 : i32
    %c0_i32_1 = arith.constant 0 : i32
    return %arg0, %c0_i32, %c0_i32_0 : i32, i32, i32
  }
}

module attributes {stable_mosaic.version = 11 : i64} {
  func.func @_matmul_bias_res_kernel(%arg0: i32, %arg1: memref<32x16xbf16, #tpu.memory_space<vmem>>, %arg2: memref<16x64xbf16, #tpu.memory_space<vmem>>, %arg3: memref<1x64xf32, #tpu.memory_space<vmem>>, %arg4: memref<32x64xbf16, #tpu.memory_space<vmem>>, %arg5: memref<32x64xbf16, #tpu.memory_space<vmem>>) attributes {dimension_semantics = [#tpu.dimension_semantics<parallel>], iteration_bounds = array<i64: 1>, scalar_prefetch = 0 : i64, scratch_operands = 0 : i64, tpu.core_type = #tpu.core_type<tc>, window_params = [{transform_indices = @transform_0, window_bounds = array<i64: 32, 16>}, {pipeline_mode = #tpu.pipeline_mode<synchronous>, transform_indices = @transform_1, window_bounds = array<i64: 16, 64>}, {pipeline_mode = #tpu.pipeline_mode<synchronous>, transform_indices = @transform_2, window_bounds = array<i64: 1, 64>}, {transform_indices = @transform_3, window_bounds = array<i64: 32, 64>}, {transform_indices = @transform_4, window_bounds = array<i64: 32, 64>}]} {
    %c0 = arith.constant 0 : index
    %c0_0 = arith.constant 0 : index
    %0 = vector.load %arg1[%c0, %c0_0] : memref<32x16xbf16, #tpu.memory_space<vmem>>, vector<32x16xbf16>
    %c0_1 = arith.constant 0 : index
    %c0_2 = arith.constant 0 : index
    %1 = vector.load %arg2[%c0_1, %c0_2] : memref<16x64xbf16, #tpu.memory_space<vmem>>, vector<16x64xbf16>
    %cst = arith.constant dense<0.000000e+00> : vector<32x64xf32>
    %2 = tpu.matmul %0, %1, %cst {dimension_numbers = #tpu.dot_dimension_numbers<[1], [0], [0], [1], [0, 0, 1, 1], [], []>} : vector<32x16xbf16>, vector<16x64xbf16>, vector<32x64xf32> -> vector<32x64xf32>
    %c0_3 = arith.constant 0 : index
    %c0_4 = arith.constant 0 : index
    %3 = vector.load %arg3[%c0_3, %c0_4] : memref<1x64xf32, #tpu.memory_space<vmem>>, vector<1x64xf32>
    %4 = vector.broadcast %3 : vector<1x64xf32> to vector<32x64xf32>
    %5 = arith.addf %2, %4 : vector<32x64xf32>
    %c0_5 = arith.constant 0 : index
    %c0_6 = arith.constant 0 : index
    %6 = vector.load %arg4[%c0_5, %c0_6] : memref<32x64xbf16, #tpu.memory_space<vmem>>, vector<32x64xbf16>
    %7 = arith.extf %6 : vector<32x64xbf16> to vector<32x64xf32>
    %8 = arith.addf %5, %7 : vector<32x64xf32>
    %cst_7 = arith.constant 0.000000e+00 : f32
    %9 = vector.broadcast %cst_7 : f32 to vector<32x64xf32>
    %10 = arith.maximumf %8, %9 : vector<32x64xf32>
    %11 = arith.truncf %10 : vector<32x64xf32> to vector<32x64xbf16>
    %c0_8 = arith.constant 0 : index
    %c0_9 = arith.constant 0 : index
    %12 = vector.load %arg5[%c0_8, %c0_9] : memref<32x64xbf16, #tpu.memory_space<vmem>>, vector<32x64xbf16>
    tpu.vector_store %arg5[%c0_8, %c0_9], %11 {strides = array<i32>} : memref<32x64xbf16, #tpu.memory_space<vmem>>, vector<32x64xbf16>,
    return
  }
  func.func @transform_0(%arg0: i32) -> (i32, i32) {
    %c0_i32 = arith.constant 0 : i32
    %c0_i32_0 = arith.constant 0 : i32
    return %arg0, %c0_i32 : i32, i32
  }
  func.func @transform_1(%arg0: i32) -> (i32, i32) {
    %c0_i32 = arith.constant 0 : i32
    %c0_i32_0 = arith.constant 0 : i32
    %c0_i32_1 = arith.constant 0 : i32
    return %c0_i32, %c0_i32_0 : i32, i32
  }
  func.func @transform_2(%arg0: i32) -> (i32, i32) {
    %c0_i32 = arith.constant 0 : i32
    %c0_i32_0 = arith.constant 0 : i32
    %c0_i32_1 = arith.constant 0 : i32
    return %c0_i32, %c0_i32_0 : i32, i32
  }
  func.func @transform_3(%arg0: i32) -> (i32, i32) {
    %c0_i32 = arith.constant 0 : i32
    %c0_i32_0 = arith.constant 0 : i32
    return %arg0, %c0_i32 : i32, i32
  }
  func.func @transform_4(%arg0: i32) -> (i32, i32) {
    %c0_i32 = arith.constant 0 : i32
    %c0_i32_0 = arith.constant 0 : i32
    return %arg0, %c0_i32 : i32, i32
  }
}

module attributes {stable_mosaic.version = 11 : i64} {
  func.func @_matmul_bias_kernel(%arg0: i32, %arg1: memref<32x64xbf16, #tpu.memory_space<vmem>>, %arg2: memref<64x32xbf16, #tpu.memory_space<vmem>>, %arg3: memref<1x32xf32, #tpu.memory_space<vmem>>, %arg4: memref<32x32xbf16, #tpu.memory_space<vmem>>) attributes {dimension_semantics = [#tpu.dimension_semantics<parallel>], iteration_bounds = array<i64: 1>, scalar_prefetch = 0 : i64, scratch_operands = 0 : i64, tpu.core_type = #tpu.core_type<tc>, window_params = [{transform_indices = @transform_0, window_bounds = array<i64: 32, 64>}, {pipeline_mode = #tpu.pipeline_mode<synchronous>, transform_indices = @transform_1, window_bounds = array<i64: 64, 32>}, {pipeline_mode = #tpu.pipeline_mode<synchronous>, transform_indices = @transform_2, window_bounds = array<i64: 1, 32>}, {transform_indices = @transform_3, window_bounds = array<i64: 32, 32>}]} {
    %c0 = arith.constant 0 : index
    %c0_0 = arith.constant 0 : index
    %0 = vector.load %arg1[%c0, %c0_0] : memref<32x64xbf16, #tpu.memory_space<vmem>>, vector<32x64xbf16>
    %c0_1 = arith.constant 0 : index
    %c0_2 = arith.constant 0 : index
    %1 = vector.load %arg2[%c0_1, %c0_2] : memref<64x32xbf16, #tpu.memory_space<vmem>>, vector<64x32xbf16>
    %cst = arith.constant dense<0.000000e+00> : vector<32x32xf32>
    %2 = tpu.matmul %0, %1, %cst {dimension_numbers = #tpu.dot_dimension_numbers<[1], [0], [0], [1], [0, 0, 1, 1], [], []>} : vector<32x64xbf16>, vector<64x32xbf16>, vector<32x32xf32> -> vector<32x32xf32>
    %c0_3 = arith.constant 0 : index
    %c0_4 = arith.constant 0 : index
    %3 = vector.load %arg3[%c0_3, %c0_4] : memref<1x32xf32, #tpu.memory_space<vmem>>, vector<1x32xf32>
    %4 = vector.broadcast %3 : vector<1x32xf32> to vector<32x32xf32>
    %5 = arith.addf %2, %4 : vector<32x32xf32>
    %cst_5 = arith.constant 0.000000e+00 : f32
    %6 = vector.broadcast %cst_5 : f32 to vector<32x32xf32>
    %7 = arith.maximumf %5, %6 : vector<32x32xf32>
    %8 = arith.truncf %7 : vector<32x32xf32> to vector<32x32xbf16>
    %c0_6 = arith.constant 0 : index
    %c0_7 = arith.constant 0 : index
    %9 = vector.load %arg4[%c0_6, %c0_7] : memref<32x32xbf16, #tpu.memory_space<vmem>>, vector<32x32xbf16>
    tpu.vector_store %arg4[%c0_6, %c0_7], %8 {strides = array<i32>} : memref<32x32xbf16, #tpu.memory_space<vmem>>, vector<32x32xbf16>,
    return
  }
  func.func @transform_0(%arg0: i32) -> (i32, i32) {
    %c0_i32 = arith.constant 0 : i32
    %c0_i32_0 = arith.constant 0 : i32
    return %arg0, %c0_i32 : i32, i32
  }
  func.func @transform_1(%arg0: i32) -> (i32, i32) {
    %c0_i32 = arith.constant 0 : i32
    %c0_i32_0 = arith.constant 0 : i32
    %c0_i32_1 = arith.constant 0 : i32
    return %c0_i32, %c0_i32_0 : i32, i32
  }
  func.func @transform_2(%arg0: i32) -> (i32, i32) {
    %c0_i32 = arith.constant 0 : i32
    %c0_i32_0 = arith.constant 0 : i32
    %c0_i32_1 = arith.constant 0 : i32
    return %c0_i32, %c0_i32_0 : i32, i32
  }
  func.func @transform_3(%arg0: i32) -> (i32, i32) {
    %c0_i32 = arith.constant 0 : i32
    %c0_i32_0 = arith.constant 0 : i32
    return %arg0, %c0_i32 : i32, i32
  }
}

module attributes {stable_mosaic.version = 11 : i64} {
  func.func @_conv_tap_kernel(%arg0: i32, %arg1: memref<1x12x3x32xbf16, #tpu.memory_space<vmem>>, %arg2: memref<9x32x32xbf16, #tpu.memory_space<vmem>>, %arg3: memref<1x32xf32, #tpu.memory_space<vmem>>, %arg4: memref<1x4x32xbf16, #tpu.memory_space<vmem>>) attributes {dimension_semantics = [#tpu.dimension_semantics<parallel>], iteration_bounds = array<i64: 2>, scalar_prefetch = 0 : i64, scratch_operands = 0 : i64, tpu.core_type = #tpu.core_type<tc>, window_params = [{transform_indices = @transform_0, window_bounds = array<i64: 1, 12, 3, 32>}, {pipeline_mode = #tpu.pipeline_mode<synchronous>, transform_indices = @transform_1, window_bounds = array<i64: 9, 32, 32>}, {pipeline_mode = #tpu.pipeline_mode<synchronous>, transform_indices = @transform_2, window_bounds = array<i64: 1, 32>}, {transform_indices = @transform_3, window_bounds = array<i64: 1, 4, 32>}]} {
    %c0 = arith.constant 0 : index
    %c0_0 = arith.constant 0 : index
    %c0_1 = arith.constant 0 : index
    %c0_2 = arith.constant 0 : index
    %0 = vector.load %arg1[%c0, %c0_0, %c0_1, %c0_2] : memref<1x12x3x32xbf16, #tpu.memory_space<vmem>>, vector<1x12x2x32xbf16>
    %1 = vector.shape_cast %0 : vector<1x12x2x32xbf16> to vector<12x2x32xbf16>
    %2 = vector.shape_cast %1 : vector<12x2x32xbf16> to vector<24x32xbf16>
    %3 = vector.extract_strided_slice %2 {offsets = [0, 0], sizes = [4, 32], strides = [1, 1]} : vector<24x32xbf16> to vector<4x32xbf16>
    %c0_3 = arith.constant 0 : index
    %c0_4 = arith.constant 0 : index
    %c0_5 = arith.constant 0 : index
    %4 = vector.load %arg2[%c0_3, %c0_4, %c0_5] : memref<9x32x32xbf16, #tpu.memory_space<vmem>>, vector<1x32x32xbf16>
    %5 = vector.shape_cast %4 : vector<1x32x32xbf16> to vector<32x32xbf16>
    %cst = arith.constant dense<0.000000e+00> : vector<4x32xf32>
    %6 = tpu.matmul %3, %5, %cst {dimension_numbers = #tpu.dot_dimension_numbers<[1], [0], [0], [1], [0, 0, 1, 1], [], []>} : vector<4x32xbf16>, vector<32x32xbf16>, vector<4x32xf32> -> vector<4x32xf32>
    %7 = vector.extract_strided_slice %2 {offsets = [12, 0], sizes = [4, 32], strides = [1, 1]} : vector<24x32xbf16> to vector<4x32xbf16>
    %c3 = arith.constant 3 : index
    %c0_6 = arith.constant 0 : index
    %c0_7 = arith.constant 0 : index
    %8 = vector.load %arg2[%c3, %c0_6, %c0_7] : memref<9x32x32xbf16, #tpu.memory_space<vmem>>, vector<1x32x32xbf16>
    %9 = vector.shape_cast %8 : vector<1x32x32xbf16> to vector<32x32xbf16>
    %cst_8 = arith.constant dense<0.000000e+00> : vector<4x32xf32>
    %10 = tpu.matmul %7, %9, %cst_8 {dimension_numbers = #tpu.dot_dimension_numbers<[1], [0], [0], [1], [0, 0, 1, 1], [], []>} : vector<4x32xbf16>, vector<32x32xbf16>, vector<4x32xf32> -> vector<4x32xf32>
    %11 = arith.addf %6, %10 : vector<4x32xf32>
    %12 = vector.extract_strided_slice %2 {offsets = [2, 0], sizes = [4, 32], strides = [1, 1]} : vector<24x32xbf16> to vector<4x32xbf16>
    %c6 = arith.constant 6 : index
    %c0_9 = arith.constant 0 : index
    %c0_10 = arith.constant 0 : index
    %13 = vector.load %arg2[%c6, %c0_9, %c0_10] : memref<9x32x32xbf16, #tpu.memory_space<vmem>>, vector<1x32x32xbf16>
    %14 = vector.shape_cast %13 : vector<1x32x32xbf16> to vector<32x32xbf16>
    %cst_11 = arith.constant dense<0.000000e+00> : vector<4x32xf32>
    %15 = tpu.matmul %12, %14, %cst_11 {dimension_numbers = #tpu.dot_dimension_numbers<[1], [0], [0], [1], [0, 0, 1, 1], [], []>} : vector<4x32xbf16>, vector<32x32xbf16>, vector<4x32xf32> -> vector<4x32xf32>
    %16 = arith.addf %11, %15 : vector<4x32xf32>
    %c0_12 = arith.constant 0 : index
    %c0_13 = arith.constant 0 : index
    %c0_14 = arith.constant 0 : index
    %c0_15 = arith.constant 0 : index
    %17 = vector.load %arg1[%c0_12, %c0_13, %c0_14, %c0_15] : memref<1x12x3x32xbf16, #tpu.memory_space<vmem>>, vector<1x12x2x32xbf16>
    %18 = vector.shape_cast %17 : vector<1x12x2x32xbf16> to vector<12x2x32xbf16>
    %19 = vector.shape_cast %18 : vector<12x2x32xbf16> to vector<24x32xbf16>
    %20 = vector.extract_strided_slice %19 {offsets = [6, 0], sizes = [4, 32], strides = [1, 1]} : vector<24x32xbf16> to vector<4x32xbf16>
    %c1 = arith.constant 1 : index
    %c0_16 = arith.constant 0 : index
    %c0_17 = arith.constant 0 : index
    %21 = vector.load %arg2[%c1, %c0_16, %c0_17] : memref<9x32x32xbf16, #tpu.memory_space<vmem>>, vector<1x32x32xbf16>
    %22 = vector.shape_cast %21 : vector<1x32x32xbf16> to vector<32x32xbf16>
    %cst_18 = arith.constant dense<0.000000e+00> : vector<4x32xf32>
    %23 = tpu.matmul %20, %22, %cst_18 {dimension_numbers = #tpu.dot_dimension_numbers<[1], [0], [0], [1], [0, 0, 1, 1], [], []>} : vector<4x32xbf16>, vector<32x32xbf16>, vector<4x32xf32> -> vector<4x32xf32>
    %24 = arith.addf %16, %23 : vector<4x32xf32>
    %25 = vector.extract_strided_slice %19 {offsets = [18, 0], sizes = [4, 32], strides = [1, 1]} : vector<24x32xbf16> to vector<4x32xbf16>
    %c4 = arith.constant 4 : index
    %c0_19 = arith.constant 0 : index
    %c0_20 = arith.constant 0 : index
    %26 = vector.load %arg2[%c4, %c0_19, %c0_20] : memref<9x32x32xbf16, #tpu.memory_space<vmem>>, vector<1x32x32xbf16>
    %27 = vector.shape_cast %26 : vector<1x32x32xbf16> to vector<32x32xbf16>
    %cst_21 = arith.constant dense<0.000000e+00> : vector<4x32xf32>
    %28 = tpu.matmul %25, %27, %cst_21 {dimension_numbers = #tpu.dot_dimension_numbers<[1], [0], [0], [1], [0, 0, 1, 1], [], []>} : vector<4x32xbf16>, vector<32x32xbf16>, vector<4x32xf32> -> vector<4x32xf32>
    %29 = arith.addf %24, %28 : vector<4x32xf32>
    %30 = vector.extract_strided_slice %19 {offsets = [8, 0], sizes = [4, 32], strides = [1, 1]} : vector<24x32xbf16> to vector<4x32xbf16>
    %c7 = arith.constant 7 : index
    %c0_22 = arith.constant 0 : index
    %c0_23 = arith.constant 0 : index
    %31 = vector.load %arg2[%c7, %c0_22, %c0_23] : memref<9x32x32xbf16, #tpu.memory_space<vmem>>, vector<1x32x32xbf16>
    %32 = vector.shape_cast %31 : vector<1x32x32xbf16> to vector<32x32xbf16>
    %cst_24 = arith.constant dense<0.000000e+00> : vector<4x32xf32>
    %33 = tpu.matmul %30, %32, %cst_24 {dimension_numbers = #tpu.dot_dimension_numbers<[1], [0], [0], [1], [0, 0, 1, 1], [], []>} : vector<4x32xbf16>, vector<32x32xbf16>, vector<4x32xf32> -> vector<4x32xf32>
    %34 = arith.addf %29, %33 : vector<4x32xf32>
    %c0_25 = arith.constant 0 : index
    %c0_26 = arith.constant 0 : index
    %c1_27 = arith.constant 1 : index
    %c0_28 = arith.constant 0 : index
    %35 = vector.load %arg1[%c0_25, %c0_26, %c1_27, %c0_28] : memref<1x12x3x32xbf16, #tpu.memory_space<vmem>>, vector<1x12x2x32xbf16>
    %36 = vector.shape_cast %35 : vector<1x12x2x32xbf16> to vector<12x2x32xbf16>
    %37 = vector.shape_cast %36 : vector<12x2x32xbf16> to vector<24x32xbf16>
    %38 = vector.extract_strided_slice %37 {offsets = [0, 0], sizes = [4, 32], strides = [1, 1]} : vector<24x32xbf16> to vector<4x32xbf16>
    %c2 = arith.constant 2 : index
    %c0_29 = arith.constant 0 : index
    %c0_30 = arith.constant 0 : index
    %39 = vector.load %arg2[%c2, %c0_29, %c0_30] : memref<9x32x32xbf16, #tpu.memory_space<vmem>>, vector<1x32x32xbf16>
    %40 = vector.shape_cast %39 : vector<1x32x32xbf16> to vector<32x32xbf16>
    %cst_31 = arith.constant dense<0.000000e+00> : vector<4x32xf32>
    %41 = tpu.matmul %38, %40, %cst_31 {dimension_numbers = #tpu.dot_dimension_numbers<[1], [0], [0], [1], [0, 0, 1, 1], [], []>} : vector<4x32xbf16>, vector<32x32xbf16>, vector<4x32xf32> -> vector<4x32xf32>
    %42 = arith.addf %34, %41 : vector<4x32xf32>
    %43 = vector.extract_strided_slice %37 {offsets = [12, 0], sizes = [4, 32], strides = [1, 1]} : vector<24x32xbf16> to vector<4x32xbf16>
    %c5 = arith.constant 5 : index
    %c0_32 = arith.constant 0 : index
    %c0_33 = arith.constant 0 : index
    %44 = vector.load %arg2[%c5, %c0_32, %c0_33] : memref<9x32x32xbf16, #tpu.memory_space<vmem>>, vector<1x32x32xbf16>
    %45 = vector.shape_cast %44 : vector<1x32x32xbf16> to vector<32x32xbf16>
    %cst_34 = arith.constant dense<0.000000e+00> : vector<4x32xf32>
    %46 = tpu.matmul %43, %45, %cst_34 {dimension_numbers = #tpu.dot_dimension_numbers<[1], [0], [0], [1], [0, 0, 1, 1], [], []>} : vector<4x32xbf16>, vector<32x32xbf16>, vector<4x32xf32> -> vector<4x32xf32>
    %47 = arith.addf %42, %46 : vector<4x32xf32>
    %48 = vector.extract_strided_slice %37 {offsets = [2, 0], sizes = [4, 32], strides = [1, 1]} : vector<24x32xbf16> to vector<4x32xbf16>
    %c8 = arith.constant 8 : index
    %c0_35 = arith.constant 0 : index
    %c0_36 = arith.constant 0 : index
    %49 = vector.load %arg2[%c8, %c0_35, %c0_36] : memref<9x32x32xbf16, #tpu.memory_space<vmem>>, vector<1x32x32xbf16>
    %50 = vector.shape_cast %49 : vector<1x32x32xbf16> to vector<32x32xbf16>
    %cst_37 = arith.constant dense<0.000000e+00> : vector<4x32xf32>
    %51 = tpu.matmul %48, %50, %cst_37 {dimension_numbers = #tpu.dot_dimension_numbers<[1], [0], [0], [1], [0, 0, 1, 1], [], []>} : vector<4x32xbf16>, vector<32x32xbf16>, vector<4x32xf32> -> vector<4x32xf32>
    %52 = arith.addf %47, %51 : vector<4x32xf32>
    %c0_38 = arith.constant 0 : index
    %c0_39 = arith.constant 0 : index
    %53 = vector.load %arg3[%c0_38, %c0_39] : memref<1x32xf32, #tpu.memory_space<vmem>>, vector<1x32xf32>
    %54 = vector.broadcast %53 : vector<1x32xf32> to vector<4x32xf32>
    %55 = arith.addf %52, %54 : vector<4x32xf32>
    %cst_40 = arith.constant 0.000000e+00 : f32
    %56 = vector.broadcast %cst_40 : f32 to vector<4x32xf32>
    %57 = arith.maximumf %55, %56 : vector<4x32xf32>
    %58 = vector.shape_cast %57 : vector<4x32xf32> to vector<1x4x32xf32>
    %59 = arith.truncf %58 : vector<1x4x32xf32> to vector<1x4x32xbf16>
    %c0_41 = arith.constant 0 : index
    %c0_42 = arith.constant 0 : index
    %c0_43 = arith.constant 0 : index
    %60 = vector.load %arg4[%c0_41, %c0_42, %c0_43] : memref<1x4x32xbf16, #tpu.memory_space<vmem>>, vector<1x4x32xbf16>
    tpu.vector_store %arg4[%c0_41, %c0_42, %c0_43], %59 {strides = array<i32>} : memref<1x4x32xbf16, #tpu.memory_space<vmem>>, vector<1x4x32xbf16>,
    return
  }
  func.func @transform_0(%arg0: i32) -> (i32, i32, i32, i32) {
    %c0_i32 = arith.constant 0 : i32
    %c0_i32_0 = arith.constant 0 : i32
    %c0_i32_1 = arith.constant 0 : i32
    %c0_i32_2 = arith.constant 0 : i32
    return %arg0, %c0_i32, %c0_i32_0, %c0_i32_1 : i32, i32, i32, i32
  }
  func.func @transform_1(%arg0: i32) -> (i32, i32, i32) {
    %c0_i32 = arith.constant 0 : i32
    %c0_i32_0 = arith.constant 0 : i32
    %c0_i32_1 = arith.constant 0 : i32
    %c0_i32_2 = arith.constant 0 : i32
    return %c0_i32, %c0_i32_0, %c0_i32_1 : i32, i32, i32
  }
  func.func @transform_2(%arg0: i32) -> (i32, i32) {
    %c0_i32 = arith.constant 0 : i32
    %c0_i32_0 = arith.constant 0 : i32
    %c0_i32_1 = arith.constant 0 : i32
    return %c0_i32, %c0_i32_0 : i32, i32
  }
  func.func @transform_3(%arg0: i32) -> (i32, i32, i32) {
    %c0_i32 = arith.constant 0 : i32
    %c0_i32_0 = arith.constant 0 : i32
    %c0_i32_1 = arith.constant 0 : i32
    return %arg0, %c0_i32, %c0_i32_0 : i32, i32, i32
  }
}

module attributes {stable_mosaic.version = 11 : i64} {
  func.func @_matmul_bias_res_kernel(%arg0: i32, %arg1: memref<8x32xbf16, #tpu.memory_space<vmem>>, %arg2: memref<32x128xbf16, #tpu.memory_space<vmem>>, %arg3: memref<1x128xf32, #tpu.memory_space<vmem>>, %arg4: memref<8x128xbf16, #tpu.memory_space<vmem>>, %arg5: memref<8x128xbf16, #tpu.memory_space<vmem>>) attributes {dimension_semantics = [#tpu.dimension_semantics<parallel>], iteration_bounds = array<i64: 1>, scalar_prefetch = 0 : i64, scratch_operands = 0 : i64, tpu.core_type = #tpu.core_type<tc>, window_params = [{transform_indices = @transform_0, window_bounds = array<i64: 8, 32>}, {pipeline_mode = #tpu.pipeline_mode<synchronous>, transform_indices = @transform_1, window_bounds = array<i64: 32, 128>}, {pipeline_mode = #tpu.pipeline_mode<synchronous>, transform_indices = @transform_2, window_bounds = array<i64: 1, 128>}, {transform_indices = @transform_3, window_bounds = array<i64: 8, 128>}, {transform_indices = @transform_4, window_bounds = array<i64: 8, 128>}]} {
    %c0 = arith.constant 0 : index
    %c0_0 = arith.constant 0 : index
    %0 = vector.load %arg1[%c0, %c0_0] : memref<8x32xbf16, #tpu.memory_space<vmem>>, vector<8x32xbf16>
    %c0_1 = arith.constant 0 : index
    %c0_2 = arith.constant 0 : index
    %1 = vector.load %arg2[%c0_1, %c0_2] : memref<32x128xbf16, #tpu.memory_space<vmem>>, vector<32x128xbf16>
    %cst = arith.constant dense<0.000000e+00> : vector<8x128xf32>
    %2 = tpu.matmul %0, %1, %cst {dimension_numbers = #tpu.dot_dimension_numbers<[1], [0], [0], [1], [0, 0, 1, 1], [], []>} : vector<8x32xbf16>, vector<32x128xbf16>, vector<8x128xf32> -> vector<8x128xf32>
    %c0_3 = arith.constant 0 : index
    %c0_4 = arith.constant 0 : index
    %3 = vector.load %arg3[%c0_3, %c0_4] : memref<1x128xf32, #tpu.memory_space<vmem>>, vector<1x128xf32>
    %4 = vector.broadcast %3 : vector<1x128xf32> to vector<8x128xf32>
    %5 = arith.addf %2, %4 : vector<8x128xf32>
    %c0_5 = arith.constant 0 : index
    %c0_6 = arith.constant 0 : index
    %6 = vector.load %arg4[%c0_5, %c0_6] : memref<8x128xbf16, #tpu.memory_space<vmem>>, vector<8x128xbf16>
    %7 = arith.extf %6 : vector<8x128xbf16> to vector<8x128xf32>
    %8 = arith.addf %5, %7 : vector<8x128xf32>
    %cst_7 = arith.constant 0.000000e+00 : f32
    %9 = vector.broadcast %cst_7 : f32 to vector<8x128xf32>
    %10 = arith.maximumf %8, %9 : vector<8x128xf32>
    %11 = arith.truncf %10 : vector<8x128xf32> to vector<8x128xbf16>
    %c0_8 = arith.constant 0 : index
    %c0_9 = arith.constant 0 : index
    %12 = vector.load %arg5[%c0_8, %c0_9] : memref<8x128xbf16, #tpu.memory_space<vmem>>, vector<8x128xbf16>
    tpu.vector_store %arg5[%c0_8, %c0_9], %11 {strides = array<i32>} : memref<8x128xbf16, #tpu.memory_space<vmem>>, vector<8x128xbf16>,
    return
  }
  func.func @transform_0(%arg0: i32) -> (i32, i32) {
    %c0_i32 = arith.constant 0 : i32
    %c0_i32_0 = arith.constant 0 : i32
    return %arg0, %c0_i32 : i32, i32
  }
  func.func @transform_1(%arg0: i32) -> (i32, i32) {
    %c0_i32 = arith.constant 0 : i32
    %c0_i32_0 = arith.constant 0 : i32
    %c0_i32_1 = arith.constant 0 : i32
    return %c0_i32, %c0_i32_0 : i32, i32
  }
  func.func @transform_2(%arg0: i32) -> (i32, i32) {
    %c0_i32 = arith.constant 0 : i32
    %c0_i32_0 = arith.constant 0 : i32
    %c0_i32_1 = arith.constant 0 : i32
    return %c0_i32, %c0_i32_0 : i32, i32
  }
  func.func @transform_3(%arg0: i32) -> (i32, i32) {
    %c0_i32 = arith.constant 0 : i32
    %c0_i32_0 = arith.constant 0 : i32
    return %arg0, %c0_i32 : i32, i32
  }
  func.func @transform_4(%arg0: i32) -> (i32, i32) {
    %c0_i32 = arith.constant 0 : i32
    %c0_i32_0 = arith.constant 0 : i32
    return %arg0, %c0_i32 : i32, i32
  }
}

module attributes {stable_mosaic.version = 11 : i64} {
  func.func @_downsample_kernel(%arg0: i32, %arg1: memref<1x2x1x2x128xbf16, #tpu.memory_space<vmem>>, %arg2: memref<128x128xbf16, #tpu.memory_space<vmem>>, %arg3: memref<1x128xf32, #tpu.memory_space<vmem>>, %arg4: memref<1x4x128xbf16, #tpu.memory_space<vmem>>) attributes {dimension_semantics = [#tpu.dimension_semantics<parallel>], iteration_bounds = array<i64: 2>, scalar_prefetch = 0 : i64, scratch_operands = 0 : i64, tpu.core_type = #tpu.core_type<tc>, window_params = [{transform_indices = @transform_0, window_bounds = array<i64: 1, 2, 1, 2, 128>}, {pipeline_mode = #tpu.pipeline_mode<synchronous>, transform_indices = @transform_1, window_bounds = array<i64: 128, 128>}, {pipeline_mode = #tpu.pipeline_mode<synchronous>, transform_indices = @transform_2, window_bounds = array<i64: 1, 128>}, {transform_indices = @transform_3, window_bounds = array<i64: 1, 4, 128>}]} {
    %c0 = arith.constant 0 : index
    %c0_0 = arith.constant 0 : index
    %c0_1 = arith.constant 0 : index
    %c0_2 = arith.constant 0 : index
    %c0_3 = arith.constant 0 : index
    %0 = vector.load %arg1[%c0, %c0_0, %c0_1, %c0_2, %c0_3] : memref<1x2x1x2x128xbf16, #tpu.memory_space<vmem>>, vector<1x2x1x2x128xbf16>
    %1 = vector.shape_cast %0 : vector<1x2x1x2x128xbf16> to vector<2x2x128xbf16>
    %2 = vector.shape_cast %1 : vector<2x2x128xbf16> to vector<4x128xbf16>
    %c0_4 = arith.constant 0 : index
    %c0_5 = arith.constant 0 : index
    %3 = vector.load %arg2[%c0_4, %c0_5] : memref<128x128xbf16, #tpu.memory_space<vmem>>, vector<128x128xbf16>
    %cst = arith.constant dense<0.000000e+00> : vector<4x128xf32>
    %4 = tpu.matmul %2, %3, %cst {dimension_numbers = #tpu.dot_dimension_numbers<[1], [0], [0], [1], [0, 0, 1, 1], [], []>} : vector<4x128xbf16>, vector<128x128xbf16>, vector<4x128xf32> -> vector<4x128xf32>
    %c0_6 = arith.constant 0 : index
    %c0_7 = arith.constant 0 : index
    %5 = vector.load %arg3[%c0_6, %c0_7] : memref<1x128xf32, #tpu.memory_space<vmem>>, vector<1x128xf32>
    %6 = vector.broadcast %5 : vector<1x128xf32> to vector<4x128xf32>
    %7 = arith.addf %4, %6 : vector<4x128xf32>
    %8 = vector.shape_cast %7 : vector<4x128xf32> to vector<1x4x128xf32>
    %9 = arith.truncf %8 : vector<1x4x128xf32> to vector<1x4x128xbf16>
    %c0_8 = arith.constant 0 : index
    %c0_9 = arith.constant 0 : index
    %c0_10 = arith.constant 0 : index
    %10 = vector.load %arg4[%c0_8, %c0_9, %c0_10] : memref<1x4x128xbf16, #tpu.memory_space<vmem>>, vector<1x4x128xbf16>
    tpu.vector_store %arg4[%c0_8, %c0_9, %c0_10], %9 {strides = array<i32>} : memref<1x4x128xbf16, #tpu.memory_space<vmem>>, vector<1x4x128xbf16>,
    return
  }
  func.func @transform_0(%arg0: i32) -> (i32, i32, i32, i32, i32) {
    %c0_i32 = arith.constant 0 : i32
    %c0_i32_0 = arith.constant 0 : i32
    %c0_i32_1 = arith.constant 0 : i32
    %c0_i32_2 = arith.constant 0 : i32
    %c0_i32_3 = arith.constant 0 : i32
    return %arg0, %c0_i32, %c0_i32_0, %c0_i32_1, %c0_i32_2 : i32, i32, i32, i32, i32
  }
  func.func @transform_1(%arg0: i32) -> (i32, i32) {
    %c0_i32 = arith.constant 0 : i32
    %c0_i32_0 = arith.constant 0 : i32
    %c0_i32_1 = arith.constant 0 : i32
    return %c0_i32, %c0_i32_0 : i32, i32
  }
  func.func @transform_2(%arg0: i32) -> (i32, i32) {
    %c0_i32 = arith.constant 0 : i32
    %c0_i32_0 = arith.constant 0 : i32
    %c0_i32_1 = arith.constant 0 : i32
    return %c0_i32, %c0_i32_0 : i32, i32
  }
  func.func @transform_3(%arg0: i32) -> (i32, i32, i32) {
    %c0_i32 = arith.constant 0 : i32
    %c0_i32_0 = arith.constant 0 : i32
    %c0_i32_1 = arith.constant 0 : i32
    return %arg0, %c0_i32, %c0_i32_0 : i32, i32, i32
  }
}

module attributes {stable_mosaic.version = 11 : i64} {
  func.func @_matmul_bias_kernel(%arg0: i32, %arg1: memref<8x128xbf16, #tpu.memory_space<vmem>>, %arg2: memref<128x64xbf16, #tpu.memory_space<vmem>>, %arg3: memref<1x64xf32, #tpu.memory_space<vmem>>, %arg4: memref<8x64xbf16, #tpu.memory_space<vmem>>) attributes {dimension_semantics = [#tpu.dimension_semantics<parallel>], iteration_bounds = array<i64: 1>, scalar_prefetch = 0 : i64, scratch_operands = 0 : i64, tpu.core_type = #tpu.core_type<tc>, window_params = [{transform_indices = @transform_0, window_bounds = array<i64: 8, 128>}, {pipeline_mode = #tpu.pipeline_mode<synchronous>, transform_indices = @transform_1, window_bounds = array<i64: 128, 64>}, {pipeline_mode = #tpu.pipeline_mode<synchronous>, transform_indices = @transform_2, window_bounds = array<i64: 1, 64>}, {transform_indices = @transform_3, window_bounds = array<i64: 8, 64>}]} {
    %c0 = arith.constant 0 : index
    %c0_0 = arith.constant 0 : index
    %0 = vector.load %arg1[%c0, %c0_0] : memref<8x128xbf16, #tpu.memory_space<vmem>>, vector<8x128xbf16>
    %c0_1 = arith.constant 0 : index
    %c0_2 = arith.constant 0 : index
    %1 = vector.load %arg2[%c0_1, %c0_2] : memref<128x64xbf16, #tpu.memory_space<vmem>>, vector<128x64xbf16>
    %cst = arith.constant dense<0.000000e+00> : vector<8x64xf32>
    %2 = tpu.matmul %0, %1, %cst {dimension_numbers = #tpu.dot_dimension_numbers<[1], [0], [0], [1], [0, 0, 1, 1], [], []>} : vector<8x128xbf16>, vector<128x64xbf16>, vector<8x64xf32> -> vector<8x64xf32>
    %c0_3 = arith.constant 0 : index
    %c0_4 = arith.constant 0 : index
    %3 = vector.load %arg3[%c0_3, %c0_4] : memref<1x64xf32, #tpu.memory_space<vmem>>, vector<1x64xf32>
    %4 = vector.broadcast %3 : vector<1x64xf32> to vector<8x64xf32>
    %5 = arith.addf %2, %4 : vector<8x64xf32>
    %cst_5 = arith.constant 0.000000e+00 : f32
    %6 = vector.broadcast %cst_5 : f32 to vector<8x64xf32>
    %7 = arith.maximumf %5, %6 : vector<8x64xf32>
    %8 = arith.truncf %7 : vector<8x64xf32> to vector<8x64xbf16>
    %c0_6 = arith.constant 0 : index
    %c0_7 = arith.constant 0 : index
    %9 = vector.load %arg4[%c0_6, %c0_7] : memref<8x64xbf16, #tpu.memory_space<vmem>>, vector<8x64xbf16>
    tpu.vector_store %arg4[%c0_6, %c0_7], %8 {strides = array<i32>} : memref<8x64xbf16, #tpu.memory_space<vmem>>, vector<8x64xbf16>,
    return
  }
  func.func @transform_0(%arg0: i32) -> (i32, i32) {
    %c0_i32 = arith.constant 0 : i32
    %c0_i32_0 = arith.constant 0 : i32
    return %arg0, %c0_i32 : i32, i32
  }
  func.func @transform_1(%arg0: i32) -> (i32, i32) {
    %c0_i32 = arith.constant 0 : i32
    %c0_i32_0 = arith.constant 0 : i32
    %c0_i32_1 = arith.constant 0 : i32
    return %c0_i32, %c0_i32_0 : i32, i32
  }
  func.func @transform_2(%arg0: i32) -> (i32, i32) {
    %c0_i32 = arith.constant 0 : i32
    %c0_i32_0 = arith.constant 0 : i32
    %c0_i32_1 = arith.constant 0 : i32
    return %c0_i32, %c0_i32_0 : i32, i32
  }
  func.func @transform_3(%arg0: i32) -> (i32, i32) {
    %c0_i32 = arith.constant 0 : i32
    %c0_i32_0 = arith.constant 0 : i32
    return %arg0, %c0_i32 : i32, i32
  }
}

module attributes {stable_mosaic.version = 11 : i64} {
  func.func @_conv_tap_kernel(%arg0: i32, %arg1: memref<1x8x2x64xbf16, #tpu.memory_space<vmem>>, %arg2: memref<9x64x64xbf16, #tpu.memory_space<vmem>>, %arg3: memref<1x64xf32, #tpu.memory_space<vmem>>, %arg4: memref<1x1x64xbf16, #tpu.memory_space<vmem>>) attributes {dimension_semantics = [#tpu.dimension_semantics<parallel>], iteration_bounds = array<i64: 2>, scalar_prefetch = 0 : i64, scratch_operands = 0 : i64, tpu.core_type = #tpu.core_type<tc>, window_params = [{transform_indices = @transform_0, window_bounds = array<i64: 1, 8, 2, 64>}, {pipeline_mode = #tpu.pipeline_mode<synchronous>, transform_indices = @transform_1, window_bounds = array<i64: 9, 64, 64>}, {pipeline_mode = #tpu.pipeline_mode<synchronous>, transform_indices = @transform_2, window_bounds = array<i64: 1, 64>}, {transform_indices = @transform_3, window_bounds = array<i64: 1, 1, 64>}]} {
    %c0 = arith.constant 0 : index
    %c0_0 = arith.constant 0 : index
    %c0_1 = arith.constant 0 : index
    %c0_2 = arith.constant 0 : index
    %0 = vector.load %arg1[%c0, %c0_0, %c0_1, %c0_2] : memref<1x8x2x64xbf16, #tpu.memory_space<vmem>>, vector<1x8x1x64xbf16>
    %1 = vector.shape_cast %0 : vector<1x8x1x64xbf16> to vector<8x1x64xbf16>
    %2 = vector.shape_cast %1 : vector<8x1x64xbf16> to vector<8x64xbf16>
    %3 = vector.extract_strided_slice %2 {offsets = [0, 0], sizes = [1, 64], strides = [1, 1]} : vector<8x64xbf16> to vector<1x64xbf16>
    %c0_3 = arith.constant 0 : index
    %c0_4 = arith.constant 0 : index
    %c0_5 = arith.constant 0 : index
    %4 = vector.load %arg2[%c0_3, %c0_4, %c0_5] : memref<9x64x64xbf16, #tpu.memory_space<vmem>>, vector<1x64x64xbf16>
    %5 = vector.shape_cast %4 : vector<1x64x64xbf16> to vector<64x64xbf16>
    %cst = arith.constant dense<0.000000e+00> : vector<1x64xf32>
    %6 = tpu.matmul %3, %5, %cst {dimension_numbers = #tpu.dot_dimension_numbers<[1], [0], [0], [1], [0, 0, 1, 1], [], []>} : vector<1x64xbf16>, vector<64x64xbf16>, vector<1x64xf32> -> vector<1x64xf32>
    %7 = vector.extract_strided_slice %2 {offsets = [4, 0], sizes = [1, 64], strides = [1, 1]} : vector<8x64xbf16> to vector<1x64xbf16>
    %c3 = arith.constant 3 : index
    %c0_6 = arith.constant 0 : index
    %c0_7 = arith.constant 0 : index
    %8 = vector.load %arg2[%c3, %c0_6, %c0_7] : memref<9x64x64xbf16, #tpu.memory_space<vmem>>, vector<1x64x64xbf16>
    %9 = vector.shape_cast %8 : vector<1x64x64xbf16> to vector<64x64xbf16>
    %cst_8 = arith.constant dense<0.000000e+00> : vector<1x64xf32>
    %10 = tpu.matmul %7, %9, %cst_8 {dimension_numbers = #tpu.dot_dimension_numbers<[1], [0], [0], [1], [0, 0, 1, 1], [], []>} : vector<1x64xbf16>, vector<64x64xbf16>, vector<1x64xf32> -> vector<1x64xf32>
    %11 = arith.addf %6, %10 : vector<1x64xf32>
    %12 = vector.extract_strided_slice %2 {offsets = [1, 0], sizes = [1, 64], strides = [1, 1]} : vector<8x64xbf16> to vector<1x64xbf16>
    %c6 = arith.constant 6 : index
    %c0_9 = arith.constant 0 : index
    %c0_10 = arith.constant 0 : index
    %13 = vector.load %arg2[%c6, %c0_9, %c0_10] : memref<9x64x64xbf16, #tpu.memory_space<vmem>>, vector<1x64x64xbf16>
    %14 = vector.shape_cast %13 : vector<1x64x64xbf16> to vector<64x64xbf16>
    %cst_11 = arith.constant dense<0.000000e+00> : vector<1x64xf32>
    %15 = tpu.matmul %12, %14, %cst_11 {dimension_numbers = #tpu.dot_dimension_numbers<[1], [0], [0], [1], [0, 0, 1, 1], [], []>} : vector<1x64xbf16>, vector<64x64xbf16>, vector<1x64xf32> -> vector<1x64xf32>
    %16 = arith.addf %11, %15 : vector<1x64xf32>
    %c0_12 = arith.constant 0 : index
    %c0_13 = arith.constant 0 : index
    %c0_14 = arith.constant 0 : index
    %c0_15 = arith.constant 0 : index
    %17 = vector.load %arg1[%c0_12, %c0_13, %c0_14, %c0_15] : memref<1x8x2x64xbf16, #tpu.memory_space<vmem>>, vector<1x8x1x64xbf16>
    %18 = vector.shape_cast %17 : vector<1x8x1x64xbf16> to vector<8x1x64xbf16>
    %19 = vector.shape_cast %18 : vector<8x1x64xbf16> to vector<8x64xbf16>
    %20 = vector.extract_strided_slice %19 {offsets = [2, 0], sizes = [1, 64], strides = [1, 1]} : vector<8x64xbf16> to vector<1x64xbf16>
    %c1 = arith.constant 1 : index
    %c0_16 = arith.constant 0 : index
    %c0_17 = arith.constant 0 : index
    %21 = vector.load %arg2[%c1, %c0_16, %c0_17] : memref<9x64x64xbf16, #tpu.memory_space<vmem>>, vector<1x64x64xbf16>
    %22 = vector.shape_cast %21 : vector<1x64x64xbf16> to vector<64x64xbf16>
    %cst_18 = arith.constant dense<0.000000e+00> : vector<1x64xf32>
    %23 = tpu.matmul %20, %22, %cst_18 {dimension_numbers = #tpu.dot_dimension_numbers<[1], [0], [0], [1], [0, 0, 1, 1], [], []>} : vector<1x64xbf16>, vector<64x64xbf16>, vector<1x64xf32> -> vector<1x64xf32>
    %24 = arith.addf %16, %23 : vector<1x64xf32>
    %25 = vector.extract_strided_slice %19 {offsets = [6, 0], sizes = [1, 64], strides = [1, 1]} : vector<8x64xbf16> to vector<1x64xbf16>
    %c4 = arith.constant 4 : index
    %c0_19 = arith.constant 0 : index
    %c0_20 = arith.constant 0 : index
    %26 = vector.load %arg2[%c4, %c0_19, %c0_20] : memref<9x64x64xbf16, #tpu.memory_space<vmem>>, vector<1x64x64xbf16>
    %27 = vector.shape_cast %26 : vector<1x64x64xbf16> to vector<64x64xbf16>
    %cst_21 = arith.constant dense<0.000000e+00> : vector<1x64xf32>
    %28 = tpu.matmul %25, %27, %cst_21 {dimension_numbers = #tpu.dot_dimension_numbers<[1], [0], [0], [1], [0, 0, 1, 1], [], []>} : vector<1x64xbf16>, vector<64x64xbf16>, vector<1x64xf32> -> vector<1x64xf32>
    %29 = arith.addf %24, %28 : vector<1x64xf32>
    %30 = vector.extract_strided_slice %19 {offsets = [3, 0], sizes = [1, 64], strides = [1, 1]} : vector<8x64xbf16> to vector<1x64xbf16>
    %c7 = arith.constant 7 : index
    %c0_22 = arith.constant 0 : index
    %c0_23 = arith.constant 0 : index
    %31 = vector.load %arg2[%c7, %c0_22, %c0_23] : memref<9x64x64xbf16, #tpu.memory_space<vmem>>, vector<1x64x64xbf16>
    %32 = vector.shape_cast %31 : vector<1x64x64xbf16> to vector<64x64xbf16>
    %cst_24 = arith.constant dense<0.000000e+00> : vector<1x64xf32>
    %33 = tpu.matmul %30, %32, %cst_24 {dimension_numbers = #tpu.dot_dimension_numbers<[1], [0], [0], [1], [0, 0, 1, 1], [], []>} : vector<1x64xbf16>, vector<64x64xbf16>, vector<1x64xf32> -> vector<1x64xf32>
    %34 = arith.addf %29, %33 : vector<1x64xf32>
    %c0_25 = arith.constant 0 : index
    %c0_26 = arith.constant 0 : index
    %c1_27 = arith.constant 1 : index
    %c0_28 = arith.constant 0 : index
    %35 = vector.load %arg1[%c0_25, %c0_26, %c1_27, %c0_28] : memref<1x8x2x64xbf16, #tpu.memory_space<vmem>>, vector<1x8x1x64xbf16>
    %36 = vector.shape_cast %35 : vector<1x8x1x64xbf16> to vector<8x1x64xbf16>
    %37 = vector.shape_cast %36 : vector<8x1x64xbf16> to vector<8x64xbf16>
    %38 = vector.extract_strided_slice %37 {offsets = [0, 0], sizes = [1, 64], strides = [1, 1]} : vector<8x64xbf16> to vector<1x64xbf16>
    %c2 = arith.constant 2 : index
    %c0_29 = arith.constant 0 : index
    %c0_30 = arith.constant 0 : index
    %39 = vector.load %arg2[%c2, %c0_29, %c0_30] : memref<9x64x64xbf16, #tpu.memory_space<vmem>>, vector<1x64x64xbf16>
    %40 = vector.shape_cast %39 : vector<1x64x64xbf16> to vector<64x64xbf16>
    %cst_31 = arith.constant dense<0.000000e+00> : vector<1x64xf32>
    %41 = tpu.matmul %38, %40, %cst_31 {dimension_numbers = #tpu.dot_dimension_numbers<[1], [0], [0], [1], [0, 0, 1, 1], [], []>} : vector<1x64xbf16>, vector<64x64xbf16>, vector<1x64xf32> -> vector<1x64xf32>
    %42 = arith.addf %34, %41 : vector<1x64xf32>
    %43 = vector.extract_strided_slice %37 {offsets = [4, 0], sizes = [1, 64], strides = [1, 1]} : vector<8x64xbf16> to vector<1x64xbf16>
    %c5 = arith.constant 5 : index
    %c0_32 = arith.constant 0 : index
    %c0_33 = arith.constant 0 : index
    %44 = vector.load %arg2[%c5, %c0_32, %c0_33] : memref<9x64x64xbf16, #tpu.memory_space<vmem>>, vector<1x64x64xbf16>
    %45 = vector.shape_cast %44 : vector<1x64x64xbf16> to vector<64x64xbf16>
    %cst_34 = arith.constant dense<0.000000e+00> : vector<1x64xf32>
    %46 = tpu.matmul %43, %45, %cst_34 {dimension_numbers = #tpu.dot_dimension_numbers<[1], [0], [0], [1], [0, 0, 1, 1], [], []>} : vector<1x64xbf16>, vector<64x64xbf16>, vector<1x64xf32> -> vector<1x64xf32>
    %47 = arith.addf %42, %46 : vector<1x64xf32>
    %48 = vector.extract_strided_slice %37 {offsets = [1, 0], sizes = [1, 64], strides = [1, 1]} : vector<8x64xbf16> to vector<1x64xbf16>
    %c8 = arith.constant 8 : index
    %c0_35 = arith.constant 0 : index
    %c0_36 = arith.constant 0 : index
    %49 = vector.load %arg2[%c8, %c0_35, %c0_36] : memref<9x64x64xbf16, #tpu.memory_space<vmem>>, vector<1x64x64xbf16>
    %50 = vector.shape_cast %49 : vector<1x64x64xbf16> to vector<64x64xbf16>
    %cst_37 = arith.constant dense<0.000000e+00> : vector<1x64xf32>
    %51 = tpu.matmul %48, %50, %cst_37 {dimension_numbers = #tpu.dot_dimension_numbers<[1], [0], [0], [1], [0, 0, 1, 1], [], []>} : vector<1x64xbf16>, vector<64x64xbf16>, vector<1x64xf32> -> vector<1x64xf32>
    %52 = arith.addf %47, %51 : vector<1x64xf32>
    %c0_38 = arith.constant 0 : index
    %c0_39 = arith.constant 0 : index
    %53 = vector.load %arg3[%c0_38, %c0_39] : memref<1x64xf32, #tpu.memory_space<vmem>>, vector<1x64xf32>
    %54 = arith.addf %52, %53 : vector<1x64xf32>
    %cst_40 = arith.constant 0.000000e+00 : f32
    %55 = vector.broadcast %cst_40 : f32 to vector<1x64xf32>
    %56 = arith.maximumf %54, %55 : vector<1x64xf32>
    %57 = vector.shape_cast %56 : vector<1x64xf32> to vector<1x1x64xf32>
    %58 = arith.truncf %57 : vector<1x1x64xf32> to vector<1x1x64xbf16>
    %c0_41 = arith.constant 0 : index
    %c0_42 = arith.constant 0 : index
    %c0_43 = arith.constant 0 : index
    %59 = vector.load %arg4[%c0_41, %c0_42, %c0_43] : memref<1x1x64xbf16, #tpu.memory_space<vmem>>, vector<1x1x64xbf16>
    tpu.vector_store %arg4[%c0_41, %c0_42, %c0_43], %58 {strides = array<i32>} : memref<1x1x64xbf16, #tpu.memory_space<vmem>>, vector<1x1x64xbf16>,
    return
  }
  func.func @transform_0(%arg0: i32) -> (i32, i32, i32, i32) {
    %c0_i32 = arith.constant 0 : i32
    %c0_i32_0 = arith.constant 0 : i32
    %c0_i32_1 = arith.constant 0 : i32
    %c0_i32_2 = arith.constant 0 : i32
    return %arg0, %c0_i32, %c0_i32_0, %c0_i32_1 : i32, i32, i32, i32
  }
  func.func @transform_1(%arg0: i32) -> (i32, i32, i32) {
    %c0_i32 = arith.constant 0 : i32
    %c0_i32_0 = arith.constant 0 : i32
    %c0_i32_1 = arith.constant 0 : i32
    %c0_i32_2 = arith.constant 0 : i32
    return %c0_i32, %c0_i32_0, %c0_i32_1 : i32, i32, i32
  }
  func.func @transform_2(%arg0: i32) -> (i32, i32) {
    %c0_i32 = arith.constant 0 : i32
    %c0_i32_0 = arith.constant 0 : i32
    %c0_i32_1 = arith.constant 0 : i32
    return %c0_i32, %c0_i32_0 : i32, i32
  }
  func.func @transform_3(%arg0: i32) -> (i32, i32, i32) {
    %c0_i32 = arith.constant 0 : i32
    %c0_i32_0 = arith.constant 0 : i32
    %c0_i32_1 = arith.constant 0 : i32
    return %arg0, %c0_i32, %c0_i32_0 : i32, i32, i32
  }
}

module attributes {stable_mosaic.version = 11 : i64} {
  func.func @_matmul_bias_res_kernel(%arg0: i32, %arg1: memref<2x64xbf16, #tpu.memory_space<vmem>>, %arg2: memref<64x256xbf16, #tpu.memory_space<vmem>>, %arg3: memref<1x256xf32, #tpu.memory_space<vmem>>, %arg4: memref<2x256xbf16, #tpu.memory_space<vmem>>, %arg5: memref<2x256xbf16, #tpu.memory_space<vmem>>) attributes {dimension_semantics = [#tpu.dimension_semantics<parallel>], iteration_bounds = array<i64: 1>, scalar_prefetch = 0 : i64, scratch_operands = 0 : i64, tpu.core_type = #tpu.core_type<tc>, window_params = [{transform_indices = @transform_0, window_bounds = array<i64: 2, 64>}, {pipeline_mode = #tpu.pipeline_mode<synchronous>, transform_indices = @transform_1, window_bounds = array<i64: 64, 256>}, {pipeline_mode = #tpu.pipeline_mode<synchronous>, transform_indices = @transform_2, window_bounds = array<i64: 1, 256>}, {transform_indices = @transform_3, window_bounds = array<i64: 2, 256>}, {transform_indices = @transform_4, window_bounds = array<i64: 2, 256>}]} {
    %c0 = arith.constant 0 : index
    %c0_0 = arith.constant 0 : index
    %0 = vector.load %arg1[%c0, %c0_0] : memref<2x64xbf16, #tpu.memory_space<vmem>>, vector<2x64xbf16>
    %c0_1 = arith.constant 0 : index
    %c0_2 = arith.constant 0 : index
    %1 = vector.load %arg2[%c0_1, %c0_2] : memref<64x256xbf16, #tpu.memory_space<vmem>>, vector<64x256xbf16>
    %cst = arith.constant dense<0.000000e+00> : vector<2x256xf32>
    %2 = tpu.matmul %0, %1, %cst {dimension_numbers = #tpu.dot_dimension_numbers<[1], [0], [0], [1], [0, 0, 1, 1], [], []>} : vector<2x64xbf16>, vector<64x256xbf16>, vector<2x256xf32> -> vector<2x256xf32>
    %c0_3 = arith.constant 0 : index
    %c0_4 = arith.constant 0 : index
    %3 = vector.load %arg3[%c0_3, %c0_4] : memref<1x256xf32, #tpu.memory_space<vmem>>, vector<1x256xf32>
    %4 = vector.broadcast %3 : vector<1x256xf32> to vector<2x256xf32>
    %5 = arith.addf %2, %4 : vector<2x256xf32>
    %c0_5 = arith.constant 0 : index
    %c0_6 = arith.constant 0 : index
    %6 = vector.load %arg4[%c0_5, %c0_6] : memref<2x256xbf16, #tpu.memory_space<vmem>>, vector<2x256xbf16>
    %7 = arith.extf %6 : vector<2x256xbf16> to vector<2x256xf32>
    %8 = arith.addf %5, %7 : vector<2x256xf32>
    %cst_7 = arith.constant 0.000000e+00 : f32
    %9 = vector.broadcast %cst_7 : f32 to vector<2x256xf32>
    %10 = arith.maximumf %8, %9 : vector<2x256xf32>
    %11 = arith.truncf %10 : vector<2x256xf32> to vector<2x256xbf16>
    %c0_8 = arith.constant 0 : index
    %c0_9 = arith.constant 0 : index
    %12 = vector.load %arg5[%c0_8, %c0_9] : memref<2x256xbf16, #tpu.memory_space<vmem>>, vector<2x256xbf16>
    tpu.vector_store %arg5[%c0_8, %c0_9], %11 {strides = array<i32>} : memref<2x256xbf16, #tpu.memory_space<vmem>>, vector<2x256xbf16>,
    return
  }
  func.func @transform_0(%arg0: i32) -> (i32, i32) {
    %c0_i32 = arith.constant 0 : i32
    %c0_i32_0 = arith.constant 0 : i32
    return %arg0, %c0_i32 : i32, i32
  }
  func.func @transform_1(%arg0: i32) -> (i32, i32) {
    %c0_i32 = arith.constant 0 : i32
    %c0_i32_0 = arith.constant 0 : i32
    %c0_i32_1 = arith.constant 0 : i32
    return %c0_i32, %c0_i32_0 : i32, i32
  }
  func.func @transform_2(%arg0: i32) -> (i32, i32) {
    %c0_i32 = arith.constant 0 : i32
    %c0_i32_0 = arith.constant 0 : i32
    %c0_i32_1 = arith.constant 0 : i32
    return %c0_i32, %c0_i32_0 : i32, i32
  }
  func.func @transform_3(%arg0: i32) -> (i32, i32) {
    %c0_i32 = arith.constant 0 : i32
    %c0_i32_0 = arith.constant 0 : i32
    return %arg0, %c0_i32 : i32, i32
  }
  func.func @transform_4(%arg0: i32) -> (i32, i32) {
    %c0_i32 = arith.constant 0 : i32
    %c0_i32_0 = arith.constant 0 : i32
    return %arg0, %c0_i32 : i32, i32
  }
}

module attributes {stable_mosaic.version = 11 : i64} {
  func.func @_downsample_kernel(%arg0: i32, %arg1: memref<1x1x1x1x256xbf16, #tpu.memory_space<vmem>>, %arg2: memref<256x256xbf16, #tpu.memory_space<vmem>>, %arg3: memref<1x256xf32, #tpu.memory_space<vmem>>, %arg4: memref<1x1x256xbf16, #tpu.memory_space<vmem>>) attributes {dimension_semantics = [#tpu.dimension_semantics<parallel>], iteration_bounds = array<i64: 2>, scalar_prefetch = 0 : i64, scratch_operands = 0 : i64, tpu.core_type = #tpu.core_type<tc>, window_params = [{transform_indices = @transform_0, window_bounds = array<i64: 1, 1, 1, 1, 256>}, {pipeline_mode = #tpu.pipeline_mode<synchronous>, transform_indices = @transform_1, window_bounds = array<i64: 256, 256>}, {pipeline_mode = #tpu.pipeline_mode<synchronous>, transform_indices = @transform_2, window_bounds = array<i64: 1, 256>}, {transform_indices = @transform_3, window_bounds = array<i64: 1, 1, 256>}]} {
    %c0 = arith.constant 0 : index
    %c0_0 = arith.constant 0 : index
    %c0_1 = arith.constant 0 : index
    %c0_2 = arith.constant 0 : index
    %c0_3 = arith.constant 0 : index
    %0 = vector.load %arg1[%c0, %c0_0, %c0_1, %c0_2, %c0_3] : memref<1x1x1x1x256xbf16, #tpu.memory_space<vmem>>, vector<1x1x1x1x256xbf16>
    %1 = vector.shape_cast %0 : vector<1x1x1x1x256xbf16> to vector<1x1x256xbf16>
    %2 = vector.shape_cast %1 : vector<1x1x256xbf16> to vector<1x256xbf16>
    %c0_4 = arith.constant 0 : index
    %c0_5 = arith.constant 0 : index
    %3 = vector.load %arg2[%c0_4, %c0_5] : memref<256x256xbf16, #tpu.memory_space<vmem>>, vector<256x256xbf16>
    %cst = arith.constant dense<0.000000e+00> : vector<1x256xf32>
    %4 = tpu.matmul %2, %3, %cst {dimension_numbers = #tpu.dot_dimension_numbers<[1], [0], [0], [1], [0, 0, 1, 1], [], []>} : vector<1x256xbf16>, vector<256x256xbf16>, vector<1x256xf32> -> vector<1x256xf32>
    %c0_6 = arith.constant 0 : index
    %c0_7 = arith.constant 0 : index
    %5 = vector.load %arg3[%c0_6, %c0_7] : memref<1x256xf32, #tpu.memory_space<vmem>>, vector<1x256xf32>
    %6 = arith.addf %4, %5 : vector<1x256xf32>
    %7 = vector.shape_cast %6 : vector<1x256xf32> to vector<1x1x256xf32>
    %8 = arith.truncf %7 : vector<1x1x256xf32> to vector<1x1x256xbf16>
    %c0_8 = arith.constant 0 : index
    %c0_9 = arith.constant 0 : index
    %c0_10 = arith.constant 0 : index
    %9 = vector.load %arg4[%c0_8, %c0_9, %c0_10] : memref<1x1x256xbf16, #tpu.memory_space<vmem>>, vector<1x1x256xbf16>
    tpu.vector_store %arg4[%c0_8, %c0_9, %c0_10], %8 {strides = array<i32>} : memref<1x1x256xbf16, #tpu.memory_space<vmem>>, vector<1x1x256xbf16>,
    return
  }
  func.func @transform_0(%arg0: i32) -> (i32, i32, i32, i32, i32) {
    %c0_i32 = arith.constant 0 : i32
    %c0_i32_0 = arith.constant 0 : i32
    %c0_i32_1 = arith.constant 0 : i32
    %c0_i32_2 = arith.constant 0 : i32
    %c0_i32_3 = arith.constant 0 : i32
    return %arg0, %c0_i32, %c0_i32_0, %c0_i32_1, %c0_i32_2 : i32, i32, i32, i32, i32
  }
  func.func @transform_1(%arg0: i32) -> (i32, i32) {
    %c0_i32 = arith.constant 0 : i32
    %c0_i32_0 = arith.constant 0 : i32
    %c0_i32_1 = arith.constant 0 : i32
    return %c0_i32, %c0_i32_0 : i32, i32
  }
  func.func @transform_2(%arg0: i32) -> (i32, i32) {
    %c0_i32 = arith.constant 0 : i32
    %c0_i32_0 = arith.constant 0 : i32
    %c0_i32_1 = arith.constant 0 : i32
    return %c0_i32, %c0_i32_0 : i32, i32
  }
  func.func @transform_3(%arg0: i32) -> (i32, i32, i32) {
    %c0_i32 = arith.constant 0 : i32
    %c0_i32_0 = arith.constant 0 : i32
    %c0_i32_1 = arith.constant 0 : i32
    return %arg0, %c0_i32, %c0_i32_0 : i32, i32, i32
  }
}

module attributes {stable_mosaic.version = 11 : i64} {
  func.func @_avgpool_fc_kernel(%arg0: i32, %arg1: memref<2x1x256xbf16, #tpu.memory_space<vmem>>, %arg2: memref<256x128xbf16, #tpu.memory_space<vmem>>, %arg3: memref<1x128xf32, #tpu.memory_space<vmem>>, %arg4: memref<2x128xf32, #tpu.memory_space<vmem>>) attributes {dimension_semantics = [#tpu.dimension_semantics<arbitrary>], iteration_bounds = array<i64: 1>, scalar_prefetch = 0 : i64, scratch_operands = 0 : i64, tpu.core_type = #tpu.core_type<tc>, window_params = [{pipeline_mode = #tpu.pipeline_mode<synchronous>, transform_indices = @transform_0, window_bounds = array<i64: 2, 1, 256>}, {pipeline_mode = #tpu.pipeline_mode<synchronous>, transform_indices = @transform_1, window_bounds = array<i64: 256, 128>}, {pipeline_mode = #tpu.pipeline_mode<synchronous>, transform_indices = @transform_2, window_bounds = array<i64: 1, 128>}, {pipeline_mode = #tpu.pipeline_mode<synchronous>, transform_indices = @transform_3, window_bounds = array<i64: 2, 128>}]} {
    %c0 = arith.constant 0 : index
    %c0_0 = arith.constant 0 : index
    %c0_1 = arith.constant 0 : index
    %0 = vector.load %arg1[%c0, %c0_0, %c0_1] : memref<2x1x256xbf16, #tpu.memory_space<vmem>>, vector<2x1x256xbf16>
    %1 = arith.extf %0 : vector<2x1x256xbf16> to vector<2x1x256xf32>
    %cst = arith.constant dense<0.000000e+00> : vector<2x256xf32>
    %2 = vector.multi_reduction <add>, %1, %cst [1] : vector<2x1x256xf32> to vector<2x256xf32>
    %cst_2 = arith.constant 1.000000e+00 : f32
    %3 = vector.broadcast %cst_2 : f32 to vector<2x256xf32>
    %4 = arith.divf %2, %3 : vector<2x256xf32>
    %5 = arith.truncf %4 : vector<2x256xf32> to vector<2x256xbf16>
    %c0_3 = arith.constant 0 : index
    %c0_4 = arith.constant 0 : index
    %6 = vector.load %arg2[%c0_3, %c0_4] : memref<256x128xbf16, #tpu.memory_space<vmem>>, vector<256x128xbf16>
    %cst_5 = arith.constant dense<0.000000e+00> : vector<2x128xf32>
    %7 = tpu.matmul %5, %6, %cst_5 {dimension_numbers = #tpu.dot_dimension_numbers<[1], [0], [0], [1], [0, 0, 1, 1], [], []>} : vector<2x256xbf16>, vector<256x128xbf16>, vector<2x128xf32> -> vector<2x128xf32>
    %c0_6 = arith.constant 0 : index
    %c0_7 = arith.constant 0 : index
    %8 = vector.load %arg3[%c0_6, %c0_7] : memref<1x128xf32, #tpu.memory_space<vmem>>, vector<1x128xf32>
    %9 = vector.broadcast %8 : vector<1x128xf32> to vector<2x128xf32>
    %10 = arith.addf %7, %9 : vector<2x128xf32>
    %c0_8 = arith.constant 0 : index
    %c0_9 = arith.constant 0 : index
    %11 = vector.load %arg4[%c0_8, %c0_9] : memref<2x128xf32, #tpu.memory_space<vmem>>, vector<2x128xf32>
    tpu.vector_store %arg4[%c0_8, %c0_9], %10 {strides = array<i32>} : memref<2x128xf32, #tpu.memory_space<vmem>>, vector<2x128xf32>,
    return
  }
  func.func @transform_0(%arg0: i32) -> (i32, i32, i32) {
    %c0_i32 = arith.constant 0 : i32
    %c0_i32_0 = arith.constant 0 : i32
    %c0_i32_1 = arith.constant 0 : i32
    %c0_i32_2 = arith.constant 0 : i32
    return %c0_i32, %c0_i32_0, %c0_i32_1 : i32, i32, i32
  }
  func.func @transform_1(%arg0: i32) -> (i32, i32) {
    %c0_i32 = arith.constant 0 : i32
    %c0_i32_0 = arith.constant 0 : i32
    %c0_i32_1 = arith.constant 0 : i32
    return %c0_i32, %c0_i32_0 : i32, i32
  }
  func.func @transform_2(%arg0: i32) -> (i32, i32) {
    %c0_i32 = arith.constant 0 : i32
    %c0_i32_0 = arith.constant 0 : i32
    %c0_i32_1 = arith.constant 0 : i32
    return %c0_i32, %c0_i32_0 : i32, i32
  }
  func.func @transform_3(%arg0: i32) -> (i32, i32) {
    %c0_i32 = arith.constant 0 : i32
    %c0_i32_0 = arith.constant 0 : i32
    %c0_i32_1 = arith.constant 0 : i32
    return %c0_i32, %c0_i32_0 : i32, i32
  }
}

</mosaic_0001>

<bundles_post_ra>
// kernel: forward.19
= control target key start
LH: loop header
LB: loop body
LE: loop exit
PB: predicated region body
PF: predicated region fallthrough
CT: control target
= control target key end

     0   :  { %s1157_s12 = smov 0   ;;  %s1361_s0 = inlined_call_operand.vmem [shape: bf16[512,147], index: 0, kind: input, shape index: {}]   ;;  %s1362_s1 = inlined_call_operand.vmem [shape: bf16[147,8], index: 1, kind: input, shape index: {}]   ;;  %s1363_s2 = inlined_call_operand.vmem [shape: f32[1,8], index: 2, kind: input, shape index: {}]   ;;  %s1364_s3 = inlined_call_operand.vmem [shape: bf16[512,8], index: 3, kind: output, shape index: {}]  }
   0x1 LB: > { %s903_s13 = sadd.s32 4294967295, %s1133_s12   ;;  %p907_p0 = scmp.ge.s32.totalorder %s1133_s12, 1  ;;  %s1133_s12 = sphi %s1157_s12, %s13_s12  }
   0x2   : > { %p139_p1 = scmp.lt.s32.totalorder %s1133_s12, 3 }
   0x4   : > { %p140_p2 = pnand %p907_p0, %p139_p1 }
   0x5   : > { %s908_s20 = sshll.u32 (!%p140_p2), %s903_s13, 5 }
   0x6   : > { %143 = sbr.rel (%p140_p2) target bundleno = 312 (0x138), region = 32  ;;  %p165_p3 = scmp.lt.s32.totalorder (!%p140_p2), %s908_s20, 63 }
   0xb   : > { %v1069_v0 = vld [vmem:[%s1362_s1 + $0x38] sm:$0xff]   ;;  %v1135_v1 = vmov 0   ;;  %v1070_v2 = vld [vmem:[%s1362_s1 + $0x30] sm:$0xff]   ;;  %v1071_v3 = vld [vmem:[%s1362_s1 + $0x28] sm:$0xff]   ;;  %s1366_s20 = smov (!%p165_p3, %s908_s20), 63  ;;  %vm437_vm0 = vcmask 154624  }
   0xc   : > { %493 = vmatprep.subr.bf16.mxu0 %v1135_v1  ;;  %1039 = vmatprep.subr.bf16.mxu1 %v1135_v1  ;;  %v1072_v4 = vld [vmem:[%s1362_s1 + $0x20] sm:$0xff]   ;;  %s1006_s23 = sshll.u32 %s1366_s20, 3  ;;  %v1073_v5 = vld [vmem:[%s1362_s1 + $0x18] sm:$0xff]   ;;  %v1074_v8 = vld [vmem:[%s1362_s1 + $0x10] sm:$0xff]   ;;  %vm486_vm1 = vcmask 1040384   ;;  %vm487_vm2 = vcmask 1041408  }
   0xd   : > { %494 = vmatpush1.bf16.msra.mxu0 %v1069_v0  ;;  %1049 = vmatpush1.bf16.msra.mxu1 %v1069_v0  ;;  %s1183_s26 = scalar_lea.vmem %s1361_s0, %s1006_s23  ;;  %v1075_v9 = vld [vmem:[%s1362_s1 + $0x8] sm:$0xff]   ;;  %v1136_v10 = vmov 65535   ;;  %v1076_v12 = vld [vmem:[%s1362_s1] sm:$0xff]   ;;  %s912_s15 = sshll.u32 %s1366_s20, 2  ;;  %vm814_vm3 = vcmask 60416  }
   0xe   : > { %495 = vmatprep.subr.bf16.mxu0 %v1135_v1  ;;  %1040 = vmatprep.subr.bf16.mxu1 %v1135_v1  ;;  %v1081_v6 = vld [vmem:[%s1183_s26 + $0x4] ss:$8 sps:$4 sm:$0xff]   ;;  %v488_v11 = vsel %vm486_vm1, 4294967295, %v1136_v10  ;;  %v1077_v13 = vld [vmem:[%s1362_s1 + $0x48] ss:$0 sps:$4 sm:$0x33]   ;;  %s1262_s18 = scalar_lea.vmem %s1364_s3, %s912_s15 }
   0xf   : > { %v1084_v7 = vld [vmem:[%s1183_s26 + $0x84] ss:$8 sps:$4 sm:$0xff]   ;;  %956 = vmatprep.mubr.msk.bf16.mxu0 %vm437_vm0, %v1081_v6  ;;  %v489_v14 = vsel %vm487_vm2, %v488_v11, 0  ;;  %v1079_v17 = vld [vmem:[%s1183_s26] ss:$8 sps:$4 sm:$0xff]  }
  0x10   : > { %964 = vmatprep.mubr.msk.bf16.mxu1 %vm437_vm0, %v1084_v7  ;;  %v491_v15 = vand.u32 %v1077_v13, %v489_v14  ;;  %v1078_v16 = vld [vmem:[%s1362_s1 + $0x40] sm:$0xff]   ;;  %v1085_v19 = vld [vmem:[%s1183_s26 + $0x14] ss:$8 sps:$4 sm:$0xff]   ;;  %v1089_v21 = vld [vmem:[%s1183_s26 + $0x10] ss:$8 sps:$4 sm:$0xff]  }
  0x11   : > { %496 = vmatpush1.bf16.msra.mxu0 %v1070_v2  ;;  %1050 = vmatpush1.bf16.msra.mxu1 %v1070_v2  ;;  %v1082_v18 = vld [vmem:[%s1183_s26 + $0x80] ss:$8 sps:$4 sm:$0xff]   ;;  %v1087_v20 = vld [vmem:[%s1183_s26 + $0x94] ss:$8 sps:$4 sm:$0xff]   ;;  %v1090_v22 = vld [vmem:[%s1183_s26 + $0x90] ss:$8 sps:$4 sm:$0xff]  }
  0x12   : > { %497 = vmatprep.subr.bf16.mxu0 %v1135_v1  ;;  %1041 = vmatprep.subr.bf16.mxu1 %v1135_v1  ;;  %v1091_v23 = vld [vmem:[%s1183_s26 + $0x24] ss:$8 sps:$4 sm:$0xff]   ;;  %v1095_v25 = vld [vmem:[%s1183_s26 + $0x20] ss:$8 sps:$4 sm:$0xff]   ;;  %v1097_v27 = vld [vmem:[%s1183_s26 + $0x34] ss:$8 sps:$4 sm:$0xff]  }
  0x13   : > { %v1093_v24 = vld [vmem:[%s1183_s26 + $0xa4] ss:$8 sps:$4 sm:$0xff]   ;;  %v1096_v26 = vld [vmem:[%s1183_s26 + $0xa0] ss:$8 sps:$4 sm:$0xff]   ;;  %v1099_v28 = vld [vmem:[%s1183_s26 + $0xb4] ss:$8 sps:$4 sm:$0xff]  }
  0x14   : > { %v1101_v29 = vld [vmem:[%s1183_s26 + $0x30] ss:$8 sps:$4 sm:$0xff]   ;;  %v1103_v31 = vld [vmem:[%s1183_s26 + $0x44] ss:$8 sps:$4 sm:$0xff]   ;;  %v1107_v33 = vld [vmem:[%s1183_s26 + $0x40] ss:$8 sps:$4 sm:$0xff]  }
  0x15   : > { %498 = vmatpush1.bf16.msra.mxu0 %v1071_v3  ;;  %1051 = vmatpush1.bf16.msra.mxu1 %v1071_v3  ;;  %v1102_v30 = vld [vmem:[%s1183_s26 + $0xb0] ss:$8 sps:$4 sm:$0xff]   ;;  %v1105_v32 = vld [vmem:[%s1183_s26 + $0xc4] ss:$8 sps:$4 sm:$0xff]   ;;  %v1108_v34 = vld [vmem:[%s1183_s26 + $0xc0] ss:$8 sps:$4 sm:$0xff]  }
  0x16   : > { %499 = vmatprep.subr.bf16.mxu0 %v1135_v1  ;;  %1042 = vmatprep.subr.bf16.mxu1 %v1135_v1  ;;  %v1109_v35 = vld [vmem:[%s1183_s26 + $0x54] ss:$8 sps:$4 sm:$0xff]   ;;  %v1113_v37 = vld [vmem:[%s1183_s26 + $0x50] ss:$8 sps:$4 sm:$0xff]   ;;  %v1115_v39 = vld [vmem:[%s1183_s26 + $0x64] ss:$8 sps:$4 sm:$0xff]  }
  0x17   : > { %v1111_v36 = vld [vmem:[%s1183_s26 + $0xd4] ss:$8 sps:$4 sm:$0xff]   ;;  %v1114_v38 = vld [vmem:[%s1183_s26 + $0xd0] ss:$8 sps:$4 sm:$0xff]   ;;  %v1117_v40 = vld [vmem:[%s1183_s26 + $0xe4] ss:$8 sps:$4 sm:$0xff]  }
  0x18   : > { %v1119_v41 = vld [vmem:[%s1183_s26 + $0x60] ss:$8 sps:$4 sm:$0xff]   ;;  %v1121_v43 = vld [vmem:[%s1183_s26 + $0x74] ss:$8 sps:$4 sm:$0xff]   ;;  %v1125_v45 = vld [vmem:[%s1183_s26 + $0x70] ss:$8 sps:$4 sm:$0xff]  }
  0x19   : > { %500 = vmatpush1.bf16.msra.mxu0 %v1072_v4  ;;  %1052 = vmatpush1.bf16.msra.mxu1 %v1072_v4  ;;  %v1120_v42 = vld [vmem:[%s1183_s26 + $0xe0] ss:$8 sps:$4 sm:$0xff]   ;;  %v1123_v44 = vld [vmem:[%s1183_s26 + $0xf4] ss:$8 sps:$4 sm:$0xff]   ;;  %v1126_v46 = vld [vmem:[%s1183_s26 + $0xf0] ss:$8 sps:$4 sm:$0xff]  }
  0x1a   : > { %501 = vmatprep.subr.bf16.mxu0 %v1135_v1  ;;  %1043 = vmatprep.subr.bf16.mxu1 %v1135_v1  ;;  %v1254_v47 = vld [vmem:[%s1363_s2] ss:$0 sm:$0xff] }
  0x1d   : > { %502 = vmatpush1.bf16.msra.mxu0 %v1073_v5  ;;  %1053 = vmatpush1.bf16.msra.mxu1 %v1073_v5 }
  0x1e   : > { %503 = vmatprep.subr.bf16.mxu0 %v1135_v1  ;;  %1044 = vmatprep.subr.bf16.mxu1 %v1135_v1 }
  0x21   : > { %504 = vmatpush1.bf16.msra.mxu0 %v1074_v8  ;;  %1054 = vmatpush1.bf16.msra.mxu1 %v1074_v8 }
  0x22   : > { %505 = vmatprep.subr.bf16.mxu0 %v1135_v1  ;;  %1045 = vmatprep.subr.bf16.mxu1 %v1135_v1 }
  0x25   : > { %506 = vmatpush1.bf16.msra.mxu0 %v1075_v9  ;;  %1055 = vmatpush1.bf16.msra.mxu1 %v1075_v9 }
  0x26   : > { %507 = vmatprep.subr.bf16.mxu0 %v1135_v1  ;;  %1046 = vmatprep.subr.bf16.mxu1 %v1135_v1 }
  0x29   : > { %508 = vmatpush1.bf16.msra.mxu0 %v1076_v12  ;;  %1056 = vmatpush1.bf16.msra.mxu1 %v1076_v12 }
  0x2a   : > { %521 = vmatprep.subr.bf16.mxu0 %v1135_v1  ;;  %1047 = vmatprep.subr.bf16.mxu1 %v1135_v1 }
  0x2d   : > { %522 = vmatpush2.bf16.msra.mxu0 %v491_v15  ;;  %1057 = vmatpush2.bf16.msra.mxu1 %v491_v15 }
  0x2e   : > { %523 = vmatprep.subr.bf16.mxu0 %v1135_v1  ;;  %1048 = vmatprep.subr.bf16.mxu1 %v1135_v1 }
  0x31   : > { %524 = vmatpush2.bf16.msra.mxu0 %v1078_v16  ;;  %1058 = vmatpush2.bf16.msra.mxu1 %v1078_v16 }
  0x34   : > { %526 = vmatmul.mubr.bf16.vlgmr.msra.gmra.mxu0 %v1079_v17  ;;  %590 = vmatmul.mubr.bf16.vlgmr.msra.gmra.mxu1 %v1082_v18 }
  0x35   : > { %957 = vmatprep.mubr.msk.bf16.mxu0 %vm437_vm0, %v1085_v19  ;;  %965 = vmatprep.mubr.msk.bf16.mxu1 %vm437_vm0, %v1087_v20 }
  0x3c   : > { %534 = vmatmul.mubr.bf16.gmra.mxu0 %v1089_v21  ;;  %598 = vmatmul.mubr.bf16.gmra.mxu1 %v1090_v22 }
  0x3d   : > { %958 = vmatprep.mubr.msk.bf16.mxu0 %vm437_vm0, %v1091_v23  ;;  %966 = vmatprep.mubr.msk.bf16.mxu1 %vm437_vm0, %v1093_v24 }
  0x44   : > { %542 = vmatmul.mubr.bf16.gmra.mxu0 %v1095_v25  ;;  %606 = vmatmul.mubr.bf16.gmra.mxu1 %v1096_v26 }
  0x45   : > { %959 = vmatprep.mubr.msk.bf16.mxu0 %vm437_vm0, %v1097_v27  ;;  %967 = vmatprep.mubr.msk.bf16.mxu1 %vm437_vm0, %v1099_v28 }
  0x4c   : > { %550 = vmatmul.mubr.bf16.gmra.mxu0 %v1101_v29  ;;  %614 = vmatmul.mubr.bf16.gmra.mxu1 %v1102_v30 }
  0x4d   : > { %960 = vmatprep.mubr.msk.bf16.mxu0 %vm437_vm0, %v1103_v31  ;;  %968 = vmatprep.mubr.msk.bf16.mxu1 %vm437_vm0, %v1105_v32 }
  0x54   : > { %558 = vmatmul.mubr.bf16.gmra.mxu0 %v1107_v33  ;;  %622 = vmatmul.mubr.bf16.gmra.mxu1 %v1108_v34 }
  0x55   : > { %961 = vmatprep.mubr.msk.bf16.mxu0 %vm437_vm0, %v1109_v35  ;;  %969 = vmatprep.mubr.msk.bf16.mxu1 %vm437_vm0, %v1111_v36 }
  0x5c   : > { %566 = vmatmul.mubr.bf16.gmra.mxu0 %v1113_v37  ;;  %630 = vmatmul.mubr.bf16.gmra.mxu1 %v1114_v38 }
  0x5d   : > { %962 = vmatprep.mubr.msk.bf16.mxu0 %vm437_vm0, %v1115_v39  ;;  %970 = vmatprep.mubr.msk.bf16.mxu1 %vm437_vm0, %v1117_v40 }
  0x64   : > { %574 = vmatmul.mubr.bf16.gmra.mxu0 %v1119_v41  ;;  %638 = vmatmul.mubr.bf16.gmra.mxu1 %v1120_v42 }
  0x65   : > { %963 = vmatprep.mubr.msk.bf16.mxu0 %vm437_vm0, %v1121_v43  ;;  %971 = vmatprep.mubr.msk.bf16.mxu1 %vm437_vm0, %v1123_v44 }
  0x6c   : > { %582 = vmatmul.mubr.bf16.gmra.mxu0 %v1125_v45  ;;  %646 = vmatmul.mubr.bf16.gmra.mxu1 %v1126_v46 }
  0xf4   : > { %v527_v48 = vpop.f32.mrf.mxu0  ;;  %v591_v49 = vpop.f32.mrf.mxu1 }
  0xf5   : > { %v528_v50 = vadd.f32 %v1254_v47, %v527_v48  ;;  %v592_v51 = vadd.f32 %v1254_v47, %v591_v49 }
  0xf6   : > { %v529_v52 = vpop.f32.mrf.mxu0  ;;  %v593_v53 = vpop.f32.mrf.mxu1 }
  0xf7   : > { %v654_v54 = vmax.f32 %v528_v50, 0.0  ;;  %v670_v55 = vmax.f32 %v592_v51, 0.0 }
  0xf8   : > { %v530_v56 = vpop.f32.mrf.mxu0  ;;  %v594_v57 = vpop.f32.mrf.mxu1 }
  0xf9   : > { %v1007_v58 = vpack.c.bf16 %v654_v54, %v654_v54  ;;  %v1023_v59 = vpack.c.bf16 %v670_v55, %v670_v55  ;;  %v531_v60 = vadd.f32 %v1254_v47, %v530_v56  ;;  %v595_v61 = vadd.f32 %v1254_v47, %v594_v57 }
  0xfa   : > { %v532_v62 = vpop.f32.mrf.mxu0  ;;  %v596_v63 = vpop.f32.mrf.mxu1 }
  0xfb   : > { %815 = vst.msk [vmem:[%s1262_s18] sm:$0xf] %vm814_vm3, %v1007_v58  ;;  %831 = vst.msk [vmem:[%s1262_s18 + $0x40] sm:$0xf] %vm814_vm3, %v1023_v59  ;;  %v655_v0 = vmax.f32 %v531_v60, 0.0  ;;  %v671_v1 = vmax.f32 %v595_v61, 0.0 }
  0xfc   : > { %v535_v2 = vpop.f32.mrf.mxu0  ;;  %v599_v3 = vpop.f32.mrf.mxu1 }
  0xfd   : > { %v1008_v4 = vpack.c.bf16 %v655_v0, %v655_v0  ;;  %v1024_v5 = vpack.c.bf16 %v671_v1, %v671_v1  ;;  %v536_v6 = vadd.f32 %v1254_v47, %v535_v2  ;;  %v600_v7 = vadd.f32 %v1254_v47, %v599_v3 }
  0xfe   : > { %v537_v8 = vpop.f32.mrf.mxu0  ;;  %v601_v9 = vpop.f32.mrf.mxu1 }
  0xff   : > { %816 = vst.msk [vmem:[%s1262_s18 + $0x4] sm:$0xf] %vm814_vm3, %v1008_v4  ;;  %832 = vst.msk [vmem:[%s1262_s18 + $0x44] sm:$0xf] %vm814_vm3, %v1024_v5  ;;  %v656_v10 = vmax.f32 %v536_v6, 0.0  ;;  %v672_v11 = vmax.f32 %v600_v7, 0.0 }
 0x100   : > { %v538_v12 = vpop.f32.mrf.mxu0  ;;  %v602_v13 = vpop.f32.mrf.mxu1 }
 0x101   : > { %v1009_v14 = vpack.c.bf16 %v656_v10, %v656_v10  ;;  %v1025_v15 = vpack.c.bf16 %v672_v11, %v672_v11  ;;  %v539_v16 = vadd.f32 %v1254_v47, %v538_v12  ;;  %v603_v17 = vadd.f32 %v1254_v47, %v602_v13 }
 0x102   : > { %v540_v18 = vpop.f32.mrf.mxu0  ;;  %v604_v19 = vpop.f32.mrf.mxu1 }
 0x103   : > { %817 = vst.msk [vmem:[%s1262_s18 + $0x8] sm:$0xf] %vm814_vm3, %v1009_v14  ;;  %833 = vst.msk [vmem:[%s1262_s18 + $0x48] sm:$0xf] %vm814_vm3, %v1025_v15  ;;  %v657_v20 = vmax.f32 %v539_v16, 0.0  ;;  %v673_v21 = vmax.f32 %v603_v17, 0.0 }
 0x104   : > { %v543_v22 = vpop.f32.mrf.mxu0  ;;  %v607_v23 = vpop.f32.mrf.mxu1 }
 0x105   : > { %v1010_v24 = vpack.c.bf16 %v657_v20, %v657_v20  ;;  %v1026_v25 = vpack.c.bf16 %v673_v21, %v673_v21  ;;  %v544_v26 = vadd.f32 %v1254_v47, %v543_v22  ;;  %v608_v27 = vadd.f32 %v1254_v47, %v607_v23 }
 0x106   : > { %v545_v28 = vpop.f32.mrf.mxu0  ;;  %v609_v29 = vpop.f32.mrf.mxu1 }
 0x107   : > { %818 = vst.msk [vmem:[%s1262_s18 + $0xc] sm:$0xf] %vm814_vm3, %v1010_v24  ;;  %834 = vst.msk [vmem:[%s1262_s18 + $0x4c] sm:$0xf] %vm814_vm3, %v1026_v25  ;;  %v658_v30 = vmax.f32 %v544_v26, 0.0  ;;  %v674_v31 = vmax.f32 %v608_v27, 0.0 }
 0x108   : > { %v546_v32 = vpop.f32.mrf.mxu0  ;;  %v610_v33 = vpop.f32.mrf.mxu1 }
 0x109   : > { %v1011_v34 = vpack.c.bf16 %v658_v30, %v658_v30  ;;  %v1027_v35 = vpack.c.bf16 %v674_v31, %v674_v31  ;;  %v547_v36 = vadd.f32 %v1254_v47, %v546_v32  ;;  %v611_v37 = vadd.f32 %v1254_v47, %v610_v33 }
 0x10a   : > { %v548_v38 = vpop.f32.mrf.mxu0  ;;  %v612_v39 = vpop.f32.mrf.mxu1 }
 0x10b   : > { %819 = vst.msk [vmem:[%s1262_s18 + $0x10] sm:$0xf] %vm814_vm3, %v1011_v34  ;;  %835 = vst.msk [vmem:[%s1262_s18 + $0x50] sm:$0xf] %vm814_vm3, %v1027_v35  ;;  %v659_v40 = vmax.f32 %v547_v36, 0.0  ;;  %v675_v41 = vmax.f32 %v611_v37, 0.0 }
 0x10c   : > { %v551_v42 = vpop.f32.mrf.mxu0  ;;  %v615_v43 = vpop.f32.mrf.mxu1 }
 0x10d   : > { %v1012_v44 = vpack.c.bf16 %v659_v40, %v659_v40  ;;  %v1028_v45 = vpack.c.bf16 %v675_v41, %v675_v41  ;;  %v552_v46 = vadd.f32 %v1254_v47, %v551_v42  ;;  %v616_v48 = vadd.f32 %v1254_v47, %v615_v43 }
 0x10e   : > { %v553_v49 = vpop.f32.mrf.mxu0  ;;  %v617_v50 = vpop.f32.mrf.mxu1 }
 0x10f   : > { %820 = vst.msk [vmem:[%s1262_s18 + $0x14] sm:$0xf] %vm814_vm3, %v1012_v44  ;;  %836 = vst.msk [vmem:[%s1262_s18 + $0x54] sm:$0xf] %vm814_vm3, %v1028_v45  ;;  %v660_v51 = vmax.f32 %v552_v46, 0.0  ;;  %v676_v52 = vmax.f32 %v616_v48, 0.0 }
 0x110   : > { %v554_v53 = vpop.f32.mrf.mxu0  ;;  %v618_v54 = vpop.f32.mrf.mxu1 }
 0x111   : > { %v1013_v55 = vpack.c.bf16 %v660_v51, %v660_v51  ;;  %v1029_v56 = vpack.c.bf16 %v676_v52, %v676_v52  ;;  %v555_v57 = vadd.f32 %v1254_v47, %v554_v53  ;;  %v619_v58 = vadd.f32 %v1254_v47, %v618_v54 }
 0x112   : > { %v556_v59 = vpop.f32.mrf.mxu0  ;;  %v620_v60 = vpop.f32.mrf.mxu1 }
 0x113   : > { %821 = vst.msk [vmem:[%s1262_s18 + $0x18] sm:$0xf] %vm814_vm3, %v1013_v55  ;;  %837 = vst.msk [vmem:[%s1262_s18 + $0x58] sm:$0xf] %vm814_vm3, %v1029_v56  ;;  %v661_v61 = vmax.f32 %v555_v57, 0.0  ;;  %v677_v62 = vmax.f32 %v619_v58, 0.0 }
 0x114   : > { %v559_v63 = vpop.f32.mrf.mxu0  ;;  %v623_v0 = vpop.f32.mrf.mxu1 }
 0x115   : > { %v1014_v1 = vpack.c.bf16 %v661_v61, %v661_v61  ;;  %v1030_v2 = vpack.c.bf16 %v677_v62, %v677_v62  ;;  %v560_v3 = vadd.f32 %v1254_v47, %v559_v63  ;;  %v624_v4 = vadd.f32 %v1254_v47, %v623_v0 }
 0x116   : > { %v561_v5 = vpop.f32.mrf.mxu0  ;;  %v625_v6 = vpop.f32.mrf.mxu1 }
 0x117   : > { %822 = vst.msk [vmem:[%s1262_s18 + $0x1c] sm:$0xf] %vm814_vm3, %v1014_v1  ;;  %838 = vst.msk [vmem:[%s1262_s18 + $0x5c] sm:$0xf] %vm814_vm3, %v1030_v2  ;;  %v662_v7 = vmax.f32 %v560_v3, 0.0  ;;  %v678_v8 = vmax.f32 %v624_v4, 0.0 }
 0x118   : > { %v562_v9 = vpop.f32.mrf.mxu0  ;;  %v626_v10 = vpop.f32.mrf.mxu1 }
 0x119   : > { %v1015_v11 = vpack.c.bf16 %v662_v7, %v662_v7  ;;  %v1031_v12 = vpack.c.bf16 %v678_v8, %v678_v8  ;;  %v563_v13 = vadd.f32 %v1254_v47, %v562_v9  ;;  %v627_v14 = vadd.f32 %v1254_v47, %v626_v10 }
 0x11a   : > { %v564_v15 = vpop.f32.mrf.mxu0  ;;  %v628_v16 = vpop.f32.mrf.mxu1 }
 0x11b   : > { %823 = vst.msk [vmem:[%s1262_s18 + $0x20] sm:$0xf] %vm814_vm3, %v1015_v11  ;;  %839 = vst.msk [vmem:[%s1262_s18 + $0x60] sm:$0xf] %vm814_vm3, %v1031_v12  ;;  %v663_v17 = vmax.f32 %v563_v13, 0.0  ;;  %v679_v18 = vmax.f32 %v627_v14, 0.0 }
 0x11c   : > { %v567_v19 = vpop.f32.mrf.mxu0  ;;  %v631_v20 = vpop.f32.mrf.mxu1 }
 0x11d   : > { %v1016_v21 = vpack.c.bf16 %v663_v17, %v663_v17  ;;  %v1032_v22 = vpack.c.bf16 %v679_v18, %v679_v18  ;;  %v568_v23 = vadd.f32 %v1254_v47, %v567_v19  ;;  %v632_v24 = vadd.f32 %v1254_v47, %v631_v20 }
 0x11e   : > { %v569_v25 = vpop.f32.mrf.mxu0  ;;  %v633_v26 = vpop.f32.mrf.mxu1 }
 0x11f   : > { %824 = vst.msk [vmem:[%s1262_s18 + $0x24] sm:$0xf] %vm814_vm3, %v1016_v21  ;;  %840 = vst.msk [vmem:[%s1262_s18 + $0x64] sm:$0xf] %vm814_vm3, %v1032_v22  ;;  %v664_v27 = vmax.f32 %v568_v23, 0.0  ;;  %v680_v28 = vmax.f32 %v632_v24, 0.0 }
 0x120   : > { %v570_v29 = vpop.f32.mrf.mxu0  ;;  %v634_v30 = vpop.f32.mrf.mxu1 }
 0x121   : > { %v1017_v31 = vpack.c.bf16 %v664_v27, %v664_v27  ;;  %v1033_v32 = vpack.c.bf16 %v680_v28, %v680_v28  ;;  %v571_v33 = vadd.f32 %v1254_v47, %v570_v29  ;;  %v635_v34 = vadd.f32 %v1254_v47, %v634_v30 }
 0x122   : > { %v572_v35 = vpop.f32.mrf.mxu0  ;;  %v636_v36 = vpop.f32.mrf.mxu1 }
 0x123   : > { %825 = vst.msk [vmem:[%s1262_s18 + $0x28] sm:$0xf] %vm814_vm3, %v1017_v31  ;;  %841 = vst.msk [vmem:[%s1262_s18 + $0x68] sm:$0xf] %vm814_vm3, %v1033_v32  ;;  %v665_v37 = vmax.f32 %v571_v33, 0.0  ;;  %v681_v38 = vmax.f32 %v635_v34, 0.0 }
 0x124   : > { %v575_v39 = vpop.f32.mrf.mxu0  ;;  %v639_v40 = vpop.f32.mrf.mxu1 }
 0x125   : > { %v1018_v41 = vpack.c.bf16 %v665_v37, %v665_v37  ;;  %v1034_v42 = vpack.c.bf16 %v681_v38, %v681_v38  ;;  %v576_v43 = vadd.f32 %v1254_v47, %v575_v39  ;;  %v640_v44 = vadd.f32 %v1254_v47, %v639_v40 }
 0x126   : > { %v577_v45 = vpop.f32.mrf.mxu0  ;;  %v641_v46 = vpop.f32.mrf.mxu1 }
 0x127   : > { %826 = vst.msk [vmem:[%s1262_s18 + $0x2c] sm:$0xf] %vm814_vm3, %v1018_v41  ;;  %842 = vst.msk [vmem:[%s1262_s18 + $0x6c] sm:$0xf] %vm814_vm3, %v1034_v42  ;;  %v666_v48 = vmax.f32 %v576_v43, 0.0  ;;  %v682_v49 = vmax.f32 %v640_v44, 0.0 }
 0x128   : > { %v578_v50 = vpop.f32.mrf.mxu0  ;;  %v642_v51 = vpop.f32.mrf.mxu1 }
 0x129   : > { %v1019_v52 = vpack.c.bf16 %v666_v48, %v666_v48  ;;  %v1035_v53 = vpack.c.bf16 %v682_v49, %v682_v49  ;;  %v579_v54 = vadd.f32 %v1254_v47, %v578_v50  ;;  %v643_v55 = vadd.f32 %v1254_v47, %v642_v51 }
 0x12a   : > { %v580_v56 = vpop.f32.mrf.mxu0  ;;  %v644_v57 = vpop.f32.mrf.mxu1 }
 0x12b   : > { %827 = vst.msk [vmem:[%s1262_s18 + $0x30] sm:$0xf] %vm814_vm3, %v1019_v52  ;;  %843 = vst.msk [vmem:[%s1262_s18 + $0x70] sm:$0xf] %vm814_vm3, %v1035_v53  ;;  %v667_v58 = vmax.f32 %v579_v54, 0.0  ;;  %v683_v59 = vmax.f32 %v643_v55, 0.0 }
 0x12c   : > { %v583_v60 = vpop.f32.mrf.mxu0  ;;  %v647_v61 = vpop.f32.mrf.mxu1 }
 0x12d   : > { %v1020_v62 = vpack.c.bf16 %v667_v58, %v667_v58  ;;  %v1036_v63 = vpack.c.bf16 %v683_v59, %v683_v59  ;;  %v584_v0 = vadd.f32 %v1254_v47, %v583_v60  ;;  %v648_v1 = vadd.f32 %v1254_v47, %v647_v61 }
 0x12e   : > { %v585_v2 = vpop.f32.mrf.mxu0  ;;  %v649_v3 = vpop.f32.mrf.mxu1 }
 0x12f   : > { %828 = vst.msk [vmem:[%s1262_s18 + $0x34] sm:$0xf] %vm814_vm3, %v1020_v62  ;;  %844 = vst.msk [vmem:[%s1262_s18 + $0x74] sm:$0xf] %vm814_vm3, %v1036_v63  ;;  %v668_v4 = vmax.f32 %v584_v0, 0.0  ;;  %v684_v5 = vmax.f32 %v648_v1, 0.0 }
 0x130   : > { %v586_v6 = vpop.f32.mrf.mxu0  ;;  %v650_v7 = vpop.f32.mrf.mxu1 }
 0x131   : > { %v1021_v8 = vpack.c.bf16 %v668_v4, %v668_v4  ;;  %v1037_v9 = vpack.c.bf16 %v684_v5, %v684_v5  ;;  %v587_v10 = vadd.f32 %v1254_v47, %v586_v6  ;;  %v651_v11 = vadd.f32 %v1254_v47, %v650_v7 }
 0x132   : > { %v588_v12 = vpop.f32.mrf.mxu0  ;;  %v652_v13 = vpop.f32.mrf.mxu1 }
 0x133   : > { %829 = vst.msk [vmem:[%s1262_s18 + $0x38] sm:$0xf] %vm814_vm3, %v1021_v8  ;;  %845 = vst.msk [vmem:[%s1262_s18 + $0x78] sm:$0xf] %vm814_vm3, %v1037_v9  ;;  %v669_v14 = vmax.f32 %v587_v10, 0.0  ;;  %v685_v15 = vmax.f32 %v651_v11, 0.0 }
 0x135   : > { %v1022_v16 = vpack.c.bf16 %v669_v14, %v669_v14  ;;  %v1038_v17 = vpack.c.bf16 %v685_v15, %v685_v15 }
 0x137   : > { %830 = vst.msk [vmem:[%s1262_s18 + $0x3c] sm:$0xf] %vm814_vm3, %v1022_v16  ;;  %846 = vst.msk [vmem:[%s1262_s18 + $0x7c] sm:$0xf] %vm814_vm3, %v1038_v17 }
 0x138 PF: > { %s13_s12 = sadd.s32 1, %s1133_s12  }
 0x139   : > { %p10_p4 = scmp.ge.s32.totalorder %s13_s12, 4  }
 0x13b   :  { %12 = sbr.rel (!%p10_p4) target bundleno = 1 (0x1), region = 62 }

// kernel: forward.20
= control target key start
LH: loop header
LB: loop body
LE: loop exit
PB: predicated region body
PF: predicated region fallthrough
CT: control target
= control target key end

     0   :  { %s592_s6 = smov 0   ;;  %s811_s0 = inlined_call_operand.vmem [shape: bf16[2,36,9,8], index: 0, kind: input, shape index: {}]   ;;  %s812_s1 = inlined_call_operand.vmem [shape: bf16[2,8,8,8], index: 1, kind: output, shape index: {}]  }
   0x1 LB: > { %s554_s7 = sadd.s32 4294967295, %s580_s6   ;;  %p558_p0 = scmp.ge.s32.totalorder %s580_s6, 1  ;;  %s580_s6 = sphi %s592_s6, %s11_s6  }
   0x2   : > { %p87_p1 = scmp.lt.s32.totalorder %s580_s6, 3 }
   0x4   : > { %p88_p2 = pnand %p558_p0, %p87_p1 }
   0x5   : > { %p107_p3 = scmp.lt.s32.totalorder (!%p88_p2), %s554_s7, 1 }
   0x6   : > { %91 = sbr.rel (%p88_p2) target bundleno = 79 (0x4f), region = 24 }
   0xb   : > { %s816_s7 = smov (!%p107_p3, %s554_s7), 1  ;;  %vm208_vm0 = vsmask.f32 3328  ;;  %vm209_vm1 = vsmask.f32 7440  ;;  %vm490_vm3 = vcmask 60416  }
   0xc   : > { %s565_s8 = smul.u32 288, %s816_s7  ;;  %vm638_vm2 = vmor %vm208_vm0, %vm209_vm1  ;;  %s564_s12 = sshll.u32 %s816_s7, 5 }
   0xd   : > { %s684_s15 = scalar_lea.vmem %s812_s1, %s564_s12 }
   0xe   : > { %s606_s11 = scalar_lea.vmem %s811_s0, %s565_s8 }
   0xf   : > { %v117_v0 = vld [vmem:[%s606_s11] sm:$0xf]  ;;  %v118_v1 = vld [vmem:[%s606_s11 + $0x8] sm:$0xf]  ;;  %v611_v2 = vld [vmem:[%s606_s11 + $0x10] sm:$0xf] }
  0x10   : > { %v135_v3 = vld [vmem:[%s606_s11 + $0x90] sm:$0xf]  ;;  %v615_v4 = vld [vmem:[%s606_s11 + $0x98] sm:$0xf]  ;;  %v126_v6 = vld [vmem:[%s606_s11 + $0x48] sm:$0xf] }
  0x11   : > { %v618_v5 = vld [vmem:[%s606_s11 + $0x18] sm:$0xf]  ;;  %v622_v7 = vld [vmem:[%s606_s11 + $0xa0] sm:$0xf]  ;;  %v151_v8 = vmax.bf16 %v135_v3, %v117_v0  ;;  %v152_v9 = vmax.bf16 %v615_v4, %v118_v1  ;;  %v127_v10 = vld [vmem:[%s606_s11 + $0x50] sm:$0xf] }
  0x12   : > { %v128_v11 = vld [vmem:[%s606_s11 + $0x58] sm:$0xf]  ;;  %v153_v12 = vmax.bf16 %v622_v7, %v611_v2  ;;  %v191_v13 = vld [vmem:[%s606_s11 + $0x4] sm:$0x1]  ;;  %v144_v15 = vld [vmem:[%s606_s11 + $0xe0] sm:$0xf] }
  0x13   : > { %v143_v14 = vld [vmem:[%s606_s11 + $0xd8] sm:$0xf]  ;;  %v159_v16 = vmax.bf16 %v151_v8, %v118_v1  ;;  %v160_v17 = vmax.bf16 %v152_v9, %v611_v2  ;;  %v212_v18 = vshrl.u32 %v117_v0, 16  ;;  %v215_v19 = vshll.u32 %v117_v0, 16  ;;  %v192_v21 = vld [vmem:[%s606_s11 + $0xc] sm:$0x1] }
  0x14   : > { %v161_v20 = vmax.bf16 %v153_v12, %v618_v5  ;;  %v221_v22 = vshll.u32 %v191_v13, 16  ;;  %v226_v23 = vshrl.u32 %v118_v1, 16  ;;  %v229_v24 = vshll.u32 %v118_v1, 16  ;;  %v200_v27 = vld [vmem:[%s606_s11 + $0x94] sm:$0x1] }
  0x15   : > { %v167_v25 = vmax.bf16 %v159_v16, %v126_v6  ;;  %v168_v26 = vmax.bf16 %v160_v17, %v127_v10  ;;  %v214_v28 = vrot.slane %v212_v18, 4  ;;  %v217_v29 = vrot.slane %v215_v19, 5  ;;  %v643_v43 = vld [vmem:[%s606_s11 + $0xa8] sm:$0xf]  ;;  %v647_v52 = vld [vmem:[%s606_s11 + $0x20] sm:$0xf] }
  0x16   : > { %v169_v30 = vmax.bf16 %v161_v20, %v128_v11  ;;  %v223_v31 = vrot.slane %v221_v22, 5  ;;  %v228_v32 = vrot.slane %v226_v23, 4  ;;  %v231_v33 = vrot.slane %v229_v24, 5  ;;  %v145_v48 = vld [vmem:[%s606_s11 + $0xe8] sm:$0xf] }
  0x17   : > { %v175_v34 = vmax.bf16 %v167_v25, %v143_v14  ;;  %v176_v35 = vmax.bf16 %v168_v26, %v144_v15  ;;  %v218_v36 = vor.u32 %v217_v29, %v214_v28  ;;  %v235_v37 = vshll.u32 %v192_v21, 16  ;;  %v652_v55 = vld [vmem:[%s606_s11 + $0x60] sm:$0xf]  ;;  %v193_v57 = vld [vmem:[%s606_s11 + $0x14] sm:$0x1] }
  0x18   : > { %v232_v39 = vor.u32 %v231_v33, %v228_v32  ;;  %v340_v40 = vshrl.u32 %v135_v3, 16  ;;  %v343_v41 = vshll.u32 %v135_v3, 16  ;;  %v349_v42 = vshll.u32 %v200_v27, 16  ;;  %v201_v62 = vld [vmem:[%s606_s11 + $0x9c] sm:$0x1] }
  0x19   : > { %v183_v44 = vmax.bf16 %v175_v34, %v127_v10  ;;  %v184_v45 = vmax.bf16 %v176_v35, %v128_v11  ;;  %v219_v46 = vrot.slane %v218_v36, 4  ;;  %v237_v47 = vrot.slane %v235_v37, 5  ;;  %v663_v0 = vld [vmem:[%s606_s11 + $0xb0] sm:$0xf]  ;;  %v671_v15 = vld [vmem:[%s606_s11 + $0x28] sm:$0xf] }
  0x1a   : > { %v233_v49 = vrot.slane %v232_v39, 4  ;;  %v342_v50 = vrot.slane %v340_v40, 4  ;;  %v345_v51 = vrot.slane %v343_v41, 5  ;;  %v351_v54 = vrot.slane %v349_v42, 5  ;;  %v146_v16 = vld [vmem:[%s606_s11 + $0xf0] sm:$0xf] }
  0x1b   : > { %v224_v53 = vsel %vm638_vm2, %v219_v46, %v223_v31  ;;  %v154_v56 = vmax.bf16 %v643_v43, %v618_v5  ;;  %v240_v58 = vshrl.u32 %v611_v2, 16  ;;  %v177_v61 = vmax.bf16 %v169_v30, %v145_v48  ;;  %v130_v22 = vld [vmem:[%s606_s11 + $0x68] sm:$0xf]  ;;  %v194_v23 = vld [vmem:[%s606_s11 + $0x1c] sm:$0x1] }
  0x1c   : > { %v238_v59 = vsel %vm638_vm2, %v233_v49, %v237_v47  ;;  %v346_v60 = vor.u32 %v345_v51, %v342_v50  ;;  %v243_v63 = vshll.u32 %v611_v2, 16  ;;  %v331_v1 = vmax.bf16 %v224_v53, %v183_v44  ;;  %v202_v34 = vld [vmem:[%s606_s11 + $0xa4] sm:$0x1]  ;;  %v690_v36 = vld [vmem:[%s606_s11 + $0xb8] sm:$0xf] }
  0x1d   : > { %v332_v3 = vmax.bf16 %v238_v59, %v184_v45  ;;  %v162_v6 = vmax.bf16 %v154_v56, %v647_v52  ;;  %v242_v8 = vrot.slane %v240_v58, 4  ;;  %v249_v11 = vshll.u32 %v193_v57, 16  ;;  %v147_v42 = vld [vmem:[%s606_s11 + $0xf8] sm:$0xf] }
  0x1e   : > { %v347_v9 = vrot.slane %v346_v60, 4  ;;  %v245_v10 = vrot.slane %v243_v63, 5  ;;  %v354_v12 = vshrl.u32 %v615_v4, 16  ;;  %v357_v14 = vshll.u32 %v615_v4, 16 }
  0x1f   : > { %v170_v13 = vmax.bf16 %v162_v6, %v652_v55  ;;  %v363_v2 = vshll.u32 %v201_v62, 16  ;;  %v155_v17 = vmax.bf16 %v663_v0, %v647_v52  ;;  %v251_v20 = vrot.slane %v249_v11, 5 }
  0x20   : > { %v352_v18 = vsel %vm638_vm2, %v347_v9, %v351_v54  ;;  %v246_v19 = vor.u32 %v245_v10, %v242_v8  ;;  %v356_v21 = vrot.slane %v354_v12, 4  ;;  %v359_v25 = vrot.slane %v357_v14, 5  ;;  %v716_v12 = vld [vmem:[%s606_s11 + $0xc0] sm:$0xf] }
  0x21   : > { %v459_v24 = vmax.bf16 %v352_v18, %v331_v1  ;;  %v365_v4 = vrot.slane %v363_v2, 5  ;;  %v163_v26 = vmax.bf16 %v155_v17, %v671_v15  ;;  %v178_v28 = vmax.bf16 %v170_v13, %v146_v16  ;;  %v203_v1 = vld [vmem:[%s606_s11 + $0xac] sm:$0x1]  ;;  %v148_v17 = vld [vmem:[%s606_s11 + $0x100] sm:$0xf] }
  0x22   : > { %v247_v27 = vrot.slane %v246_v19, 4  ;;  %v254_v29 = vshrl.u32 %v618_v5, 16  ;;  %v257_v30 = vshll.u32 %v618_v5, 16  ;;  %v360_v32 = vor.u32 %v359_v25, %v356_v21  ;;  %v196_v25 = vld [vmem:[%s606_s11 + $0x2c] sm:$0x1] }
  0x23   : > { %v482_v31 = vmax.bf16 %v459_v24, %v238_v59  ;;  %v171_v33 = vmax.bf16 %v163_v26, %v130_v22  ;;  %v263_v35 = vshll.u32 %v194_v23, 16  ;;  %v185_v37 = vmax.bf16 %v177_v61, %v652_v55  ;;  %v195_v55 = vld [vmem:[%s606_s11 + $0x24] sm:$0x1]  ;;  %v707_v61 = vld [vmem:[%s606_s11 + $0x30] sm:$0xf] }
  0x24   : > { %v252_v39 = vsel %vm638_vm2, %v247_v27, %v251_v20  ;;  %v256_v40 = vrot.slane %v254_v29, 4  ;;  %v259_v41 = vrot.slane %v257_v30, 5  ;;  %v361_v44 = vrot.slane %v360_v32, 4  ;;  %v729_v27 = vld [vmem:[%s606_s11 + $0x38] sm:$0xf] }
  0x25   : > { %491 = vst.msk [vmem:[%s684_s15] sm:$0xf] %vm490_vm3, %v482_v31  ;;  %v186_v5 = vmax.bf16 %v178_v28, %v130_v22  ;;  %v265_v45 = vrot.slane %v263_v35, 5  ;;  %v368_v46 = vshrl.u32 %v622_v7, 16  ;;  %v371_v48 = vshll.u32 %v622_v7, 16 }
  0x26   : > { %v260_v47 = vor.u32 %v259_v41, %v256_v40  ;;  %v377_v49 = vshll.u32 %v202_v34, 16  ;;  %v156_v50 = vmax.bf16 %v690_v36, %v671_v15  ;;  %v366_v51 = vsel %vm638_vm2, %v361_v44, %v365_v4  ;;  %v131_v7 = vld [vmem:[%s606_s11 + $0x70] sm:$0xf]  ;;  %v132_v28 = vld [vmem:[%s606_s11 + $0x78] sm:$0xf] }
  0x27   : > { %v370_v53 = vrot.slane %v368_v46, 4  ;;  %v179_v54 = vmax.bf16 %v171_v33, %v147_v42  ;;  %v268_v56 = vshrl.u32 %v647_v52, 16  ;;  %v333_v57 = vmax.bf16 %v252_v39, %v185_v37  ;;  %v204_v34 = vld [vmem:[%s606_s11 + $0xb4] sm:$0x1]  ;;  %v737_v41 = vld [vmem:[%s606_s11 + $0xc8] sm:$0xf] }
  0x28   : > { %v460_v58 = vmax.bf16 %v366_v51, %v332_v3  ;;  %v261_v59 = vrot.slane %v260_v47, 4  ;;  %v373_v60 = vrot.slane %v371_v48, 5  ;;  %v379_v62 = vrot.slane %v377_v49, 5  ;;  %v149_v51 = vld [vmem:[%s606_s11 + $0x108] sm:$0xf] }
  0x29   : > { %v164_v63 = vmax.bf16 %v156_v50, %v707_v61  ;;  %v270_v6 = vrot.slane %v268_v56, 4  ;;  %v271_v8 = vshll.u32 %v647_v52, 16  ;;  %v277_v3 = vshll.u32 %v195_v55, 16  ;;  %v743_v50 = vld [vmem:[%s606_s11 + $0x40] sm:$0xf] }
  0x2a   : > { %v483_v9 = vmax.bf16 %v460_v58, %v252_v39  ;;  %v266_v10 = vsel %vm638_vm2, %v261_v59, %v265_v45  ;;  %v374_v11 = vor.u32 %v373_v60, %v370_v53  ;;  %v187_v14 = vmax.bf16 %v179_v54, %v131_v7  ;;  %v754_v59 = vld [vmem:[%s606_s11 + $0x80] sm:$0xf]  ;;  %v197_v60 = vld [vmem:[%s606_s11 + $0x34] sm:$0x1] }
  0x2b   : > { %v172_v13 = vmax.bf16 %v164_v63, %v131_v7  ;;  %v273_v2 = vrot.slane %v271_v8, 5  ;;  %v382_v16 = vshrl.u32 %v643_v43, 16  ;;  %v334_v52 = vmax.bf16 %v266_v10, %v186_v5 }
  0x2c   : > { %492 = vst.msk [vmem:[%s684_s15 + $0x4] sm:$0xf] %vm490_vm3, %v483_v9  ;;  %v375_v18 = vrot.slane %v374_v11, 4  ;;  %v385_v19 = vshll.u32 %v643_v43, 16  ;;  %v391_v20 = vshll.u32 %v203_v1, 16  ;;  %v279_v22 = vrot.slane %v277_v3, 5 }
  0x2d   : > { %v274_v21 = vor.u32 %v273_v2, %v270_v6  ;;  %v384_v23 = vrot.slane %v382_v16, 4  ;;  %v157_v24 = vmax.bf16 %v716_v12, %v707_v61  ;;  %v180_v29 = vmax.bf16 %v172_v13, %v148_v17  ;;  %v205_v9 = vld [vmem:[%s606_s11 + $0xbc] sm:$0x1]  ;;  %v150_v16 = vld [vmem:[%s606_s11 + $0x110] sm:$0xf] }
  0x2e   : > { %v380_v4 = vsel %vm638_vm2, %v375_v18, %v379_v62  ;;  %v387_v26 = vrot.slane %v385_v19, 5  ;;  %v282_v43 = vshrl.u32 %v671_v15, 16  ;;  %v393_v32 = vrot.slane %v391_v20, 5 }
  0x2f   : > { %v461_v30 = vmax.bf16 %v380_v4, %v333_v57  ;;  %v275_v31 = vrot.slane %v274_v21, 4  ;;  %v165_v33 = vmax.bf16 %v157_v24, %v729_v27  ;;  %v285_v39 = vshll.u32 %v671_v15, 16 }
  0x30   : > { %v388_v35 = vor.u32 %v387_v26, %v384_v23  ;;  %v284_v37 = vrot.slane %v282_v43, 4  ;;  %v291_v40 = vshll.u32 %v196_v25, 16  ;;  %v396_v45 = vshrl.u32 %v663_v0, 16  ;;  %v198_v26 = vld [vmem:[%s606_s11 + $0x3c] sm:$0x1] }
  0x31   : > { %v484_v42 = vmax.bf16 %v461_v30, %v266_v10  ;;  %v280_v44 = vsel %vm638_vm2, %v275_v31, %v279_v22  ;;  %v173_v5 = vmax.bf16 %v165_v33, %v132_v28  ;;  %v188_v48 = vmax.bf16 %v180_v29, %v132_v28  ;;  %v134_v43 = vld [vmem:[%s606_s11 + $0x88] sm:$0xf] }
  0x32   : > { %v335_v46 = vmax.bf16 %v280_v44, %v187_v14  ;;  %v389_v47 = vrot.slane %v388_v35, 4  ;;  %v287_v49 = vrot.slane %v285_v39, 5  ;;  %v398_v15 = vrot.slane %v396_v45, 4  ;;  %v206_v35 = vld [vmem:[%s606_s11 + $0xc4] sm:$0x1] }
  0x33   : > { %493 = vst.msk [vmem:[%s684_s15 + $0x8] sm:$0xf] %vm490_vm3, %v484_v42  ;;  %v399_v53 = vshll.u32 %v663_v0, 16  ;;  %v405_v54 = vshll.u32 %v204_v34, 16  ;;  %v158_v55 = vmax.bf16 %v737_v41, %v729_v27  ;;  %v293_v58 = vrot.slane %v291_v40, 5 }
  0x34   : > { %v394_v56 = vsel %vm638_vm2, %v389_v47, %v393_v32  ;;  %v288_v57 = vor.u32 %v287_v49, %v284_v37  ;;  %v296_v7 = vshrl.u32 %v707_v61, 16  ;;  %v759_v0 = vmax.bf16 %v173_v5, %v149_v51 }
  0x35   : > { %v462_v62 = vmax.bf16 %v394_v56, %v334_v52  ;;  %v401_v63 = vrot.slane %v399_v53, 5  ;;  %v166_v1 = vmax.bf16 %v158_v55, %v743_v50  ;;  %v407_v8 = vrot.slane %v405_v54, 5 }
  0x36   : > { %v289_v6 = vrot.slane %v288_v57, 4  ;;  %v298_v10 = vrot.slane %v296_v7, 4  ;;  %v299_v11 = vshll.u32 %v707_v61, 16  ;;  %v305_v2 = vshll.u32 %v197_v60, 16  ;;  %v199_v7 = vld [vmem:[%s606_s11 + $0x44] sm:$0x1] }
  0x37   : > { %v485_v3 = vmax.bf16 %v462_v62, %v280_v44  ;;  %v402_v13 = vor.u32 %v401_v63, %v398_v15  ;;  %v174_v14 = vmax.bf16 %v166_v1, %v754_v59  ;;  %v410_v18 = vshrl.u32 %v690_v36, 16 }
  0x38   : > { %v294_v17 = vsel %vm638_vm2, %v289_v6, %v293_v58  ;;  %v301_v52 = vrot.slane %v299_v11, 5  ;;  %v413_v19 = vshll.u32 %v690_v36, 16  ;;  %v189_v21 = vmax.bf16 %v759_v0, %v754_v59 }
  0x39   : > { %494 = vst.msk [vmem:[%s684_s15 + $0xc] sm:$0xf] %vm490_vm3, %v485_v3  ;;  %v336_v20 = vmax.bf16 %v294_v17, %v188_v48  ;;  %v403_v61 = vrot.slane %v402_v13, 4  ;;  %v419_v22 = vshll.u32 %v205_v9, 16  ;;  %v412_v24 = vrot.slane %v410_v18, 4 }
  0x3a   : > { %v302_v23 = vor.u32 %v301_v52, %v298_v10  ;;  %v415_v25 = vrot.slane %v413_v19, 5  ;;  %v182_v4 = vmax.bf16 %v174_v14, %v150_v16  ;;  %v307_v29 = vrot.slane %v305_v2, 5  ;;  %v207_v48 = vld [vmem:[%s606_s11 + $0xcc] sm:$0x1] }
  0x3b   : > { %v408_v28 = vsel %vm638_vm2, %v403_v61, %v407_v8  ;;  %v310_v36 = vshrl.u32 %v729_v27, 16  ;;  %v313_v30 = vshll.u32 %v729_v27, 16  ;;  %v421_v34 = vrot.slane %v419_v22, 5 }
  0x3c   : > { %v463_v31 = vmax.bf16 %v408_v28, %v335_v46  ;;  %v303_v32 = vrot.slane %v302_v23, 4  ;;  %v416_v33 = vor.u32 %v415_v25, %v412_v24  ;;  %v319_v40 = vshll.u32 %v198_v26, 16 }
  0x3d   : > { %v312_v37 = vrot.slane %v310_v36, 4  ;;  %v315_v39 = vrot.slane %v313_v30, 5  ;;  %v424_v42 = vshrl.u32 %v716_v12, 16  ;;  %v190_v45 = vmax.bf16 %v182_v4, %v134_v43 }
  0x3e   : > { %v486_v44 = vmax.bf16 %v463_v31, %v294_v17  ;;  %v417_v5 = vrot.slane %v416_v33, 4  ;;  %v427_v47 = vshll.u32 %v716_v12, 16  ;;  %v308_v27 = vsel %vm638_vm2, %v303_v32, %v307_v29 }
  0x3f   : > { %v316_v46 = vor.u32 %v315_v39, %v312_v37  ;;  %v321_v49 = vrot.slane %v319_v40, 5  ;;  %v426_v51 = vrot.slane %v424_v42, 4  ;;  %v433_v54 = vshll.u32 %v206_v35, 16 }
  0x40   : > { %495 = vst.msk [vmem:[%s684_s15 + $0x10] sm:$0xf] %vm490_vm3, %v486_v44  ;;  %v422_v15 = vsel %vm638_vm2, %v417_v5, %v421_v34  ;;  %v429_v53 = vrot.slane %v427_v47, 5  ;;  %v438_v55 = vshrl.u32 %v737_v41, 16  ;;  %v441_v57 = vshll.u32 %v737_v41, 16 }
  0x41   : > { %v464_v56 = vmax.bf16 %v422_v15, %v336_v20  ;;  %v317_v12 = vrot.slane %v316_v46, 4  ;;  %v447_v58 = vshll.u32 %v207_v48, 16  ;;  %v435_v60 = vrot.slane %v433_v54, 5 }
  0x42   : > { %v430_v59 = vor.u32 %v429_v53, %v426_v51  ;;  %v440_v62 = vrot.slane %v438_v55, 4  ;;  %v468_v63 = vshrl.u32 %v743_v50, 16  ;;  %v337_v1 = vmax.bf16 %v308_v27, %v189_v21 }
  0x43   : > { %v487_v0 = vmax.bf16 %v464_v56, %v308_v27  ;;  %v322_v6 = vsel %vm638_vm2, %v317_v12, %v321_v49  ;;  %v443_v8 = vrot.slane %v441_v57, 5  ;;  %v471_v11 = vshll.u32 %v743_v50, 16 }
  0x44   : > { %v431_v9 = vrot.slane %v430_v59, 4  ;;  %v470_v10 = vrot.slane %v468_v63, 4  ;;  %v449_v3 = vrot.slane %v447_v58, 5  ;;  %v477_v13 = vshll.u32 %v199_v7, 16 }
  0x45   : > { %496 = vst.msk [vmem:[%s684_s15 + $0x14] sm:$0xf] %vm490_vm3, %v487_v0  ;;  %v444_v41 = vor.u32 %v443_v8, %v440_v62  ;;  %v338_v14 = vmax.bf16 %v322_v6, %v190_v45  ;;  %v473_v16 = vrot.slane %v471_v11, 5 }
  0x46   : > { %v436_v2 = vsel %vm638_vm2, %v431_v9, %v435_v60  ;;  %v479_v19 = vrot.slane %v477_v13, 5 }
  0x47   : > { %v465_v17 = vmax.bf16 %v436_v2, %v337_v1  ;;  %v445_v52 = vrot.slane %v444_v41, 4  ;;  %v474_v18 = vor.u32 %v473_v16, %v470_v10 }
  0x49   : > { %v488_v20 = vmax.bf16 %v465_v17, %v322_v6  ;;  %v450_v50 = vsel %vm638_vm2, %v445_v52, %v449_v3  ;;  %v475_v21 = vrot.slane %v474_v18, 4 }
  0x4a   : > { %v466_v61 = vmax.bf16 %v450_v50, %v338_v14 }
  0x4b   : > { %497 = vst.msk [vmem:[%s684_s15 + $0x18] sm:$0xf] %vm490_vm3, %v488_v20  ;;  %v480_v22 = vsel %vm638_vm2, %v475_v21, %v479_v19 }
  0x4c   : > { %v489_v23 = vmax.bf16 %v480_v22, %v466_v61 }
  0x4e   : > { %498 = vst.msk [vmem:[%s684_s15 + $0x1c] sm:$0xf] %vm490_vm3, %v489_v23 }
  0x4f PF: > { %s11_s6 = sadd.s32 1, %s580_s6  }
  0x50   : > { %p8_p4 = scmp.ge.s32.totalorder %s11_s6, 4  }
  0x52   :  { %10 = sbr.rel (!%p8_p4) target bundleno = 1 (0x1), region = 54 }

// kernel: forward.21
= control target key start
LH: loop header
LB: loop body
LE: loop exit
PB: predicated region body
PF: predicated region fallthrough
CT: control target
= control target key end

     0   :  { %vm104_vm0 = vcmask 1043456   ;;  %vm79_vm1 = vcmask 64512   ;;  %vm285_vm2 = vcmask 60416   ;;  %s534_s1 = inlined_call_operand.vmem [shape: bf16[8,8], index: 1, kind: input, shape index: {}]   ;;  %s535_s0 = inlined_call_operand.vmem [shape: bf16[128,8], index: 0, kind: input, shape index: {}]   ;;  %s536_s2 = inlined_call_operand.vmem [shape: f32[1,8], index: 2, kind: input, shape index: {}]   ;;  %s537_s3 = inlined_call_operand.vmem [shape: bf16[128,8], index: 3, kind: output, shape index: {}]  }
   0x1   :  { %v31_v0 = vld [vmem:[%s534_s1] sm:$0xf]  ;;  %v388_v4 = vld [vmem:[%s535_s0 + $0x8] sm:$0xff]   ;;  %v390_v6 = vld [vmem:[%s535_s0 + $0x10] sm:$0xff]  }
   0x2   :  { %384 = vmatprep.subr.msk.bf16.mxu0 %vm104_vm0, %v31_v0  ;;  %385 = vmatprep.subr.msk.bf16.mxu1 %vm104_vm0, %v31_v0  ;;  %v106_v1 = vsel %vm104_vm0, %v31_v0, 0  ;;  %v386_v2 = vld [vmem:[%s535_s0] sm:$0xff]   ;;  %v389_v5 = vld [vmem:[%s535_s0 + $0x28] sm:$0xff]   ;;  %v391_v7 = vld [vmem:[%s535_s0 + $0x30] sm:$0xff]  }
   0x3   :  { %365 = vmatpush3.bf16.msra.mxu0 %v106_v1  ;;  %383 = vmatpush3.bf16.msra.mxu1 %v106_v1  ;;  %v387_v3 = vld [vmem:[%s535_s0 + $0x20] sm:$0xff]   ;;  %v392_v8 = vld [vmem:[%s535_s0 + $0x18] sm:$0xff]  }
   0x4   :  { %366 = vmatprep.mubr.msk.bf16.mxu0 %vm79_vm1, %v386_v2  ;;  %374 = vmatprep.mubr.msk.bf16.mxu1 %vm79_vm1, %v387_v3  ;;  %v393_v9 = vld [vmem:[%s535_s0 + $0x38] sm:$0xff]   ;;  %v452_v10 = vld [vmem:[%s536_s2] ss:$0 sm:$0xff] }
   0x6   :  { %367 = vmatmul.mubr.msk.bf16.vlgmr.msra.gmra.mxu0 %vm79_vm1, %v388_v4  ;;  %375 = vmatmul.mubr.msk.bf16.vlgmr.msra.gmra.mxu1 %vm79_vm1, %v389_v5 }
   0x7   :  { %370 = vmatprep.mubr.msk.bf16.mxu0 %vm79_vm1, %v390_v6  ;;  %378 = vmatprep.mubr.msk.bf16.mxu1 %vm79_vm1, %v391_v7 }
   0xe   :  { %371 = vmatmul.mubr.msk.bf16.gmra.mxu0 %vm79_vm1, %v392_v8  ;;  %379 = vmatmul.mubr.msk.bf16.gmra.mxu1 %vm79_vm1, %v393_v9 }
  0xc6   :  { %v368_v11 = vpop.f32.mrf.mxu0  ;;  %v376_v13 = vpop.f32.mrf.mxu1 }
  0xc7   :  { %v151_v12 = vadd.f32 %v368_v11, %v452_v10  ;;  %v183_v14 = vadd.f32 %v376_v13, %v452_v10 }
  0xc8   :  { %v142_v15 = vpop.f32.mrf.mxu0  ;;  %v174_v18 = vpop.f32.mrf.mxu1 }
  0xc9   :  { %v207_v16 = vmax.f32 %v151_v12, 0.0  ;;  %v143_v17 = vadd.f32 %v452_v10, %v142_v15  ;;  %v215_v19 = vmax.f32 %v183_v14, 0.0  ;;  %v175_v20 = vadd.f32 %v452_v10, %v174_v18 }
  0xca   :  { %v369_v21 = vpop.f32.mrf.mxu0  ;;  %v377_v25 = vpop.f32.mrf.mxu1 }
  0xcb   :  { %v341_v22 = vpack.c.bf16 %v207_v16, %v207_v16  ;;  %v205_v23 = vmax.f32 %v143_v17, 0.0  ;;  %v154_v24 = vadd.f32 %v369_v21, %v452_v10  ;;  %v349_v26 = vpack.c.bf16 %v215_v19, %v215_v19 }
  0xcc   :  { %v213_v27 = vmax.f32 %v175_v20, 0.0  ;;  %v186_v28 = vadd.f32 %v377_v25, %v452_v10  ;;  %v145_v29 = vpop.f32.mrf.mxu0  ;;  %v177_v33 = vpop.f32.mrf.mxu1 }
  0xcd   :  { %288 = vst.msk [vmem:[%s537_s3 + $0x8] sm:$0xf] %vm285_vm2, %v341_v22  ;;  %v339_v30 = vpack.c.bf16 %v205_v23, %v205_v23  ;;  %v208_v31 = vmax.f32 %v154_v24, 0.0  ;;  %v146_v32 = vadd.f32 %v452_v10, %v145_v29  ;;  %296 = vst.msk [vmem:[%s537_s3 + $0x28] sm:$0xf] %vm285_vm2, %v349_v26  ;;  %v178_v36 = vadd.f32 %v452_v10, %v177_v33 }
  0xce   :  { %v347_v34 = vpack.c.bf16 %v213_v27, %v213_v27  ;;  %v216_v35 = vmax.f32 %v186_v28, 0.0  ;;  %v372_v37 = vpop.f32.mrf.mxu0  ;;  %v380_v41 = vpop.f32.mrf.mxu1 }
  0xcf   :  { %286 = vst.msk [vmem:[%s537_s3] sm:$0xf] %vm285_vm2, %v339_v30  ;;  %v342_v38 = vpack.c.bf16 %v208_v31, %v208_v31  ;;  %v206_v39 = vmax.f32 %v146_v32, 0.0  ;;  %v167_v40 = vadd.f32 %v372_v37, %v452_v10  ;;  %v214_v43 = vmax.f32 %v178_v36, 0.0 }
  0xd0   :  { %294 = vst.msk [vmem:[%s537_s3 + $0x20] sm:$0xf] %vm285_vm2, %v347_v34  ;;  %v350_v42 = vpack.c.bf16 %v216_v35, %v216_v35  ;;  %v199_v44 = vadd.f32 %v380_v41, %v452_v10  ;;  %v158_v45 = vpop.f32.mrf.mxu0  ;;  %v190_v49 = vpop.f32.mrf.mxu1 }
  0xd1   :  { %289 = vst.msk [vmem:[%s537_s3 + $0xc] sm:$0xf] %vm285_vm2, %v342_v38  ;;  %v340_v46 = vpack.c.bf16 %v206_v39, %v206_v39  ;;  %v211_v47 = vmax.f32 %v167_v40, 0.0  ;;  %v159_v48 = vadd.f32 %v452_v10, %v158_v45  ;;  %v348_v50 = vpack.c.bf16 %v214_v43, %v214_v43 }
  0xd2   :  { %297 = vst.msk [vmem:[%s537_s3 + $0x2c] sm:$0xf] %vm285_vm2, %v350_v42  ;;  %v219_v51 = vmax.f32 %v199_v44, 0.0  ;;  %v191_v52 = vadd.f32 %v452_v10, %v190_v49  ;;  %v373_v53 = vpop.f32.mrf.mxu0  ;;  %v381_v57 = vpop.f32.mrf.mxu1 }
  0xd3   :  { %287 = vst.msk [vmem:[%s537_s3 + $0x4] sm:$0xf] %vm285_vm2, %v340_v46  ;;  %v345_v54 = vpack.c.bf16 %v211_v47, %v211_v47  ;;  %v209_v55 = vmax.f32 %v159_v48, 0.0  ;;  %v170_v56 = vadd.f32 %v373_v53, %v452_v10  ;;  %295 = vst.msk [vmem:[%s537_s3 + $0x24] sm:$0xf] %vm285_vm2, %v348_v50  ;;  %v202_v60 = vadd.f32 %v381_v57, %v452_v10 }
  0xd4   :  { %v353_v58 = vpack.c.bf16 %v219_v51, %v219_v51  ;;  %v217_v59 = vmax.f32 %v191_v52, 0.0  ;;  %v161_v61 = vpop.f32.mrf.mxu0  ;;  %v193_v1 = vpop.f32.mrf.mxu1 }
  0xd5   :  { %292 = vst.msk [vmem:[%s537_s3 + $0x18] sm:$0xf] %vm285_vm2, %v345_v54  ;;  %v343_v62 = vpack.c.bf16 %v209_v55, %v209_v55  ;;  %v212_v63 = vmax.f32 %v170_v56, 0.0  ;;  %v162_v0 = vadd.f32 %v452_v10, %v161_v61  ;;  %v220_v3 = vmax.f32 %v202_v60, 0.0 }
  0xd6   :  { %300 = vst.msk [vmem:[%s537_s3 + $0x38] sm:$0xf] %vm285_vm2, %v353_v58  ;;  %v351_v2 = vpack.c.bf16 %v217_v59, %v217_v59  ;;  %v194_v4 = vadd.f32 %v452_v10, %v193_v1 }
  0xd7   :  { %290 = vst.msk [vmem:[%s537_s3 + $0x10] sm:$0xf] %vm285_vm2, %v343_v62  ;;  %v346_v5 = vpack.c.bf16 %v212_v63, %v212_v63  ;;  %v210_v6 = vmax.f32 %v162_v0, 0.0  ;;  %v354_v7 = vpack.c.bf16 %v220_v3, %v220_v3 }
  0xd8   :  { %298 = vst.msk [vmem:[%s537_s3 + $0x30] sm:$0xf] %vm285_vm2, %v351_v2  ;;  %v218_v8 = vmax.f32 %v194_v4, 0.0 }
  0xd9   :  { %293 = vst.msk [vmem:[%s537_s3 + $0x1c] sm:$0xf] %vm285_vm2, %v346_v5  ;;  %v344_v9 = vpack.c.bf16 %v210_v6, %v210_v6  ;;  %301 = vst.msk [vmem:[%s537_s3 + $0x3c] sm:$0xf] %vm285_vm2, %v354_v7 }
  0xda   :  { %v352_v10 = vpack.c.bf16 %v218_v8, %v218_v8 }
  0xdb   :  { %291 = vst.msk [vmem:[%s537_s3 + $0x14] sm:$0xf] %vm285_vm2, %v344_v9 }
  0xdc   :  { %299 = vst.msk [vmem:[%s537_s3 + $0x34] sm:$0xf] %vm285_vm2, %v352_v10 }

// kernel: forward.23
= control target key start
LH: loop header
LB: loop body
LE: loop exit
PB: predicated region body
PF: predicated region fallthrough
CT: control target
= control target key end

     0   :  { %vm104_vm0 = vcmask 1043456   ;;  %vm79_vm1 = vcmask 64512   ;;  %vm269_vm2 = vcmask 257024   ;;  %s500_s1 = inlined_call_operand.vmem [shape: bf16[8,32], index: 1, kind: input, shape index: {}]   ;;  %s501_s0 = inlined_call_operand.vmem [shape: bf16[128,8], index: 0, kind: input, shape index: {}]   ;;  %s502_s2 = inlined_call_operand.vmem [shape: f32[1,32], index: 2, kind: input, shape index: {}]   ;;  %s503_s3 = inlined_call_operand.vmem [shape: bf16[128,32], index: 3, kind: output, shape index: {}]  }
   0x1   :  { %v31_v0 = vld [vmem:[%s500_s1] sm:$0xf]  ;;  %v372_v4 = vld [vmem:[%s501_s0 + $0x8] sm:$0xff]   ;;  %v374_v6 = vld [vmem:[%s501_s0 + $0x10] sm:$0xff]  }
   0x2   :  { %368 = vmatprep.subr.msk.bf16.mxu0 %vm104_vm0, %v31_v0  ;;  %369 = vmatprep.subr.msk.bf16.mxu1 %vm104_vm0, %v31_v0  ;;  %v106_v1 = vsel %vm104_vm0, %v31_v0, 0  ;;  %v370_v2 = vld [vmem:[%s501_s0] sm:$0xff]   ;;  %v373_v5 = vld [vmem:[%s501_s0 + $0x28] sm:$0xff]   ;;  %v375_v7 = vld [vmem:[%s501_s0 + $0x30] sm:$0xff]  }
   0x3   :  { %349 = vmatpush3.bf16.msra.mxu0 %v106_v1  ;;  %367 = vmatpush3.bf16.msra.mxu1 %v106_v1  ;;  %v371_v3 = vld [vmem:[%s501_s0 + $0x20] sm:$0xff]   ;;  %v376_v8 = vld [vmem:[%s501_s0 + $0x18] sm:$0xff]  }
   0x4   :  { %350 = vmatprep.mubr.msk.bf16.mxu0 %vm79_vm1, %v370_v2  ;;  %358 = vmatprep.mubr.msk.bf16.mxu1 %vm79_vm1, %v371_v3  ;;  %v377_v9 = vld [vmem:[%s501_s0 + $0x38] sm:$0xff]   ;;  %v290_v10 = vld [vmem:[%s502_s2] ss:$0 sm:$0xff] }
   0x6   :  { %351 = vmatmul.mubr.msk.bf16.vlgmr.msra.gmra.mxu0 %vm79_vm1, %v372_v4  ;;  %359 = vmatmul.mubr.msk.bf16.vlgmr.msra.gmra.mxu1 %vm79_vm1, %v373_v5 }
   0x7   :  { %354 = vmatprep.mubr.msk.bf16.mxu0 %vm79_vm1, %v374_v6  ;;  %362 = vmatprep.mubr.msk.bf16.mxu1 %vm79_vm1, %v375_v7 }
   0xe   :  { %355 = vmatmul.mubr.msk.bf16.gmra.mxu0 %vm79_vm1, %v376_v8  ;;  %363 = vmatmul.mubr.msk.bf16.gmra.mxu1 %vm79_vm1, %v377_v9 }
  0xc6   :  { %v352_v11 = vpop.f32.mrf.mxu0  ;;  %v360_v13 = vpop.f32.mrf.mxu1 }
  0xc7   :  { %v151_v12 = vadd.f32 %v352_v11, %v290_v10  ;;  %v183_v14 = vadd.f32 %v360_v13, %v290_v10 }
  0xc8   :  { %v142_v15 = vpop.f32.mrf.mxu0  ;;  %v174_v18 = vpop.f32.mrf.mxu1 }
  0xc9   :  { %v325_v16 = vpack.c.bf16 %v151_v12, %v151_v12  ;;  %v143_v17 = vadd.f32 %v290_v10, %v142_v15  ;;  %v333_v19 = vpack.c.bf16 %v183_v14, %v183_v14  ;;  %v175_v20 = vadd.f32 %v290_v10, %v174_v18 }
  0xca   :  { %v353_v21 = vpop.f32.mrf.mxu0  ;;  %v361_v24 = vpop.f32.mrf.mxu1 }
  0xcb   :  { %272 = vst.msk [vmem:[%s503_s3 + $0x8] sm:$0xf] %vm269_vm2, %v325_v16  ;;  %v323_v22 = vpack.c.bf16 %v143_v17, %v143_v17  ;;  %v154_v23 = vadd.f32 %v353_v21, %v290_v10  ;;  %280 = vst.msk [vmem:[%s503_s3 + $0x28] sm:$0xf] %vm269_vm2, %v333_v19  ;;  %v331_v25 = vpack.c.bf16 %v175_v20, %v175_v20 }
  0xcc   :  { %v186_v26 = vadd.f32 %v361_v24, %v290_v10  ;;  %v145_v27 = vpop.f32.mrf.mxu0  ;;  %v177_v30 = vpop.f32.mrf.mxu1 }
  0xcd   :  { %270 = vst.msk [vmem:[%s503_s3] sm:$0xf] %vm269_vm2, %v323_v22  ;;  %v326_v28 = vpack.c.bf16 %v154_v23, %v154_v23  ;;  %v146_v29 = vadd.f32 %v290_v10, %v145_v27  ;;  %278 = vst.msk [vmem:[%s503_s3 + $0x20] sm:$0xf] %vm269_vm2, %v331_v25  ;;  %v178_v32 = vadd.f32 %v290_v10, %v177_v30 }
  0xce   :  { %v334_v31 = vpack.c.bf16 %v186_v26, %v186_v26  ;;  %v356_v33 = vpop.f32.mrf.mxu0  ;;  %v364_v36 = vpop.f32.mrf.mxu1 }
  0xcf   :  { %273 = vst.msk [vmem:[%s503_s3 + $0xc] sm:$0xf] %vm269_vm2, %v326_v28  ;;  %v324_v34 = vpack.c.bf16 %v146_v29, %v146_v29  ;;  %v167_v35 = vadd.f32 %v356_v33, %v290_v10  ;;  %v332_v37 = vpack.c.bf16 %v178_v32, %v178_v32  ;;  %v199_v38 = vadd.f32 %v364_v36, %v290_v10 }
  0xd0   :  { %281 = vst.msk [vmem:[%s503_s3 + $0x2c] sm:$0xf] %vm269_vm2, %v334_v31  ;;  %v158_v39 = vpop.f32.mrf.mxu0  ;;  %v190_v42 = vpop.f32.mrf.mxu1 }
  0xd1   :  { %271 = vst.msk [vmem:[%s503_s3 + $0x4] sm:$0xf] %vm269_vm2, %v324_v34  ;;  %v329_v40 = vpack.c.bf16 %v167_v35, %v167_v35  ;;  %v159_v41 = vadd.f32 %v290_v10, %v158_v39  ;;  %279 = vst.msk [vmem:[%s503_s3 + $0x24] sm:$0xf] %vm269_vm2, %v332_v37  ;;  %v337_v43 = vpack.c.bf16 %v199_v38, %v199_v38 }
  0xd2   :  { %v191_v44 = vadd.f32 %v290_v10, %v190_v42  ;;  %v357_v45 = vpop.f32.mrf.mxu0  ;;  %v365_v48 = vpop.f32.mrf.mxu1 }
  0xd3   :  { %276 = vst.msk [vmem:[%s503_s3 + $0x18] sm:$0xf] %vm269_vm2, %v329_v40  ;;  %v327_v46 = vpack.c.bf16 %v159_v41, %v159_v41  ;;  %v170_v47 = vadd.f32 %v357_v45, %v290_v10  ;;  %284 = vst.msk [vmem:[%s503_s3 + $0x38] sm:$0xf] %vm269_vm2, %v337_v43  ;;  %v202_v50 = vadd.f32 %v365_v48, %v290_v10 }
  0xd4   :  { %v335_v49 = vpack.c.bf16 %v191_v44, %v191_v44  ;;  %v161_v51 = vpop.f32.mrf.mxu0  ;;  %v193_v54 = vpop.f32.mrf.mxu1 }
  0xd5   :  { %274 = vst.msk [vmem:[%s503_s3 + $0x10] sm:$0xf] %vm269_vm2, %v327_v46  ;;  %v330_v52 = vpack.c.bf16 %v170_v47, %v170_v47  ;;  %v162_v53 = vadd.f32 %v290_v10, %v161_v51  ;;  %v338_v55 = vpack.c.bf16 %v202_v50, %v202_v50  ;;  %v194_v56 = vadd.f32 %v290_v10, %v193_v54 }
  0xd6   :  { %282 = vst.msk [vmem:[%s503_s3 + $0x30] sm:$0xf] %vm269_vm2, %v335_v49 }
  0xd7   :  { %277 = vst.msk [vmem:[%s503_s3 + $0x1c] sm:$0xf] %vm269_vm2, %v330_v52  ;;  %v328_v57 = vpack.c.bf16 %v162_v53, %v162_v53  ;;  %285 = vst.msk [vmem:[%s503_s3 + $0x3c] sm:$0xf] %vm269_vm2, %v338_v55  ;;  %v336_v58 = vpack.c.bf16 %v194_v56, %v194_v56 }
  0xd9   :  { %275 = vst.msk [vmem:[%s503_s3 + $0x14] sm:$0xf] %vm269_vm2, %v328_v57  ;;  %283 = vst.msk [vmem:[%s503_s3 + $0x34] sm:$0xf] %vm269_vm2, %v336_v58 }

// kernel: forward.24
= control target key start
LH: loop header
LB: loop body
LE: loop exit
PB: predicated region body
PF: predicated region fallthrough
CT: control target
= control target key end

     0   :  { %vm107_vm0 = vcmask 1043456   ;;  %vm82_vm1 = vcmask 64512   ;;  %vm336_vm2 = vcmask 257024   ;;  %s679_s1 = inlined_call_operand.vmem [shape: bf16[8,32], index: 1, kind: input, shape index: {}]   ;;  %s680_s0 = inlined_call_operand.vmem [shape: bf16[128,8], index: 0, kind: input, shape index: {}]   ;;  %s681_s3 = inlined_call_operand.vmem [shape: bf16[128,32], index: 3, kind: input, shape index: {}]   ;;  %s682_s2 = inlined_call_operand.vmem [shape: f32[1,32], index: 2, kind: input, shape index: {}]   ;;  %s683_s4 = inlined_call_operand.vmem [shape: bf16[128,32], index: 4, kind: output, shape index: {}]  }
   0x1   :  { %v34_v0 = vld [vmem:[%s679_s1] sm:$0xf]  ;;  %v478_v4 = vld [vmem:[%s680_s0 + $0x8] sm:$0xff]   ;;  %v480_v6 = vld [vmem:[%s680_s0 + $0x10] sm:$0xff]  }
   0x2   :  { %474 = vmatprep.subr.msk.bf16.mxu0 %vm107_vm0, %v34_v0  ;;  %475 = vmatprep.subr.msk.bf16.mxu1 %vm107_vm0, %v34_v0  ;;  %v109_v1 = vsel %vm107_vm0, %v34_v0, 0  ;;  %v476_v2 = vld [vmem:[%s680_s0] sm:$0xff]   ;;  %v479_v5 = vld [vmem:[%s680_s0 + $0x28] sm:$0xff]   ;;  %v481_v7 = vld [vmem:[%s680_s0 + $0x30] sm:$0xff]  }
   0x3   :  { %455 = vmatpush3.bf16.msra.mxu0 %v109_v1  ;;  %473 = vmatpush3.bf16.msra.mxu1 %v109_v1  ;;  %v477_v3 = vld [vmem:[%s680_s0 + $0x20] sm:$0xff]   ;;  %v482_v8 = vld [vmem:[%s680_s0 + $0x18] sm:$0xff]   ;;  %v438_v10 = vld [vmem:[%s681_s3 + $0x8] sm:$0xff]  }
   0x4   :  { %456 = vmatprep.mubr.msk.bf16.mxu0 %vm82_vm1, %v476_v2  ;;  %464 = vmatprep.mubr.msk.bf16.mxu1 %vm82_vm1, %v477_v3  ;;  %v483_v9 = vld [vmem:[%s680_s0 + $0x38] sm:$0xff]   ;;  %v442_v11 = vld [vmem:[%s681_s3 + $0x28] sm:$0xff]   ;;  %v407_v12 = vld [vmem:[%s681_s3] sm:$0xff]   ;;  %v412_v15 = vunpack.c.l.bf16 %v438_v10  ;;  %v413_v22 = vunpack.c.h.bf16 %v438_v10 }
   0x5   :  { %v556_v13 = vld [vmem:[%s681_s3 + $0x20] sm:$0xff]   ;;  %v566_v16 = vld [vmem:[%s681_s3 + $0x18] sm:$0xff]   ;;  %v428_v19 = vunpack.c.l.bf16 %v442_v11  ;;  %v408_v20 = vunpack.c.l.bf16 %v407_v12  ;;  %v577_v23 = vld [vmem:[%s681_s3 + $0x10] sm:$0xff]   ;;  %v429_v27 = vunpack.c.h.bf16 %v442_v11  ;;  %v409_v28 = vunpack.c.h.bf16 %v407_v12 }
   0x6   :  { %457 = vmatmul.mubr.msk.bf16.vlgmr.msra.gmra.mxu0 %vm82_vm1, %v478_v4  ;;  %465 = vmatmul.mubr.msk.bf16.vlgmr.msra.gmra.mxu1 %vm82_vm1, %v479_v5  ;;  %v561_v14 = vld [vmem:[%s682_s2] ss:$0 sm:$0xff]  ;;  %v571_v17 = vld [vmem:[%s681_s3 + $0x38] sm:$0xff]   ;;  %v424_v21 = vunpack.c.l.bf16 %v556_v13  ;;  %v582_v24 = vld [vmem:[%s681_s3 + $0x30] sm:$0xff]   ;;  %v425_v31 = vunpack.c.h.bf16 %v556_v13  ;;  %v420_v32 = vunpack.c.l.bf16 %v566_v16  ;;  %v416_v37 = vunpack.c.l.bf16 %v577_v23 }
   0x7   :  { %460 = vmatprep.mubr.msk.bf16.mxu0 %vm82_vm1, %v480_v6  ;;  %468 = vmatprep.mubr.msk.bf16.mxu1 %vm82_vm1, %v481_v7  ;;  %v436_v33 = vunpack.c.l.bf16 %v571_v17  ;;  %v432_v38 = vunpack.c.l.bf16 %v582_v24  ;;  %v421_v42 = vunpack.c.h.bf16 %v566_v16  ;;  %v437_v43 = vunpack.c.h.bf16 %v571_v17 }
   0x8   :  { %v417_v48 = vunpack.c.h.bf16 %v577_v23  ;;  %v433_v53 = vunpack.c.h.bf16 %v582_v24 }
   0xe   :  { %461 = vmatmul.mubr.msk.bf16.gmra.mxu0 %vm82_vm1, %v482_v8  ;;  %469 = vmatmul.mubr.msk.bf16.gmra.mxu1 %vm82_vm1, %v483_v9 }
  0xc6   :  { %v458_v18 = vpop.f32.mrf.mxu0  ;;  %v466_v26 = vpop.f32.mrf.mxu1 }
  0xc7   :  { %v154_v25 = vadd.f32 %v458_v18, %v561_v14  ;;  %v186_v29 = vadd.f32 %v466_v26, %v561_v14 }
  0xc8   :  { %v145_v30 = vpop.f32.mrf.mxu0  ;;  %v177_v36 = vpop.f32.mrf.mxu1 }
  0xc9   :  { %v242_v34 = vadd.f32 %v412_v15, %v154_v25  ;;  %v146_v35 = vadd.f32 %v561_v14, %v145_v30  ;;  %v250_v39 = vadd.f32 %v428_v19, %v186_v29  ;;  %v178_v40 = vadd.f32 %v561_v14, %v177_v36 }
  0xca   :  { %v459_v41 = vpop.f32.mrf.mxu0  ;;  %v467_v47 = vpop.f32.mrf.mxu1 }
  0xcb   :  { %v258_v44 = vmax.f32 %v242_v34, 0.0  ;;  %v240_v45 = vadd.f32 %v408_v20, %v146_v35  ;;  %v157_v46 = vadd.f32 %v459_v41, %v561_v14  ;;  %v266_v49 = vmax.f32 %v250_v39, 0.0 }
  0xcc   :  { %v248_v50 = vadd.f32 %v424_v21, %v178_v40  ;;  %v189_v51 = vadd.f32 %v467_v47, %v561_v14  ;;  %v148_v52 = vpop.f32.mrf.mxu0  ;;  %v180_v58 = vpop.f32.mrf.mxu1 }
  0xcd   :  { %v392_v54 = vpack.c.bf16 %v258_v44, %v258_v44  ;;  %v256_v55 = vmax.f32 %v240_v45, 0.0  ;;  %v243_v56 = vadd.f32 %v413_v22, %v157_v46  ;;  %v149_v57 = vadd.f32 %v561_v14, %v148_v52 }
  0xce   :  { %v400_v59 = vpack.c.bf16 %v266_v49, %v266_v49  ;;  %v264_v60 = vmax.f32 %v248_v50, 0.0  ;;  %v251_v61 = vadd.f32 %v429_v27, %v189_v51  ;;  %v181_v62 = vadd.f32 %v561_v14, %v180_v58  ;;  %v462_v63 = vpop.f32.mrf.mxu0  ;;  %v470_v4 = vpop.f32.mrf.mxu1 }
  0xcf   :  { %339 = vst.msk [vmem:[%s683_s4 + $0x8] sm:$0xf] %vm336_vm2, %v392_v54  ;;  %v390_v0 = vpack.c.bf16 %v256_v55, %v256_v55  ;;  %v259_v1 = vmax.f32 %v243_v56, 0.0  ;;  %v241_v2 = vadd.f32 %v409_v28, %v149_v57  ;;  %v170_v3 = vadd.f32 %v462_v63, %v561_v14 }
  0xd0   :  { %347 = vst.msk [vmem:[%s683_s4 + $0x28] sm:$0xf] %vm336_vm2, %v400_v59  ;;  %v398_v5 = vpack.c.bf16 %v264_v60, %v264_v60  ;;  %v267_v6 = vmax.f32 %v251_v61, 0.0  ;;  %v249_v7 = vadd.f32 %v425_v31, %v181_v62  ;;  %v202_v8 = vadd.f32 %v470_v4, %v561_v14  ;;  %v161_v9 = vpop.f32.mrf.mxu0  ;;  %v193_v15 = vpop.f32.mrf.mxu1 }
  0xd1   :  { %337 = vst.msk [vmem:[%s683_s4] sm:$0xf] %vm336_vm2, %v390_v0  ;;  %v393_v10 = vpack.c.bf16 %v259_v1, %v259_v1  ;;  %v257_v11 = vmax.f32 %v241_v2, 0.0  ;;  %v246_v12 = vadd.f32 %v420_v32, %v170_v3  ;;  %v162_v13 = vadd.f32 %v561_v14, %v161_v9 }
  0xd2   :  { %345 = vst.msk [vmem:[%s683_s4 + $0x20] sm:$0xf] %vm336_vm2, %v398_v5  ;;  %v401_v16 = vpack.c.bf16 %v267_v6, %v267_v6  ;;  %v265_v18 = vmax.f32 %v249_v7, 0.0  ;;  %v254_v19 = vadd.f32 %v436_v33, %v202_v8  ;;  %v194_v20 = vadd.f32 %v561_v14, %v193_v15  ;;  %v463_v21 = vpop.f32.mrf.mxu0  ;;  %v471_v28 = vpop.f32.mrf.mxu1 }
  0xd3   :  { %340 = vst.msk [vmem:[%s683_s4 + $0xc] sm:$0xf] %vm336_vm2, %v393_v10  ;;  %v391_v22 = vpack.c.bf16 %v257_v11, %v257_v11  ;;  %v262_v25 = vmax.f32 %v246_v12, 0.0  ;;  %v244_v26 = vadd.f32 %v416_v37, %v162_v13  ;;  %v173_v27 = vadd.f32 %v463_v21, %v561_v14 }
  0xd4   :  { %348 = vst.msk [vmem:[%s683_s4 + $0x2c] sm:$0xf] %vm336_vm2, %v401_v16  ;;  %v399_v29 = vpack.c.bf16 %v265_v18, %v265_v18  ;;  %v270_v30 = vmax.f32 %v254_v19, 0.0  ;;  %v252_v31 = vadd.f32 %v432_v38, %v194_v20  ;;  %v205_v32 = vadd.f32 %v471_v28, %v561_v14  ;;  %v164_v33 = vpop.f32.mrf.mxu0  ;;  %v196_v39 = vpop.f32.mrf.mxu1 }
  0xd5   :  { %338 = vst.msk [vmem:[%s683_s4 + $0x4] sm:$0xf] %vm336_vm2, %v391_v22  ;;  %v396_v34 = vpack.c.bf16 %v262_v25, %v262_v25  ;;  %v260_v35 = vmax.f32 %v244_v26, 0.0  ;;  %v247_v36 = vadd.f32 %v421_v42, %v173_v27  ;;  %v165_v37 = vadd.f32 %v561_v14, %v164_v33 }
  0xd6   :  { %346 = vst.msk [vmem:[%s683_s4 + $0x24] sm:$0xf] %vm336_vm2, %v399_v29  ;;  %v404_v38 = vpack.c.bf16 %v270_v30, %v270_v30  ;;  %v268_v40 = vmax.f32 %v252_v31, 0.0  ;;  %v255_v41 = vadd.f32 %v437_v43, %v205_v32  ;;  %v197_v44 = vadd.f32 %v561_v14, %v196_v39 }
  0xd7   :  { %343 = vst.msk [vmem:[%s683_s4 + $0x18] sm:$0xf] %vm336_vm2, %v396_v34  ;;  %v394_v42 = vpack.c.bf16 %v260_v35, %v260_v35  ;;  %v263_v45 = vmax.f32 %v247_v36, 0.0  ;;  %v245_v46 = vadd.f32 %v417_v48, %v165_v37 }
  0xd8   :  { %351 = vst.msk [vmem:[%s683_s4 + $0x38] sm:$0xf] %vm336_vm2, %v404_v38  ;;  %v402_v47 = vpack.c.bf16 %v268_v40, %v268_v40  ;;  %v271_v17 = vmax.f32 %v255_v41, 0.0  ;;  %v253_v14 = vadd.f32 %v433_v53, %v197_v44 }
  0xd9   :  { %341 = vst.msk [vmem:[%s683_s4 + $0x10] sm:$0xf] %vm336_vm2, %v394_v42  ;;  %v397_v43 = vpack.c.bf16 %v263_v45, %v263_v45  ;;  %v261_v49 = vmax.f32 %v245_v46, 0.0 }
  0xda   :  { %349 = vst.msk [vmem:[%s683_s4 + $0x30] sm:$0xf] %vm336_vm2, %v402_v47  ;;  %v405_v23 = vpack.c.bf16 %v271_v17, %v271_v17  ;;  %v269_v48 = vmax.f32 %v253_v14, 0.0 }
  0xdb   :  { %344 = vst.msk [vmem:[%s683_s4 + $0x1c] sm:$0xf] %vm336_vm2, %v397_v43  ;;  %v395_v24 = vpack.c.bf16 %v261_v49, %v261_v49 }
  0xdc   :  { %352 = vst.msk [vmem:[%s683_s4 + $0x3c] sm:$0xf] %vm336_vm2, %v405_v23  ;;  %v403_v50 = vpack.c.bf16 %v269_v48, %v269_v48 }
  0xdd   :  { %342 = vst.msk [vmem:[%s683_s4 + $0x14] sm:$0xf] %vm336_vm2, %v395_v24 }
  0xde   :  { %350 = vst.msk [vmem:[%s683_s4 + $0x34] sm:$0xf] %vm336_vm2, %v403_v50 }

// kernel: forward.25
= control target key start
LH: loop header
LB: loop body
LE: loop exit
PB: predicated region body
PF: predicated region fallthrough
CT: control target
= control target key end

     0   :  { %vm94_vm0 = vcmask 261120   ;;  %vm296_vm1 = vcmask 125952   ;;  %s555_s1 = inlined_call_operand.vmem [shape: bf16[32,16], index: 1, kind: input, shape index: {}]   ;;  %s556_s0 = inlined_call_operand.vmem [shape: bf16[128,32], index: 0, kind: input, shape index: {}]   ;;  %s557_s2 = inlined_call_operand.vmem [shape: f32[1,16], index: 2, kind: input, shape index: {}]   ;;  %s558_s3 = inlined_call_operand.vmem [shape: bf16[128,16], index: 3, kind: output, shape index: {}]  }
   0x1   :  { %v402_v0 = vld [vmem:[%s555_s1 + $0x8] sm:$0xff]   ;;  %v403_v1 = vld [vmem:[%s555_s1] sm:$0xff]   ;;  %v408_v6 = vld [vmem:[%s556_s0 + $0x10] sm:$0xff]  }
   0x2   :  { %378 = vmatprep.subr.bf16.mxu0 %v402_v0  ;;  %398 = vmatprep.subr.bf16.mxu1 %v402_v0  ;;  %v404_v2 = vld [vmem:[%s556_s0] sm:$0xff]   ;;  %v406_v4 = vld [vmem:[%s556_s0 + $0x8] sm:$0xff]   ;;  %v409_v7 = vld [vmem:[%s556_s0 + $0x30] sm:$0xff]  }
   0x3   :  { %379 = vmatpush3.bf16.msra.mxu0 %v402_v0  ;;  %400 = vmatpush3.bf16.msra.mxu1 %v402_v0  ;;  %v405_v3 = vld [vmem:[%s556_s0 + $0x20] sm:$0xff]   ;;  %v407_v5 = vld [vmem:[%s556_s0 + $0x28] sm:$0xff]   ;;  %v410_v8 = vld [vmem:[%s556_s0 + $0x18] sm:$0xff]  }
   0x4   :  { %380 = vmatprep.subr.bf16.mxu0 %v403_v1  ;;  %399 = vmatprep.subr.bf16.mxu1 %v403_v1  ;;  %v411_v9 = vld [vmem:[%s556_s0 + $0x38] sm:$0xff]   ;;  %v473_v10 = vld [vmem:[%s557_s2] ss:$0 sm:$0xff] }
   0x5   :  { %382 = vmatprep.mubr.msk.bf16.mxu0 %vm94_vm0, %v404_v2  ;;  %390 = vmatprep.mubr.msk.bf16.mxu1 %vm94_vm0, %v405_v3 }
   0x7   :  { %381 = vmatpush3.bf16.msra.mxu0 %v403_v1  ;;  %401 = vmatpush3.bf16.msra.mxu1 %v403_v1 }
   0xa   :  { %383 = vmatmul.mubr.msk.bf16.vlgmr.msra.gmra.mxu0 %vm94_vm0, %v406_v4  ;;  %391 = vmatmul.mubr.msk.bf16.vlgmr.msra.gmra.mxu1 %vm94_vm0, %v407_v5 }
   0xb   :  { %386 = vmatprep.mubr.msk.bf16.mxu0 %vm94_vm0, %v408_v6  ;;  %394 = vmatprep.mubr.msk.bf16.mxu1 %vm94_vm0, %v409_v7 }
  0x12   :  { %387 = vmatmul.mubr.msk.bf16.gmra.mxu0 %vm94_vm0, %v410_v8  ;;  %395 = vmatmul.mubr.msk.bf16.gmra.mxu1 %vm94_vm0, %v411_v9 }
  0xca   :  { %v384_v11 = vpop.f32.mrf.mxu0  ;;  %v392_v12 = vpop.f32.mrf.mxu1 }
  0xcb   :  { %v162_v13 = vadd.f32 %v384_v11, %v473_v10  ;;  %v194_v14 = vadd.f32 %v392_v12, %v473_v10 }
  0xcc   :  { %v153_v15 = vpop.f32.mrf.mxu0  ;;  %v185_v16 = vpop.f32.mrf.mxu1 }
  0xcd   :  { %v218_v17 = vmax.f32 %v162_v13, 0.0  ;;  %v226_v18 = vmax.f32 %v194_v14, 0.0  ;;  %v154_v19 = vadd.f32 %v473_v10, %v153_v15  ;;  %v186_v20 = vadd.f32 %v473_v10, %v185_v16 }
  0xce   :  { %v385_v21 = vpop.f32.mrf.mxu0  ;;  %v393_v22 = vpop.f32.mrf.mxu1 }
  0xcf   :  { %v354_v23 = vpack.c.bf16 %v218_v17, %v218_v17  ;;  %v362_v24 = vpack.c.bf16 %v226_v18, %v226_v18  ;;  %v216_v25 = vmax.f32 %v154_v19, 0.0  ;;  %v224_v26 = vmax.f32 %v186_v20, 0.0 }
  0xd0   :  { %v165_v27 = vadd.f32 %v385_v21, %v473_v10  ;;  %v197_v28 = vadd.f32 %v393_v22, %v473_v10  ;;  %v156_v29 = vpop.f32.mrf.mxu0  ;;  %v188_v30 = vpop.f32.mrf.mxu1 }
  0xd1   :  { %299 = vst.msk [vmem:[%s558_s3 + $0x8] sm:$0xf] %vm296_vm1, %v354_v23  ;;  %307 = vst.msk [vmem:[%s558_s3 + $0x28] sm:$0xf] %vm296_vm1, %v362_v24  ;;  %v352_v31 = vpack.c.bf16 %v216_v25, %v216_v25  ;;  %v360_v32 = vpack.c.bf16 %v224_v26, %v224_v26  ;;  %v157_v33 = vadd.f32 %v473_v10, %v156_v29 }
  0xd2   :  { %v189_v34 = vadd.f32 %v473_v10, %v188_v30  ;;  %v219_v35 = vmax.f32 %v165_v27, 0.0  ;;  %v227_v36 = vmax.f32 %v197_v28, 0.0  ;;  %v388_v37 = vpop.f32.mrf.mxu0  ;;  %v396_v38 = vpop.f32.mrf.mxu1 }
  0xd3   :  { %297 = vst.msk [vmem:[%s558_s3] sm:$0xf] %vm296_vm1, %v352_v31  ;;  %305 = vst.msk [vmem:[%s558_s3 + $0x20] sm:$0xf] %vm296_vm1, %v360_v32  ;;  %v217_v39 = vmax.f32 %v157_v33, 0.0  ;;  %v178_v41 = vadd.f32 %v388_v37, %v473_v10  ;;  %v210_v42 = vadd.f32 %v396_v38, %v473_v10 }
  0xd4   :  { %v225_v40 = vmax.f32 %v189_v34, 0.0  ;;  %v355_v43 = vpack.c.bf16 %v219_v35, %v219_v35  ;;  %v363_v44 = vpack.c.bf16 %v227_v36, %v227_v36  ;;  %v169_v45 = vpop.f32.mrf.mxu0  ;;  %v201_v46 = vpop.f32.mrf.mxu1 }
  0xd5   :  { %v353_v47 = vpack.c.bf16 %v217_v39, %v217_v39  ;;  %v222_v49 = vmax.f32 %v178_v41, 0.0  ;;  %v230_v50 = vmax.f32 %v210_v42, 0.0  ;;  %v170_v51 = vadd.f32 %v473_v10, %v169_v45 }
  0xd6   :  { %v361_v48 = vpack.c.bf16 %v225_v40, %v225_v40  ;;  %300 = vst.msk [vmem:[%s558_s3 + $0xc] sm:$0xf] %vm296_vm1, %v355_v43  ;;  %308 = vst.msk [vmem:[%s558_s3 + $0x2c] sm:$0xf] %vm296_vm1, %v363_v44  ;;  %v202_v52 = vadd.f32 %v473_v10, %v201_v46  ;;  %v389_v53 = vpop.f32.mrf.mxu0  ;;  %v397_v54 = vpop.f32.mrf.mxu1 }
  0xd7   :  { %298 = vst.msk [vmem:[%s558_s3 + $0x4] sm:$0xf] %vm296_vm1, %v353_v47  ;;  %v358_v55 = vpack.c.bf16 %v222_v49, %v222_v49  ;;  %v366_v56 = vpack.c.bf16 %v230_v50, %v230_v50  ;;  %v181_v57 = vadd.f32 %v389_v53, %v473_v10  ;;  %v213_v58 = vadd.f32 %v397_v54, %v473_v10 }
  0xd8   :  { %306 = vst.msk [vmem:[%s558_s3 + $0x24] sm:$0xf] %vm296_vm1, %v361_v48  ;;  %v220_v59 = vmax.f32 %v170_v51, 0.0  ;;  %v228_v60 = vmax.f32 %v202_v52, 0.0  ;;  %v172_v61 = vpop.f32.mrf.mxu0  ;;  %v204_v62 = vpop.f32.mrf.mxu1 }
  0xd9   :  { %303 = vst.msk [vmem:[%s558_s3 + $0x18] sm:$0xf] %vm296_vm1, %v358_v55  ;;  %311 = vst.msk [vmem:[%s558_s3 + $0x38] sm:$0xf] %vm296_vm1, %v366_v56  ;;  %v223_v63 = vmax.f32 %v181_v57, 0.0  ;;  %v231_v0 = vmax.f32 %v213_v58, 0.0  ;;  %v173_v1 = vadd.f32 %v473_v10, %v172_v61  ;;  %v205_v2 = vadd.f32 %v473_v10, %v204_v62 }
  0xda   :  { %v356_v3 = vpack.c.bf16 %v220_v59, %v220_v59  ;;  %v364_v4 = vpack.c.bf16 %v228_v60, %v228_v60 }
  0xdb   :  { %v359_v5 = vpack.c.bf16 %v223_v63, %v223_v63  ;;  %v367_v6 = vpack.c.bf16 %v231_v0, %v231_v0  ;;  %v221_v7 = vmax.f32 %v173_v1, 0.0  ;;  %v229_v8 = vmax.f32 %v205_v2, 0.0 }
  0xdc   :  { %301 = vst.msk [vmem:[%s558_s3 + $0x10] sm:$0xf] %vm296_vm1, %v356_v3  ;;  %309 = vst.msk [vmem:[%s558_s3 + $0x30] sm:$0xf] %vm296_vm1, %v364_v4 }
  0xdd   :  { %304 = vst.msk [vmem:[%s558_s3 + $0x1c] sm:$0xf] %vm296_vm1, %v359_v5  ;;  %312 = vst.msk [vmem:[%s558_s3 + $0x3c] sm:$0xf] %vm296_vm1, %v367_v6  ;;  %v357_v9 = vpack.c.bf16 %v221_v7, %v221_v7  ;;  %v365_v10 = vpack.c.bf16 %v229_v8, %v229_v8 }
  0xdf   :  { %302 = vst.msk [vmem:[%s558_s3 + $0x14] sm:$0xf] %vm296_vm1, %v357_v9  ;;  %310 = vst.msk [vmem:[%s558_s3 + $0x34] sm:$0xf] %vm296_vm1, %v365_v10 }

// kernel: forward.22
= control target key start
LH: loop header
LB: loop body
LE: loop exit
PB: predicated region body
PF: predicated region fallthrough
CT: control target
= control target key end

     0   :  { %s1674_s12 = smov 0   ;;  %s1996_s0 = inlined_call_operand.vmem [shape: bf16[2,10,10,8], index: 0, kind: input, shape index: {}]   ;;  %s1997_s1 = inlined_call_operand.vmem [shape: bf16[9,8,8], index: 1, kind: input, shape index: {}]   ;;  %s1998_s2 = inlined_call_operand.vmem [shape: f32[1,8], index: 2, kind: input, shape index: {}]   ;;  %s1999_s3 = inlined_call_operand.vmem [shape: bf16[2,64,8], index: 3, kind: output, shape index: {}]  }
   0x1 LB: > { %s1372_s13 = sadd.s32 4294967295, %s1652_s12   ;;  %p1376_p0 = scmp.ge.s32.totalorder %s1652_s12, 1  ;;  %s1652_s12 = sphi %s1674_s12, %s13_s12  }
   0x2   : > { %p137_p1 = scmp.lt.s32.totalorder %s1652_s12, 3 }
   0x4   : > { %p138_p2 = pnand %p1376_p0, %p137_p1 }
   0x5   : > { %p161_p3 = scmp.lt.s32.totalorder (!%p138_p2), %s1372_s13, 1 }
   0x6   : > { %141 = sbr.rel (%p138_p2) target bundleno = 295 (0x127), region = 32 }
   0xb   : > { %v1380_v0 = vld [vmem:[%s1997_s1 + $0xc] sm:$0xf]  ;;  %vm218_vm0 = vcmask 1043456   ;;  %v182_v2 = vld [vmem:[%s1997_s1] sm:$0xf]  ;;  %s2005_s13 = smov (!%p161_p3, %s1372_s13), 1 }
   0xc   : > { %1619 = vmatprep.subr.msk.bf16.mxu1 %vm218_vm0, %v1380_v0  ;;  %1618 = vmatprep.subr.msk.bf16.mxu0 %vm218_vm0, %v1380_v0  ;;  %v220_v1 = vsel %vm218_vm0, %v1380_v0, 0  ;;  %v1397_v3 = vld [vmem:[%s1997_s1 + $0x18] sm:$0xf]  ;;  %v1403_v4 = vld [vmem:[%s1997_s1 + $0x4] sm:$0xf]  ;;  %s1628_s24 = smul.u32 80, %s2005_s13 }
   0xd   : > { %1617 = vmatpush3.bf16.msra.mxu1 %v220_v1  ;;  %1527 = vmatpush3.bf16.msra.mxu0 %v220_v1  ;;  %v1412_v5 = vld [vmem:[%s1997_s1 + $0x10] sm:$0xf]  ;;  %vm205_vm1 = vcmask 64512   ;;  %v306_v6 = vsel %vm218_vm0, %v182_v2, 0  ;;  %v382_v7 = vsel %vm218_vm0, %v1397_v3, 0  ;;  %v1713_v8 = vsel %vm218_vm0, %v1403_v4, 0 }
   0xe   : > { %1620 = vmatprep.subr.msk.bf16.mxu1 %vm218_vm0, %v182_v2  ;;  %1621 = vmatprep.subr.msk.bf16.mxu0 %vm218_vm0, %v1397_v3  ;;  %s1708_s27 = scalar_lea.vmem %s1996_s0, %s1628_s24  ;;  %v1716_v9 = vsel %vm218_vm0, %v1412_v5, 0  ;;  %vm477_vm2 = vsmask.f32 3328  ;;  %vm478_vm3 = vsmask.f32 7440  ;;  %vm930_vm5 = vcmask 1042432  }
   0xf   : > { %v172_v10 = vld [vmem:[%s1708_s27] sm:$0xf]  ;;  %v173_v11 = vld [vmem:[%s1708_s27 + $0x8] sm:$0xf]  ;;  %v174_v12 = vld [vmem:[%s1708_s27 + $0x10] sm:$0xf] }
  0x10   : > { %v175_v13 = vld [vmem:[%s1708_s27 + $0x18] sm:$0xf]  ;;  %v1381_v14 = vcombine.low %v173_v11, %v174_v12  ;;  %v176_v15 = vld [vmem:[%s1708_s27 + $0x20] sm:$0xf]  ;;  %v177_v16 = vld [vmem:[%s1708_s27 + $0x28] sm:$0xf]  ;;  %v1389_v22 = vcombine.low %v172_v10, %v173_v11 }
  0x11   : > { %v1724_v17 = vcombine.low %v174_v12, %v175_v13  ;;  %v178_v18 = vld [vmem:[%s1708_s27 + $0x30] sm:$0xf]  ;;  %v179_v19 = vld [vmem:[%s1708_s27 + $0x38] sm:$0xf]  ;;  %v1729_v20 = vld [vmem:[%s1708_s27 + $0x40] sm:$0xf]  ;;  %v1382_v21 = vcombine.low %v175_v13, %v176_v15  ;;  %v1391_v40 = vcombine.low %v176_v15, %v177_v16 }
  0x12   : > { %1528 = vmatprep.mubr.msk.bf16.mxu0 %vm205_vm1, %v1381_v14  ;;  %v1383_v23 = vcombine.low %v177_v16, %v178_v18  ;;  %v1384_v24 = vcombine.low %v179_v19, %v1729_v20  ;;  %v457_v25 = vld [vmem:[%s1708_s27] sm:$0xf]  ;;  %v1735_v26 = vld [vmem:[%s1708_s27 + $0x4] sm:$0x1]  ;;  %v459_v27 = vld [vmem:[%s1708_s27 + $0x8] sm:$0xf]  ;;  %v1753_v41 = vcombine.low %v178_v18, %v179_v19 }
  0x13   : > { %1529 = vmatmul.mubr.msk.bf16.vlgmr.msra.gmra.mxu0 %vm205_vm1, %v1382_v21  ;;  %v1740_v28 = vld [vmem:[%s1708_s27 + $0xc] sm:$0x1]  ;;  %v481_v29 = vshrl.u32 %v457_v25, 16  ;;  %v484_v30 = vshll.u32 %v457_v25, 16  ;;  %v490_v31 = vshll.u32 %v1735_v26, 16  ;;  %v495_v32 = vshrl.u32 %v459_v27, 16  ;;  %vm1772_vm4 = vmor %vm477_vm2, %vm478_vm3 }
  0x14   : > { %1532 = vmatprep.mubr.msk.bf16.mxu1 %vm205_vm1, %v1383_v23  ;;  %1547 = vmatpush3.bf16.msra.mxu0 %v382_v7  ;;  %v498_v33 = vshll.u32 %v459_v27, 16  ;;  %v504_v34 = vshll.u32 %v1740_v28, 16  ;;  %v461_v35 = vld [vmem:[%s1708_s27 + $0x10] sm:$0xf]  ;;  %v1750_v38 = vld [vmem:[%s1708_s27 + $0x14] sm:$0x1] }
  0x15   : > { %1533 = vmatmul.mubr.msk.bf16.vlgmr.msra.gmra.mxu1 %vm205_vm1, %v1384_v24  ;;  %1548 = vmatprep.mubr.msk.bf16.mxu0 %vm205_vm1, %v1724_v17  ;;  %v483_v36 = vrot.slane %v481_v29, 4  ;;  %v486_v37 = vrot.slane %v484_v30, 5  ;;  %v463_v39 = vld [vmem:[%s1708_s27 + $0x18] sm:$0xf]  ;;  %v497_v42 = vrot.slane %v495_v32, 4  ;;  %v492_v46 = vrot.slane %v490_v31, 5 }
  0x16   : > { %1537 = vmatpush3.bf16.msra.mxu1 %v306_v6  ;;  %1538 = vmatprep.mubr.msk.bf16.mxu1 %vm205_vm1, %v1389_v22  ;;  %v500_v43 = vrot.slane %v498_v33, 5  ;;  %v1757_v44 = vld [vmem:[%s1708_s27 + $0x1c] sm:$0x1]  ;;  %v509_v47 = vshrl.u32 %v461_v35, 16  ;;  %v512_v48 = vshll.u32 %v461_v35, 16  ;;  %v518_v52 = vshll.u32 %v1750_v38, 16 }
  0x17   : > { %1622 = vmatprep.subr.msk.bf16.mxu1 %vm218_vm0, %v1403_v4  ;;  %1623 = vmatprep.subr.msk.bf16.mxu0 %vm218_vm0, %v1412_v5  ;;  %v487_v45 = vor.u32 %v486_v37, %v483_v36  ;;  %v1437_v49 = vld [vmem:[%s1997_s1 + $0x8] sm:$0xf]  ;;  %v465_v51 = vld [vmem:[%s1708_s27 + $0x20] sm:$0xf]  ;;  %v523_v53 = vshrl.u32 %v463_v39, 16  ;;  %v526_v54 = vshll.u32 %v463_v39, 16 }
  0x18   : > { %v501_v50 = vor.u32 %v500_v43, %v497_v42  ;;  %v506_v55 = vrot.slane %v504_v34, 5  ;;  %v1767_v56 = vld [vmem:[%s1708_s27 + $0x24] sm:$0x1]  ;;  %v511_v57 = vrot.slane %v509_v47, 4  ;;  %v514_v58 = vrot.slane %v512_v48, 5  ;;  %s1472_s11 = sshll.u32 %s2005_s13, 5 }
  0x19   : > { %v532_v59 = vshll.u32 %v1757_v44, 16  ;;  %v488_v61 = vrot.slane %v487_v45, 4  ;;  %v525_v63 = vrot.slane %v523_v53, 4  ;;  %v528_v0 = vrot.slane %v526_v54, 5  ;;  %v1779_v1 = vld [vmem:[%s1997_s1 + $0x1c] sm:$0xf]  ;;  %s1967_s15 = scalar_lea.vmem %s1999_s3, %s1472_s11 }
  0x1a   : > { %v502_v62 = vrot.slane %v501_v50, 4  ;;  %v181_v2 = vld [vmem:[%s1708_s27 + $0x48] sm:$0xf]  ;;  %v515_v3 = vor.u32 %v514_v58, %v511_v57  ;;  %v520_v4 = vrot.slane %v518_v52, 5  ;;  %v537_v5 = vshrl.u32 %v465_v51, 16 }
  0x1b   : > { %1549 = vmatmul.mubr.msk.bf16.vlgmr.msra.gmra.mxu0 %vm205_vm1, %v1391_v40  ;;  %v1784_v6 = vsel %vm218_vm0, %v1437_v49, 0  ;;  %v529_v7 = vor.u32 %v528_v0, %v525_v63  ;;  %v540_v10 = vshll.u32 %v465_v51, 16  ;;  %v546_v11 = vshll.u32 %v1767_v56, 16  ;;  %v467_v12 = vld [vmem:[%s1708_s27 + $0x28] sm:$0xf] }
  0x1c   : > { %1567 = vmatpush3.bf16.msra.mxu0 %v1716_v9  ;;  %1552 = vmatprep.mubr.msk.bf16.mxu0 %vm205_vm1, %v1753_v41  ;;  %v1792_v13 = vld [vmem:[%s1708_s27 + $0x2c] sm:$0x1]  ;;  %v507_v14 = vsel %vm1772_vm4, %v502_v62, %v506_v55  ;;  %v516_v15 = vrot.slane %v515_v3, 4  ;;  %v534_v16 = vrot.slane %v532_v59, 5  ;;  %v539_v9 = vrot.slane %v537_v5, 4 }
  0x1d   : > { %1539 = vmatmul.mubr.msk.bf16.vlgmr.msra.gmra.mxu1 %vm205_vm1, %v1724_v17  ;;  %1625 = vmatprep.subr.msk.bf16.mxu0 %vm218_vm0, %v1437_v49  ;;  %v469_v18 = vld [vmem:[%s1708_s27 + $0x30] sm:$0xf]  ;;  %v1398_v19 = vcombine.low %v1729_v20, %v181_v2  ;;  %v493_v17 = vsel %vm1772_vm4, %v488_v61, %v492_v46  ;;  %v530_v21 = vrot.slane %v529_v7, 4  ;;  %v542_v22 = vrot.slane %v540_v10, 5  ;;  %v1811_v27 = vld [vmem:[%s1708_s27 + $0x34] sm:$0x1] }
  0x1e   : > { %1557 = vmatpush3.bf16.msra.mxu1 %v1713_v8  ;;  %1542 = vmatprep.mubr.msk.bf16.mxu1 %vm205_vm1, %v1391_v40  ;;  %v521_v23 = vsel %vm1772_vm4, %v516_v15, %v520_v4  ;;  %v551_v24 = vshrl.u32 %v467_v12, 16  ;;  %v554_v8 = vshll.u32 %v467_v12, 16  ;;  %v560_v25 = vshll.u32 %v1792_v13, 16  ;;  %v471_v32 = vld [vmem:[%s1708_s27 + $0x38] sm:$0xf] }
  0x1f   : > { %1624 = vmatprep.subr.msk.bf16.mxu1 %vm218_vm0, %v1779_v1  ;;  %vm931_vm6 = vcmask 1046532   ;;  %v543_v20 = vor.u32 %v542_v22, %v539_v9  ;;  %v548_v29 = vrot.slane %v546_v11, 5  ;;  %v1413_v30 = vcombine.low %v507_v14, %v521_v23  ;;  %v1817_v37 = vld [vmem:[%s1708_s27 + $0x3c] sm:$0x1]  ;;  %v473_v39 = vld [vmem:[%s1708_s27 + $0x40] sm:$0xf] }
  0x20   : > { %v565_v31 = vshrl.u32 %v469_v18, 16  ;;  %v1404_v33 = vcombine.low %v493_v17, %v507_v14  ;;  %v535_v34 = vsel %vm1772_vm4, %v530_v21, %v534_v16  ;;  %v553_v35 = vrot.slane %v551_v24, 4  ;;  %v1827_v53 = vld [vmem:[%s1708_s27 + $0x44] sm:$0x1]  ;;  %v900_v61 = vld [vmem:[%s1708_s27] sm:$0xe]  ;;  %vm1847_vm7 = vmor %vm930_vm5, %vm931_vm6 }
  0x21   : > { %v556_v36 = vrot.slane %v554_v8, 5  ;;  %v544_v40 = vrot.slane %v543_v20, 4  ;;  %v568_v43 = vshll.u32 %v469_v18, 16  ;;  %v574_v45 = vshll.u32 %v1811_v27, 16  ;;  %v901_v3 = vld [vmem:[%s1708_s27 + $0x8] sm:$0xe] }
  0x22   : > { %v567_v42 = vrot.slane %v565_v31, 4  ;;  %v562_v47 = vrot.slane %v560_v25, 5  ;;  %v579_v48 = vshrl.u32 %v471_v32, 16  ;;  %v582_v49 = vshll.u32 %v471_v32, 16  ;;  %v1446_v24 = vld [vmem:[%s1997_s1 + $0x14] sm:$0xf] }
  0x23   : > { %1553 = vmatmul.mubr.msk.bf16.gmra.mxu0 %vm205_vm1, %v1398_v19  ;;  %v557_v46 = vor.u32 %v556_v36, %v553_v35  ;;  %v549_v50 = vsel %vm1772_vm4, %v544_v40, %v548_v29  ;;  %v570_v51 = vrot.slane %v568_v43, 5  ;;  %v588_v52 = vshll.u32 %v1817_v37, 16  ;;  %v1455_v20 = vld [vmem:[%s1997_s1 + $0x20] sm:$0xf]  ;;  %v475_v29 = vld [vmem:[%s1708_s27 + $0x48] sm:$0xf] }
  0x24   : > { %1568 = vmatprep.mubr.msk.bf16.mxu0 %vm205_vm1, %v1413_v30  ;;  %v593_v54 = vshrl.u32 %v473_v39, 16  ;;  %v1831_v55 = vcombine.low %v521_v23, %v535_v34  ;;  %v581_v58 = vrot.slane %v579_v48, 4  ;;  %v584_v59 = vrot.slane %v582_v49, 5  ;;  %v902_v30 = vld [vmem:[%s1708_s27 + $0x10] sm:$0xe] }
  0x25   : > { %1543 = vmatmul.mubr.msk.bf16.gmra.mxu1 %vm205_vm1, %v1753_v41  ;;  %v558_v57 = vrot.slane %v557_v46, 4  ;;  %v571_v62 = vor.u32 %v570_v51, %v567_v42  ;;  %v576_v63 = vrot.slane %v574_v45, 5  ;;  %v596_v2 = vshll.u32 %v473_v39, 16  ;;  %v903_v31 = vld [vmem:[%s1708_s27 + $0x18] sm:$0xe] }
  0x26   : > { %1558 = vmatprep.mubr.msk.bf16.mxu1 %vm205_vm1, %v1404_v33  ;;  %v595_v0 = vrot.slane %v593_v54, 4  ;;  %v1414_v4 = vcombine.low %v535_v34, %v549_v50  ;;  %v585_v7 = vor.u32 %v584_v59, %v581_v58  ;;  %v602_v41 = vshll.u32 %v1827_v53, 16  ;;  %v904_v34 = vld [vmem:[%s1708_s27 + $0x20] sm:$0xe]  ;;  %v905_v35 = vld [vmem:[%s1708_s27 + $0x28] sm:$0xe] }
  0x27   : > { %v563_v5 = vsel %vm1772_vm4, %v558_v57, %v562_v47  ;;  %v572_v10 = vrot.slane %v571_v62, 4  ;;  %v590_v11 = vrot.slane %v588_v52, 5  ;;  %v598_v12 = vrot.slane %v596_v2, 5  ;;  %v476_v52 = vld [vmem:[%s1708_s27 + $0x4c] sm:$0x1] }
  0x28   : > { %v1427_v14 = vrot.slane %v900_v61, 9  ;;  %v586_v15 = vrot.slane %v585_v7, 4  ;;  %v935_v16 = vrot.slane %v1735_v26, 5  ;;  %v1428_v9 = vrot.slane %v901_v3, 9  ;;  %v906_v58 = vld [vmem:[%s1708_s27 + $0x30] sm:$0xe] }
  0x29   : > { %v939_v18 = vrot.slane %v1740_v28, 5  ;;  %v1841_v19 = vcombine.low %v549_v50, %v563_v5  ;;  %v577_v17 = vsel %vm1772_vm4, %v572_v10, %v576_v63  ;;  %v599_v21 = vor.u32 %v598_v12, %v595_v0  ;;  %v907_v59 = vld [vmem:[%s1708_s27 + $0x38] sm:$0xe] }
  0x2a   : > { %v604_v22 = vrot.slane %v602_v41, 5  ;;  %v825_v26 = vsel %vm218_vm0, %v1779_v1, 0  ;;  %v1415_v28 = vcombine.low %v563_v5, %v577_v17  ;;  %v591_v8 = vsel %vm1772_vm4, %v586_v15, %v590_v11 }
  0x2b   : > { %1569 = vmatmul.mubr.msk.bf16.vlgmr.msra.gmra.mxu0 %vm205_vm1, %v1414_v4  ;;  %v600_v25 = vrot.slane %v599_v21, 4  ;;  %v936_v1 = vsel %vm1847_vm7, %v1427_v14, %v935_v16  ;;  %v943_v32 = vrot.slane %v1750_v38, 5  ;;  %v947_v36 = vrot.slane %v1757_v44, 5  ;;  %v908_v16 = vld [vmem:[%s1708_s27 + $0x40] sm:$0xe] }
  0x2c   : > { %1587 = vmatpush3.bf16.msra.mxu0 %v1784_v6  ;;  %1572 = vmatprep.mubr.msk.bf16.mxu0 %vm205_vm1, %v1415_v28  ;;  %v1871_v6 = vsel %vm1847_vm7, %v1428_v9, %v939_v18  ;;  %v607_v40 = vshrl.u32 %v475_v29, 16  ;;  %v610_v42 = vshll.u32 %v475_v29, 16  ;;  %v1407_v38 = vcombine.low %v577_v17, %v591_v8  ;;  %v909_v9 = vld [vmem:[%s1708_s27 + $0x48] sm:$0xe] }
  0x2d   : > { %1559 = vmatmul.mubr.msk.bf16.vlgmr.msra.gmra.mxu1 %vm205_vm1, %v1831_v55  ;;  %v605_v33 = vsel %vm1772_vm4, %v600_v25, %v604_v22  ;;  %1627 = vmatprep.subr.msk.bf16.mxu0 %vm218_vm0, %v1455_v20  ;;  %v1438_v43 = vcombine.low %v936_v1, %v1871_v6  ;;  %v1429_v45 = vrot.slane %v902_v30, 9  ;;  %v1430_v46 = vrot.slane %v903_v31, 9 }
  0x2e   : > { %1577 = vmatpush3.bf16.msra.mxu1 %v825_v26  ;;  %1562 = vmatprep.mubr.msk.bf16.mxu1 %vm205_vm1, %v1841_v19  ;;  %v1416_v39 = vcombine.low %v591_v8, %v605_v33  ;;  %v1431_v47 = vrot.slane %v904_v34, 9  ;;  %v951_v48 = vrot.slane %v1767_v56, 5  ;;  %v1432_v49 = vrot.slane %v905_v35, 9 }
  0x2f   : > { %1626 = vmatprep.subr.msk.bf16.mxu1 %vm218_vm0, %v1446_v24  ;;  %v955_v44 = vrot.slane %v1792_v13, 5  ;;  %v609_v50 = vrot.slane %v607_v40, 4  ;;  %v612_v51 = vrot.slane %v610_v42, 5  ;;  %v944_v54 = vsel %vm1847_vm7, %v1429_v45, %v943_v32 }
  0x30   : > { %v948_v57 = vsel %vm1847_vm7, %v1430_v46, %v947_v36  ;;  %v952_v56 = vsel %vm1847_vm7, %v1431_v47, %v951_v48  ;;  %v616_v62 = vshll.u32 %v476_v52, 16  ;;  %v1433_v0 = vrot.slane %v906_v58, 9 }
  0x31   : > { %v956_v13 = vsel %vm1847_vm7, %v1432_v49, %v955_v44  ;;  %v613_v61 = vor.u32 %v612_v51, %v609_v50  ;;  %v1439_v63 = vcombine.low %v944_v54, %v948_v57  ;;  %v959_v3 = vrot.slane %v1811_v27, 5 }
  0x32   : > { %v1440_v2 = vcombine.low %v952_v56, %v956_v13  ;;  %v1434_v4 = vrot.slane %v907_v59, 9  ;;  %v963_v5 = vrot.slane %v1817_v37, 5  ;;  %v1178_v7 = vsel %vm218_vm0, %v1455_v20, 0 }
  0x33   : > { %1573 = vmatmul.mubr.msk.bf16.gmra.mxu0 %vm205_vm1, %v1416_v39  ;;  %v614_v41 = vrot.slane %v613_v61, 4  ;;  %v618_v10 = vrot.slane %v616_v62, 5  ;;  %v1095_v11 = vsel %vm218_vm0, %v1446_v24, 0  ;;  %v1447_v15 = vcombine.low %v1871_v6, %v944_v54 }
  0x34   : > { %1588 = vmatprep.mubr.msk.bf16.mxu0 %vm205_vm1, %v1438_v43  ;;  %v964_v27 = vsel %vm1847_vm7, %v1434_v4, %v963_v5  ;;  %v1435_v18 = vrot.slane %v908_v16, 9  ;;  %v1436_v17 = vrot.slane %v909_v9, 9  ;;  %v971_v60 = vrot.slane %v476_v52, 5 }
  0x35   : > { %1563 = vmatmul.mubr.msk.bf16.gmra.mxu1 %vm205_vm1, %v1407_v38  ;;  %v619_v37 = vsel %vm1772_vm4, %v614_v41, %v618_v10  ;;  %v1448_v21 = vcombine.low %v948_v57, %v952_v56  ;;  %vm1308_vm8 = vcmask 60416  }
  0x36   : > { %1578 = vmatprep.mubr.msk.bf16.mxu1 %vm205_vm1, %v1831_v55  ;;  %v960_v55 = vsel %vm1847_vm7, %v1433_v0, %v959_v3  ;;  %v1422_v14 = vcombine.low %v605_v33, %v619_v37  ;;  %v972_v28 = vsel %vm1847_vm7, %v1436_v17, %v971_v60 }
  0x37   : > { %v1441_v12 = vcombine.low %v960_v55, %v964_v27  ;;  %v1449_v22 = vcombine.low %v956_v13, %v960_v55 }
  0x3b   : > { %1589 = vmatmul.mubr.msk.bf16.vlgmr.msra.gmra.mxu0 %vm205_vm1, %v1439_v63 }
  0x3c   : > { %1607 = vmatpush3.bf16.msra.mxu0 %v1178_v7  ;;  %1592 = vmatprep.mubr.msk.bf16.mxu0 %vm205_vm1, %v1440_v2 }
  0x3d   : > { %1579 = vmatmul.mubr.msk.bf16.vlgmr.msra.gmra.mxu1 %vm205_vm1, %v1841_v19  ;;  %v967_v19 = vrot.slane %v1827_v53, 5 }
  0x3e   : > { %1597 = vmatpush3.bf16.msra.mxu1 %v1095_v11  ;;  %1582 = vmatprep.mubr.msk.bf16.mxu1 %vm205_vm1, %v1407_v38 }
  0x3f   : > { %v968_v26 = vsel %vm1847_vm7, %v1435_v18, %v967_v19 }
  0x40   : > { %v1456_v24 = vcombine.low %v968_v26, %v972_v28  ;;  %v1450_v53 = vcombine.low %v964_v27, %v968_v26 }
  0x43   : > { %1593 = vmatmul.mubr.msk.bf16.gmra.mxu0 %vm205_vm1, %v1441_v12 }
  0x44   : > { %1608 = vmatprep.mubr.msk.bf16.mxu0 %vm205_vm1, %v1439_v63 }
  0x45   : > { %1583 = vmatmul.mubr.msk.bf16.gmra.mxu1 %vm205_vm1, %v1422_v14 }
  0x46   : > { %1598 = vmatprep.mubr.msk.bf16.mxu1 %vm205_vm1, %v1447_v15 }
  0x4b   : > { %1609 = vmatmul.mubr.msk.bf16.vlgmr.msra.gmra.mxu0 %vm205_vm1, %v1440_v2 }
  0x4c   : > { %1612 = vmatprep.mubr.msk.bf16.mxu0 %vm205_vm1, %v1441_v12 }
  0x4d   : > { %1599 = vmatmul.mubr.msk.bf16.vlgmr.msra.gmra.mxu1 %vm205_vm1, %v1448_v21 }
  0x4e   : > { %1602 = vmatprep.mubr.msk.bf16.mxu1 %vm205_vm1, %v1449_v22 }
  0x53   : > { %1613 = vmatmul.mubr.msk.bf16.gmra.mxu0 %vm205_vm1, %v1456_v24 }
  0x55   : > { %1603 = vmatmul.mubr.msk.bf16.gmra.mxu1 %vm205_vm1, %v1450_v53 }
  0xd3   : > { %v1530_v8 = vpop.f32.mrf.mxu0 }
  0xd5   : > { %v1534_v25 = vpop.f32.mrf.mxu1  ;;  %v256_v20 = vpop.f32.mrf.mxu0 }
  0xd7   : > { %v272_v29 = vpop.f32.mrf.mxu1  ;;  %v1531_v1 = vpop.f32.mrf.mxu0 }
  0xd9   : > { %v1535_v6 = vpop.f32.mrf.mxu1  ;;  %v259_v30 = vpop.f32.mrf.mxu0 }
  0xdb   : > { %v1937_v31 = vpop.f32.mrf.mxu1  ;;  %v1550_v23 = vpop.f32.mrf.mxu0 }
  0xdd   : > { %v1540_v32 = vpop.f32.mrf.mxu1  ;;  %v418_v33 = vpop.f32.mrf.mxu0 }
  0xde   : > { %v351_v5 = vadd.f32 %v1540_v32, %v1530_v8 }
  0xdf   : > { %v342_v34 = vpop.f32.mrf.mxu1  ;;  %v1551_v35 = vpop.f32.mrf.mxu0 }
  0xe0   : > { %v343_v10 = vadd.f32 %v342_v34, %v256_v20  ;;  %v451_v27 = vadd.f32 %v1550_v23, %v351_v5 }
  0xe1   : > { %v1541_v36 = vpop.f32.mrf.mxu1  ;;  %v421_v39 = vpop.f32.mrf.mxu0 }
  0xe2   : > { %v354_v37 = vadd.f32 %v1541_v36, %v1531_v1  ;;  %v449_v15 = vadd.f32 %v418_v33, %v343_v10 }
  0xe3   : > { %v345_v40 = vpop.f32.mrf.mxu1  ;;  %v1554_v42 = vpop.f32.mrf.mxu0 }
  0xe4   : > { %v346_v16 = vadd.f32 %v345_v40, %v259_v30  ;;  %v452_v17 = vadd.f32 %v1551_v35, %v354_v37 }
  0xe5   : > { %v1544_v38 = vpop.f32.mrf.mxu1  ;;  %v434_v43 = vpop.f32.mrf.mxu0 }
  0xe6   : > { %v367_v21 = vadd.f32 %v1544_v38, %v1534_v25  ;;  %v450_v24 = vadd.f32 %v421_v39, %v346_v16 }
  0xe7   : > { %v358_v45 = vpop.f32.mrf.mxu1  ;;  %v1555_v46 = vpop.f32.mrf.mxu0 }
  0xe8   : > { %v359_v22 = vadd.f32 %v358_v45, %v272_v29  ;;  %v455_v34 = vadd.f32 %v1554_v42, %v367_v21 }
  0xe9   : > { %v1545_v47 = vpop.f32.mrf.mxu1  ;;  %v1939_v48 = vpop.f32.mrf.mxu0 }
  0xea   : > { %v370_v20 = vadd.f32 %v1545_v47, %v1535_v6  ;;  %v453_v36 = vadd.f32 %v434_v43, %v359_v22 }
  0xeb   : > { %v361_v49 = vpop.f32.mrf.mxu1  ;;  %v1570_v44 = vpop.f32.mrf.mxu0 }
  0xec   : > { %v362_v40 = vadd.f32 %v361_v49, %v1937_v31  ;;  %v456_v38 = vadd.f32 %v1555_v46, %v370_v20  ;;  %v1956_v46 = vld [vmem:[%s1998_s2] ss:$0 sm:$0xff] }
  0xed   : > { %v1560_v50 = vpop.f32.mrf.mxu1  ;;  %v778_v51 = vpop.f32.mrf.mxu0 }
  0xee   : > { %v716_v9 = vadd.f32 %v1560_v50, %v451_v27 }
  0xef   : > { %v683_v52 = vpop.f32.mrf.mxu1  ;;  %v1571_v54 = vpop.f32.mrf.mxu0 }
  0xf0   : > { %v714_v60 = vadd.f32 %v683_v52, %v449_v15  ;;  %v811_v53 = vadd.f32 %v1570_v44, %v716_v9 }
  0xf1   : > { %v1561_v57 = vpop.f32.mrf.mxu1  ;;  %v781_v58 = vpop.f32.mrf.mxu0 }
  0xf2   : > { %v717_v8 = vadd.f32 %v1561_v57, %v452_v17  ;;  %v809_v32 = vadd.f32 %v778_v51, %v714_v60  ;;  %v454_v51 = vadd.f32 %v1939_v48, %v362_v40 }
  0xf3   : > { %v686_v56 = vpop.f32.mrf.mxu1  ;;  %v1574_v13 = vpop.f32.mrf.mxu0 }
  0xf4   : > { %v715_v33 = vadd.f32 %v686_v56, %v450_v24  ;;  %v812_v25 = vadd.f32 %v1571_v54, %v717_v8 }
  0xf5   : > { %v1564_v59 = vpop.f32.mrf.mxu1  ;;  %v794_v61 = vpop.f32.mrf.mxu0 }
  0xf6   : > { %v720_v39 = vadd.f32 %v1564_v59, %v455_v34  ;;  %v810_v47 = vadd.f32 %v781_v58, %v715_v33 }
  0xf7   : > { %v699_v62 = vpop.f32.mrf.mxu1  ;;  %v1941_v63 = vpop.f32.mrf.mxu0 }
  0xf8   : > { %v718_v45 = vadd.f32 %v699_v62, %v453_v36 }
  0xf9   : > { %v1565_v0 = vpop.f32.mrf.mxu1  ;;  %v1943_v2 = vpop.f32.mrf.mxu0 }
  0xfa   : > { %v721_v56 = vadd.f32 %v1565_v0, %v456_v38  ;;  %v813_v54 = vadd.f32 %v794_v61, %v718_v45 }
  0xfb   : > { %v702_v3 = vpop.f32.mrf.mxu1  ;;  %v1590_v4 = vpop.f32.mrf.mxu0 }
  0xfc   : > { %v719_v10 = vadd.f32 %v702_v3, %v454_v51  ;;  %v816_v0 = vadd.f32 %v1941_v63, %v721_v56 }
  0xfd   : > { %v1580_v7 = vpop.f32.mrf.mxu1  ;;  %v1036_v41 = vpop.f32.mrf.mxu0 }
  0xfe   : > { %v894_v30 = vadd.f32 %v1580_v7, %v811_v53  ;;  %v815_v7 = vadd.f32 %v1574_v13, %v720_v39  ;;  %v814_v15 = vadd.f32 %v1943_v2, %v719_v10 }
  0xff   : > { %v861_v11 = vpop.f32.mrf.mxu1  ;;  %v1591_v55 = vpop.f32.mrf.mxu0 }
 0x100   : > { %v892_v29 = vadd.f32 %v861_v11, %v809_v32  ;;  %v1069_v52 = vadd.f32 %v1590_v4, %v894_v30 }
 0x101   : > { %v1581_v12 = vpop.f32.mrf.mxu1  ;;  %v1039_v14 = vpop.f32.mrf.mxu0 }
 0x102   : > { %v895_v57 = vadd.f32 %v1581_v12, %v812_v25  ;;  %v1067_v5 = vadd.f32 %v1036_v41, %v892_v29 }
 0x103   : > { %v864_v18 = vpop.f32.mrf.mxu1  ;;  %v1945_v19 = vpop.f32.mrf.mxu0 }
 0x104   : > { %v893_v31 = vadd.f32 %v864_v18, %v810_v47  ;;  %v1070_v62 = vadd.f32 %v1591_v55, %v895_v57 }
 0x105   : > { %v1584_v26 = vpop.f32.mrf.mxu1  ;;  %v1052_v28 = vpop.f32.mrf.mxu0 }
 0x106   : > { %v898_v11 = vadd.f32 %v1584_v26, %v815_v7  ;;  %v1068_v12 = vadd.f32 %v1039_v14, %v893_v31 }
 0x107   : > { %v877_v23 = vpop.f32.mrf.mxu1  ;;  %v1947_v1 = vpop.f32.mrf.mxu0 }
 0x108   : > { %v896_v41 = vadd.f32 %v877_v23, %v813_v54  ;;  %v1073_v21 = vadd.f32 %v1945_v19, %v898_v11 }
 0x109   : > { %v1585_v35 = vpop.f32.mrf.mxu1  ;;  %v1950_v50 = vpop.f32.mrf.mxu0 }
 0x10a   : > { %v899_v16 = vadd.f32 %v1585_v35, %v816_v0  ;;  %v1071_v22 = vadd.f32 %v1052_v28, %v896_v41 }
 0x10b   : > { %v880_v44 = vpop.f32.mrf.mxu1  ;;  %v1610_v6 = vpop.f32.mrf.mxu0 }
 0x10c   : > { %v897_v26 = vadd.f32 %v880_v44, %v814_v15  ;;  %v1074_v23 = vadd.f32 %v1947_v1, %v899_v16 }
 0x10d   : > { %v1600_v42 = vpop.f32.mrf.mxu1  ;;  %v1214_v43 = vpop.f32.mrf.mxu0 }
 0x10e   : > { %v1164_v49 = vadd.f32 %v1600_v42, %v1069_v52  ;;  %v1072_v36 = vadd.f32 %v1950_v50, %v897_v26 }
 0x10f   : > { %v1131_v58 = vpop.f32.mrf.mxu1  ;;  %v1611_v59 = vpop.f32.mrf.mxu0 }
 0x110   : > { %v1247_v4 = vadd.f32 %v1610_v6, %v1164_v49  ;;  %v1162_v48 = vadd.f32 %v1131_v58, %v1067_v5 }
 0x111   : > { %v1601_v27 = vpop.f32.mrf.mxu1  ;;  %v1217_v37 = vpop.f32.mrf.mxu0 }
 0x112   : > { %v1262_v13 = vadd.f32 %v1956_v46, %v1247_v4  ;;  %v1245_v61 = vadd.f32 %v1214_v43, %v1162_v48  ;;  %v1165_v3 = vadd.f32 %v1601_v27, %v1070_v62 }
 0x113   : > { %v1134_v9 = vpop.f32.mrf.mxu1  ;;  %v1614_v18 = vpop.f32.mrf.mxu0 }
 0x114   : > { %v1270_v55 = vmax.f32 %v1262_v13, 0.0  ;;  %v1260_v17 = vadd.f32 %v1956_v46, %v1245_v61  ;;  %v1248_v60 = vadd.f32 %v1611_v59, %v1165_v3  ;;  %v1163_v63 = vadd.f32 %v1134_v9, %v1068_v12 }
 0x115   : > { %v1604_v2 = vpop.f32.mrf.mxu1  ;;  %v1230_v14 = vpop.f32.mrf.mxu0 }
 0x116   : > { %v1475_v24 = vpack.c.bf16 %v1270_v55, %v1270_v55  ;;  %v1268_v53 = vmax.f32 %v1260_v17, 0.0  ;;  %v1263_v8 = vadd.f32 %v1956_v46, %v1248_v60  ;;  %v1246_v20 = vadd.f32 %v1217_v37, %v1163_v63 }
 0x117   : > { %v1168_v19 = vadd.f32 %v1604_v2, %v1073_v21  ;;  %v1147_v28 = vpop.f32.mrf.mxu1  ;;  %v1615_v25 = vpop.f32.mrf.mxu0 }
 0x118   : > { %1311 = vst.msk [vmem:[%s1967_s15 + $0x8] sm:$0xf] %vm1308_vm8, %v1475_v24  ;;  %v1473_v32 = vpack.c.bf16 %v1268_v53, %v1268_v53  ;;  %v1271_v33 = vmax.f32 %v1263_v8, 0.0  ;;  %v1261_v30 = vadd.f32 %v1956_v46, %v1246_v20  ;;  %v1166_v34 = vadd.f32 %v1147_v28, %v1071_v22 }
 0x119   : > { %v1251_v40 = vadd.f32 %v1614_v18, %v1168_v19  ;;  %v1605_v35 = vpop.f32.mrf.mxu1  ;;  %v1233_v51 = vpop.f32.mrf.mxu0 }
 0x11a   : > { %1309 = vst.msk [vmem:[%s1967_s15] sm:$0xf] %vm1308_vm8, %v1473_v32  ;;  %v1476_v29 = vpack.c.bf16 %v1271_v33, %v1271_v33  ;;  %v1269_v1 = vmax.f32 %v1261_v30, 0.0  ;;  %v1249_v38 = vadd.f32 %v1230_v14, %v1166_v34  ;;  %v1169_v39 = vadd.f32 %v1605_v35, %v1074_v23 }
 0x11b   : > { %v1266_v45 = vadd.f32 %v1956_v46, %v1251_v40  ;;  %v1150_v44 = vpop.f32.mrf.mxu1 }
 0x11c   : > { %1312 = vst.msk [vmem:[%s1967_s15 + $0xc] sm:$0xf] %vm1308_vm8, %v1476_v29  ;;  %v1474_v6 = vpack.c.bf16 %v1269_v1, %v1269_v1  ;;  %v1264_v50 = vadd.f32 %v1956_v46, %v1249_v38  ;;  %v1252_v47 = vadd.f32 %v1615_v25, %v1169_v39  ;;  %v1167_v52 = vadd.f32 %v1150_v44, %v1072_v36 }
 0x11d   : > { %v1274_v57 = vmax.f32 %v1266_v45, 0.0 }
 0x11e   : > { %1310 = vst.msk [vmem:[%s1967_s15 + $0x4] sm:$0xf] %vm1308_vm8, %v1474_v6  ;;  %v1272_v56 = vmax.f32 %v1264_v50, 0.0  ;;  %v1267_v42 = vadd.f32 %v1956_v46, %v1252_v47  ;;  %v1250_v43 = vadd.f32 %v1233_v51, %v1167_v52 }
 0x11f   : > { %v1479_v5 = vpack.c.bf16 %v1274_v57, %v1274_v57 }
 0x120   : > { %v1477_v31 = vpack.c.bf16 %v1272_v56, %v1272_v56  ;;  %v1275_v49 = vmax.f32 %v1267_v42, 0.0  ;;  %v1265_v7 = vadd.f32 %v1956_v46, %v1250_v43 }
 0x121   : > { %1315 = vst.msk [vmem:[%s1967_s15 + $0x18] sm:$0xf] %vm1308_vm8, %v1479_v5 }
 0x122   : > { %1313 = vst.msk [vmem:[%s1967_s15 + $0x10] sm:$0xf] %vm1308_vm8, %v1477_v31  ;;  %v1480_v54 = vpack.c.bf16 %v1275_v49, %v1275_v49  ;;  %v1273_v10 = vmax.f32 %v1265_v7, 0.0 }
 0x124   : > { %1316 = vst.msk [vmem:[%s1967_s15 + $0x1c] sm:$0xf] %vm1308_vm8, %v1480_v54  ;;  %v1478_v58 = vpack.c.bf16 %v1273_v10, %v1273_v10 }
 0x126   : > { %1314 = vst.msk [vmem:[%s1967_s15 + $0x14] sm:$0xf] %vm1308_vm8, %v1478_v58 }
 0x127 PF: > { %s13_s12 = sadd.s32 1, %s1652_s12  }
 0x128   : > { %p10_p4 = scmp.ge.s32.totalorder %s13_s12, 4  }
 0x12a   :  { %12 = sbr.rel (!%p10_p4) target bundleno = 1 (0x1), region = 70 }

// kernel: forward.28
= control target key start
LH: loop header
LB: loop body
LE: loop exit
PB: predicated region body
PF: predicated region fallthrough
CT: control target
= control target key end

     0   :  { %vm47_vm0 = vcmask 130048   ;;  %vm135_vm1 = vcmask 519168   ;;  %s234_s1 = inlined_call_operand.vmem [shape: bf16[16,64], index: 1, kind: input, shape index: {}]   ;;  %s235_s0 = inlined_call_operand.vmem [shape: bf16[32,16], index: 0, kind: input, shape index: {}]   ;;  %s236_s3 = inlined_call_operand.vmem [shape: bf16[32,64], index: 3, kind: input, shape index: {}]   ;;  %s237_s2 = inlined_call_operand.vmem [shape: f32[1,64], index: 2, kind: input, shape index: {}]   ;;  %s238_s4 = inlined_call_operand.vmem [shape: bf16[32,64], index: 4, kind: output, shape index: {}]  }
   0x1   :  { %v176_v0 = vld [vmem:[%s234_s1] sm:$0xff]   ;;  %v178_v2 = vld [vmem:[%s235_s0 + $0x8] sm:$0xff]  }
   0x2   :  { %v177_v1 = vld [vmem:[%s235_s0] sm:$0xff]   ;;  %170 = vmatprep.subr.bf16.mxu0 %v176_v0  ;;  %v166_v3 = vld [vmem:[%s236_s3 + $0x8] sm:$0xff]  }
   0x3   :  { %171 = vmatpush3.bf16.msra.mxu0 %v176_v0  ;;  %172 = vmatprep.mubr.msk.bf16.mxu0 %vm47_vm0, %v177_v1  ;;  %v144_v4 = vld [vmem:[%s237_s2] ss:$0 sm:$0xff]  ;;  %v164_v6 = vunpack.c.l.bf16 %v166_v3  ;;  %v165_v13 = vunpack.c.h.bf16 %v166_v3 }
   0x4   :  { %v159_v5 = vld [vmem:[%s236_s3] sm:$0xff]  }
   0x5   :  { %v160_v9 = vunpack.c.l.bf16 %v159_v5  ;;  %v161_v18 = vunpack.c.h.bf16 %v159_v5 }
   0x6   :  { %173 = vmatmul.mubr.msk.bf16.vlgmr.msra.gmra.mxu0 %vm47_vm0, %v178_v2 }
  0xc6   :  { %v174_v7 = vpop.f32.mrf.mxu0 }
  0xc7   :  { %v97_v8 = vadd.f32 %v174_v7, %v144_v4 }
  0xc8   :  { %v88_v10 = vpop.f32.mrf.mxu0 }
  0xc9   :  { %v113_v11 = vadd.f32 %v164_v6, %v97_v8  ;;  %v89_v12 = vadd.f32 %v144_v4, %v88_v10 }
  0xca   :  { %v175_v14 = vpop.f32.mrf.mxu0 }
  0xcb   :  { %v117_v15 = vmax.f32 %v113_v11, 0.0  ;;  %v111_v16 = vadd.f32 %v160_v9, %v89_v12  ;;  %v100_v17 = vadd.f32 %v175_v14, %v144_v4 }
  0xcc   :  { %v91_v19 = vpop.f32.mrf.mxu0 }
  0xcd   :  { %v156_v20 = vpack.c.bf16 %v117_v15, %v117_v15  ;;  %v115_v21 = vmax.f32 %v111_v16, 0.0  ;;  %v114_v22 = vadd.f32 %v165_v13, %v100_v17  ;;  %v92_v23 = vadd.f32 %v144_v4, %v91_v19 }
  0xcf   :  { %138 = vst.msk [vmem:[%s238_s4 + $0x8] sm:$0xf] %vm135_vm1, %v156_v20  ;;  %v154_v24 = vpack.c.bf16 %v115_v21, %v115_v21  ;;  %v118_v25 = vmax.f32 %v114_v22, 0.0  ;;  %v112_v26 = vadd.f32 %v161_v18, %v92_v23 }
  0xd1   :  { %136 = vst.msk [vmem:[%s238_s4] sm:$0xf] %vm135_vm1, %v154_v24  ;;  %v157_v27 = vpack.c.bf16 %v118_v25, %v118_v25  ;;  %v116_v28 = vmax.f32 %v112_v26, 0.0 }
  0xd3   :  { %139 = vst.msk [vmem:[%s238_s4 + $0xc] sm:$0xf] %vm135_vm1, %v157_v27  ;;  %v155_v29 = vpack.c.bf16 %v116_v28, %v116_v28 }
  0xd5   :  { %137 = vst.msk [vmem:[%s238_s4 + $0x4] sm:$0xf] %vm135_vm1, %v155_v29 }

// kernel: forward.27
= control target key start
LH: loop header
LB: loop body
LE: loop exit
PB: predicated region body
PF: predicated region fallthrough
CT: control target
= control target key end

     0   :  { %s529_s12 = smov 0   ;;  %s531_s13 = smov 0   ;;  %s598_s0 = inlined_call_operand.vmem [shape: bf16[2,4,2,4,64], index: 0, kind: input, shape index: {}]   ;;  %s599_s1 = inlined_call_operand.vmem [shape: bf16[64,64], index: 1, kind: input, shape index: {}]   ;;  %s600_s2 = inlined_call_operand.vmem [shape: f32[1,64], index: 2, kind: input, shape index: {}]   ;;  %s601_s3 = inlined_call_operand.vmem [shape: bf16[2,16,64], index: 3, kind: output, shape index: {}]  }
   0x1   :  { %s533_s14 = smov 0  }
   0x2 LB: > { %s409_s15 = sadd.s32 4294967295, %s504_s14   ;;  %s546_s16 = sadd.s32 1, %s504_s14   ;;  %s504_s14 = sphi %s533_s14, %s604_s14   ;;  %s500_s13 = sphi %s531_s13, %s603_s13   ;;  %s496_s12 = sphi %s529_s12, %s602_s12  }
   0x3   : > { %s17_s17 = ssub.s32 %s504_s14, %s546_s16  ;;  %s20_s18 = sadd.s32 1, %s500_s13 }
   0x4   : > { %p18_p0 = scmp.eq.s32.totalorder %s17_s17, 0  ;;  %p27_p1 = scmp.ne.s32.totalorder %s500_s13, %s496_s12 }
   0x5   : > { %p28_p2 = scmp.eq.s32.totalorder %s504_s14, 0  ;;  %p412_p4 = scmp.ge.s32.totalorder %s504_s14, 2 }
   0x6   : > { %s555_s19 = scalar_select %p18_p0, %s500_s13, %s20_s18  }
   0x7   : > { %p29_p3 = por %p28_p2, %p27_p1  ;;  %127 = sbr.rel (%p412_p4) target bundleno = 18 (0x12), region = 24 }
   0xc   : > { %130 = sbr.rel (!%p29_p3) target bundleno = 18 (0x12), region = 28  ;;  %s132_s20 = sand.u32 (%p29_p3), 1, %s500_s13  }
   0xd   : > { %s430_s21 = sshll.u32 (%p29_p3), %s504_s14, 4  ;;  %s413_s22 = sshll.u32 (%p29_p3), %s132_s20, 3 }
   0xe   : > { %s137_s25 = scalar_lea.vmem (%p29_p3), %s598_s0, %s430_s21  ;;  %s134_s26 = scalar_lea.vmem (%p29_p3), [#allocation2], %s413_s22 }
   0xf   : > { %v154_v0 = vld [vmem:[%s137_s25] sm:$0x3] (%p29_p3)  ;;  %v156_v1 = vld [vmem:[%s137_s25 + $0x4] sm:$0x3] (%p29_p3)  ;;  %v158_v2 = vld [vmem:[%s137_s25 + $0x8] sm:$0x3] (%p29_p3) }
  0x10   : > { %155 = vst [vmem:[%s134_s26] sm:$0x3] (%p29_p3), %v154_v0  ;;  %157 = vst [vmem:[%s134_s26 + $0x2] sm:$0x3] (%p29_p3), %v156_v1  ;;  %v160_v3 = vld [vmem:[%s137_s25 + $0xc] sm:$0x3] (%p29_p3) }
  0x11   : > { %159 = vst [vmem:[%s134_s26 + $0x4] sm:$0x3] %v158_v2  ;;  %161 = vst [vmem:[%s134_s26 + $0x6] sm:$0x3] %v160_v3 }
  0x12 PF: > { %p416_p5 = scmp.ge.s32.totalorder %s504_s14, 1  ;;  %p192_p6 = scmp.lt.s32.totalorder %s504_s14, 3 }
  0x14   : > { %p193_p7 = pnand %p416_p5, %p192_p6 }
  0x15   : > { %s199_s4 = sand.u32 (!%p193_p7), 1, %s496_s12   ;;  %p222_p8 = scmp.lt.s32.totalorder (!%p193_p7), %s409_s15, 1 }
  0x16   : > { %196 = sbr.rel (%p193_p7) target bundleno = 246 (0xf6), region = 69  ;;  %s417_s5 = sshll.u32 (!%p193_p7), %s199_s4, 3 }
  0x17   : > { %s201_s6 = scalar_lea.vmem (!%p193_p7), [#allocation2], %s417_s5 }
  0x1b   : > { %v478_v4 = vld [vmem:[%s599_s1 + $0x18] sm:$0xff]   ;;  %v256_v5 = vlaneseq  ;;  %v506_v6 = vmov 0.0   ;;  %v479_v7 = vld [vmem:[%s599_s1 + $0x10] sm:$0xff]   ;;  %vm507_vm0 = vmmov 0   ;;  %v228_v9 = vld [vmem:[%s201_s6] sm:$0x3] }
  0x1c   : > { %439 = vmatprep.subr.bf16.mxu0 %v506_v6  ;;  %447 = vmatprep.mubr.msk.bf16.mxu0 %vm507_vm0, %v506_v6  ;;  %v229_v10 = vld [vmem:[%s201_s6 + $0x2] sm:$0x3]  ;;  %v230_v11 = vld [vmem:[%s201_s6 + $0x4] sm:$0x3]  ;;  %v508_v12 = vmov 1983009808  }
  0x1d   : > { %440 = vmatpush3.bf16.msra.mxu0 %v478_v4  ;;  %v257_v8 = vshrl.u32 %v256_v5, 7  ;;  %v254_v13 = vunpack.c.l.s4 %v508_v12  ;;  %v480_v14 = vld [vmem:[%s599_s1 + $0x8] sm:$0xff]   ;;  %v251_v16 = vcombine.low %v228_v9, %v229_v10  ;;  %v481_v20 = vld [vmem:[%s599_s1] sm:$0xff]   ;;  %vm292_vm1 = vcmask 523264   ;;  %s606_s15 = smov (!%p222_p8, %s409_s15), 1 }
  0x1e   : > { %441 = vmatprep.subr.bf16.mxu0 %v506_v6  ;;  %v231_v15 = vld [vmem:[%s201_s6 + $0x6] sm:$0x3]  ;;  %v420_v24 = vld [vmem:[%s600_s2] ss:$0 sm:$0xff]  ;;  %s431_s17 = sshll.u32 %s606_s15, 3  ;;  %vm345_vm2 = vcmask 519168  }
  0x1f   : > { %v252_v17 = vcombine.low %v230_v11, %v231_v15  ;;  %v255_v18 = vunpack.c.0.s8 %v254_v13  ;;  %s226_s21 = scalar_lea.vmem %s601_s3, %s431_s17 }
  0x21   : > { %442 = vmatpush3.bf16.msra.mxu0 %v479_v7  ;;  %v258_v19 = vsub.s32 %v255_v18, %v257_v8 }
  0x22   : > { %443 = vmatprep.subr.bf16.mxu0 %v506_v6 }
  0x23   : > { %v259_v21 = vrot.slane %v251_v16, %v258_v19  ;;  %v266_v22 = vrot.slane %v252_v17, %v258_v19 }
  0x25   : > { %444 = vmatpush3.bf16.msra.mxu0 %v480_v14  ;;  %v267_v23 = vcombine.low %v259_v21, %v266_v22 }
  0x26   : > { %445 = vmatprep.subr.bf16.mxu0 %v506_v6 }
  0x29   : > { %446 = vmatpush3.bf16.msra.mxu0 %v481_v20 }
  0x2c   : > { %448 = vmatmul.mubr.msk.bf16.vlgmr.msra.gmra.mxu0 %vm292_vm1, %v267_v23 }
  0xec   : > { %v330_v25 = vpop.f32.mrf.mxu0 }
  0xed   : > { %v331_v26 = vadd.f32 %v420_v24, %v330_v25 }
  0xee   : > { %v449_v27 = vpop.f32.mrf.mxu0 }
  0xef   : > { %v432_v28 = vpack.c.bf16 %v331_v26, %v331_v26 }
  0xf0   : > { %v333_v29 = vpop.f32.mrf.mxu0 }
  0xf1   : > { %346 = vst.msk [vmem:[%s226_s21] sm:$0xf] %vm345_vm2, %v432_v28  ;;  %v334_v30 = vadd.f32 %v420_v24, %v333_v29 }
  0xf2   : > { %v450_v31 = vpop.f32.mrf.mxu0 }
  0xf3   : > { %v433_v32 = vpack.c.bf16 %v334_v30, %v334_v30 }
  0xf5   : > { %347 = vst.msk [vmem:[%s226_s21 + $0x4] sm:$0xf] %vm345_vm2, %v433_v32 }
  0xf6 PF: > { %p10_p9 = scmp.ge.s32.totalorder %s546_s16, 4   ;;  %s602_s12 = smov %s500_s13 }
  0xf7   : > { %s603_s13 = smov %s555_s19  ;;  %s604_s14 = smov %s546_s16 }
  0xf8   :  { %12 = sbr.rel (!%p10_p9) target bundleno = 2 (0x2), region = 108 }

// kernel: forward.26
= control target key start
LH: loop header
LB: loop body
LE: loop exit
PB: predicated region body
PF: predicated region fallthrough
CT: control target
= control target key end

     0   :  { %s1351_s12 = smov 0   ;;  %s1533_s0 = inlined_call_operand.vmem [shape: bf16[2,20,5,16], index: 0, kind: input, shape index: {}]   ;;  %s1534_s1 = inlined_call_operand.vmem [shape: bf16[9,16,16], index: 1, kind: input, shape index: {}]   ;;  %s1535_s2 = inlined_call_operand.vmem [shape: f32[1,16], index: 2, kind: input, shape index: {}]   ;;  %s1536_s3 = inlined_call_operand.vmem [shape: bf16[2,16,16], index: 3, kind: output, shape index: {}]  }
   0x1 LB: > { %s1152_s13 = sadd.s32 4294967295, %s1326_s12   ;;  %p1156_p0 = scmp.ge.s32.totalorder %s1326_s12, 1  ;;  %s1326_s12 = sphi %s1351_s12, %s13_s12  }
   0x2   : > { %p137_p1 = scmp.lt.s32.totalorder %s1326_s12, 3 }
   0x4   : > { %p138_p2 = pnand %p1156_p0, %p137_p1 }
   0x5   : > { %p161_p3 = scmp.lt.s32.totalorder (!%p138_p2), %s1152_s13, 1 }
   0x6   : > { %141 = sbr.rel (%p138_p2) target bundleno = 266 (0x10a), region = 32 }
   0xb   : > { %v1295_v0 = vld [vmem:[%s1534_s1 + $0x18] sm:$0xff]   ;;  %v204_v1 = vlaneseq  ;;  %v1328_v2 = vmov 0.0   ;;  %v1296_v3 = vld [vmem:[%s1534_s1] sm:$0xff]   ;;  %vm1329_vm0 = vmmov 0   ;;  %v1330_v4 = vmov 1983009808  }
   0xc   : > { %1229 = vmatprep.subr.bf16.mxu0 %v1328_v2  ;;  %1235 = vmatprep.subr.bf16.mxu1 %v1328_v2  ;;  %v202_v5 = vunpack.c.l.s4 %v1330_v4  ;;  %s1542_s13 = smov (!%p161_p3, %s1152_s13), 1  ;;  %vm222_vm1 = vcmask 130048   ;;  %v1303_v14 = vld [vmem:[%s1534_s1 + $0x30] sm:$0xff]   ;;  %v1304_v35 = vld [vmem:[%s1534_s1 + $0x8] sm:$0xff]   ;;  %vm726_vm2 = vsmask.f32 1280 }
   0xd   : > { %1230 = vmatpush3.bf16.msra.mxu0 %v1295_v0  ;;  %1231 = vmatprep.mubr.msk.bf16.mxu0 %vm1329_vm0, %v1328_v2  ;;  %v205_v6 = vshrl.u32 %v204_v1, 7  ;;  %s1283_s18 = smul.u32 80, %s1542_s13  ;;  %vm727_vm3 = vsmask.f32 3336  ;;  %vm729_vm5 = vsmask.f32 5392 }
   0xe   : > { %1236 = vmatpush3.bf16.msra.mxu1 %v1296_v3  ;;  %1237 = vmatprep.mubr.msk.bf16.mxu1 %vm1329_vm0, %v1328_v2  ;;  %v203_v7 = vunpack.c.0.s8 %v202_v5  ;;  %vm728_vm4 = vmor %vm726_vm2, %vm727_vm3  ;;  %v1307_v53 = vld [vmem:[%s1534_s1 + $0x20] sm:$0xff]   ;;  %vm731_vm6 = vsmask.f32 7448  ;;  %v1308_v3 = vld [vmem:[%s1534_s1 + $0x38] sm:$0xff]   ;;  %s1208_s11 = sshll.u32 %s1542_s13, 3  ;;  %vm1094_vm9 = vcmask 125952  }
   0xf   : > { %1241 = vmatprep.subr.bf16.mxu0 %v1328_v2  ;;  %1247 = vmatprep.subr.bf16.mxu1 %v1328_v2  ;;  %s1379_s21 = scalar_lea.vmem %s1533_s0, %s1283_s18  ;;  %vm1438_vm7 = vmor %vm728_vm4, %vm729_vm5  ;;  %s170_s16 = scalar_lea.vmem %s1536_s3, %s1208_s11 }
  0x10   : > { %v1381_v8 = vsub.s32 %v203_v7, %v205_v6  ;;  %v1316_v9 = vld.sshfl [vmem:[%s1379_s21 + $0x28] sm:$0xf pattern:$0x76325410]  ;;  %v172_v11 = vld [vmem:[%s1379_s21] sm:$0x3]  ;;  %vm1453_vm8 = vmor %vm1438_vm7, %vm731_vm6 }
  0x11   : > { %v1317_v10 = vld.sshfl [vmem:[%s1379_s21 + $0x30] sm:$0xf pattern:$0x76325410]  ;;  %v173_v12 = vld [vmem:[%s1379_s21 + $0x4] sm:$0x3] }
  0x12   : > { %v174_v13 = vld [vmem:[%s1379_s21 + $0x8] sm:$0x3]  ;;  %v175_v15 = vld [vmem:[%s1379_s21 + $0xc] sm:$0x3]  ;;  %v176_v16 = vld [vmem:[%s1379_s21 + $0x10] sm:$0x3]  ;;  %v271_v17 = vcombine.low %v172_v11, %v173_v12  ;;  %v215_v25 = vcombine.low %v1316_v9, %v1317_v10 }
  0x13   : > { %v342_v18 = vcombine.low %v173_v12, %v174_v13  ;;  %v177_v19 = vld [vmem:[%s1379_s21 + $0x14] sm:$0x3]  ;;  %v272_v20 = vcombine.low %v174_v13, %v175_v15  ;;  %v343_v21 = vcombine.low %v175_v15, %v176_v16  ;;  %v178_v22 = vld [vmem:[%s1379_s21 + $0x18] sm:$0x3]  ;;  %v179_v23 = vld [vmem:[%s1379_s21 + $0x1c] sm:$0x3] }
  0x14   : > { %v180_v24 = vld [vmem:[%s1379_s21 + $0x20] sm:$0x3]  ;;  %v279_v26 = vrot.slane %v271_v17, %v1381_v8  ;;  %v418_v28 = vcombine.low %v177_v19, %v178_v22  ;;  %v1405_v33 = vld.sshfl [vmem:[%s1379_s21 + $0x44] sm:$0xf pattern:$0x76325410]  ;;  %v567_v34 = vcombine.low %v178_v22, %v179_v23  ;;  %1232 = vmatmul.mubr.msk.bf16.vlgmr.msra.gmra.mxu0 %vm222_vm1, %v215_v25 }
  0x15   : > { %v350_v27 = vrot.slane %v342_v18, %v1381_v8  ;;  %v286_v29 = vrot.slane %v272_v20, %v1381_v8  ;;  %v357_v30 = vrot.slane %v343_v21, %v1381_v8  ;;  %v419_v31 = vcombine.low %v179_v23, %v180_v24  ;;  %v1402_v32 = vld.sshfl [vmem:[%s1379_s21 + $0x3c] sm:$0xf pattern:$0x76325410]  ;;  %v181_v37 = vld [vmem:[%s1379_s21 + $0x24] sm:$0x3]  ;;  %1242 = vmatpush3.bf16.msra.mxu0 %v1303_v14 }
  0x16   : > { %v426_v36 = vrot.slane %v418_v28, %v1381_v8  ;;  %1243 = vmatprep.mubr.msk.bf16.mxu0 %vm1329_vm0, %v1328_v2  ;;  %v1182_v40 = vld.sshfl [vmem:[%s1379_s21] sm:$0x13 pattern:$0x76325410]  ;;  %1253 = vmatprep.subr.bf16.mxu0 %v1328_v2  ;;  %v568_v42 = vcombine.low %v180_v24, %v181_v37  ;;  %v1421_v45 = vrot.slane %v567_v34, %v1381_v8  ;;  %v1313_v23 = vld [vmem:[%s1534_s1 + $0x10] sm:$0xff]  }
  0x17   : > { %v287_v38 = vcombine.low %v279_v26, %v286_v29  ;;  %v433_v39 = vrot.slane %v419_v31, %v1381_v8  ;;  %v358_v41 = vcombine.low %v350_v27, %v357_v30  ;;  %v1183_v43 = vld.sshfl [vmem:[%s1379_s21 + $0x4] sm:$0x13 pattern:$0x76325410]  ;;  %v661_v47 = vcombine.high %v1182_v40, %v1182_v40 }
  0x18   : > { %v1184_v46 = vld.sshfl [vmem:[%s1379_s21 + $0x8] sm:$0x13 pattern:$0x76325410]  ;;  %v669_v48 = vcombine.high %v1183_v43, %v1183_v43  ;;  %v510_v49 = vcombine.low %v1402_v32, %v1405_v33  ;;  %v1429_v50 = vrot.slane %v568_v42, %v1381_v8  ;;  %v734_v55 = vshrl.u32 %v1182_v40, 16 }
  0x19   : > { %1238 = vmatmul.mubr.msk.bf16.vlgmr.msra.gmra.mxu1 %vm222_vm1, %v287_v38  ;;  %v434_v44 = vcombine.low %v426_v36, %v433_v39  ;;  %v1185_v51 = vld.sshfl [vmem:[%s1379_s21 + $0xc] sm:$0x13 pattern:$0x76325410]  ;;  %v677_v52 = vcombine.high %v1184_v46, %v1184_v46  ;;  %v737_v56 = vshll.u32 %v1182_v40, 16  ;;  %v743_v57 = vshll.u32 %v661_v47, 16 }
  0x1a   : > { %1248 = vmatpush3.bf16.msra.mxu1 %v1304_v35  ;;  %1249 = vmatprep.mubr.msk.bf16.mxu1 %vm1329_vm0, %v1328_v2  ;;  %v685_v54 = vcombine.high %v1185_v51, %v1185_v51  ;;  %v748_v58 = vshrl.u32 %v1183_v43, 16  ;;  %v751_v59 = vshll.u32 %v1183_v43, 16  ;;  %v757_v60 = vshll.u32 %v669_v48, 16 }
  0x1b   : > { %1259 = vmatprep.subr.bf16.mxu1 %v1328_v2  ;;  %v736_v62 = vrot.slane %v734_v55, 6  ;;  %v739_v63 = vrot.slane %v737_v56, 7  ;;  %v745_v0 = vrot.slane %v743_v57, 7  ;;  %v762_v1 = vshrl.u32 %v1184_v46, 16 }
  0x1c   : > { %1244 = vmatmul.mubr.msk.bf16.vlgmr.msra.gmra.mxu0 %vm222_vm1, %v358_v41  ;;  %v750_v4 = vrot.slane %v748_v58, 6  ;;  %v753_v5 = vrot.slane %v751_v59, 7  ;;  %v759_v6 = vrot.slane %v757_v60, 7  ;;  %v765_v7 = vshll.u32 %v1184_v46, 16 }
  0x1d   : > { %v1187_v9 = vld.sshfl [vmem:[%s1379_s21 + $0x28] sm:$0x13 pattern:$0x76325410]  ;;  %1254 = vmatpush3.bf16.msra.mxu0 %v1307_v53  ;;  %1255 = vmatprep.mubr.msk.bf16.mxu0 %vm1329_vm0, %v1328_v2  ;;  %v740_v10 = vor.u32 %v739_v63, %v736_v62  ;;  %v764_v11 = vrot.slane %v762_v1, 6  ;;  %v771_v12 = vshll.u32 %v677_v52, 16  ;;  %v583_v28 = vcombine.low %v1421_v45, %v1429_v50 }
  0x1e   : > { %v776_v13 = vshrl.u32 %v1185_v51, 16  ;;  %1265 = vmatprep.subr.bf16.mxu0 %v1328_v2  ;;  %v754_v15 = vor.u32 %v753_v5, %v750_v4  ;;  %v767_v16 = vrot.slane %v765_v7, 7  ;;  %v779_v17 = vshll.u32 %v1185_v51, 16  ;;  %v1314_v45 = vld [vmem:[%s1534_s1 + $0x28] sm:$0xff]  }
  0x1f   : > { %v785_v18 = vshll.u32 %v685_v54, 16  ;;  %v741_v19 = vrot.slane %v740_v10, 2  ;;  %v773_v20 = vrot.slane %v771_v12, 7  ;;  %v701_v22 = vcombine.high %v1187_v9, %v1187_v9  ;;  %v1315_v10 = vld [vmem:[%s1534_s1 + $0x40] sm:$0xff]  }
  0x20   : > { %v778_v21 = vrot.slane %v776_v13, 6  ;;  %v755_v24 = vrot.slane %v754_v15, 2  ;;  %v768_v25 = vor.u32 %v767_v16, %v764_v11  ;;  %v781_v26 = vrot.slane %v779_v17, 7 }
  0x21   : > { %1250 = vmatmul.mubr.msk.bf16.vlgmr.msra.gmra.mxu1 %vm222_vm1, %v434_v44  ;;  %v787_v27 = vrot.slane %v785_v18, 7  ;;  %v746_v29 = vsel %vm1453_vm8, %v741_v19, %v745_v0  ;;  %v1188_v30 = vld.sshfl [vmem:[%s1379_s21 + $0x2c] sm:$0x13 pattern:$0x76325410]  ;;  %v804_v31 = vshrl.u32 %v1187_v9, 16 }
  0x22   : > { %1260 = vmatpush3.bf16.msra.mxu1 %v1308_v3  ;;  %1261 = vmatprep.mubr.msk.bf16.mxu1 %vm1329_vm0, %v1328_v2  ;;  %v807_v34 = vshll.u32 %v1187_v9, 16  ;;  %v1471_v35 = vsel %vm1453_vm8, %v755_v24, %v759_v6  ;;  %v769_v36 = vrot.slane %v768_v25, 2  ;;  %v782_v37 = vor.u32 %v781_v26, %v778_v21  ;;  %v1189_v38 = vld.sshfl [vmem:[%s1379_s21 + $0x30] sm:$0x13 pattern:$0x76325410] }
  0x23   : > { %1271 = vmatprep.subr.bf16.mxu1 %v1328_v2  ;;  %v709_v39 = vcombine.high %v1188_v30, %v1188_v30  ;;  %v862_v40 = vcombine.low %v746_v29, %v1471_v35  ;;  %v1190_v41 = vld.sshfl [vmem:[%s1379_s21 + $0x34] sm:$0x13 pattern:$0x76325410]  ;;  %v717_v42 = vcombine.high %v1189_v38, %v1189_v38  ;;  %v806_v43 = vrot.slane %v804_v31, 6 }
  0x24   : > { %v809_v44 = vrot.slane %v807_v34, 7  ;;  %1256 = vmatmul.mubr.msk.bf16.vlgmr.msra.gmra.mxu0 %vm222_vm1, %v510_v49  ;;  %v1485_v46 = vsel %vm1453_vm8, %v769_v36, %v773_v20  ;;  %v783_v47 = vrot.slane %v782_v37, 2  ;;  %v725_v48 = vcombine.high %v1190_v41, %v1190_v41  ;;  %v1186_v4 = vld.sshfl [vmem:[%s1379_s21 + $0x10] sm:$0x13 pattern:$0x76325410] }
  0x25   : > { %v813_v50 = vshll.u32 %v701_v22, 16  ;;  %1266 = vmatpush3.bf16.msra.mxu0 %v1313_v23  ;;  %1267 = vmatprep.mubr.msk.bf16.mxu0 %vm1329_vm0, %v1328_v2  ;;  %v870_v51 = vrot.slane %v862_v40, %v1381_v8  ;;  %v818_v33 = vshrl.u32 %v1188_v30, 16  ;;  %v821_v49 = vshll.u32 %v1188_v30, 16 }
  0x26   : > { %v810_v32 = vor.u32 %v809_v44, %v806_v43  ;;  %1277 = vmatprep.subr.bf16.mxu0 %v1328_v2  ;;  %v788_v52 = vsel %vm1453_vm8, %v783_v47, %v787_v27  ;;  %v827_v54 = vshll.u32 %v709_v39, 16  ;;  %v832_v55 = vshrl.u32 %v1189_v38, 16 }
  0x27   : > { %v815_v53 = vrot.slane %v813_v50, 7  ;;  %v863_v56 = vcombine.low %v1485_v46, %v788_v52  ;;  %v820_v58 = vrot.slane %v818_v33, 6  ;;  %v823_v59 = vrot.slane %v821_v49, 7 }
  0x28   : > { %v811_v57 = vrot.slane %v810_v32, 2  ;;  %v834_v60 = vrot.slane %v832_v55, 6  ;;  %v835_v61 = vshll.u32 %v1189_v38, 16  ;;  %v841_v62 = vshll.u32 %v717_v42, 16 }
  0x29   : > { %1262 = vmatmul.mubr.msk.bf16.vlgmr.msra.gmra.mxu1 %vm222_vm1, %v583_v28  ;;  %v877_v63 = vrot.slane %v863_v56, %v1381_v8  ;;  %v824_v0 = vor.u32 %v823_v59, %v820_v58  ;;  %v829_v1 = vrot.slane %v827_v54, 7  ;;  %v846_v3 = vshrl.u32 %v1190_v41, 16 }
  0x2a   : > { %1272 = vmatpush3.bf16.msra.mxu1 %v1314_v45  ;;  %1273 = vmatprep.mubr.msk.bf16.mxu1 %vm1329_vm0, %v1328_v2  ;;  %v816_v5 = vsel %vm1453_vm8, %v811_v57, %v815_v53  ;;  %v837_v6 = vrot.slane %v835_v61, 7  ;;  %v849_v7 = vshll.u32 %v1190_v41, 16  ;;  %v855_v9 = vshll.u32 %v725_v48, 16 }
  0x2b   : > { %v878_v11 = vcombine.low %v870_v51, %v877_v63  ;;  %v825_v12 = vrot.slane %v824_v0, 2  ;;  %v848_v13 = vrot.slane %v846_v3, 6  ;;  %v693_v15 = vcombine.high %v1186_v4, %v1186_v4 }
  0x2c   : > { %v838_v16 = vor.u32 %v837_v6, %v834_v60  ;;  %v843_v17 = vrot.slane %v841_v62, 7  ;;  %v851_v18 = vrot.slane %v849_v7, 7  ;;  %v790_v19 = vshrl.u32 %v1186_v4, 16 }
  0x2d   : > { %1268 = vmatmul.mubr.msk.bf16.vlgmr.msra.gmra.mxu0 %vm222_vm1, %v878_v11  ;;  %v830_v20 = vsel %vm1453_vm8, %v825_v12, %v829_v1  ;;  %v793_v21 = vshll.u32 %v1186_v4, 16  ;;  %v799_v22 = vshll.u32 %v693_v15, 16  ;;  %v857_v25 = vrot.slane %v855_v9, 7 }
  0x2e   : > { %v839_v23 = vrot.slane %v838_v16, 2  ;;  %v852_v24 = vor.u32 %v851_v18, %v848_v13  ;;  %1278 = vmatpush3.bf16.msra.mxu0 %v1315_v10  ;;  %1279 = vmatprep.mubr.msk.bf16.mxu0 %vm1329_vm0, %v1328_v2  ;;  %v792_v26 = vrot.slane %v790_v19, 6  ;;  %v934_v27 = vcombine.low %v816_v5, %v830_v20 }
  0x2f   : > { %v795_v28 = vrot.slane %v793_v21, 7  ;;  %v801_v34 = vrot.slane %v799_v22, 7  ;;  %v1006_v37 = vcombine.low %v1471_v35, %v1485_v46 }
  0x30   : > { %v844_v29 = vsel %vm1453_vm8, %v839_v23, %v843_v17  ;;  %v853_v30 = vrot.slane %v852_v24, 2  ;;  %v942_v39 = vrot.slane %v934_v27, %v1381_v8 }
  0x31   : > { %v796_v31 = vor.u32 %v795_v28, %v792_v26  ;;  %v1014_v43 = vrot.slane %v1006_v37, %v1381_v8 }
  0x32   : > { %v858_v36 = vsel %vm1453_vm8, %v853_v30, %v857_v25  ;;  %v1203_v25 = vld [vmem:[%s1535_s2] ss:$0 sm:$0xff] }
  0x33   : > { %v935_v38 = vcombine.low %v844_v29, %v858_v36  ;;  %v797_v40 = vrot.slane %v796_v31, 2 }
  0x35   : > { %v949_v2 = vrot.slane %v935_v38, %v1381_v8  ;;  %v802_v41 = vsel %vm1453_vm8, %v797_v40, %v801_v34 }
  0x36   : > { %v1007_v42 = vcombine.low %v788_v52, %v802_v41 }
  0x37   : > { %v950_v44 = vcombine.low %v942_v39, %v949_v2 }
  0x38   : > { %v1021_v45 = vrot.slane %v1007_v42, %v1381_v8 }
  0x39   : > { %1274 = vmatmul.mubr.msk.bf16.vlgmr.msra.gmra.mxu1 %vm222_vm1, %v950_v44 }
  0x3a   : > { %v1022_v47 = vcombine.low %v1014_v43, %v1021_v45 }
  0x3c   : > { %1280 = vmatmul.mubr.msk.bf16.vlgmr.msra.gmra.mxu0 %vm222_vm1, %v1022_v47 }
  0xd4   : > { %v260_v35 = vpop.f32.mrf.mxu0 }
  0xd6   : > { %v1233_v46 = vpop.f32.mrf.mxu0 }
  0xd8   : > { %v263_v50 = vpop.f32.mrf.mxu0 }
  0xd9   : > { %v331_v48 = vpop.f32.mrf.mxu1 }
  0xda   : > { %v1234_v32 = vpop.f32.mrf.mxu0  ;;  %v332_v62 = vadd.f32 %v331_v48, %v260_v35 }
  0xdb   : > { %v1239_v51 = vpop.f32.mrf.mxu1 }
  0xdc   : > { %v402_v14 = vpop.f32.mrf.mxu0 }
  0xdd   : > { %v334_v33 = vpop.f32.mrf.mxu1  ;;  %v409_v1 = vadd.f32 %v402_v14, %v332_v62 }
  0xde   : > { %v1245_v52 = vpop.f32.mrf.mxu0  ;;  %v335_v4 = vadd.f32 %v334_v33, %v263_v50 }
  0xdf   : > { %v1240_v49 = vpop.f32.mrf.mxu1 }
  0xe0   : > { %v405_v54 = vpop.f32.mrf.mxu0 }
  0xe1   : > { %v478_v53 = vpop.f32.mrf.mxu1  ;;  %v410_v9 = vadd.f32 %v405_v54, %v335_v4 }
  0xe2   : > { %v1246_v56 = vpop.f32.mrf.mxu0  ;;  %v485_v7 = vadd.f32 %v478_v53, %v409_v1 }
  0xe3   : > { %v1251_v55 = vpop.f32.mrf.mxu1 }
  0xe4   : > { %v554_v57 = vpop.f32.mrf.mxu0 }
  0xe5   : > { %v481_v8 = vpop.f32.mrf.mxu1  ;;  %v561_v11 = vadd.f32 %v554_v57, %v485_v7 }
  0xe6   : > { %v1257_v59 = vpop.f32.mrf.mxu0  ;;  %v486_v13 = vadd.f32 %v481_v8, %v410_v9 }
  0xe7   : > { %v1252_v58 = vpop.f32.mrf.mxu1 }
  0xe8   : > { %v557_v61 = vpop.f32.mrf.mxu0 }
  0xe9   : > { %v627_v60 = vpop.f32.mrf.mxu1  ;;  %v562_v17 = vadd.f32 %v557_v61, %v486_v13 }
  0xea   : > { %v1258_v0 = vpop.f32.mrf.mxu0  ;;  %v634_v16 = vadd.f32 %v627_v60, %v561_v11 }
  0xeb   : > { %v1263_v63 = vpop.f32.mrf.mxu1 }
  0xed   : > { %v630_v3 = vpop.f32.mrf.mxu1  ;;  %v922_v6 = vpop.f32.mrf.mxu0 }
  0xee   : > { %v929_v18 = vadd.f32 %v922_v6, %v634_v16  ;;  %v635_v19 = vadd.f32 %v630_v3, %v562_v17 }
  0xef   : > { %v1264_v5 = vpop.f32.mrf.mxu1  ;;  %v1269_v10 = vpop.f32.mrf.mxu0 }
  0xf1   : > { %v925_v12 = vpop.f32.mrf.mxu0 }
  0xf2   : > { %v930_v23 = vadd.f32 %v925_v12, %v635_v19 }
  0xf3   : > { %v1270_v15 = vpop.f32.mrf.mxu0 }
  0xf9   : > { %v994_v20 = vpop.f32.mrf.mxu1 }
  0xfa   : > { %v1001_v21 = vadd.f32 %v994_v20, %v929_v18 }
  0xfb   : > { %v1275_v22 = vpop.f32.mrf.mxu1 }
  0xfc   : > { %v1066_v24 = vpop.f32.mrf.mxu0 }
  0xfd   : > { %v997_v26 = vpop.f32.mrf.mxu1  ;;  %v1073_v27 = vadd.f32 %v1066_v24, %v1001_v21 }
  0xfe   : > { %v1281_v28 = vpop.f32.mrf.mxu0  ;;  %v1002_v29 = vadd.f32 %v997_v26, %v930_v23 }
  0xff   : > { %v1276_v30 = vpop.f32.mrf.mxu1  ;;  %v1082_v31 = vadd.f32 %v1203_v25, %v1073_v27 }
 0x100   : > { %v1069_v34 = vpop.f32.mrf.mxu0 }
 0x101   : > { %v1084_v36 = vmax.f32 %v1082_v31, 0.0  ;;  %v1074_v37 = vadd.f32 %v1069_v34, %v1002_v29 }
 0x102   : > { %v1282_v38 = vpop.f32.mrf.mxu0 }
 0x103   : > { %v1209_v39 = vpack.c.bf16 %v1084_v36, %v1084_v36  ;;  %v1083_v40 = vadd.f32 %v1203_v25, %v1074_v37 }
 0x105   : > { %1095 = vst.msk [vmem:[%s170_s16] sm:$0xf] %vm1094_vm9, %v1209_v39  ;;  %v1085_v2 = vmax.f32 %v1083_v40, 0.0 }
 0x107   : > { %v1210_v41 = vpack.c.bf16 %v1085_v2, %v1085_v2 }
 0x109   : > { %1096 = vst.msk [vmem:[%s170_s16 + $0x4] sm:$0xf] %vm1094_vm9, %v1210_v41 }
 0x10a PF: > { %s13_s12 = sadd.s32 1, %s1326_s12  }
 0x10b   : > { %p10_p4 = scmp.ge.s32.totalorder %s13_s12, 4  }
 0x10d   :  { %12 = sbr.rel (!%p10_p4) target bundleno = 1 (0x1), region = 70 }

// kernel: forward.29
= control target key start
LH: loop header
LB: loop body
LE: loop exit
PB: predicated region body
PF: predicated region fallthrough
CT: control target
= control target key end

     0   :  { %vm68_vm0 = vcmask 523264   ;;  %vm144_vm1 = vcmask 257024   ;;  %s247_s1 = inlined_call_operand.vmem [shape: bf16[64,32], index: 1, kind: input, shape index: {}]   ;;  %s248_s0 = inlined_call_operand.vmem [shape: bf16[32,64], index: 0, kind: input, shape index: {}]   ;;  %s249_s2 = inlined_call_operand.vmem [shape: f32[1,32], index: 2, kind: input, shape index: {}]   ;;  %s250_s3 = inlined_call_operand.vmem [shape: bf16[32,32], index: 3, kind: output, shape index: {}]  }
   0x1   :  { %v188_v0 = vld [vmem:[%s247_s1 + $0x18] sm:$0xff]   ;;  %v189_v1 = vld [vmem:[%s247_s1 + $0x10] sm:$0xff]   ;;  %v190_v2 = vld [vmem:[%s247_s1 + $0x8] sm:$0xff]  }
   0x2   :  { %176 = vmatprep.subr.bf16.mxu0 %v188_v0  ;;  %v192_v3 = vld [vmem:[%s248_s0] sm:$0xff]   ;;  %v193_v5 = vld [vmem:[%s248_s0 + $0x8] sm:$0xff]  }
   0x3   :  { %177 = vmatpush3.bf16.msra.mxu0 %v188_v0  ;;  %184 = vmatprep.mubr.msk.bf16.mxu0 %vm68_vm0, %v192_v3  ;;  %v191_v4 = vld [vmem:[%s247_s1] sm:$0xff]  }
   0x4   :  { %178 = vmatprep.subr.bf16.mxu0 %v189_v1  ;;  %v153_v6 = vld [vmem:[%s249_s2] ss:$0 sm:$0xff] }
   0x7   :  { %179 = vmatpush3.bf16.msra.mxu0 %v189_v1 }
   0x8   :  { %180 = vmatprep.subr.bf16.mxu0 %v190_v2 }
   0xb   :  { %181 = vmatpush3.bf16.msra.mxu0 %v190_v2 }
   0xc   :  { %182 = vmatprep.subr.bf16.mxu0 %v191_v4 }
   0xf   :  { %183 = vmatpush3.bf16.msra.mxu0 %v191_v4 }
  0x12   :  { %185 = vmatmul.mubr.msk.bf16.vlgmr.msra.gmra.mxu0 %vm68_vm0, %v193_v5 }
  0xd2   :  { %v186_v7 = vpop.f32.mrf.mxu0 }
  0xd3   :  { %v118_v8 = vadd.f32 %v186_v7, %v153_v6 }
  0xd4   :  { %v109_v9 = vpop.f32.mrf.mxu0 }
  0xd5   :  { %v126_v10 = vmax.f32 %v118_v8, 0.0  ;;  %v110_v11 = vadd.f32 %v153_v6, %v109_v9 }
  0xd6   :  { %v187_v12 = vpop.f32.mrf.mxu0 }
  0xd7   :  { %v168_v13 = vpack.c.bf16 %v126_v10, %v126_v10  ;;  %v124_v14 = vmax.f32 %v110_v11, 0.0  ;;  %v121_v15 = vadd.f32 %v187_v12, %v153_v6 }
  0xd8   :  { %v112_v16 = vpop.f32.mrf.mxu0 }
  0xd9   :  { %147 = vst.msk [vmem:[%s250_s3 + $0x8] sm:$0xf] %vm144_vm1, %v168_v13  ;;  %v166_v17 = vpack.c.bf16 %v124_v14, %v124_v14  ;;  %v127_v18 = vmax.f32 %v121_v15, 0.0  ;;  %v113_v19 = vadd.f32 %v153_v6, %v112_v16 }
  0xdb   :  { %145 = vst.msk [vmem:[%s250_s3] sm:$0xf] %vm144_vm1, %v166_v17  ;;  %v169_v20 = vpack.c.bf16 %v127_v18, %v127_v18  ;;  %v125_v21 = vmax.f32 %v113_v19, 0.0 }
  0xdd   :  { %148 = vst.msk [vmem:[%s250_s3 + $0xc] sm:$0xf] %vm144_vm1, %v169_v20  ;;  %v167_v22 = vpack.c.bf16 %v125_v21, %v125_v21 }
  0xdf   :  { %146 = vst.msk [vmem:[%s250_s3 + $0x4] sm:$0xf] %vm144_vm1, %v167_v22 }

// kernel: forward.32
= control target key start
LH: loop header
LB: loop body
LE: loop exit
PB: predicated region body
PF: predicated region fallthrough
CT: control target
= control target key end

     0   :  { %v115_v0 = vmov 0.0   ;;  %vm116_vm0 = vmmov 0   ;;  %vm42_vm1 = vcmask 261120   ;;  %s160_s1 = inlined_call_operand.vmem [shape: bf16[32,128], index: 1, kind: input, shape index: {}]   ;;  %s161_s0 = inlined_call_operand.vmem [shape: bf16[8,32], index: 0, kind: input, shape index: {}]   ;;  %s162_s3 = inlined_call_operand.vmem [shape: bf16[8,128], index: 3, kind: input, shape index: {}]   ;;  %s163_s2 = inlined_call_operand.vmem [shape: f32[1,128], index: 2, kind: input, shape index: {}]   ;;  %s164_s4 = inlined_call_operand.vmem [shape: bf16[8,128], index: 4, kind: output, shape index: {}]  }
   0x1   :  { %103 = vmatprep.subr.bf16.mxu0 %v115_v0  ;;  %v113_v1 = vld [vmem:[%s160_s1 + $0x8] sm:$0xff]   ;;  %107 = vmatprep.mubr.msk.bf16.mxu0 %vm116_vm0, %v115_v0  ;;  %v114_v2 = vld [vmem:[%s160_s1] sm:$0xff]  }
   0x2   :  { %104 = vmatpush3.bf16.msra.mxu0 %v113_v1  ;;  %v18_v3 = vld [vmem:[%s161_s0] sm:$0xf] }
   0x3   :  { %105 = vmatprep.subr.bf16.mxu0 %v115_v0  ;;  %v86_v4 = vld [vmem:[%s162_s3] sm:$0xf] }
   0x4   :  { %v96_v5 = vld [vmem:[%s163_s2] ss:$0 sm:$0xff]  ;;  %v87_v6 = vunpack.c.l.bf16 %v86_v4 }
   0x6   :  { %106 = vmatpush3.bf16.msra.mxu0 %v114_v2 }
   0x9   :  { %108 = vmatmul.mubr.msk.bf16.vlgmr.msra.gmra.mxu0 %vm42_vm1, %v18_v3 }
  0xc9   :  { %v80_v7 = vpop.f32.mrf.mxu0 }
  0xca   :  { %v81_v8 = vadd.f32 %v96_v5, %v80_v7 }
  0xcb   :  { %v109_v9 = vpop.f32.mrf.mxu0 }
  0xcc   :  { %v88_v10 = vadd.f32 %v87_v6, %v81_v8 }
  0xcd   :  { %v83_v11 = vpop.f32.mrf.mxu0 }
  0xce   :  { %v89_v12 = vmax.f32 %v88_v10, 0.0 }
  0xcf   :  { %v110_v13 = vpop.f32.mrf.mxu0 }
  0xd0   :  { %v90_v14 = vpack.c.bf16 %v89_v12, %v89_v12 }
  0xd2   :  { %91 = vst [vmem:[%s164_s4] sm:$0xf] %v90_v14 }

// kernel: forward.31
= control target key start
LH: loop header
LB: loop body
LE: loop exit
PB: predicated region body
PF: predicated region fallthrough
CT: control target
= control target key end

     0   :  { %s532_s12 = smov 0   ;;  %s534_s13 = smov 0   ;;  %s613_s0 = inlined_call_operand.vmem [shape: bf16[2,2,2,2,128], index: 0, kind: input, shape index: {}]   ;;  %s614_s1 = inlined_call_operand.vmem [shape: bf16[128,128], index: 1, kind: input, shape index: {}]   ;;  %s615_s2 = inlined_call_operand.vmem [shape: f32[1,128], index: 2, kind: input, shape index: {}]   ;;  %s616_s3 = inlined_call_operand.vmem [shape: bf16[2,4,128], index: 3, kind: output, shape index: {}]  }
   0x1   :  { %s536_s14 = smov 0  }
   0x2 LB: > { %s401_s15 = sadd.s32 4294967295, %s507_s14   ;;  %s549_s16 = sadd.s32 1, %s507_s14   ;;  %s507_s14 = sphi %s536_s14, %s619_s14   ;;  %s503_s13 = sphi %s534_s13, %s618_s13   ;;  %s499_s12 = sphi %s532_s12, %s617_s12  }
   0x3   : > { %s17_s17 = ssub.s32 %s507_s14, %s549_s16  ;;  %s20_s18 = sadd.s32 1, %s503_s13 }
   0x4   : > { %p18_p0 = scmp.eq.s32.totalorder %s17_s17, 0  ;;  %p27_p1 = scmp.ne.s32.totalorder %s503_s13, %s499_s12 }
   0x5   : > { %p28_p2 = scmp.eq.s32.totalorder %s507_s14, 0  ;;  %p404_p4 = scmp.ge.s32.totalorder %s507_s14, 2 }
   0x6   : > { %s558_s19 = scalar_select %p18_p0, %s503_s13, %s20_s18  }
   0x7   : > { %p29_p3 = por %p28_p2, %p27_p1  ;;  %127 = sbr.rel (%p404_p4) target bundleno = 17 (0x11), region = 24 }
   0xc   : > { %130 = sbr.rel (!%p29_p3) target bundleno = 17 (0x11), region = 28  ;;  %s132_s20 = sand.u32 (%p29_p3), 1, %s503_s13  }
   0xd   : > { %s406_s21 = sshll.u32 (%p29_p3), %s507_s14, 2  ;;  %s405_s22 = sshll.u32 (%p29_p3), %s132_s20, 1 }
   0xe   : > { %s136_s25 = scalar_lea.vmem (%p29_p3), %s613_s0, %s406_s21  ;;  %s134_s26 = scalar_lea.vmem (%p29_p3), [#allocation2], %s405_s22 }
   0xf   : > { %v153_v0 = vld [vmem:[%s136_s25] sm:$0x1] (%p29_p3)  ;;  %v155_v1 = vld [vmem:[%s136_s25 + $0x2] sm:$0x1] (%p29_p3) }
  0x10   : > { %154 = vst [vmem:[%s134_s26] sm:$0x1] (%p29_p3), %v153_v0  ;;  %156 = vst [vmem:[%s134_s26 + $0x1] sm:$0x1] (%p29_p3), %v155_v1 }
  0x11 PF: > { %p407_p5 = scmp.ge.s32.totalorder %s507_s14, 1  ;;  %p175_p6 = scmp.lt.s32.totalorder %s507_s14, 3 }
  0x13   : > { %p176_p7 = pnand %p407_p5, %p175_p6 }
  0x14   : > { %s182_s6 = sand.u32 (!%p176_p7), 1, %s499_s12   ;;  %p204_p8 = scmp.lt.s32.totalorder (!%p176_p7), %s401_s15, 1 }
  0x15   : > { %179 = sbr.rel (%p176_p7) target bundleno = 258 (0x102), region = 62  ;;  %s408_s9 = sshll.u32 (!%p176_p7), %s182_s6, 1 }
  0x16   : > { %s184_s18 = scalar_lea.vmem (!%p176_p7), [#allocation2], %s408_s9 }
  0x1a   : > { %v477_v2 = vld [vmem:[%s614_s1 + $0x38] sm:$0xff]   ;;  %v509_v3 = vmov 0.0   ;;  %v478_v4 = vld [vmem:[%s614_s1 + $0x30] sm:$0xff]   ;;  %vm510_vm0 = vmmov 0   ;;  %v479_v5 = vld [vmem:[%s614_s1 + $0x28] sm:$0xff]   ;;  %v240_v9 = vlaneseq  ;;  %s621_s15 = smov (!%p204_p8, %s401_s15), 1 }
  0x1b   : > { %430 = vmatprep.subr.bf16.mxu0 %v509_v3  ;;  %446 = vmatprep.mubr.msk.bf16.mxu0 %vm510_vm0, %v509_v3  ;;  %v480_v6 = vld [vmem:[%s614_s1 + $0x20] sm:$0xff]   ;;  %v511_v7 = vmov 1966171168   ;;  %v481_v10 = vld [vmem:[%s614_s1 + $0x18] sm:$0xff]   ;;  %v482_v13 = vld [vmem:[%s614_s1 + $0x10] sm:$0xff]   ;;  %s409_s26 = sshll.u32 %s621_s15, 1 }
  0x1c   : > { %431 = vmatpush3.bf16.msra.mxu0 %v477_v2  ;;  %v238_v8 = vunpack.c.l.s4 %v511_v7  ;;  %v241_v12 = vshrl.u32 %v240_v9, 7  ;;  %v209_v14 = vld [vmem:[%s184_s18] sm:$0x1]  ;;  %v210_v15 = vld [vmem:[%s184_s18 + $0x1] sm:$0x1]  ;;  %v483_v18 = vld [vmem:[%s614_s1 + $0x8] sm:$0xff]   ;;  %s207_s29 = scalar_lea.vmem %s616_s3, %s409_s26 }
  0x1d   : > { %432 = vmatprep.subr.bf16.mxu0 %v509_v3  ;;  %v236_v16 = vcombine.low %v209_v14, %v210_v15  ;;  %v484_v20 = vld [vmem:[%s614_s1] sm:$0xff]  }
  0x1e   : > { %v239_v11 = vunpack.c.0.s8 %v238_v8  ;;  %v410_v22 = vld [vmem:[%s615_s2] ss:$0 sm:$0xff] }
  0x20   : > { %433 = vmatpush3.bf16.msra.mxu0 %v478_v4  ;;  %v242_v17 = vsub.s32 %v239_v11, %v241_v12 }
  0x21   : > { %434 = vmatprep.subr.bf16.mxu0 %v509_v3 }
  0x22   : > { %v243_v19 = vrot.slane %v236_v16, %v242_v17 }
  0x24   : > { %435 = vmatpush3.bf16.msra.mxu0 %v479_v5  ;;  %v250_v21 = vrot.slane %v243_v19, %v242_v17 }
  0x25   : > { %436 = vmatprep.subr.bf16.mxu0 %v509_v3 }
  0x28   : > { %437 = vmatpush3.bf16.msra.mxu0 %v480_v6 }
  0x29   : > { %438 = vmatprep.subr.bf16.mxu0 %v509_v3 }
  0x2c   : > { %439 = vmatpush3.bf16.msra.mxu0 %v481_v10 }
  0x2d   : > { %440 = vmatprep.subr.bf16.mxu0 %v509_v3 }
  0x30   : > { %441 = vmatpush3.bf16.msra.mxu0 %v482_v13 }
  0x31   : > { %442 = vmatprep.subr.bf16.mxu0 %v509_v3 }
  0x34   : > { %443 = vmatpush3.bf16.msra.mxu0 %v483_v18 }
  0x35   : > { %444 = vmatprep.subr.bf16.mxu0 %v509_v3 }
  0x38   : > { %445 = vmatpush3.bf16.msra.mxu0 %v484_v20 }
  0x3b   : > { %447 = vmatmul.mubr.bf16.vlgmr.msra.gmra.mxu0 %v250_v21 }
  0xfb   : > { %v334_v23 = vpop.f32.mrf.mxu0 }
  0xfc   : > { %v335_v24 = vadd.f32 %v410_v22, %v334_v23 }
  0xfd   : > { %v448_v25 = vpop.f32.mrf.mxu0 }
  0xfe   : > { %v340_v26 = vpack.c.bf16 %v335_v24, %v335_v24 }
  0xff   : > { %v337_v27 = vpop.f32.mrf.mxu0 }
 0x100   : > { %341 = vst [vmem:[%s207_s29] sm:$0x3] %v340_v26 }
 0x101   : > { %v449_v28 = vpop.f32.mrf.mxu0 }
 0x102 PF: > { %p10_p9 = scmp.ge.s32.totalorder %s549_s16, 4   ;;  %s617_s12 = smov %s503_s13 }
 0x103   : > { %s618_s13 = smov %s558_s19  ;;  %s619_s14 = smov %s549_s16 }
 0x104   :  { %12 = sbr.rel (!%p10_p9) target bundleno = 2 (0x2), region = 101 }

// kernel: forward.30
= control target key start
LH: loop header
LB: loop body
LE: loop exit
PB: predicated region body
PF: predicated region fallthrough
CT: control target
= control target key end

     0   :  { %s1286_s12 = smov 0   ;;  %s1464_s0 = inlined_call_operand.vmem [shape: bf16[2,12,3,32], index: 0, kind: input, shape index: {}]   ;;  %s1465_s1 = inlined_call_operand.vmem [shape: bf16[9,32,32], index: 1, kind: input, shape index: {}]   ;;  %s1466_s2 = inlined_call_operand.vmem [shape: f32[1,32], index: 2, kind: input, shape index: {}]   ;;  %s1467_s3 = inlined_call_operand.vmem [shape: bf16[2,4,32], index: 3, kind: output, shape index: {}]  }
   0x1 LB: > { %s1047_s13 = sadd.s32 4294967295, %s1261_s12   ;;  %p1051_p0 = scmp.ge.s32.totalorder %s1261_s12, 1  ;;  %s1261_s12 = sphi %s1286_s12, %s13_s12  }
   0x2   : > { %p137_p1 = scmp.lt.s32.totalorder %s1261_s12, 3 }
   0x4   : > { %p138_p2 = pnand %p1051_p0, %p137_p1 }
   0x5   : > { %p160_p3 = scmp.lt.s32.totalorder (!%p138_p2), %s1047_s13, 1 }
   0x6   : > { %141 = sbr.rel (%p138_p2) target bundleno = 257 (0x101), region = 32 }
   0xb   : > { %v1237_v0 = vld [vmem:[%s1465_s1 + $0x38] sm:$0xff]   ;;  %v1263_v1 = vmov 0.0   ;;  %v1238_v2 = vld [vmem:[%s1465_s1 + $0x8] sm:$0xff]   ;;  %v195_v3 = vlaneseq  ;;  %v1239_v4 = vld [vmem:[%s1465_s1 + $0x30] sm:$0xff]   ;;  %vm1264_vm0 = vmmov 0   ;;  %s1471_s13 = smov (!%p160_p3, %s1047_s13), 1 }
   0xc   : > { %1153 = vmatprep.subr.bf16.mxu0 %v1263_v1  ;;  %1161 = vmatprep.subr.bf16.mxu1 %v1263_v1  ;;  %v1240_v5 = vld [vmem:[%s1465_s1] sm:$0xff]   ;;  %v1265_v6 = vmov 1966171168   ;;  %s1225_s22 = smul.u32 24, %s1471_s13  ;;  %vm218_vm1 = vcmask 261120   ;;  %v1241_v23 = vld [vmem:[%s1465_s1 + $0x68] sm:$0xff]  }
   0xd   : > { %1154 = vmatpush3.bf16.msra.mxu0 %v1237_v0  ;;  %1157 = vmatprep.mubr.msk.bf16.mxu0 %vm1264_vm0, %v1263_v1  ;;  %v193_v7 = vunpack.c.l.s4 %v1265_v6  ;;  %v196_v8 = vshrl.u32 %v195_v3, 7  ;;  %v1242_v26 = vld [vmem:[%s1465_s1 + $0x18] sm:$0xff]   ;;  %v1243_v32 = vld [vmem:[%s1465_s1 + $0x60] sm:$0xff]   ;;  %v1244_v35 = vld [vmem:[%s1465_s1 + $0x10] sm:$0xff]   ;;  %vm694_vm2 = vsmask.f32 256 }
   0xe   : > { %1162 = vmatpush3.bf16.msra.mxu1 %v1238_v2  ;;  %1155 = vmatprep.subr.bf16.mxu0 %v1263_v1  ;;  %s1321_s25 = scalar_lea.vmem %s1464_s0, %s1225_s22  ;;  %v1245_v36 = vld [vmem:[%s1465_s1 + $0x48] sm:$0xff]   ;;  %v1246_v39 = vld [vmem:[%s1465_s1 + $0x78] sm:$0xff]   ;;  %vm695_vm3 = vsmask.f32 1284  ;;  %vm697_vm5 = vsmask.f32 2312 }
   0xf   : > { %1163 = vmatprep.subr.bf16.mxu1 %v1263_v1  ;;  %1165 = vmatprep.mubr.msk.bf16.mxu1 %vm1264_vm0, %v1263_v1  ;;  %v194_v9 = vunpack.c.0.s8 %v193_v7  ;;  %v176_v10 = vld [vmem:[%s1321_s25 + $0xc] sm:$0x1]  ;;  %v177_v11 = vld [vmem:[%s1321_s25 + $0xe] sm:$0x1]  ;;  %v170_v13 = vld [vmem:[%s1321_s25] sm:$0x1] }
  0x10   : > { %v191_v14 = vcombine.low %v176_v10, %v177_v11  ;;  %v171_v15 = vld [vmem:[%s1321_s25 + $0x2] sm:$0x1]  ;;  %v172_v16 = vld [vmem:[%s1321_s25 + $0x4] sm:$0x1]  ;;  %v173_v17 = vld [vmem:[%s1321_s25 + $0x6] sm:$0x1] }
  0x11   : > { %1156 = vmatpush3.bf16.msra.mxu0 %v1239_v4  ;;  %v1326_v12 = vsub.s32 %v194_v9, %v196_v8  ;;  %v264_v18 = vcombine.low %v170_v13, %v171_v15  ;;  %v174_v19 = vld [vmem:[%s1321_s25 + $0x8] sm:$0x1]  ;;  %v340_v21 = vcombine.low %v171_v15, %v172_v16  ;;  %v178_v28 = vld [vmem:[%s1321_s25 + $0x12] sm:$0x1]  ;;  %v179_v29 = vld [vmem:[%s1321_s25 + $0x14] sm:$0x1] }
  0x12   : > { %1164 = vmatpush3.bf16.msra.mxu1 %v1240_v5  ;;  %1169 = vmatprep.subr.bf16.mxu0 %v1263_v1  ;;  %v418_v24 = vcombine.low %v173_v17, %v174_v19  ;;  %v175_v31 = vld [vmem:[%s1321_s25 + $0xa] sm:$0x1]  ;;  %v496_v34 = vcombine.low %v178_v28, %v179_v29  ;;  %v1092_v40 = vld.sshfl [vmem:[%s1321_s25] sm:$0x11 pattern:$0x75316420]  ;;  %vm696_vm4 = vmor %vm694_vm2, %vm695_vm3 }
  0x13   : > { %1177 = vmatprep.subr.bf16.mxu1 %v1263_v1  ;;  %v198_v20 = vrot.slane %v191_v14, %v1326_v12  ;;  %v271_v22 = vrot.slane %v264_v18, %v1326_v12  ;;  %v347_v30 = vrot.slane %v340_v21, %v1326_v12  ;;  %v573_v37 = vcombine.low %v174_v19, %v175_v31  ;;  %v1093_v43 = vld.sshfl [vmem:[%s1321_s25 + $0x2] sm:$0x11 pattern:$0x75316420]  ;;  %vm698_vm8 = vmor %vm696_vm4, %vm697_vm5  ;;  %v1248_v53 = vld [vmem:[%s1465_s1 + $0x70] sm:$0xff]   ;;  %s1053_s4 = sshll.u32 %s1471_s13, 1 }
  0x14   : > { %v425_v33 = vrot.slane %v418_v24, %v1326_v12  ;;  %v503_v42 = vrot.slane %v496_v34, %v1326_v12  ;;  %v661_v44 = vcombine.high %v1092_v40, %v1092_v40  ;;  %v669_v45 = vcombine.high %v1093_v43, %v1093_v43  ;;  %v1247_v46 = vld [vmem:[%s1465_s1 + $0x40] sm:$0xff]   ;;  %v1095_v52 = vld.sshfl [vmem:[%s1321_s25 + $0xc] sm:$0x11 pattern:$0x75316420]  ;;  %v1250_v6 = vld [vmem:[%s1465_s1 + $0x58] sm:$0xff]   ;;  %s168_s7 = scalar_lea.vmem %s1467_s3, %s1053_s4 }
  0x15   : > { %v205_v25 = vrot.slane %v198_v20, %v1326_v12  ;;  %v278_v27 = vrot.slane %v271_v22, %v1326_v12  ;;  %v354_v38 = vrot.slane %v347_v30, %v1326_v12  ;;  %vm699_vm6 = vsmask.f32 3340  ;;  %v1096_v54 = vld.sshfl [vmem:[%s1321_s25 + $0xe] sm:$0x11 pattern:$0x75316420] }
  0x16   : > { %v432_v41 = vrot.slane %v425_v33, %v1326_v12  ;;  %vm701_vm7 = vsmask.f32 4368  ;;  %v580_v47 = vrot.slane %v573_v37, %v1326_v12  ;;  %vm703_vm9 = vsmask.f32 5396  ;;  %vm700_vm12 = vmor %vm698_vm8, %vm699_vm6  ;;  %v1249_v0 = vld [vmem:[%s1465_s1 + $0x28] sm:$0xff]   ;;  %v1251_v15 = vld [vmem:[%s1465_s1 + $0x20] sm:$0xff]  }
  0x17   : > { %1158 = vmatmul.mubr.msk.bf16.vlgmr.msra.gmra.mxu0 %vm218_vm1, %v205_v25  ;;  %1166 = vmatmul.mubr.msk.bf16.vlgmr.msra.gmra.mxu1 %vm218_vm1, %v278_v27  ;;  %vm705_vm10 = vsmask.f32 6424  ;;  %vm707_vm11 = vsmask.f32 7452  ;;  %v710_v48 = vshrl.u32 %v1092_v40, 16  ;;  %v715_v49 = vshll.u32 %v661_v44, 16  ;;  %vm702_vm13 = vmor %vm700_vm12, %vm701_vm7 }
  0x18   : > { %1170 = vmatpush3.bf16.msra.mxu0 %v1241_v23  ;;  %1178 = vmatpush3.bf16.msra.mxu1 %v1242_v26  ;;  %v719_v50 = vshrl.u32 %v1093_v43, 16  ;;  %v724_v51 = vshll.u32 %v669_v45, 16  ;;  %vm704_vm14 = vmor %vm702_vm13, %vm703_vm9  ;;  %v685_v55 = vcombine.high %v1095_v52, %v1095_v52  ;;  %v737_v56 = vshrl.u32 %v1095_v52, 16  ;;  %v1252_v17 = vld [vmem:[%s1465_s1 + $0x50] sm:$0xff]   ;;  %v1253_v22 = vld [vmem:[%s1465_s1 + $0x88] sm:$0xff]  }
  0x19   : > { %1171 = vmatprep.subr.bf16.mxu0 %v1263_v1  ;;  %1179 = vmatprep.subr.bf16.mxu1 %v1263_v1  ;;  %vm706_vm15 = vmor %vm704_vm14, %vm705_vm10  ;;  %v693_v57 = vcombine.high %v1096_v54, %v1096_v54  ;;  %v746_v58 = vshrl.u32 %v1096_v54, 16  ;;  %v510_v59 = vrot.slane %v503_v42, %v1326_v12  ;;  %v587_v60 = vrot.slane %v580_v47, %v1326_v12  ;;  %v1094_v63 = vld.sshfl [vmem:[%s1321_s25 + $0x4] sm:$0x11 pattern:$0x75316420] }
  0x1a   : > { %1173 = vmatprep.mubr.msk.bf16.mxu0 %vm1264_vm0, %v1263_v1  ;;  %1181 = vmatprep.mubr.msk.bf16.mxu1 %vm1264_vm0, %v1263_v1  ;;  %vm1398_vm2 = vmor %vm706_vm15, %vm707_vm11  ;;  %v742_v62 = vshll.u32 %v685_v55, 16  ;;  %v677_v5 = vcombine.high %v1094_v63, %v1094_v63  ;;  %v728_v9 = vshrl.u32 %v1094_v63, 16  ;;  %v1254_v24 = vld [vmem:[%s1465_s1 + $0x80] sm:$0xff]  }
  0x1b   : > { %v717_v2 = vsel %vm1398_vm2, %v710_v48, %v715_v49  ;;  %v726_v3 = vsel %vm1398_vm2, %v719_v50, %v724_v51  ;;  %v751_v4 = vshll.u32 %v693_v57, 16 }
  0x1c   : > { %1172 = vmatpush3.bf16.msra.mxu0 %v1243_v32  ;;  %1180 = vmatpush3.bf16.msra.mxu1 %v1244_v35  ;;  %v759_v7 = vcombine.low %v717_v2, %v726_v3  ;;  %v744_v8 = vsel %vm1398_vm2, %v737_v56, %v742_v62  ;;  %v733_v11 = vshll.u32 %v677_v5, 16 }
  0x1d   : > { %1185 = vmatprep.subr.bf16.mxu0 %v1263_v1  ;;  %1193 = vmatprep.subr.bf16.mxu1 %v1263_v1  ;;  %v753_v10 = vsel %vm1398_vm2, %v746_v58, %v751_v4 }
  0x1e   : > { %v766_v13 = vrot.slane %v759_v7, %v1326_v12  ;;  %v835_v14 = vcombine.low %v744_v8, %v753_v10  ;;  %v735_v16 = vsel %vm1398_vm2, %v728_v9, %v733_v11 }
  0x1f   : > { %1174 = vmatmul.mubr.msk.bf16.vlgmr.msra.gmra.mxu0 %vm218_vm1, %v354_v38  ;;  %1182 = vmatmul.mubr.msk.bf16.vlgmr.msra.gmra.mxu1 %vm218_vm1, %v432_v41  ;;  %v911_v20 = vcombine.low %v726_v3, %v735_v16 }
  0x20   : > { %1186 = vmatpush3.bf16.msra.mxu0 %v1245_v36  ;;  %1194 = vmatpush3.bf16.msra.mxu1 %v1246_v39  ;;  %v842_v18 = vrot.slane %v835_v14, %v1326_v12  ;;  %v773_v19 = vrot.slane %v766_v13, %v1326_v12 }
  0x21   : > { %1187 = vmatprep.subr.bf16.mxu0 %v1263_v1  ;;  %1195 = vmatprep.subr.bf16.mxu1 %v1263_v1  ;;  %v918_v23 = vrot.slane %v911_v20, %v1326_v12 }
  0x22   : > { %1189 = vmatprep.mubr.msk.bf16.mxu0 %vm1264_vm0, %v1263_v1  ;;  %1197 = vmatprep.mubr.msk.bf16.mxu1 %vm1264_vm0, %v1263_v1  ;;  %v849_v21 = vrot.slane %v842_v18, %v1326_v12 }
  0x23   : > { %v925_v25 = vrot.slane %v918_v23, %v1326_v12 }
  0x24   : > { %1188 = vmatpush3.bf16.msra.mxu0 %v1247_v46  ;;  %1196 = vmatpush3.bf16.msra.mxu1 %v1248_v53 }
  0x25   : > { %1201 = vmatprep.subr.bf16.mxu0 %v1263_v1  ;;  %1209 = vmatprep.subr.bf16.mxu1 %v1263_v1 }
  0x27   : > { %1190 = vmatmul.mubr.msk.bf16.vlgmr.msra.gmra.mxu0 %vm218_vm1, %v510_v59  ;;  %1198 = vmatmul.mubr.msk.bf16.vlgmr.msra.gmra.mxu1 %vm218_vm1, %v587_v60 }
  0x28   : > { %1202 = vmatpush3.bf16.msra.mxu0 %v1249_v0  ;;  %1210 = vmatpush3.bf16.msra.mxu1 %v1250_v6  ;;  %v1123_v0 = vld [vmem:[%s1466_s2] ss:$0 sm:$0xff] }
  0x29   : > { %1203 = vmatprep.subr.bf16.mxu0 %v1263_v1  ;;  %1211 = vmatprep.subr.bf16.mxu1 %v1263_v1 }
  0x2a   : > { %1205 = vmatprep.mubr.msk.bf16.mxu0 %vm1264_vm0, %v1263_v1  ;;  %1213 = vmatprep.mubr.msk.bf16.mxu1 %vm1264_vm0, %v1263_v1 }
  0x2c   : > { %1204 = vmatpush3.bf16.msra.mxu0 %v1251_v15  ;;  %1212 = vmatpush3.bf16.msra.mxu1 %v1252_v17 }
  0x2d   : > { %1217 = vmatprep.subr.bf16.mxu0 %v1263_v1 }
  0x2f   : > { %1206 = vmatmul.mubr.msk.bf16.vlgmr.msra.gmra.mxu0 %vm218_vm1, %v773_v19  ;;  %1214 = vmatmul.mubr.msk.bf16.vlgmr.msra.gmra.mxu1 %vm218_vm1, %v849_v21 }
  0x30   : > { %1218 = vmatpush3.bf16.msra.mxu0 %v1253_v22  ;;  %1221 = vmatprep.mubr.msk.bf16.mxu0 %vm1264_vm0, %v1263_v1  ;;  %vm992_vm0 = vcmask 254976  }
  0x31   : > { %1219 = vmatprep.subr.bf16.mxu0 %v1263_v1 }
  0x34   : > { %1220 = vmatpush3.bf16.msra.mxu0 %v1254_v24 }
  0x37   : > { %1222 = vmatmul.mubr.msk.bf16.vlgmr.msra.gmra.mxu0 %vm218_vm1, %v925_v25 }
  0xd7   : > { %v256_v26 = vpop.f32.mrf.mxu0  ;;  %v328_v27 = vpop.f32.mrf.mxu1 }
  0xd8   : > { %v329_v39 = vadd.f32 %v328_v27, %v256_v26 }
  0xd9   : > { %v1159_v28 = vpop.f32.mrf.mxu0  ;;  %v1167_v29 = vpop.f32.mrf.mxu1 }
  0xdb   : > { %v259_v30 = vpop.f32.mrf.mxu0  ;;  %v331_v31 = vpop.f32.mrf.mxu1 }
  0xdd   : > { %v1160_v32 = vpop.f32.mrf.mxu0  ;;  %v1168_v33 = vpop.f32.mrf.mxu1 }
  0xdf   : > { %v404_v34 = vpop.f32.mrf.mxu0  ;;  %v482_v35 = vpop.f32.mrf.mxu1 }
  0xe0   : > { %v410_v12 = vadd.f32 %v404_v34, %v329_v39 }
  0xe1   : > { %v1175_v36 = vpop.f32.mrf.mxu0  ;;  %v1183_v37 = vpop.f32.mrf.mxu1 }
  0xe2   : > { %v488_v45 = vadd.f32 %v482_v35, %v410_v12 }
  0xe3   : > { %v407_v38 = vpop.f32.mrf.mxu0  ;;  %v485_v1 = vpop.f32.mrf.mxu1 }
  0xe5   : > { %v1176_v40 = vpop.f32.mrf.mxu0  ;;  %v1184_v41 = vpop.f32.mrf.mxu1 }
  0xe7   : > { %v560_v42 = vpop.f32.mrf.mxu0  ;;  %v637_v43 = vpop.f32.mrf.mxu1 }
  0xe8   : > { %v566_v48 = vadd.f32 %v560_v42, %v488_v45 }
  0xe9   : > { %v1191_v44 = vpop.f32.mrf.mxu0  ;;  %v1199_v46 = vpop.f32.mrf.mxu1 }
  0xea   : > { %v643_v53 = vadd.f32 %v637_v43, %v566_v48 }
  0xeb   : > { %v563_v47 = vpop.f32.mrf.mxu0  ;;  %v640_v49 = vpop.f32.mrf.mxu1 }
  0xed   : > { %v1192_v50 = vpop.f32.mrf.mxu0  ;;  %v1200_v51 = vpop.f32.mrf.mxu1 }
  0xef   : > { %v823_v52 = vpop.f32.mrf.mxu0  ;;  %v899_v54 = vpop.f32.mrf.mxu1 }
  0xf0   : > { %v829_v56 = vadd.f32 %v823_v52, %v643_v53 }
  0xf1   : > { %v1207_v55 = vpop.f32.mrf.mxu0  ;;  %v1215_v57 = vpop.f32.mrf.mxu1 }
  0xf2   : > { %v905_v61 = vadd.f32 %v899_v54, %v829_v56 }
  0xf3   : > { %v826_v58 = vpop.f32.mrf.mxu0  ;;  %v902_v59 = vpop.f32.mrf.mxu1 }
  0xf5   : > { %v1208_v60 = vpop.f32.mrf.mxu0  ;;  %v1216_v62 = vpop.f32.mrf.mxu1 }
  0xf7   : > { %v975_v63 = vpop.f32.mrf.mxu0 }
  0xf8   : > { %v981_v2 = vadd.f32 %v975_v63, %v905_v61 }
  0xf9   : > { %v1223_v3 = vpop.f32.mrf.mxu0 }
  0xfa   : > { %v989_v4 = vadd.f32 %v1123_v0, %v981_v2 }
  0xfb   : > { %v978_v5 = vpop.f32.mrf.mxu0 }
  0xfc   : > { %v990_v6 = vmax.f32 %v989_v4, 0.0 }
  0xfd   : > { %v1224_v7 = vpop.f32.mrf.mxu0 }
  0xfe   : > { %v991_v8 = vpack.c.bf16 %v990_v6, %v990_v6 }
 0x100   : > { %993 = vst.msk [vmem:[%s168_s7] sm:$0x3] %vm992_vm0, %v991_v8 }
 0x101 PF: > { %s13_s12 = sadd.s32 1, %s1261_s12  }
 0x102   : > { %p10_p4 = scmp.ge.s32.totalorder %s13_s12, 4  }
 0x104   :  { %12 = sbr.rel (!%p10_p4) target bundleno = 1 (0x1), region = 70 }

// kernel: forward.33
= control target key start
LH: loop header
LB: loop body
LE: loop exit
PB: predicated region body
PF: predicated region fallthrough
CT: control target
= control target key end

     0   :  { %v183_v0 = vmov 0.0   ;;  %vm184_vm0 = vmmov 0   ;;  %vm129_vm1 = vcmask 519168   ;;  %s238_s1 = inlined_call_operand.vmem [shape: bf16[128,64], index: 1, kind: input, shape index: {}]   ;;  %s239_s0 = inlined_call_operand.vmem [shape: bf16[8,128], index: 0, kind: input, shape index: {}]   ;;  %s240_s2 = inlined_call_operand.vmem [shape: f32[1,64], index: 2, kind: input, shape index: {}]   ;;  %s241_s3 = inlined_call_operand.vmem [shape: bf16[8,64], index: 3, kind: output, shape index: {}]  }
   0x1   :  { %153 = vmatprep.subr.bf16.mxu0 %v183_v0  ;;  %v175_v1 = vld [vmem:[%s238_s1 + $0x38] sm:$0xff]   ;;  %169 = vmatprep.mubr.msk.bf16.mxu0 %vm184_vm0, %v183_v0  ;;  %v176_v2 = vld [vmem:[%s238_s1 + $0x30] sm:$0xff]   ;;  %v177_v3 = vld [vmem:[%s238_s1 + $0x28] sm:$0xff]  }
   0x2   :  { %154 = vmatpush3.bf16.msra.mxu0 %v175_v1  ;;  %v178_v4 = vld [vmem:[%s238_s1 + $0x20] sm:$0xff]   ;;  %v179_v5 = vld [vmem:[%s238_s1 + $0x18] sm:$0xff]   ;;  %v180_v6 = vld [vmem:[%s238_s1 + $0x10] sm:$0xff]  }
   0x3   :  { %155 = vmatprep.subr.bf16.mxu0 %v183_v0  ;;  %v181_v7 = vld [vmem:[%s238_s1 + $0x8] sm:$0xff]   ;;  %v182_v8 = vld [vmem:[%s238_s1] sm:$0xff]  }
   0x4   :  { %v15_v9 = vld [vmem:[%s239_s0] sm:$0xf] }
   0x5   :  { %v135_v10 = vld [vmem:[%s240_s2] ss:$0 sm:$0xff] }
   0x6   :  { %156 = vmatpush3.bf16.msra.mxu0 %v176_v2 }
   0x7   :  { %157 = vmatprep.subr.bf16.mxu0 %v183_v0 }
   0xa   :  { %158 = vmatpush3.bf16.msra.mxu0 %v177_v3 }
   0xb   :  { %159 = vmatprep.subr.bf16.mxu0 %v183_v0 }
   0xe   :  { %160 = vmatpush3.bf16.msra.mxu0 %v178_v4 }
   0xf   :  { %161 = vmatprep.subr.bf16.mxu0 %v183_v0 }
  0x12   :  { %162 = vmatpush3.bf16.msra.mxu0 %v179_v5 }
  0x13   :  { %163 = vmatprep.subr.bf16.mxu0 %v183_v0 }
  0x16   :  { %164 = vmatpush3.bf16.msra.mxu0 %v180_v6 }
  0x17   :  { %165 = vmatprep.subr.bf16.mxu0 %v183_v0 }
  0x1a   :  { %166 = vmatpush3.bf16.msra.mxu0 %v181_v7 }
  0x1b   :  { %167 = vmatprep.subr.bf16.mxu0 %v183_v0 }
  0x1e   :  { %168 = vmatpush3.bf16.msra.mxu0 %v182_v8 }
  0x21   :  { %170 = vmatmul.mubr.bf16.vlgmr.msra.gmra.mxu0 %v15_v9 }
  0xe1   :  { %v121_v11 = vpop.f32.mrf.mxu0 }
  0xe2   :  { %v122_v12 = vadd.f32 %v135_v10, %v121_v11 }
  0xe3   :  { %v171_v13 = vpop.f32.mrf.mxu0 }
  0xe4   :  { %v127_v14 = vmax.f32 %v122_v12, 0.0 }
  0xe5   :  { %v124_v15 = vpop.f32.mrf.mxu0 }
  0xe6   :  { %v128_v16 = vpack.c.bf16 %v127_v14, %v127_v14 }
  0xe7   :  { %v172_v17 = vpop.f32.mrf.mxu0 }
  0xe8   :  { %130 = vst.msk [vmem:[%s241_s3] sm:$0xf] %vm129_vm1, %v128_v16 }

// kernel: forward.36
= control target key start
LH: loop header
LB: loop body
LE: loop exit
PB: predicated region body
PF: predicated region fallthrough
CT: control target
= control target key end

     0   :  { %v192_v1 = vmov 0   ;;  %vm79_vm0 = vcmask 523264   ;;  %v29_v10 = vlaneseq  ;;  %v193_v11 = vmov 1983009808   ;;  %s256_s1 = inlined_call_operand.vmem [shape: bf16[64,256], index: 1, kind: input, shape index: {}]   ;;  %s257_s0 = inlined_call_operand.vmem [shape: bf16[2,64], index: 0, kind: input, shape index: {}]   ;;  %s258_s3 = inlined_call_operand.vmem [shape: bf16[2,256], index: 3, kind: input, shape index: {}]   ;;  %s259_s2 = inlined_call_operand.vmem [shape: f32[1,256], index: 2, kind: input, shape index: {}]   ;;  %s260_s4 = inlined_call_operand.vmem [shape: bf16[2,256], index: 4, kind: output, shape index: {}]  }
   0x1   :  { %v180_v0 = vld [vmem:[%s256_s1 + $0x34] ss:$8 sps:$4 sm:$0xff]   ;;  %115 = vmatprep.mubr.bf16.mxu0 %v192_v1  ;;  %v182_v2 = vld [vmem:[%s256_s1 + $0x30] ss:$8 sps:$4 sm:$0xff]   ;;  %v183_v3 = vld [vmem:[%s256_s1 + $0x24] ss:$8 sps:$4 sm:$0xff]   ;;  %v128_v12 = vunpack.c.l.s4 %v193_v11 }
   0x2   :  { %91 = vmatprep.subr.bf16.mxu0 %v180_v0  ;;  %v185_v4 = vld [vmem:[%s256_s1 + $0x20] ss:$8 sps:$4 sm:$0xff]   ;;  %v186_v5 = vld [vmem:[%s256_s1 + $0x14] ss:$8 sps:$4 sm:$0xff]   ;;  %v188_v6 = vld [vmem:[%s256_s1 + $0x10] ss:$8 sps:$4 sm:$0xff]  }
   0x3   :  { %92 = vmatpush1.bf16.msra.mxu0 %v182_v2  ;;  %v189_v7 = vld [vmem:[%s256_s1 + $0x4] ss:$8 sps:$4 sm:$0xff]   ;;  %v191_v8 = vld [vmem:[%s256_s1] ss:$8 sps:$4 sm:$0xff]   ;;  %v30_v13 = vshrl.u32 %v29_v10, 7  ;;  %v129_v14 = vunpack.c.0.s8 %v128_v12 }
   0x4   :  { %93 = vmatprep.subr.bf16.mxu0 %v183_v3  ;;  %v18_v9 = vld [vmem:[%s257_s0] sm:$0x1]  ;;  %v194_v24 = vmov 1966171168  }
   0x5   :  { %v124_v15 = vld [vmem:[%s258_s3] sm:$0x3]  ;;  %v31_v16 = vsub.s32 0, %v30_v13  ;;  %v132_v18 = vsub.s32 %v129_v14, %v30_v13  ;;  %v35_v20 = vsub.s32 1, %v30_v13  ;;  %v147_v25 = vunpack.c.l.s4 %v194_v24 }
   0x6   :  { %v125_v17 = vunpack.c.l.bf16 %v124_v15  ;;  %v27_v19 = vld [vmem:[%s259_s2] sm:$0x3] }
   0x7   :  { %94 = vmatpush1.bf16.msra.mxu0 %v185_v4  ;;  %v32_v21 = vrot.slane %v27_v19, %v31_v16  ;;  %v36_v23 = vrot.slane %v27_v19, %v35_v20  ;;  %v148_v32 = vunpack.c.0.s8 %v147_v25 }
   0x8   :  { %95 = vmatprep.subr.bf16.mxu0 %v186_v5  ;;  %v133_v22 = vrot.slane %v125_v17, %v132_v18 }
   0x9   :  { %v151_v38 = vsub.s32 %v148_v32, %v30_v13 }
   0xa   :  { %v134_v28 = vcombine.high %v133_v22, %v133_v22 }
   0xb   :  { %96 = vmatpush1.bf16.msra.mxu0 %v188_v6 }
   0xc   :  { %97 = vmatprep.subr.bf16.mxu0 %v189_v7 }
   0xf   :  { %98 = vmatpush1.bf16.msra.mxu0 %v191_v8 }
  0x12   :  { %174 = vmatmul.mubr.msk.bf16.vlgmr.msra.gmra.mxu0 %vm79_vm0, %v18_v9 }
  0xd2   :  { %v117_v26 = vpop.f32.mrf.mxu0 }
  0xd3   :  { %v118_v27 = vadd.f32 %v117_v26, %v32_v21 }
  0xd4   :  { %v119_v29 = vpop.f32.mrf.mxu0 }
  0xd5   :  { %v137_v30 = vadd.f32 %v133_v22, %v118_v27  ;;  %v120_v31 = vadd.f32 %v119_v29, %v36_v23 }
  0xd6   :  { %v121_v33 = vpop.f32.mrf.mxu0 }
  0xd7   :  { %v138_v34 = vadd.f32 %v134_v28, %v120_v31  ;;  %v139_v36 = vmax.f32 %v137_v30, 0.0 }
  0xd8   :  { %v122_v35 = vpop.f32.mrf.mxu0 }
  0xd9   :  { %v140_v37 = vmax.f32 %v138_v34, 0.0 }
  0xdb   :  { %v175_v39 = vpack.c.bf16 %v140_v37, %v139_v36 }
  0xdd   :  { %v152_v40 = vrot.slane %v175_v39, %v151_v38 }
  0xdf   :  { %176 = vst.sshfl [vmem:[%s260_s4] sm:$0x5 pattern:$0x73625140] %v152_v40 }

// kernel: forward.35
= control target key start
LH: loop header
LB: loop body
LE: loop exit
PB: predicated region body
PF: predicated region fallthrough
CT: control target
= control target key end

     0   :  { %s649_s12 = smov 0   ;;  %s775_s0 = inlined_call_operand.vmem [shape: bf16[2,1,2,1,256], index: 0, kind: input, shape index: {}]   ;;  %s776_s1 = inlined_call_operand.vmem [shape: bf16[256,256], index: 1, kind: input, shape index: {}]   ;;  %s777_s2 = inlined_call_operand.vmem [shape: f32[1,256], index: 2, kind: input, shape index: {}]   ;;  %s778_s3 = inlined_call_operand.vmem [shape: bf16[2,1,256], index: 3, kind: output, shape index: {}]  }
   0x1 LB: > { %s520_s13 = sadd.s32 4294967295, %s626_s12   ;;  %p524_p0 = scmp.ge.s32.totalorder %s626_s12, 1  ;;  %s626_s12 = sphi %s649_s12, %s13_s12  }
   0x2   : > { %p136_p1 = scmp.lt.s32.totalorder %s626_s12, 3 }
   0x4   : > { %p137_p2 = pnand %p524_p0, %p136_p1 }
   0x5   : > { %p158_p3 = scmp.lt.s32.totalorder (!%p137_p2), %s520_s13, 1 }
   0x6   : > { %140 = sbr.rel (%p137_p2) target bundleno = 281 (0x119), region = 32 }
   0xb   : > { %v572_v0 = vld [vmem:[%s776_s1 + $0x74] ss:$8 sps:$4 sm:$0xff]   ;;  %v574_v1 = vld [vmem:[%s776_s1 + $0x70] ss:$8 sps:$4 sm:$0xff]   ;;  %v575_v2 = vld [vmem:[%s776_s1 + $0x64] ss:$8 sps:$4 sm:$0xff]   ;;  %v212_v11 = vlaneseq }
   0xc   : > { %396 = vmatprep.subr.bf16.mxu0 %v572_v0  ;;  %v577_v3 = vld [vmem:[%s776_s1 + $0x60] ss:$8 sps:$4 sm:$0xff]   ;;  %v578_v4 = vld [vmem:[%s776_s1 + $0x54] ss:$8 sps:$4 sm:$0xff]   ;;  %v580_v5 = vld [vmem:[%s776_s1 + $0x50] ss:$8 sps:$4 sm:$0xff]  }
   0xd   : > { %397 = vmatpush1.bf16.msra.mxu0 %v574_v1  ;;  %v581_v6 = vld [vmem:[%s776_s1 + $0x44] ss:$8 sps:$4 sm:$0xff]   ;;  %v583_v7 = vld [vmem:[%s776_s1 + $0x40] ss:$8 sps:$4 sm:$0xff]   ;;  %s780_s13 = smov (!%p158_p3, %s520_s13), 1  ;;  %v213_v15 = vshrl.u32 %v212_v11, 7 }
   0xe   : > { %398 = vmatprep.subr.bf16.mxu0 %v575_v2  ;;  %v584_v8 = vld [vmem:[%s776_s1 + $0x34] ss:$8 sps:$4 sm:$0xff]   ;;  %v628_v9 = vmov 1966171168   ;;  %v586_v12 = vld [vmem:[%s776_s1 + $0x30] ss:$8 sps:$4 sm:$0xff]  }
   0xf   : > { %v210_v10 = vunpack.c.l.s4 %v628_v9  ;;  %s525_s7 = sshll.u32 %s780_s13, 2  ;;  %v587_v13 = vld [vmem:[%s776_s1 + $0x24] ss:$8 sps:$4 sm:$0xff]   ;;  %v589_v16 = vld [vmem:[%s776_s1 + $0x20] ss:$8 sps:$4 sm:$0xff]   ;;  %v388_v42 = vsub.s32 0, %v213_v15 }
  0x10   : > { %s161_s14 = scalar_lea.vmem %s775_s0, %s525_s7  ;;  %v590_v17 = vld [vmem:[%s776_s1 + $0x14] ss:$8 sps:$4 sm:$0xff]   ;;  %v592_v21 = vld [vmem:[%s776_s1 + $0x10] ss:$8 sps:$4 sm:$0xff]   ;;  %v593_v22 = vld [vmem:[%s776_s1 + $0x4] ss:$8 sps:$4 sm:$0xff]  }
  0x11   : > { %399 = vmatpush1.bf16.msra.mxu0 %v577_v3  ;;  %v211_v14 = vunpack.c.0.s8 %v210_v10  ;;  %v527_v19 = vld.sshfl [vmem:[%s161_s14] sm:$0x11 pattern:$0x75316420]  ;;  %v596_v25 = vld [vmem:[%s776_s1 + $0xf4] ss:$8 sps:$4 sm:$0xff]  }
  0x12   : > { %400 = vmatprep.subr.bf16.mxu0 %v578_v4  ;;  %v208_v20 = vcombine.high %v527_v19, %v527_v19  ;;  %v595_v24 = vld [vmem:[%s776_s1] ss:$8 sps:$4 sm:$0xff]   ;;  %v598_v26 = vld [vmem:[%s776_s1 + $0xf0] ss:$8 sps:$4 sm:$0xff]   ;;  %v599_v27 = vld [vmem:[%s776_s1 + $0xe4] ss:$8 sps:$4 sm:$0xff]  }
  0x13   : > { %v702_v18 = vsub.s32 %v211_v14, %v213_v15  ;;  %v601_v28 = vld [vmem:[%s776_s1 + $0xe0] ss:$8 sps:$4 sm:$0xff]   ;;  %v602_v29 = vld [vmem:[%s776_s1 + $0xd4] ss:$8 sps:$4 sm:$0xff]   ;;  %v604_v30 = vld [vmem:[%s776_s1 + $0xd0] ss:$8 sps:$4 sm:$0xff]  }
  0x14   : > { %v605_v31 = vld [vmem:[%s776_s1 + $0xc4] ss:$8 sps:$4 sm:$0xff]   ;;  %v607_v32 = vld [vmem:[%s776_s1 + $0xc0] ss:$8 sps:$4 sm:$0xff]   ;;  %v608_v33 = vld [vmem:[%s776_s1 + $0xb4] ss:$8 sps:$4 sm:$0xff]  }
  0x15   : > { %401 = vmatpush1.bf16.msra.mxu0 %v580_v5  ;;  %v222_v23 = vrot.slane %v208_v20, %v702_v18  ;;  %v610_v34 = vld [vmem:[%s776_s1 + $0xb0] ss:$8 sps:$4 sm:$0xff]   ;;  %v611_v35 = vld [vmem:[%s776_s1 + $0xa4] ss:$8 sps:$4 sm:$0xff]   ;;  %v613_v36 = vld [vmem:[%s776_s1 + $0xa0] ss:$8 sps:$4 sm:$0xff]   ;;  %v215_v41 = vrot.slane %v527_v19, %v702_v18 }
  0x16   : > { %402 = vmatprep.subr.bf16.mxu0 %v581_v6  ;;  %v614_v37 = vld [vmem:[%s776_s1 + $0x94] ss:$8 sps:$4 sm:$0xff]   ;;  %v616_v38 = vld [vmem:[%s776_s1 + $0x90] ss:$8 sps:$4 sm:$0xff]   ;;  %v617_v39 = vld [vmem:[%s776_s1 + $0x84] ss:$8 sps:$4 sm:$0xff]  }
  0x17   : > { %428 = vmatprep.mubr.bf16.mxu0 %v222_v23  ;;  %v619_v40 = vld [vmem:[%s776_s1 + $0x80] ss:$8 sps:$4 sm:$0xff]   ;;  %v392_v43 = vsub.s32 1, %v213_v15  ;;  %vm457_vm0 = vcmask 1040384   ;;  %vm458_vm1 = vsmask.f32 256 }
  0x18   : > { %v199_v44 = vld [vmem:[%s777_s2] sm:$0x3]  ;;  %s526_s7 = sshll.u32 %s780_s13, 1  ;;  %vm460_vm2 = vcmask 1041409   ;;  %vm461_vm3 = vsmask.f32 1280  ;;  %vm459_vm4 = vmand %vm457_vm0, %vm458_vm1 }
  0x19   : > { %403 = vmatpush1.bf16.msra.mxu0 %v583_v7  ;;  %v389_v45 = vrot.slane %v199_v44, %v388_v42  ;;  %v393_v46 = vrot.slane %v199_v44, %v392_v43  ;;  %s165_s10 = scalar_lea.vmem %s778_s3, %s526_s7  ;;  %vm462_vm5 = vmand %vm460_vm2, %vm461_vm3 }
  0x1a   : > { %404 = vmatprep.subr.bf16.mxu0 %v584_v8  ;;  %v464_v55 = vld [vmem:[%s165_s10] sm:$0x3]  ;;  %vm463_vm6 = vmor %vm462_vm5, %vm459_vm4 }
  0x1d   : > { %405 = vmatpush1.bf16.msra.mxu0 %v586_v12 }
  0x1e   : > { %406 = vmatprep.subr.bf16.mxu0 %v587_v13 }
  0x21   : > { %407 = vmatpush1.bf16.msra.mxu0 %v589_v16 }
  0x22   : > { %408 = vmatprep.subr.bf16.mxu0 %v590_v17 }
  0x25   : > { %409 = vmatpush1.bf16.msra.mxu0 %v592_v21 }
  0x26   : > { %410 = vmatprep.subr.bf16.mxu0 %v593_v22 }
  0x29   : > { %411 = vmatpush1.bf16.msra.mxu0 %v595_v24 }
  0x2a   : > { %412 = vmatprep.subr.bf16.mxu0 %v596_v25 }
  0x2d   : > { %413 = vmatpush2.bf16.msra.mxu0 %v598_v26 }
  0x2e   : > { %414 = vmatprep.subr.bf16.mxu0 %v599_v27 }
  0x31   : > { %415 = vmatpush2.bf16.msra.mxu0 %v601_v28 }
  0x32   : > { %416 = vmatprep.subr.bf16.mxu0 %v602_v29 }
  0x35   : > { %417 = vmatpush2.bf16.msra.mxu0 %v604_v30 }
  0x36   : > { %418 = vmatprep.subr.bf16.mxu0 %v605_v31 }
  0x39   : > { %419 = vmatpush2.bf16.msra.mxu0 %v607_v32 }
  0x3a   : > { %420 = vmatprep.subr.bf16.mxu0 %v608_v33 }
  0x3d   : > { %421 = vmatpush2.bf16.msra.mxu0 %v610_v34 }
  0x3e   : > { %422 = vmatprep.subr.bf16.mxu0 %v611_v35 }
  0x41   : > { %423 = vmatpush2.bf16.msra.mxu0 %v613_v36 }
  0x42   : > { %424 = vmatprep.subr.bf16.mxu0 %v614_v37 }
  0x45   : > { %425 = vmatpush2.bf16.msra.mxu0 %v616_v38 }
  0x46   : > { %426 = vmatprep.subr.bf16.mxu0 %v617_v39 }
  0x49   : > { %427 = vmatpush2.bf16.msra.mxu0 %v619_v40 }
  0x4c   : > { %429 = vmatmul.mubr.bf16.vlgmr.msra.gmra.mxu0 %v215_v41 }
 0x10c   : > { %v430_v47 = vpop.f32.mrf.mxu0 }
 0x10d   : > { %v431_v49 = vadd.f32 %v430_v47, %v389_v45 }
 0x10e   : > { %v432_v48 = vpop.f32.mrf.mxu0 }
 0x10f   : > { %v433_v50 = vadd.f32 %v432_v48, %v393_v46 }
 0x110   : > { %v434_v51 = vpop.f32.mrf.mxu0 }
 0x111   : > { %v560_v52 = vpack.c.bf16 %v433_v50, %v431_v49 }
 0x112   : > { %v435_v53 = vpop.f32.mrf.mxu0 }
 0x113   : > { %v448_v54 = vrot.slane %v560_v52, %v702_v18 }
 0x115   : > { %v455_v56 = vrot.slane %v448_v54, %v702_v18 }
 0x117   : > { %v465_v57 = vsel %vm463_vm6, %v455_v56, %v464_v55 }
 0x118   : > { %466 = vst [vmem:[%s165_s10] sm:$0x3] %v465_v57 }
 0x119 PF: > { %s13_s12 = sadd.s32 1, %s626_s12  }
 0x11a   : > { %p10_p4 = scmp.ge.s32.totalorder %s13_s12, 4  }
 0x11c   :  { %12 = sbr.rel (!%p10_p4) target bundleno = 1 (0x1), region = 62 }

// kernel: forward.37
= control target key start
LH: loop header
LB: loop body
LE: loop exit
PB: predicated region body
PF: predicated region fallthrough
CT: control target
= control target key end

     0   :  { %v24_v5 = vlaneseq  ;;  %s414_s0 = inlined_call_operand.vmem [shape: bf16[2,1,256], index: 0, kind: input, shape index: {}]   ;;  %s415_s1 = inlined_call_operand.vmem [shape: bf16[256,128], index: 1, kind: input, shape index: {}]   ;;  %s416_s2 = inlined_call_operand.vmem [shape: f32[1,128], index: 2, kind: input, shape index: {}]   ;;  %s417_s3 = inlined_call_operand.hbm [shape: f32[2,128], index: 3, kind: output, shape index: {}]  }
   0x1   :  { %v295_v0 = vld [vmem:[%s415_s1 + $0x78] sm:$0xff]   ;;  %v297_v2 = vld [vmem:[%s415_s1 + $0x70] sm:$0xff]   ;;  %v299_v4 = vld [vmem:[%s415_s1 + $0x68] sm:$0xff]  }
   0x2   :  { %v296_v1 = vld [vmem:[%s415_s1 + $0x38] sm:$0xff]   ;;  %272 = vmatprep.subr.bf16.mxu0 %v295_v0  ;;  %v298_v3 = vld [vmem:[%s415_s1 + $0x30] sm:$0xff]   ;;  %v300_v6 = vld [vmem:[%s415_s1 + $0x28] sm:$0xff]   ;;  %v25_v8 = vshrl.u32 %v24_v5, 7 }
   0x3   :  { %273 = vmatpush3.bf16.msra.mxu0 %v296_v1  ;;  %v301_v7 = vld [vmem:[%s415_s1 + $0x60] sm:$0xff]   ;;  %v303_v10 = vld [vmem:[%s415_s1 + $0x58] sm:$0xff]   ;;  %v305_v13 = vld [vmem:[%s415_s1 + $0x50] sm:$0xff]  }
   0x4   :  { %274 = vmatprep.subr.bf16.mxu0 %v297_v2  ;;  %v302_v9 = vld [vmem:[%s415_s1 + $0x20] sm:$0xff]   ;;  %v304_v11 = vld [vmem:[%s415_s1 + $0x18] sm:$0xff]   ;;  %v30_v12 = vsub.s32 2, %v25_v8  ;;  %v26_v14 = vsub.s32 0, %v25_v8 }
   0x5   :  { %v16_v15 = vld [vmem:[%s414_s0] sm:$0x3]  ;;  %v17_v16 = vld [vmem:[%s414_s0 + $0x2] sm:$0x3] }
   0x7   :  { %275 = vmatpush3.bf16.msra.mxu0 %v298_v3 }
   0x8   :  { %276 = vmatprep.subr.bf16.mxu0 %v299_v4 }
   0xb   :  { %277 = vmatpush3.bf16.msra.mxu0 %v300_v6 }
   0xc   :  { %278 = vmatprep.subr.bf16.mxu0 %v301_v7 }
   0xf   :  { %279 = vmatpush3.bf16.msra.mxu0 %v302_v9 }
  0x10   :  { %280 = vmatprep.subr.bf16.mxu0 %v303_v10 }
  0x11   :  { %8 = vsyncpa [#allocation3], 0  ;;  %v18_v17 = vunpack.c.l.bf16 %v16_v15  ;;  %v19_v18 = vunpack.c.l.bf16 %v17_v16  ;;  %v306_v19 = vld [vmem:[%s415_s1 + $0x10] sm:$0xff]   ;;  %v307_v24 = vld [vmem:[%s415_s1 + $0x48] sm:$0xff]   ;;  %vm96_vm0 = vcmask 1041409   ;;  %s333_s22 = smov [#allocation2]  }
  0x12   :  { %v308_v29 = vld [vmem:[%s415_s1 + $0x8] sm:$0xff]   ;;  %v309_v34 = vld [vmem:[%s415_s1 + $0x40] sm:$0xff]   ;;  %s247_s23 = sshll.u32 %s333_s22, 4  ;;  %s248_s23 = int_to_ptr.vmem [resolvable:$true] %s247_s23 }
  0x13   :  { %281 = vmatpush3.bf16.msra.mxu0 %v304_v11  ;;  %v31_v20 = vrot.slane %v18_v17, %v30_v12  ;;  %v39_v21 = vrot.slane %v19_v18, %v30_v12  ;;  %v27_v22 = vrot.slane %v18_v17, %v26_v14  ;;  %v35_v23 = vrot.slane %v19_v18, %v26_v14  ;;  %v310_v37 = vld [vmem:[%s415_s1] sm:$0xff]   ;;  %s311_s1 = scalar_lea.vmem %s248_s23, 32  ;;  %p316_p1 = scmp.lt.s32.totalorder %s248_s23, %s248_s23 }
  0x14   :  { %282 = vmatprep.subr.bf16.mxu0 %v305_v13  ;;  %v255_v44 = vld [vmem:[%s416_s2] ss:$0 sm:$0xff]  ;;  %p312_p0 = scmp.ne.s32.totalorder %s248_s23, %s311_s1  ;;  %p317_p2 = scmp.lt.s32.totalorder %s311_s1, %s311_s1 }
  0x15   :  { %v45_v25 = vpack.c.bf16 %v31_v20, %v31_v20  ;;  %v47_v26 = vpack.c.bf16 %v39_v21, %v39_v21  ;;  %v44_v27 = vpack.c.bf16 %v27_v22, %v27_v22  ;;  %v46_v28 = vpack.c.bf16 %v35_v23, %v35_v23 }
  0x16   :  { %p318_p3 = por %p317_p2, %p316_p1 }
  0x17   :  { %283 = vmatpush3.bf16.msra.mxu0 %v306_v19  ;;  %v92_v30 = vunpack.c.l.b16 %v45_v25  ;;  %v94_v31 = vunpack.c.l.b16 %v47_v26  ;;  %v91_v32 = vunpack.c.l.b16 %v44_v27  ;;  %v93_v33 = vunpack.c.l.b16 %v46_v28 }
  0x18   :  { %284 = vmatprep.subr.bf16.mxu0 %v307_v24  ;;  %p319_p4 = pnand %p318_p3, %p312_p0 }
  0x19   :  { %v98_v35 = vrot.slane %v94_v31, 7  ;;  %v95_v36 = vrot.slane %v93_v33, 7 }
  0x1b   :  { %285 = vmatpush3.bf16.msra.mxu0 %v308_v29  ;;  %v99_v38 = vsel %vm96_vm0, %v98_v35, %v92_v30  ;;  %v97_v39 = vsel %vm96_vm0, %v95_v36, %v91_v32 }
  0x1c   :  { %286 = vmatprep.subr.bf16.mxu0 %v309_v34  ;;  %v101_v40 = vpack.c.b16 %v99_v38, %v99_v38  ;;  %v100_v41 = vpack.c.b16 %v97_v39, %v97_v39 }
  0x1e   :  { %232 = vmatprep.mubr.bf16.mxu0 %v101_v40 }
  0x1f   :  { %287 = vmatpush3.bf16.msra.mxu0 %v310_v37 }
  0x22   :  { %233 = vmatmul.mubr.bf16.vlgmr.msra.gmra.mxu0 %v100_v41 }
  0xe2   :  { %v288_v42 = vpop.f32.mrf.mxu0 }
  0xe4   :  { %v289_v43 = vpop.f32.mrf.mxu0 }
  0xe5   :  { %v290_v45 = vadd.f32 %v289_v43, %v288_v42 }
  0xe6   :  { %v291_v46 = vpop.f32.mrf.mxu0 }
  0xe7   :  { %v235_v47 = vadd.f32 %v290_v45, %v255_v44 }
  0xe8   :  { %v292_v48 = vpop.f32.mrf.mxu0 }
  0xe9   :  { %240 = vst [vmem:[#allocation2] sm:$0x3] %v235_v47 }
  0xea   :  { %322 = shalt.err (!%p319_p4)
}
  0xeb   :  { %250 = dma.vmem_to_hbm [thread:$0]  %s248_s23, 32, %s417_s3, [#allocation3]  }
  0xec   :  { %331 = dma.done.wait [#allocation3], 32  }
  0xed   :  { %332 = vsyncadd [#allocation3], 4294967264 }
  0xee   :  { %254 = vsyncpa [#allocation3], 1 }

// kernel: forward.34
= control target key start
LH: loop header
LB: loop body
LE: loop exit
PB: predicated region body
PF: predicated region fallthrough
CT: control target
= control target key end

     0   :  { %s1321_s12 = smov 0   ;;  %s1536_s0 = inlined_call_operand.vmem [shape: bf16[2,8,2,64], index: 0, kind: input, shape index: {}]   ;;  %s1537_s1 = inlined_call_operand.vmem [shape: bf16[9,64,64], index: 1, kind: input, shape index: {}]   ;;  %s1538_s2 = inlined_call_operand.vmem [shape: f32[1,64], index: 2, kind: input, shape index: {}]   ;;  %s1539_s3 = inlined_call_operand.vmem [shape: bf16[2,1,64], index: 3, kind: output, shape index: {}]  }
   0x1 LB: > { %s973_s13 = sadd.s32 4294967295, %s1296_s12   ;;  %p977_p0 = scmp.ge.s32.totalorder %s1296_s12, 1  ;;  %s1296_s12 = sphi %s1321_s12, %s13_s12  }
   0x2   : > { %p136_p1 = scmp.lt.s32.totalorder %s1296_s12, 3 }
   0x4   : > { %p137_p2 = pnand %p977_p0, %p136_p1 }
   0x5   : > { %p157_p3 = scmp.lt.s32.totalorder (!%p137_p2), %s973_s13, 1 }
   0x6   : > { %140 = sbr.rel (%p137_p2) target bundleno = 295 (0x127), region = 32 }
   0xb   : > { %v1254_v0 = vld [vmem:[%s1537_s1 + $0x78] sm:$0xff]   ;;  %v1298_v1 = vmov 0.0   ;;  %v1256_v3 = vld [vmem:[%s1537_s1 + $0x70] sm:$0xff]   ;;  %vm1299_vm0 = vmmov 0   ;;  %s1541_s13 = smov (!%p157_p3, %s973_s13), 1  ;;  %v1258_v5 = vld [vmem:[%s1537_s1 + $0x68] sm:$0xff]   ;;  %v644_v29 = vlaneseq }
   0xc   : > { %1135 = vmatprep.subr.bf16.mxu0 %v1298_v1  ;;  %1147 = vmatprep.subr.bf16.mxu1 %v1298_v1  ;;  %v1255_v2 = vld [vmem:[%s1537_s1 + $0x18] sm:$0xff]   ;;  %v1257_v4 = vld [vmem:[%s1537_s1 + $0x10] sm:$0xff]   ;;  %s978_s24 = sshll.u32 %s1541_s13, 3  ;;  %v1259_v6 = vld [vmem:[%s1537_s1 + $0x8] sm:$0xff]   ;;  %vm212_vm1 = vcmask 523264   ;;  %s163_s20 = scalar_lea.vmem %s1539_s3, %s1541_s13  ;;  %vm920_vm2 = vcmask 516096  }
   0xd   : > { %1136 = vmatpush3.bf16.msra.mxu0 %v1254_v0  ;;  %1143 = vmatprep.mubr.msk.bf16.mxu0 %vm1299_vm0, %v1298_v1  ;;  %s1363_s29 = scalar_lea.vmem %s1536_s0, %s978_s24  ;;  %v1260_v7 = vld [vmem:[%s1537_s1 + $0x60] sm:$0xff]   ;;  %v1262_v11 = vld [vmem:[%s1537_s1 + $0xd8] sm:$0xff]   ;;  %v1264_v13 = vld [vmem:[%s1537_s1 + $0xd0] sm:$0xff]   ;;  %v1300_v27 = vmov 1966171168   ;;  %v645_v33 = vshrl.u32 %v644_v29, 7 }
   0xe   : > { %1148 = vmatpush3.bf16.msra.mxu1 %v1255_v2  ;;  %1137 = vmatprep.subr.bf16.mxu0 %v1298_v1  ;;  %v1261_v8 = vld [vmem:[%s1537_s1] sm:$0xff]   ;;  %v1263_v12 = vld [vmem:[%s1537_s1 + $0x38] sm:$0xff]   ;;  %v1265_v14 = vld [vmem:[%s1537_s1 + $0x30] sm:$0xff]   ;;  %v642_v28 = vunpack.c.l.s4 %v1300_v27  ;;  %vm921_vm3 = vsmask.f32 256 }
   0xf   : > { %1149 = vmatprep.subr.bf16.mxu1 %v1298_v1  ;;  %1155 = vmatprep.mubr.msk.bf16.mxu1 %vm1299_vm0, %v1298_v1  ;;  %v1374_v9 = vld [vmem:[%s1363_s29 + $0x4] sm:$0x1]  ;;  %v1377_v10 = vld [vmem:[%s1363_s29] sm:$0x1]  ;;  %v1266_v15 = vld [vmem:[%s1537_s1 + $0xc8] sm:$0xff]  }
  0x10   : > { %v1267_v16 = vld [vmem:[%s1537_s1 + $0x28] sm:$0xff]   ;;  %v1268_v17 = vld [vmem:[%s1537_s1 + $0xc0] sm:$0xff]   ;;  %v1270_v20 = vld [vmem:[%s1537_s1 + $0x98] sm:$0xff]   ;;  %v643_v32 = vunpack.c.0.s8 %v642_v28 }
  0x11   : > { %1138 = vmatpush3.bf16.msra.mxu0 %v1256_v3  ;;  %v1269_v18 = vld [vmem:[%s1537_s1 + $0x20] sm:$0xff]   ;;  %v1271_v22 = vld [vmem:[%s1537_s1 + $0xf8] sm:$0xff]   ;;  %v1272_v23 = vld [vmem:[%s1537_s1 + $0x90] sm:$0xff]  }
  0x12   : > { %1150 = vmatpush3.bf16.msra.mxu1 %v1257_v4  ;;  %1139 = vmatprep.subr.bf16.mxu0 %v1298_v1  ;;  %v1420_v19 = vld [vmem:[%s1363_s29 + $0x1] sm:$0x1]  ;;  %v167_v21 = vld [vmem:[%s1363_s29 + $0x2] sm:$0x1]  ;;  %v1273_v24 = vld [vmem:[%s1537_s1 + $0xf0] sm:$0xff]   ;;  %v646_v38 = vsub.s32 %v643_v32, %v645_v33 }
  0x13   : > { %1151 = vmatprep.subr.bf16.mxu1 %v1298_v1  ;;  %v1274_v25 = vld [vmem:[%s1537_s1 + $0x88] sm:$0xff]   ;;  %v1276_v30 = vld [vmem:[%s1537_s1 + $0x80] sm:$0xff]   ;;  %v1278_v35 = vld [vmem:[%s1537_s1 + $0x58] sm:$0xff]  }
  0x14   : > { %v1275_v26 = vld [vmem:[%s1537_s1 + $0xe8] sm:$0xff]   ;;  %v1277_v31 = vld [vmem:[%s1537_s1 + $0xe0] sm:$0xff]   ;;  %v1279_v37 = vld [vmem:[%s1537_s1 + $0xb8] sm:$0xff]   ;;  %v647_v41 = vrot.slane %v1377_v10, %v646_v38  ;;  %v742_v42 = vrot.slane %v1374_v9, %v646_v38  ;;  %v837_v53 = vrot.slane %v1420_v19, %v646_v38 }
  0x15   : > { %1140 = vmatpush3.bf16.msra.mxu0 %v1258_v5  ;;  %v170_v34 = vld [vmem:[%s1363_s29 + $0x6] sm:$0x1]  ;;  %v168_v36 = vld [vmem:[%s1363_s29 + $0x3] sm:$0x1]  ;;  %v1280_v39 = vld [vmem:[%s1537_s1 + $0x50] sm:$0xff]  }
  0x16   : > { %1152 = vmatpush3.bf16.msra.mxu1 %v1259_v6  ;;  %1141 = vmatprep.subr.bf16.mxu0 %v1298_v1  ;;  %v1281_v40 = vld [vmem:[%s1537_s1 + $0xb0] sm:$0xff]   ;;  %v1282_v43 = vld [vmem:[%s1537_s1 + $0x48] sm:$0xff]   ;;  %v654_v45 = vrot.slane %v647_v41, %v646_v38  ;;  %v749_v46 = vrot.slane %v742_v42, %v646_v38  ;;  %v1284_v47 = vld [vmem:[%s1537_s1 + $0x40] sm:$0xff]   ;;  %v844_v55 = vrot.slane %v837_v53, %v646_v38 }
  0x17   : > { %1153 = vmatprep.subr.bf16.mxu1 %v1298_v1  ;;  %v1283_v44 = vld [vmem:[%s1537_s1 + $0xa8] sm:$0xff]   ;;  %v1285_v48 = vld [vmem:[%s1537_s1 + $0xa0] sm:$0xff]   ;;  %v1286_v51 = vld [vmem:[%s1537_s1 + $0x118] sm:$0xff]  }
  0x18   : > { %v656_v49 = vshrl.u32 %v654_v45, 16  ;;  %v751_v50 = vshrl.u32 %v749_v46, 16  ;;  %v1287_v52 = vld [vmem:[%s1537_s1 + $0x110] sm:$0xff]   ;;  %v1288_v54 = vld [vmem:[%s1537_s1 + $0x108] sm:$0xff]   ;;  %v1289_v56 = vld [vmem:[%s1537_s1 + $0x100] sm:$0xff]   ;;  %v846_v57 = vshrl.u32 %v844_v55, 16 }
  0x19   : > { %1142 = vmatpush3.bf16.msra.mxu0 %v1260_v7  ;;  %vm922_vm4 = vmand %vm920_vm2, %vm921_vm3 }
  0x1a   : > { %1154 = vmatpush3.bf16.msra.mxu1 %v1261_v8  ;;  %1159 = vmatprep.subr.bf16.mxu0 %v1298_v1 }
  0x1b   : > { %1171 = vmatprep.subr.bf16.mxu1 %v1298_v1 }
  0x1c   : > { %1144 = vmatmul.mubr.msk.bf16.vlgmr.msra.gmra.mxu0 %vm212_vm1, %v1374_v9 }
  0x1d   : > { %1156 = vmatmul.mubr.msk.bf16.vlgmr.msra.gmra.mxu1 %vm212_vm1, %v1377_v10  ;;  %1160 = vmatpush3.bf16.msra.mxu0 %v1262_v11 }
  0x1e   : > { %1172 = vmatpush3.bf16.msra.mxu1 %v1263_v12  ;;  %1161 = vmatprep.subr.bf16.mxu0 %v1298_v1 }
  0x1f   : > { %1173 = vmatprep.subr.bf16.mxu1 %v1298_v1  ;;  %1167 = vmatprep.mubr.msk.bf16.mxu0 %vm1299_vm0, %v1298_v1 }
  0x20   : > { %1179 = vmatprep.mubr.msk.bf16.mxu1 %vm1299_vm0, %v1298_v1 }
  0x21   : > { %1162 = vmatpush3.bf16.msra.mxu0 %v1264_v13 }
  0x22   : > { %1174 = vmatpush3.bf16.msra.mxu1 %v1265_v14  ;;  %1163 = vmatprep.subr.bf16.mxu0 %v1298_v1 }
  0x23   : > { %1175 = vmatprep.subr.bf16.mxu1 %v1298_v1 }
  0x25   : > { %1164 = vmatpush3.bf16.msra.mxu0 %v1266_v15 }
  0x26   : > { %1176 = vmatpush3.bf16.msra.mxu1 %v1267_v16  ;;  %1165 = vmatprep.subr.bf16.mxu0 %v1298_v1 }
  0x27   : > { %1177 = vmatprep.subr.bf16.mxu1 %v1298_v1 }
  0x29   : > { %1166 = vmatpush3.bf16.msra.mxu0 %v1268_v17 }
  0x2a   : > { %1178 = vmatpush3.bf16.msra.mxu1 %v1269_v18  ;;  %1183 = vmatprep.subr.bf16.mxu0 %v1298_v1 }
  0x2b   : > { %1195 = vmatprep.subr.bf16.mxu1 %v1298_v1 }
  0x2c   : > { %1168 = vmatmul.mubr.msk.bf16.vlgmr.msra.gmra.mxu0 %vm212_vm1, %v1420_v19 }
  0x2d   : > { %1184 = vmatpush3.bf16.msra.mxu0 %v1270_v20  ;;  %1180 = vmatmul.mubr.msk.bf16.vlgmr.msra.gmra.mxu1 %vm212_vm1, %v167_v21 }
  0x2e   : > { %1196 = vmatpush3.bf16.msra.mxu1 %v1271_v22  ;;  %1185 = vmatprep.subr.bf16.mxu0 %v1298_v1 }
  0x2f   : > { %1197 = vmatprep.subr.bf16.mxu1 %v1298_v1  ;;  %1191 = vmatprep.mubr.msk.bf16.mxu0 %vm1299_vm0, %v1298_v1 }
  0x30   : > { %1203 = vmatprep.mubr.msk.bf16.mxu1 %vm1299_vm0, %v1298_v1 }
  0x31   : > { %1186 = vmatpush3.bf16.msra.mxu0 %v1272_v23 }
  0x32   : > { %1198 = vmatpush3.bf16.msra.mxu1 %v1273_v24  ;;  %1187 = vmatprep.subr.bf16.mxu0 %v1298_v1 }
  0x33   : > { %1199 = vmatprep.subr.bf16.mxu1 %v1298_v1 }
  0x35   : > { %1188 = vmatpush3.bf16.msra.mxu0 %v1274_v25 }
  0x36   : > { %1200 = vmatpush3.bf16.msra.mxu1 %v1275_v26  ;;  %1189 = vmatprep.subr.bf16.mxu0 %v1298_v1 }
  0x37   : > { %1201 = vmatprep.subr.bf16.mxu1 %v1298_v1 }
  0x39   : > { %1190 = vmatpush3.bf16.msra.mxu0 %v1276_v30 }
  0x3a   : > { %1202 = vmatpush3.bf16.msra.mxu1 %v1277_v31  ;;  %1207 = vmatprep.subr.bf16.mxu0 %v1298_v1 }
  0x3b   : > { %1219 = vmatprep.subr.bf16.mxu1 %v1298_v1 }
  0x3c   : > { %1192 = vmatmul.mubr.msk.bf16.vlgmr.msra.gmra.mxu0 %vm212_vm1, %v170_v34  ;;  %v916_v34 = vld [vmem:[%s1538_s2] sm:$0x1] }
  0x3d   : > { %1208 = vmatpush3.bf16.msra.mxu0 %v1278_v35  ;;  %1204 = vmatmul.mubr.msk.bf16.vlgmr.msra.gmra.mxu1 %vm212_vm1, %v168_v36 }
  0x3e   : > { %1220 = vmatpush3.bf16.msra.mxu1 %v1279_v37  ;;  %1209 = vmatprep.subr.bf16.mxu0 %v1298_v1 }
  0x3f   : > { %1221 = vmatprep.subr.bf16.mxu1 %v1298_v1  ;;  %1215 = vmatprep.mubr.msk.bf16.mxu0 %vm1299_vm0, %v1298_v1 }
  0x40   : > { %1227 = vmatprep.mubr.msk.bf16.mxu1 %vm1299_vm0, %v1298_v1 }
  0x41   : > { %1210 = vmatpush3.bf16.msra.mxu0 %v1280_v39 }
  0x42   : > { %1222 = vmatpush3.bf16.msra.mxu1 %v1281_v40  ;;  %1211 = vmatprep.subr.bf16.mxu0 %v1298_v1  ;;  %v923_v40 = vld [vmem:[%s163_s20] sm:$0x1] }
  0x43   : > { %1223 = vmatprep.subr.bf16.mxu1 %v1298_v1 }
  0x45   : > { %1212 = vmatpush3.bf16.msra.mxu0 %v1282_v43 }
  0x46   : > { %1224 = vmatpush3.bf16.msra.mxu1 %v1283_v44  ;;  %1213 = vmatprep.subr.bf16.mxu0 %v1298_v1 }
  0x47   : > { %1225 = vmatprep.subr.bf16.mxu1 %v1298_v1 }
  0x49   : > { %1214 = vmatpush3.bf16.msra.mxu0 %v1284_v47 }
  0x4a   : > { %1226 = vmatpush3.bf16.msra.mxu1 %v1285_v48  ;;  %1231 = vmatprep.subr.bf16.mxu0 %v1298_v1 }
  0x4c   : > { %1216 = vmatmul.mubr.msk.bf16.vlgmr.msra.gmra.mxu0 %vm212_vm1, %v656_v49 }
  0x4d   : > { %1232 = vmatpush3.bf16.msra.mxu0 %v1286_v51  ;;  %1228 = vmatmul.mubr.msk.bf16.vlgmr.msra.gmra.mxu1 %vm212_vm1, %v751_v50 }
  0x4e   : > { %1233 = vmatprep.subr.bf16.mxu0 %v1298_v1  ;;  %1239 = vmatprep.mubr.msk.bf16.mxu0 %vm1299_vm0, %v1298_v1 }
  0x51   : > { %1234 = vmatpush3.bf16.msra.mxu0 %v1287_v52 }
  0x52   : > { %1235 = vmatprep.subr.bf16.mxu0 %v1298_v1 }
  0x55   : > { %1236 = vmatpush3.bf16.msra.mxu0 %v1288_v54 }
  0x56   : > { %1237 = vmatprep.subr.bf16.mxu0 %v1298_v1 }
  0x59   : > { %1238 = vmatpush3.bf16.msra.mxu0 %v1289_v56 }
  0x5c   : > { %1240 = vmatmul.mubr.msk.bf16.vlgmr.msra.gmra.mxu0 %vm212_vm1, %v846_v57 }
  0xdc   : > { %v250_v58 = vpop.f32.mrf.mxu0 }
  0xdd   : > { %v317_v59 = vpop.f32.mrf.mxu1 }
  0xde   : > { %v1145_v60 = vpop.f32.mrf.mxu0  ;;  %v318_v18 = vadd.f32 %v317_v59, %v250_v58 }
  0xdf   : > { %v1157_v61 = vpop.f32.mrf.mxu1 }
  0xe0   : > { %v253_v62 = vpop.f32.mrf.mxu0 }
  0xe1   : > { %v320_v63 = vpop.f32.mrf.mxu1 }
  0xe2   : > { %v1146_v0 = vpop.f32.mrf.mxu0 }
  0xe3   : > { %v1158_v2 = vpop.f32.mrf.mxu1 }
  0xec   : > { %v393_v3 = vpop.f32.mrf.mxu0 }
  0xed   : > { %v470_v4 = vpop.f32.mrf.mxu1  ;;  %v399_v19 = vadd.f32 %v393_v3, %v318_v18 }
  0xee   : > { %v1169_v5 = vpop.f32.mrf.mxu0 }
  0xef   : > { %v1181_v6 = vpop.f32.mrf.mxu1  ;;  %v476_v23 = vadd.f32 %v470_v4, %v399_v19 }
  0xf0   : > { %v396_v7 = vpop.f32.mrf.mxu0 }
  0xf1   : > { %v473_v8 = vpop.f32.mrf.mxu1 }
  0xf2   : > { %v1170_v9 = vpop.f32.mrf.mxu0 }
  0xf3   : > { %v1182_v1 = vpop.f32.mrf.mxu1 }
  0xfc   : > { %v547_v10 = vpop.f32.mrf.mxu0 }
  0xfd   : > { %v624_v11 = vpop.f32.mrf.mxu1  ;;  %v553_v26 = vadd.f32 %v547_v10, %v476_v23 }
  0xfe   : > { %v1193_v12 = vpop.f32.mrf.mxu0 }
  0xff   : > { %v1205_v13 = vpop.f32.mrf.mxu1  ;;  %v630_v30 = vadd.f32 %v624_v11, %v553_v26 }
 0x100   : > { %v550_v14 = vpop.f32.mrf.mxu0 }
 0x101   : > { %v627_v15 = vpop.f32.mrf.mxu1 }
 0x102   : > { %v1194_v16 = vpop.f32.mrf.mxu0 }
 0x103   : > { %v1206_v17 = vpop.f32.mrf.mxu1 }
 0x10c   : > { %v719_v20 = vpop.f32.mrf.mxu0 }
 0x10d   : > { %v814_v21 = vpop.f32.mrf.mxu1  ;;  %v725_v31 = vadd.f32 %v719_v20, %v630_v30 }
 0x10e   : > { %v1217_v22 = vpop.f32.mrf.mxu0 }
 0x10f   : > { %v1229_v24 = vpop.f32.mrf.mxu1  ;;  %v820_v32 = vadd.f32 %v814_v21, %v725_v31 }
 0x110   : > { %v722_v25 = vpop.f32.mrf.mxu0 }
 0x111   : > { %v817_v27 = vpop.f32.mrf.mxu1 }
 0x112   : > { %v1218_v28 = vpop.f32.mrf.mxu0 }
 0x113   : > { %v1230_v29 = vpop.f32.mrf.mxu1 }
 0x11c   : > { %v909_v33 = vpop.f32.mrf.mxu0 }
 0x11d   : > { %v915_v35 = vadd.f32 %v909_v33, %v820_v32 }
 0x11e   : > { %v1241_v36 = vpop.f32.mrf.mxu0 }
 0x11f   : > { %v917_v37 = vadd.f32 %v916_v34, %v915_v35 }
 0x120   : > { %v912_v38 = vpop.f32.mrf.mxu0 }
 0x121   : > { %v918_v39 = vmax.f32 %v917_v37, 0.0 }
 0x122   : > { %v1242_v41 = vpop.f32.mrf.mxu0 }
 0x123   : > { %v919_v42 = vpack.c.bf16 %v918_v39, %v918_v39 }
 0x125   : > { %v924_v43 = vsel %vm922_vm4, %v919_v42, %v923_v40 }
 0x126   : > { %925 = vst [vmem:[%s163_s20] sm:$0x1] %v924_v43 }
 0x127 PF: > { %s13_s12 = sadd.s32 1, %s1296_s12  }
 0x128   : > { %p10_p4 = scmp.ge.s32.totalorder %s13_s12, 4  }
 0x12a   :  { %12 = sbr.rel (!%p10_p4) target bundleno = 1 (0x1), region = 70 }

</bundles_post_ra>
